<compile_context>
chip_gen: v5e
topology: v5e:2x2
jax: 0.10.0
libtpu: 0.0.40
codegen_flags: <defaults>
</compile_context>

<pallas_src>
import functools

import jax
import jax.numpy as jnp
from jax.experimental import pallas as pl
from jax.experimental.pallas import tpu as pltpu

EPS = 1e-5
LANES = 128          # lane width: pad all channel dims to a multiple of this
GEMM_TM = 256        # row tile for the GEMM / element-wise kernels


# ------------------------------ small helpers ------------------------------

def _round_up(a, b):
    return -(-a // b) * b


def _pad_axis(a, axis, target, value=0.0):
    pad = target - a.shape[axis]
    if pad <= 0:
        return a
    widths = [(0, 0)] * a.ndim
    widths[axis] = (0, pad)
    return jnp.pad(a, widths, constant_values=value)


def _bn_from_stats(psum, psq, count, gamma, beta):
    """Train-mode BatchNorm fold from in-kernel sum / sum-of-squares."""
    mean = psum / count
    var = jnp.maximum(psq / count - mean * mean, 0.0)   # biased variance
    scale = gamma / jnp.sqrt(var + EPS)
    bias = beta - mean * scale
    return scale[None, :], bias[None, :]


# ----------------------------- Pallas kernels ------------------------------

def _gemm1x1_kernel(x_ref, w_ref, s_ref, b_ref, y_ref, psum_ref, psq_ref, *,
                    relu_prologue, tm, m_real, need_mask):
    """1x1 conv as GEMM.  Prologue: folded-BN affine (+ReLU) of previous stage.
    Also emits per-tile sum / sum^2 of the output for the next BN's stats."""
    x = x_ref[...].astype(jnp.float32) * s_ref[...] + b_ref[...]
    if relu_prologue:
        x = jnp.maximum(x, 0.0)
    y = jnp.dot(x.astype(jnp.bfloat16), w_ref[...],
                preferred_element_type=jnp.float32)
    if need_mask:  # zero rows beyond the real M so stats / output stay exact
        rows = pl.program_id(0) * tm + jax.lax.broadcasted_iota(
            jnp.int32, y.shape, 0)
        y = jnp.where(rows < m_real, y, 0.0)
    y_ref[...] = y
    cout = y.shape[1]
    psum_ref[...] = jnp.broadcast_to(jnp.sum(y, axis=0)[None, None, :],
                                     (1, 8, cout))
    psq_ref[...] = jnp.broadcast_to(jnp.sum(y * y, axis=0)[None, None, :],
                                    (1, 8, cout))


def _conv3x3_kernel(x_ref, w_ref, s_ref, b_ref, y_ref, psum_ref, psq_ref,
                    o_scr, *, stride, H, W, Ho, Wo):
    """3x3 conv (pad=1) for one batch element.

    stride == 1: x_ref is the raw conv1 output (1,H,W,C); the BN1 affine+ReLU
    prologue and spatial zero padding are built in the VMEM scratch, then the
    conv is 9 shifted (Ho*Wo, C) x (C, Cout) MXU dots accumulated in f32.

    stride  > 1: x_ref is a pre-activated phase-split (space-to-depth) block
    (s, s, 1, Hph, Wph, C); each tap is a contiguous window of one phase, so
    only the strided-output FLOPs are computed.
    """
    C = w_ref.shape[2]
    Cout = w_ref.shape[3]
    W0 = 8  # sublane-aligned column offset of the image inside the scratch

    if stride == 1:
        o_scr[...] = jnp.zeros(o_scr.shape, o_scr.dtype)
        act = jnp.maximum(
            x_ref[0].astype(jnp.float32) * s_ref[...] + b_ref[...], 0.0)
        o_scr[1:H + 1, W0:W0 + W, :] = act.astype(o_scr.dtype)

        def window(dy, dx):
            return o_scr[dy:dy + Ho, W0 - 1 + dx:W0 - 1 + dx + Wo, :]
    else:
        def window(dy, dx):
            py, px = dy % stride, dx % stride
            oy, ox = dy // stride, dx // stride
            return x_ref[py, px, 0, oy:oy + Ho, ox:ox + Wo, :]

    acc = jnp.zeros((Ho * Wo, Cout), jnp.float32)
    for dy in range(3):
        for dx in range(3):
            acc = acc + jnp.dot(window(dy, dx).reshape(Ho * Wo, C),
                                w_ref[dy, dx],
                                preferred_element_type=jnp.float32)

    y_ref[...] = acc.reshape(1, Ho, Wo, Cout)
    psum_ref[...] = jnp.broadcast_to(jnp.sum(acc, axis=0)[None, None, :],
                                     (1, 8, Cout))
    psq_ref[...] = jnp.broadcast_to(jnp.sum(acc * acc, axis=0)[None, None, :],
                                    (1, 8, Cout))


def _bn_add_relu_kernel(y_ref, r_ref, s_ref, b_ref, ss_ref, bs_ref, o_ref):
    """out = relu(bn3(conv3) + bn_s(shortcut)) — single fused pass."""
    o_ref[...] = jnp.maximum(
        y_ref[...].astype(jnp.float32) * s_ref[...] + b_ref[...]
        + r_ref[...].astype(jnp.float32) * ss_ref[...] + bs_ref[...], 0.0)


# ------------------------------ kernel drivers -----------------------------

def gemm1x1_bn_stats(x2d, w, scale_in, bias_in, *, relu_prologue):
    M, K = x2d.shape
    Cout = w.shape[1]
    Mp = _round_up(M, GEMM_TM)
    need_mask = Mp != M
    if need_mask:
        x2d = jnp.pad(x2d, ((0, Mp - M), (0, 0)))
    grid_m = Mp // GEMM_TM
    kern = functools.partial(_gemm1x1_kernel, relu_prologue=relu_prologue,
                             tm=GEMM_TM, m_real=M, need_mask=need_mask)
    y, psum, psq = pl.pallas_call(
        kern,
        out_shape=(jax.ShapeDtypeStruct((Mp, Cout), jnp.float32),
                   jax.ShapeDtypeStruct((grid_m, 8, Cout), jnp.float32),
                   jax.ShapeDtypeStruct((grid_m, 8, Cout), jnp.float32)),
        grid=(grid_m,),
        in_specs=[pl.BlockSpec((GEMM_TM, K), lambda i: (i, 0)),
                  pl.BlockSpec((K, Cout), lambda i: (0, 0)),
                  pl.BlockSpec((1, K), lambda i: (0, 0)),
                  pl.BlockSpec((1, K), lambda i: (0, 0))],
        out_specs=(pl.BlockSpec((GEMM_TM, Cout), lambda i: (i, 0)),
                   pl.BlockSpec((1, 8, Cout), lambda i: (i, 0, 0)),
                   pl.BlockSpec((1, 8, Cout), lambda i: (i, 0, 0))),
        compiler_params=pltpu.CompilerParams(
            dimension_semantics=("parallel",)),
    )(x2d, w, scale_in, bias_in)
    return y, psum[:, 0, :].sum(axis=0), psq[:, 0, :].sum(axis=0)


def conv3x3_bn_stats(x_in, w2, scale_in, bias_in, *, stride, H, W):
    Ho = (H - 1) // stride + 1
    Wo = (W - 1) // stride + 1
    C, Cout = w2.shape[2], w2.shape[3]
    if stride == 1:
        N = x_in.shape[0]
        x_spec = pl.BlockSpec((1, H, W, C), lambda n: (n, 0, 0, 0))
    else:
        s = stride
        N = x_in.shape[2]
        hph, wph = x_in.shape[3], x_in.shape[4]
        x_spec = pl.BlockSpec((s, s, 1, hph, wph, C),
                              lambda n: (0, 0, n, 0, 0, 0))
    kern = functools.partial(_conv3x3_kernel, stride=stride,
                             H=H, W=W, Ho=Ho, Wo=Wo)
    y, psum, psq = pl.pallas_call(
        kern,
        out_shape=(jax.ShapeDtypeStruct((N, Ho, Wo, Cout), jnp.float32),
                   jax.ShapeDtypeStruct((N, 8, Cout), jnp.float32),
                   jax.ShapeDtypeStruct((N, 8, Cout), jnp.float32)),
        grid=(N,),
        in_specs=[x_spec,
                  pl.BlockSpec((3, 3, C, Cout), lambda n: (0, 0, 0, 0)),
                  pl.BlockSpec((1, C), lambda n: (0, 0)),
                  pl.BlockSpec((1, C), lambda n: (0, 0))],
        out_specs=(pl.BlockSpec((1, Ho, Wo, Cout), lambda n: (n, 0, 0, 0)),
                   pl.BlockSpec((1, 8, Cout), lambda n: (n, 0, 0)),
                   pl.BlockSpec((1, 8, Cout), lambda n: (n, 0, 0))),
        scratch_shapes=[pltpu.VMEM((H + 2, W + 16, C), jnp.bfloat16)],
        compiler_params=pltpu.CompilerParams(
            dimension_semantics=("parallel",)),
    )(x_in, w2, scale_in, bias_in)
    return y, psum[:, 0, :].sum(axis=0), psq[:, 0, :].sum(axis=0)


def bn_add_relu(y2d, r2d, s3, b3, ss, bs):
    Mp, C = y2d.shape
    tm = 512 if Mp % 512 == 0 else GEMM_TM
    return pl.pallas_call(
        _bn_add_relu_kernel,
        out_shape=jax.ShapeDtypeStruct((Mp, C), jnp.float32),
        grid=(Mp // tm,),
        in_specs=[pl.BlockSpec((tm, C), lambda i: (i, 0)),
                  pl.BlockSpec((tm, C), lambda i: (i, 0)),
                  pl.BlockSpec((1, C), lambda i: (0, 0)),
                  pl.BlockSpec((1, C), lambda i: (0, 0)),
                  pl.BlockSpec((1, C), lambda i: (0, 0)),
                  pl.BlockSpec((1, C), lambda i: (0, 0))],
        out_specs=pl.BlockSpec((tm, C), lambda i: (i, 0)),
        compiler_params=pltpu.CompilerParams(
            dimension_semantics=("parallel",)),
    )(y2d, r2d, s3, b3, ss, bs)


# ------------------------------- forward pass -------------------------------

@functools.partial(jax.jit, static_argnames=("stride",))
def bottleneck_forward(x_nchw, p, stride=1):
    x = jnp.transpose(x_nchw, (0, 2, 3, 1)).astype(jnp.float32)   # -> NHWC
    N, H, W, Cin = x.shape
    planes = p["w1"].shape[1]
    out_c = p["w3"].shape[1]

    cin_p = _round_up(Cin, LANES)
    cmid_p = _round_up(planes, LANES)
    cout_p = _round_up(out_c, LANES)

    # pad params to lane-dense channel counts; weights to bf16 for the MXU
    w1p = _pad_axis(_pad_axis(p["w1"], 0, cin_p), 1, cmid_p).astype(jnp.bfloat16)
    w2p = _pad_axis(_pad_axis(p["w2"], 2, cmid_p), 3, cmid_p).astype(jnp.bfloat16)
    w3p = _pad_axis(_pad_axis(p["w3"], 0, cmid_p), 1, cout_p).astype(jnp.bfloat16)
    g1p = _pad_axis(p["g1"], 0, cmid_p, 1.0)
    be1p = _pad_axis(p["b1"], 0, cmid_p)
    g2p = _pad_axis(p["g2"], 0, cmid_p, 1.0)
    be2p = _pad_axis(p["b2"], 0, cmid_p)
    g3p = _pad_axis(p["g3"], 0, cout_p, 1.0)
    be3p = _pad_axis(p["b3"], 0, cout_p)

    ones_in = jnp.ones((1, cin_p), jnp.float32)
    zeros_in = jnp.zeros((1, cin_p), jnp.float32)

    xp = _pad_axis(x, 3, cin_p).astype(jnp.bfloat16)   # lane-dense bf16 input

    Ho = (H - 1) // stride + 1
    Wo = (W - 1) // stride + 1
    M1 = N * H * W
    M2 = N * Ho * Wo

    # ---- conv1 (1x1): GEMM, BN1 batch stats emitted by the kernel ----
    y1, s1sum, s1sq = gemm1x1_bn_stats(xp.reshape(M1, cin_p), w1p,
                                       ones_in, zeros_in, relu_prologue=False)
    sc1, bi1 = _bn_from_stats(s1sum, s1sq, M1, g1p, be1p)

    # ---- conv2 (3x3, stride, pad=1): BN1 affine+ReLU fused as prologue ----
    y1_img = y1[:M1].reshape(N, H, W, cmid_p)
    if stride == 1:
        conv2_in = y1_img                        # prologue runs inside kernel
    else:
        # TODO(synk): for stride>1 the BN1 prologue rides the XLA phase-split
        # repack instead of being applied inside the Pallas kernel.
        o1 = jnp.maximum(y1_img * sc1 + bi1, 0.0).astype(jnp.bfloat16)
        hph = -(-(H + 2) // stride)
        wph = -(-(W + 2) // stride)
        o1p = jnp.pad(o1, ((0, 0), (1, stride * hph - H - 1),
                           (1, stride * wph - W - 1), (0, 0)))
        conv2_in = o1p.reshape(N, hph, stride, wph, stride,
                               cmid_p).transpose(2, 4, 0, 1, 3, 5)
    y2, s2sum, s2sq = conv3x3_bn_stats(conv2_in, w2p, sc1, bi1,
                                       stride=stride, H=H, W=W)
    sc2, bi2 = _bn_from_stats(s2sum, s2sq, M2, g2p, be2p)

    # ---- conv3 (1x1): BN2 affine+ReLU prologue, BN3 stats emitted ----
    y3, s3sum, s3sq = gemm1x1_bn_stats(y2.reshape(M2, cmid_p), w3p,
                                       sc2, bi2, relu_prologue=True)
    sc3, bi3 = _bn_from_stats(s3sum, s3sq, M2, g3p, be3p)

    # ---- shortcut ----
    xs = xp[:, ::stride, ::stride, :].reshape(M2, cin_p)
    if stride != 1 or Cin != out_c:
        wsp = _pad_axis(_pad_axis(p["ws"], 0, cin_p), 1, cout_p).astype(jnp.bfloat16)
        gsp = _pad_axis(p["gs"], 0, cout_p, 1.0)
        besp = _pad_axis(p["bs"], 0, cout_p)
        short, sssum, sssq = gemm1x1_bn_stats(xs, wsp, ones_in, zeros_in,
                                              relu_prologue=False)
        scs, bis = _bn_from_stats(sssum, sssq, M2, gsp, besp)
    else:
        short = jnp.pad(xs, ((0, y3.shape[0] - M2), (0, 0)))
        scs = jnp.ones((1, cout_p), jnp.float32)
        bis = jnp.zeros((1, cout_p), jnp.float32)

    # ---- fused epilogue: BN3 + shortcut-BN + residual add + ReLU ----
    out2d = bn_add_relu(y3, short, sc3, bi3, scs, bis)
    out = out2d[:M2].reshape(N, Ho, Wo, cout_p)[..., :out_c]
    return jnp.transpose(out, (0, 3, 1, 2))                     # back to NCHW


# -------------------------- parameter construction -------------------------

def init_params(key, in_planes, planes, expansion=2):
    k1, k2, k3, k4 = jax.random.split(key, 4)
    return {
        # conv weights stored channels-last friendly: 1x1 -> (Cin, Cout),
        # 3x3 -> (kh, kw, Cin, Cout)  (HWIO)
        "w1": 0.2 * jax.random.normal(k1, (in_planes, planes), jnp.float32),
        "w2": 0.2 * jax.random.normal(k2, (3, 3, planes, planes), jnp.float32),
        "w3": 0.2 * jax.random.normal(k3, (planes, expansion * planes), jnp.float32),
        "g1": jnp.ones((planes,), jnp.float32),
        "b1": jnp.zeros((planes,), jnp.float32),
        "g2": jnp.ones((planes,), jnp.float32),
        "b2": jnp.zeros((planes,), jnp.float32),
        "g3": jnp.ones((expansion * planes,), jnp.float32),
        "b3": jnp.zeros((expansion * planes,), jnp.float32),
        "ws": 0.2 * jax.random.normal(k4, (in_planes, expansion * planes), jnp.float32),
        "gs": jnp.ones((expansion * planes,), jnp.float32),
        "bs": jnp.zeros((expansion * planes,), jnp.float32),
    }


# --------------------------- pure-JAX reference -----------------------------

def reference_forward(x_nchw, p, stride=1):
    x = jnp.transpose(x_nchw, (0, 2, 3, 1)).astype(jnp.float32)

    def conv(v, w_hwio, s, pad):
        return jax.lax.conv_general_dilated(
            v, w_hwio, (s, s), ((pad, pad), (pad, pad)),
            dimension_numbers=("NHWC", "HWIO", "NHWC"))

    def bn(v, g, b):
        m = jnp.mean(v, axis=(0, 1, 2))
        var = jnp.mean(jnp.square(v - m), axis=(0, 1, 2))
        return (v - m) / jnp.sqrt(var + EPS) * g + b

    o = jax.nn.relu(bn(conv(x, p["w1"][None, None], 1, 0), p["g1"], p["b1"]))
    o = jax.nn.relu(bn(conv(o, p["w2"], stride, 1), p["g2"], p["b2"]))
    o = bn(conv(o, p["w3"][None, None], 1, 0), p["g3"], p["b3"])
    out_c = p["w3"].shape[1]
    if stride != 1 or x.shape[-1] != out_c:
        sc = bn(conv(x, p["ws"][None, None], stride, 0), p["gs"], p["bs"])
    else:
        sc = x[:, ::stride, ::stride, :]
    out = jax.nn.relu(o + sc)
    return jnp.transpose(out, (0, 3, 1, 2))


# ----------------------------------- main -----------------------------------

if __name__ == "__main__":
    in_planes, planes, stride = 4, 4, 1            # expansion*planes = 8
    key = jax.random.PRNGKey(0)
    kx, kp = jax.random.split(key)
    x = jax.random.normal(kx, (2, in_planes, 16, 16), jnp.float32)   # NCHW
    params = init_params(kp, in_planes, planes)

    out = bottleneck_forward(x, params, stride=stride)
    out = jax.block_until_ready(out)
    assert out.shape == (2, 2 * planes, 16, 16), out.shape

    ref = reference_forward(x, params, stride=stride)
    # bf16 MXU inputs shift results at the ~1e-2 level vs the f32 reference.
    max_err = float(jnp.max(jnp.abs(out - ref)))
    mean_err = float(jnp.mean(jnp.abs(out - ref)))
    if not (bool(jnp.allclose(out, ref, atol=8e-2, rtol=8e-2))
            and mean_err < 1e-2):
        raise AssertionError(
            f"Pallas Bottleneck mismatch: max={max_err:.4f} mean={mean_err:.4f}")

    print("KERNEL_OK")
</pallas_src>

<mosaic_0001>
module attributes {stable_mosaic.version = 11 : i64} {
  func.func @_gemm1x1_kernel(%arg0: i32, %arg1: memref<256x128xbf16, #tpu.memory_space<vmem>>, %arg2: memref<128x128xbf16, #tpu.memory_space<vmem>>, %arg3: memref<1x128xf32, #tpu.memory_space<vmem>>, %arg4: memref<1x128xf32, #tpu.memory_space<vmem>>, %arg5: memref<256x128xf32, #tpu.memory_space<vmem>>, %arg6: memref<1x8x128xf32, #tpu.memory_space<vmem>>, %arg7: memref<1x8x128xf32, #tpu.memory_space<vmem>>) attributes {dimension_semantics = [#tpu.dimension_semantics<parallel>], iteration_bounds = array<i64: 2>, scalar_prefetch = 0 : i64, scratch_operands = 0 : i64, tpu.core_type = #tpu.core_type<tc>, window_params = [{transform_indices = @transform_0, window_bounds = array<i64: 256, 128>}, {pipeline_mode = #tpu.pipeline_mode<synchronous>, transform_indices = @transform_1, window_bounds = array<i64: 128, 128>}, {pipeline_mode = #tpu.pipeline_mode<synchronous>, transform_indices = @transform_2, window_bounds = array<i64: 1, 128>}, {pipeline_mode = #tpu.pipeline_mode<synchronous>, transform_indices = @transform_3, window_bounds = array<i64: 1, 128>}, {transform_indices = @transform_4, window_bounds = array<i64: 256, 128>}, {transform_indices = @transform_5, window_bounds = array<i64: 1, 8, 128>}, {transform_indices = @transform_6, window_bounds = array<i64: 1, 8, 128>}]} {
    %c0 = arith.constant 0 : index
    %c0_0 = arith.constant 0 : index
    %0 = vector.load %arg1[%c0, %c0_0] : memref<256x128xbf16, #tpu.memory_space<vmem>>, vector<256x128xbf16>
    %1 = arith.extf %0 : vector<256x128xbf16> to vector<256x128xf32>
    %c0_1 = arith.constant 0 : index
    %c0_2 = arith.constant 0 : index
    %2 = vector.load %arg3[%c0_1, %c0_2] : memref<1x128xf32, #tpu.memory_space<vmem>>, vector<1x128xf32>
    %3 = vector.broadcast %2 : vector<1x128xf32> to vector<256x128xf32>
    %4 = arith.mulf %1, %3 : vector<256x128xf32>
    %c0_3 = arith.constant 0 : index
    %c0_4 = arith.constant 0 : index
    %5 = vector.load %arg4[%c0_3, %c0_4] : memref<1x128xf32, #tpu.memory_space<vmem>>, vector<1x128xf32>
    %6 = vector.broadcast %5 : vector<1x128xf32> to vector<256x128xf32>
    %7 = arith.addf %4, %6 : vector<256x128xf32>
    %8 = arith.truncf %7 : vector<256x128xf32> to vector<256x128xbf16>
    %c0_5 = arith.constant 0 : index
    %c0_6 = arith.constant 0 : index
    %9 = vector.load %arg2[%c0_5, %c0_6] : memref<128x128xbf16, #tpu.memory_space<vmem>>, vector<128x128xbf16>
    %cst = arith.constant dense<0.000000e+00> : vector<256x128xf32>
    %10 = tpu.matmul %8, %9, %cst {dimension_numbers = #tpu.dot_dimension_numbers<[1], [0], [0], [1], [0, 0, 1, 1], [], []>} : vector<256x128xbf16>, vector<128x128xbf16>, vector<256x128xf32> -> vector<256x128xf32>
    %c0_7 = arith.constant 0 : index
    %c0_8 = arith.constant 0 : index
    %11 = vector.load %arg5[%c0_7, %c0_8] : memref<256x128xf32, #tpu.memory_space<vmem>>, vector<256x128xf32>
    tpu.vector_store %arg5[%c0_7, %c0_8], %10 {strides = array<i32>} : memref<256x128xf32, #tpu.memory_space<vmem>>, vector<256x128xf32>,
    %cst_9 = arith.constant dense<0.000000e+00> : vector<128xf32>
    %12 = vector.multi_reduction <add>, %10, %cst_9 [0] : vector<256x128xf32> to vector<128xf32>
    %13 = vector.shape_cast %12 : vector<128xf32> to vector<1x1x128xf32>
    %14 = vector.shape_cast %13 : vector<1x1x128xf32> to vector<1x1x128xf32>
    %15 = vector.broadcast %14 : vector<1x1x128xf32> to vector<1x8x128xf32>
    %c0_10 = arith.constant 0 : index
    %c0_11 = arith.constant 0 : index
    %c0_12 = arith.constant 0 : index
    %16 = vector.load %arg6[%c0_10, %c0_11, %c0_12] : memref<1x8x128xf32, #tpu.memory_space<vmem>>, vector<1x8x128xf32>
    tpu.vector_store %arg6[%c0_10, %c0_11, %c0_12], %15 {strides = array<i32>} : memref<1x8x128xf32, #tpu.memory_space<vmem>>, vector<1x8x128xf32>,
    %17 = arith.mulf %10, %10 : vector<256x128xf32>
    %cst_13 = arith.constant dense<0.000000e+00> : vector<128xf32>
    %18 = vector.multi_reduction <add>, %17, %cst_13 [0] : vector<256x128xf32> to vector<128xf32>
    %19 = vector.shape_cast %18 : vector<128xf32> to vector<1x1x128xf32>
    %20 = vector.shape_cast %19 : vector<1x1x128xf32> to vector<1x1x128xf32>
    %21 = vector.broadcast %20 : vector<1x1x128xf32> to vector<1x8x128xf32>
    %c0_14 = arith.constant 0 : index
    %c0_15 = arith.constant 0 : index
    %c0_16 = arith.constant 0 : index
    %22 = vector.load %arg7[%c0_14, %c0_15, %c0_16] : memref<1x8x128xf32, #tpu.memory_space<vmem>>, vector<1x8x128xf32>
    tpu.vector_store %arg7[%c0_14, %c0_15, %c0_16], %21 {strides = array<i32>} : memref<1x8x128xf32, #tpu.memory_space<vmem>>, vector<1x8x128xf32>,
    return
  }
  func.func @transform_0(%arg0: i32) -> (i32, i32) {
    %c0_i32 = arith.constant 0 : i32
    %c0_i32_0 = arith.constant 0 : i32
    return %arg0, %c0_i32 : i32, i32
  }
  func.func @transform_1(%arg0: i32) -> (i32, i32) {
    %c0_i32 = arith.constant 0 : i32
    %c0_i32_0 = arith.constant 0 : i32
    %c0_i32_1 = arith.constant 0 : i32
    return %c0_i32, %c0_i32_0 : i32, i32
  }
  func.func @transform_2(%arg0: i32) -> (i32, i32) {
    %c0_i32 = arith.constant 0 : i32
    %c0_i32_0 = arith.constant 0 : i32
    %c0_i32_1 = arith.constant 0 : i32
    return %c0_i32, %c0_i32_0 : i32, i32
  }
  func.func @transform_3(%arg0: i32) -> (i32, i32) {
    %c0_i32 = arith.constant 0 : i32
    %c0_i32_0 = arith.constant 0 : i32
    %c0_i32_1 = arith.constant 0 : i32
    return %c0_i32, %c0_i32_0 : i32, i32
  }
  func.func @transform_4(%arg0: i32) -> (i32, i32) {
    %c0_i32 = arith.constant 0 : i32
    %c0_i32_0 = arith.constant 0 : i32
    return %arg0, %c0_i32 : i32, i32
  }
  func.func @transform_5(%arg0: i32) -> (i32, i32, i32) {
    %c0_i32 = arith.constant 0 : i32
    %c0_i32_0 = arith.constant 0 : i32
    %c0_i32_1 = arith.constant 0 : i32
    return %arg0, %c0_i32, %c0_i32_0 : i32, i32, i32
  }
  func.func @transform_6(%arg0: i32) -> (i32, i32, i32) {
    %c0_i32 = arith.constant 0 : i32
    %c0_i32_0 = arith.constant 0 : i32
    %c0_i32_1 = arith.constant 0 : i32
    return %arg0, %c0_i32, %c0_i32_0 : i32, i32, i32
  }
}

module attributes {stable_mosaic.version = 11 : i64} {
  func.func @_conv3x3_kernel(%arg0: i32, %arg1: memref<1x16x16x128xf32, #tpu.memory_space<vmem>>, %arg2: memref<3x3x128x128xbf16, #tpu.memory_space<vmem>>, %arg3: memref<1x128xf32, #tpu.memory_space<vmem>>, %arg4: memref<1x128xf32, #tpu.memory_space<vmem>>, %arg5: memref<1x16x16x128xf32, #tpu.memory_space<vmem>>, %arg6: memref<1x8x128xf32, #tpu.memory_space<vmem>>, %arg7: memref<1x8x128xf32, #tpu.memory_space<vmem>>, %arg8: memref<18x32x128xbf16, #tpu.memory_space<vmem>>) attributes {dimension_semantics = [#tpu.dimension_semantics<parallel>], iteration_bounds = array<i64: 2>, scalar_prefetch = 0 : i64, scratch_operands = 1 : i64, tpu.core_type = #tpu.core_type<tc>, window_params = [{transform_indices = @transform_0, window_bounds = array<i64: 1, 16, 16, 128>}, {pipeline_mode = #tpu.pipeline_mode<synchronous>, transform_indices = @transform_1, window_bounds = array<i64: 3, 3, 128, 128>}, {pipeline_mode = #tpu.pipeline_mode<synchronous>, transform_indices = @transform_2, window_bounds = array<i64: 1, 128>}, {pipeline_mode = #tpu.pipeline_mode<synchronous>, transform_indices = @transform_3, window_bounds = array<i64: 1, 128>}, {transform_indices = @transform_4, window_bounds = array<i64: 1, 16, 16, 128>}, {transform_indices = @transform_5, window_bounds = array<i64: 1, 8, 128>}, {transform_indices = @transform_6, window_bounds = array<i64: 1, 8, 128>}]} {
    %cst = arith.constant 0.000000e+00 : bf16
    %0 = vector.broadcast %cst : bf16 to vector<18x32x128xbf16>
    %c0 = arith.constant 0 : index
    %c0_0 = arith.constant 0 : index
    %c0_1 = arith.constant 0 : index
    %1 = vector.load %arg8[%c0, %c0_0, %c0_1] : memref<18x32x128xbf16, #tpu.memory_space<vmem>>, vector<18x32x128xbf16>
    tpu.vector_store %arg8[%c0, %c0_0, %c0_1], %0 {strides = array<i32>} : memref<18x32x128xbf16, #tpu.memory_space<vmem>>, vector<18x32x128xbf16>,
    %c0_2 = arith.constant 0 : index
    %c0_3 = arith.constant 0 : index
    %c0_4 = arith.constant 0 : index
    %c0_5 = arith.constant 0 : index
    %2 = vector.load %arg1[%c0_2, %c0_3, %c0_4, %c0_5] : memref<1x16x16x128xf32, #tpu.memory_space<vmem>>, vector<1x16x16x128xf32>
    %3 = vector.shape_cast %2 : vector<1x16x16x128xf32> to vector<16x16x128xf32>
    %c0_6 = arith.constant 0 : index
    %c0_7 = arith.constant 0 : index
    %4 = vector.load %arg3[%c0_6, %c0_7] : memref<1x128xf32, #tpu.memory_space<vmem>>, vector<1x128xf32>
    %5 = vector.shape_cast %4 : vector<1x128xf32> to vector<1x1x128xf32>
    %6 = vector.broadcast %5 : vector<1x1x128xf32> to vector<16x16x128xf32>
    %7 = arith.mulf %3, %6 : vector<16x16x128xf32>
    %c0_8 = arith.constant 0 : index
    %c0_9 = arith.constant 0 : index
    %8 = vector.load %arg4[%c0_8, %c0_9] : memref<1x128xf32, #tpu.memory_space<vmem>>, vector<1x128xf32>
    %9 = vector.shape_cast %8 : vector<1x128xf32> to vector<1x1x128xf32>
    %10 = vector.broadcast %9 : vector<1x1x128xf32> to vector<16x16x128xf32>
    %11 = arith.addf %7, %10 : vector<16x16x128xf32>
    %cst_10 = arith.constant 0.000000e+00 : f32
    %12 = vector.broadcast %cst_10 : f32 to vector<16x16x128xf32>
    %13 = arith.maximumf %11, %12 : vector<16x16x128xf32>
    %14 = arith.truncf %13 : vector<16x16x128xf32> to vector<16x16x128xbf16>
    %c1 = arith.constant 1 : index
    %c8 = arith.constant 8 : index
    %c0_11 = arith.constant 0 : index
    %15 = vector.load %arg8[%c1, %c8, %c0_11] : memref<18x32x128xbf16, #tpu.memory_space<vmem>>, vector<16x16x128xbf16>
    tpu.vector_store %arg8[%c1, %c8, %c0_11], %14 {strides = array<i32>} : memref<18x32x128xbf16, #tpu.memory_space<vmem>>, vector<16x16x128xbf16>,
    %cst_12 = arith.constant 0.000000e+00 : f32
    %16 = vector.broadcast %cst_12 : f32 to vector<256x128xf32>
    %c0_13 = arith.constant 0 : index
    %c7 = arith.constant 7 : index
    %c0_14 = arith.constant 0 : index
    %17 = vector.load %arg8[%c0_13, %c7, %c0_14] : memref<18x32x128xbf16, #tpu.memory_space<vmem>>, vector<16x16x128xbf16>
    %18 = vector.shape_cast %17 : vector<16x16x128xbf16> to vector<256x128xbf16>
    %c0_15 = arith.constant 0 : index
    %c0_16 = arith.constant 0 : index
    %c0_17 = arith.constant 0 : index
    %c0_18 = arith.constant 0 : index
    %19 = vector.load %arg2[%c0_15, %c0_16, %c0_17, %c0_18] : memref<3x3x128x128xbf16, #tpu.memory_space<vmem>>, vector<1x1x128x128xbf16>
    %20 = vector.shape_cast %19 : vector<1x1x128x128xbf16> to vector<128x128xbf16>
    %cst_19 = arith.constant dense<0.000000e+00> : vector<256x128xf32>
    %21 = tpu.matmul %18, %20, %cst_19 {dimension_numbers = #tpu.dot_dimension_numbers<[1], [0], [0], [1], [0, 0, 1, 1], [], []>} : vector<256x128xbf16>, vector<128x128xbf16>, vector<256x128xf32> -> vector<256x128xf32>
    %22 = arith.addf %16, %21 : vector<256x128xf32>
    %c0_20 = arith.constant 0 : index
    %c8_21 = arith.constant 8 : index
    %c0_22 = arith.constant 0 : index
    %23 = vector.load %arg8[%c0_20, %c8_21, %c0_22] : memref<18x32x128xbf16, #tpu.memory_space<vmem>>, vector<16x16x128xbf16>
    %24 = vector.shape_cast %23 : vector<16x16x128xbf16> to vector<256x128xbf16>
    %c0_23 = arith.constant 0 : index
    %c1_24 = arith.constant 1 : index
    %c0_25 = arith.constant 0 : index
    %c0_26 = arith.constant 0 : index
    %25 = vector.load %arg2[%c0_23, %c1_24, %c0_25, %c0_26] : memref<3x3x128x128xbf16, #tpu.memory_space<vmem>>, vector<1x1x128x128xbf16>
    %26 = vector.shape_cast %25 : vector<1x1x128x128xbf16> to vector<128x128xbf16>
    %cst_27 = arith.constant dense<0.000000e+00> : vector<256x128xf32>
    %27 = tpu.matmul %24, %26, %cst_27 {dimension_numbers = #tpu.dot_dimension_numbers<[1], [0], [0], [1], [0, 0, 1, 1], [], []>} : vector<256x128xbf16>, vector<128x128xbf16>, vector<256x128xf32> -> vector<256x128xf32>
    %28 = arith.addf %22, %27 : vector<256x128xf32>
    %c0_28 = arith.constant 0 : index
    %c9 = arith.constant 9 : index
    %c0_29 = arith.constant 0 : index
    %29 = vector.load %arg8[%c0_28, %c9, %c0_29] : memref<18x32x128xbf16, #tpu.memory_space<vmem>>, vector<16x16x128xbf16>
    %30 = vector.shape_cast %29 : vector<16x16x128xbf16> to vector<256x128xbf16>
    %c0_30 = arith.constant 0 : index
    %c2 = arith.constant 2 : index
    %c0_31 = arith.constant 0 : index
    %c0_32 = arith.constant 0 : index
    %31 = vector.load %arg2[%c0_30, %c2, %c0_31, %c0_32] : memref<3x3x128x128xbf16, #tpu.memory_space<vmem>>, vector<1x1x128x128xbf16>
    %32 = vector.shape_cast %31 : vector<1x1x128x128xbf16> to vector<128x128xbf16>
    %cst_33 = arith.constant dense<0.000000e+00> : vector<256x128xf32>
    %33 = tpu.matmul %30, %32, %cst_33 {dimension_numbers = #tpu.dot_dimension_numbers<[1], [0], [0], [1], [0, 0, 1, 1], [], []>} : vector<256x128xbf16>, vector<128x128xbf16>, vector<256x128xf32> -> vector<256x128xf32>
    %34 = arith.addf %28, %33 : vector<256x128xf32>
    %c1_34 = arith.constant 1 : index
    %c7_35 = arith.constant 7 : index
    %c0_36 = arith.constant 0 : index
    %35 = vector.load %arg8[%c1_34, %c7_35, %c0_36] : memref<18x32x128xbf16, #tpu.memory_space<vmem>>, vector<16x16x128xbf16>
    %36 = vector.shape_cast %35 : vector<16x16x128xbf16> to vector<256x128xbf16>
    %c1_37 = arith.constant 1 : index
    %c0_38 = arith.constant 0 : index
    %c0_39 = arith.constant 0 : index
    %c0_40 = arith.constant 0 : index
    %37 = vector.load %arg2[%c1_37, %c0_38, %c0_39, %c0_40] : memref<3x3x128x128xbf16, #tpu.memory_space<vmem>>, vector<1x1x128x128xbf16>
    %38 = vector.shape_cast %37 : vector<1x1x128x128xbf16> to vector<128x128xbf16>
    %cst_41 = arith.constant dense<0.000000e+00> : vector<256x128xf32>
    %39 = tpu.matmul %36, %38, %cst_41 {dimension_numbers = #tpu.dot_dimension_numbers<[1], [0], [0], [1], [0, 0, 1, 1], [], []>} : vector<256x128xbf16>, vector<128x128xbf16>, vector<256x128xf32> -> vector<256x128xf32>
    %40 = arith.addf %34, %39 : vector<256x128xf32>
    %c1_42 = arith.constant 1 : index
    %c8_43 = arith.constant 8 : index
    %c0_44 = arith.constant 0 : index
    %41 = vector.load %arg8[%c1_42, %c8_43, %c0_44] : memref<18x32x128xbf16, #tpu.memory_space<vmem>>, vector<16x16x128xbf16>
    %42 = vector.shape_cast %41 : vector<16x16x128xbf16> to vector<256x128xbf16>
    %c1_45 = arith.constant 1 : index
    %c1_46 = arith.constant 1 : index
    %c0_47 = arith.constant 0 : index
    %c0_48 = arith.constant 0 : index
    %43 = vector.load %arg2[%c1_45, %c1_46, %c0_47, %c0_48] : memref<3x3x128x128xbf16, #tpu.memory_space<vmem>>, vector<1x1x128x128xbf16>
    %44 = vector.shape_cast %43 : vector<1x1x128x128xbf16> to vector<128x128xbf16>
    %cst_49 = arith.constant dense<0.000000e+00> : vector<256x128xf32>
    %45 = tpu.matmul %42, %44, %cst_49 {dimension_numbers = #tpu.dot_dimension_numbers<[1], [0], [0], [1], [0, 0, 1, 1], [], []>} : vector<256x128xbf16>, vector<128x128xbf16>, vector<256x128xf32> -> vector<256x128xf32>
    %46 = arith.addf %40, %45 : vector<256x128xf32>
    %c1_50 = arith.constant 1 : index
    %c9_51 = arith.constant 9 : index
    %c0_52 = arith.constant 0 : index
    %47 = vector.load %arg8[%c1_50, %c9_51, %c0_52] : memref<18x32x128xbf16, #tpu.memory_space<vmem>>, vector<16x16x128xbf16>
    %48 = vector.shape_cast %47 : vector<16x16x128xbf16> to vector<256x128xbf16>
    %c1_53 = arith.constant 1 : index
    %c2_54 = arith.constant 2 : index
    %c0_55 = arith.constant 0 : index
    %c0_56 = arith.constant 0 : index
    %49 = vector.load %arg2[%c1_53, %c2_54, %c0_55, %c0_56] : memref<3x3x128x128xbf16, #tpu.memory_space<vmem>>, vector<1x1x128x128xbf16>
    %50 = vector.shape_cast %49 : vector<1x1x128x128xbf16> to vector<128x128xbf16>
    %cst_57 = arith.constant dense<0.000000e+00> : vector<256x128xf32>
    %51 = tpu.matmul %48, %50, %cst_57 {dimension_numbers = #tpu.dot_dimension_numbers<[1], [0], [0], [1], [0, 0, 1, 1], [], []>} : vector<256x128xbf16>, vector<128x128xbf16>, vector<256x128xf32> -> vector<256x128xf32>
    %52 = arith.addf %46, %51 : vector<256x128xf32>
    %c2_58 = arith.constant 2 : index
    %c7_59 = arith.constant 7 : index
    %c0_60 = arith.constant 0 : index
    %53 = vector.load %arg8[%c2_58, %c7_59, %c0_60] : memref<18x32x128xbf16, #tpu.memory_space<vmem>>, vector<16x16x128xbf16>
    %54 = vector.shape_cast %53 : vector<16x16x128xbf16> to vector<256x128xbf16>
    %c2_61 = arith.constant 2 : index
    %c0_62 = arith.constant 0 : index
    %c0_63 = arith.constant 0 : index
    %c0_64 = arith.constant 0 : index
    %55 = vector.load %arg2[%c2_61, %c0_62, %c0_63, %c0_64] : memref<3x3x128x128xbf16, #tpu.memory_space<vmem>>, vector<1x1x128x128xbf16>
    %56 = vector.shape_cast %55 : vector<1x1x128x128xbf16> to vector<128x128xbf16>
    %cst_65 = arith.constant dense<0.000000e+00> : vector<256x128xf32>
    %57 = tpu.matmul %54, %56, %cst_65 {dimension_numbers = #tpu.dot_dimension_numbers<[1], [0], [0], [1], [0, 0, 1, 1], [], []>} : vector<256x128xbf16>, vector<128x128xbf16>, vector<256x128xf32> -> vector<256x128xf32>
    %58 = arith.addf %52, %57 : vector<256x128xf32>
    %c2_66 = arith.constant 2 : index
    %c8_67 = arith.constant 8 : index
    %c0_68 = arith.constant 0 : index
    %59 = vector.load %arg8[%c2_66, %c8_67, %c0_68] : memref<18x32x128xbf16, #tpu.memory_space<vmem>>, vector<16x16x128xbf16>
    %60 = vector.shape_cast %59 : vector<16x16x128xbf16> to vector<256x128xbf16>
    %c2_69 = arith.constant 2 : index
    %c1_70 = arith.constant 1 : index
    %c0_71 = arith.constant 0 : index
    %c0_72 = arith.constant 0 : index
    %61 = vector.load %arg2[%c2_69, %c1_70, %c0_71, %c0_72] : memref<3x3x128x128xbf16, #tpu.memory_space<vmem>>, vector<1x1x128x128xbf16>
    %62 = vector.shape_cast %61 : vector<1x1x128x128xbf16> to vector<128x128xbf16>
    %cst_73 = arith.constant dense<0.000000e+00> : vector<256x128xf32>
    %63 = tpu.matmul %60, %62, %cst_73 {dimension_numbers = #tpu.dot_dimension_numbers<[1], [0], [0], [1], [0, 0, 1, 1], [], []>} : vector<256x128xbf16>, vector<128x128xbf16>, vector<256x128xf32> -> vector<256x128xf32>
    %64 = arith.addf %58, %63 : vector<256x128xf32>
    %c2_74 = arith.constant 2 : index
    %c9_75 = arith.constant 9 : index
    %c0_76 = arith.constant 0 : index
    %65 = vector.load %arg8[%c2_74, %c9_75, %c0_76] : memref<18x32x128xbf16, #tpu.memory_space<vmem>>, vector<16x16x128xbf16>
    %66 = vector.shape_cast %65 : vector<16x16x128xbf16> to vector<256x128xbf16>
    %c2_77 = arith.constant 2 : index
    %c2_78 = arith.constant 2 : index
    %c0_79 = arith.constant 0 : index
    %c0_80 = arith.constant 0 : index
    %67 = vector.load %arg2[%c2_77, %c2_78, %c0_79, %c0_80] : memref<3x3x128x128xbf16, #tpu.memory_space<vmem>>, vector<1x1x128x128xbf16>
    %68 = vector.shape_cast %67 : vector<1x1x128x128xbf16> to vector<128x128xbf16>
    %cst_81 = arith.constant dense<0.000000e+00> : vector<256x128xf32>
    %69 = tpu.matmul %66, %68, %cst_81 {dimension_numbers = #tpu.dot_dimension_numbers<[1], [0], [0], [1], [0, 0, 1, 1], [], []>} : vector<256x128xbf16>, vector<128x128xbf16>, vector<256x128xf32> -> vector<256x128xf32>
    %70 = arith.addf %64, %69 : vector<256x128xf32>
    %71 = vector.shape_cast %70 : vector<256x128xf32> to vector<1x16x16x128xf32>
    %c0_82 = arith.constant 0 : index
    %c0_83 = arith.constant 0 : index
    %c0_84 = arith.constant 0 : index
    %c0_85 = arith.constant 0 : index
    %72 = vector.load %arg5[%c0_82, %c0_83, %c0_84, %c0_85] : memref<1x16x16x128xf32, #tpu.memory_space<vmem>>, vector<1x16x16x128xf32>
    tpu.vector_store %arg5[%c0_82, %c0_83, %c0_84, %c0_85], %71 {strides = array<i32>} : memref<1x16x16x128xf32, #tpu.memory_space<vmem>>, vector<1x16x16x128xf32>,
    %cst_86 = arith.constant dense<0.000000e+00> : vector<128xf32>
    %73 = vector.multi_reduction <add>, %70, %cst_86 [0] : vector<256x128xf32> to vector<128xf32>
    %74 = vector.shape_cast %73 : vector<128xf32> to vector<1x1x128xf32>
    %75 = vector.shape_cast %74 : vector<1x1x128xf32> to vector<1x1x128xf32>
    %76 = vector.broadcast %75 : vector<1x1x128xf32> to vector<1x8x128xf32>
    %c0_87 = arith.constant 0 : index
    %c0_88 = arith.constant 0 : index
    %c0_89 = arith.constant 0 : index
    %77 = vector.load %arg6[%c0_87, %c0_88, %c0_89] : memref<1x8x128xf32, #tpu.memory_space<vmem>>, vector<1x8x128xf32>
    tpu.vector_store %arg6[%c0_87, %c0_88, %c0_89], %76 {strides = array<i32>} : memref<1x8x128xf32, #tpu.memory_space<vmem>>, vector<1x8x128xf32>,
    %78 = arith.mulf %70, %70 : vector<256x128xf32>
    %cst_90 = arith.constant dense<0.000000e+00> : vector<128xf32>
    %79 = vector.multi_reduction <add>, %78, %cst_90 [0] : vector<256x128xf32> to vector<128xf32>
    %80 = vector.shape_cast %79 : vector<128xf32> to vector<1x1x128xf32>
    %81 = vector.shape_cast %80 : vector<1x1x128xf32> to vector<1x1x128xf32>
    %82 = vector.broadcast %81 : vector<1x1x128xf32> to vector<1x8x128xf32>
    %c0_91 = arith.constant 0 : index
    %c0_92 = arith.constant 0 : index
    %c0_93 = arith.constant 0 : index
    %83 = vector.load %arg7[%c0_91, %c0_92, %c0_93] : memref<1x8x128xf32, #tpu.memory_space<vmem>>, vector<1x8x128xf32>
    tpu.vector_store %arg7[%c0_91, %c0_92, %c0_93], %82 {strides = array<i32>} : memref<1x8x128xf32, #tpu.memory_space<vmem>>, vector<1x8x128xf32>,
    return
  }
  func.func @transform_0(%arg0: i32) -> (i32, i32, i32, i32) {
    %c0_i32 = arith.constant 0 : i32
    %c0_i32_0 = arith.constant 0 : i32
    %c0_i32_1 = arith.constant 0 : i32
    %c0_i32_2 = arith.constant 0 : i32
    return %arg0, %c0_i32, %c0_i32_0, %c0_i32_1 : i32, i32, i32, i32
  }
  func.func @transform_1(%arg0: i32) -> (i32, i32, i32, i32) {
    %c0_i32 = arith.constant 0 : i32
    %c0_i32_0 = arith.constant 0 : i32
    %c0_i32_1 = arith.constant 0 : i32
    %c0_i32_2 = arith.constant 0 : i32
    %c0_i32_3 = arith.constant 0 : i32
    return %c0_i32, %c0_i32_0, %c0_i32_1, %c0_i32_2 : i32, i32, i32, i32
  }
  func.func @transform_2(%arg0: i32) -> (i32, i32) {
    %c0_i32 = arith.constant 0 : i32
    %c0_i32_0 = arith.constant 0 : i32
    %c0_i32_1 = arith.constant 0 : i32
    return %c0_i32, %c0_i32_0 : i32, i32
  }
  func.func @transform_3(%arg0: i32) -> (i32, i32) {
    %c0_i32 = arith.constant 0 : i32
    %c0_i32_0 = arith.constant 0 : i32
    %c0_i32_1 = arith.constant 0 : i32
    return %c0_i32, %c0_i32_0 : i32, i32
  }
  func.func @transform_4(%arg0: i32) -> (i32, i32, i32, i32) {
    %c0_i32 = arith.constant 0 : i32
    %c0_i32_0 = arith.constant 0 : i32
    %c0_i32_1 = arith.constant 0 : i32
    %c0_i32_2 = arith.constant 0 : i32
    return %arg0, %c0_i32, %c0_i32_0, %c0_i32_1 : i32, i32, i32, i32
  }
  func.func @transform_5(%arg0: i32) -> (i32, i32, i32) {
    %c0_i32 = arith.constant 0 : i32
    %c0_i32_0 = arith.constant 0 : i32
    %c0_i32_1 = arith.constant 0 : i32
    return %arg0, %c0_i32, %c0_i32_0 : i32, i32, i32
  }
  func.func @transform_6(%arg0: i32) -> (i32, i32, i32) {
    %c0_i32 = arith.constant 0 : i32
    %c0_i32_0 = arith.constant 0 : i32
    %c0_i32_1 = arith.constant 0 : i32
    return %arg0, %c0_i32, %c0_i32_0 : i32, i32, i32
  }
}

module attributes {stable_mosaic.version = 11 : i64} {
  func.func @_gemm1x1_kernel(%arg0: i32, %arg1: memref<256x128xf32, #tpu.memory_space<vmem>>, %arg2: memref<128x128xbf16, #tpu.memory_space<vmem>>, %arg3: memref<1x128xf32, #tpu.memory_space<vmem>>, %arg4: memref<1x128xf32, #tpu.memory_space<vmem>>, %arg5: memref<256x128xf32, #tpu.memory_space<vmem>>, %arg6: memref<1x8x128xf32, #tpu.memory_space<vmem>>, %arg7: memref<1x8x128xf32, #tpu.memory_space<vmem>>) attributes {dimension_semantics = [#tpu.dimension_semantics<parallel>], iteration_bounds = array<i64: 2>, scalar_prefetch = 0 : i64, scratch_operands = 0 : i64, tpu.core_type = #tpu.core_type<tc>, window_params = [{transform_indices = @transform_0, window_bounds = array<i64: 256, 128>}, {pipeline_mode = #tpu.pipeline_mode<synchronous>, transform_indices = @transform_1, window_bounds = array<i64: 128, 128>}, {pipeline_mode = #tpu.pipeline_mode<synchronous>, transform_indices = @transform_2, window_bounds = array<i64: 1, 128>}, {pipeline_mode = #tpu.pipeline_mode<synchronous>, transform_indices = @transform_3, window_bounds = array<i64: 1, 128>}, {transform_indices = @transform_4, window_bounds = array<i64: 256, 128>}, {transform_indices = @transform_5, window_bounds = array<i64: 1, 8, 128>}, {transform_indices = @transform_6, window_bounds = array<i64: 1, 8, 128>}]} {
    %c0 = arith.constant 0 : index
    %c0_0 = arith.constant 0 : index
    %0 = vector.load %arg1[%c0, %c0_0] : memref<256x128xf32, #tpu.memory_space<vmem>>, vector<256x128xf32>
    %c0_1 = arith.constant 0 : index
    %c0_2 = arith.constant 0 : index
    %1 = vector.load %arg3[%c0_1, %c0_2] : memref<1x128xf32, #tpu.memory_space<vmem>>, vector<1x128xf32>
    %2 = vector.broadcast %1 : vector<1x128xf32> to vector<256x128xf32>
    %3 = arith.mulf %0, %2 : vector<256x128xf32>
    %c0_3 = arith.constant 0 : index
    %c0_4 = arith.constant 0 : index
    %4 = vector.load %arg4[%c0_3, %c0_4] : memref<1x128xf32, #tpu.memory_space<vmem>>, vector<1x128xf32>
    %5 = vector.broadcast %4 : vector<1x128xf32> to vector<256x128xf32>
    %6 = arith.addf %3, %5 : vector<256x128xf32>
    %cst = arith.constant 0.000000e+00 : f32
    %7 = vector.broadcast %cst : f32 to vector<256x128xf32>
    %8 = arith.maximumf %6, %7 : vector<256x128xf32>
    %9 = arith.truncf %8 : vector<256x128xf32> to vector<256x128xbf16>
    %c0_5 = arith.constant 0 : index
    %c0_6 = arith.constant 0 : index
    %10 = vector.load %arg2[%c0_5, %c0_6] : memref<128x128xbf16, #tpu.memory_space<vmem>>, vector<128x128xbf16>
    %cst_7 = arith.constant dense<0.000000e+00> : vector<256x128xf32>
    %11 = tpu.matmul %9, %10, %cst_7 {dimension_numbers = #tpu.dot_dimension_numbers<[1], [0], [0], [1], [0, 0, 1, 1], [], []>} : vector<256x128xbf16>, vector<128x128xbf16>, vector<256x128xf32> -> vector<256x128xf32>
    %c0_8 = arith.constant 0 : index
    %c0_9 = arith.constant 0 : index
    %12 = vector.load %arg5[%c0_8, %c0_9] : memref<256x128xf32, #tpu.memory_space<vmem>>, vector<256x128xf32>
    tpu.vector_store %arg5[%c0_8, %c0_9], %11 {strides = array<i32>} : memref<256x128xf32, #tpu.memory_space<vmem>>, vector<256x128xf32>,
    %cst_10 = arith.constant dense<0.000000e+00> : vector<128xf32>
    %13 = vector.multi_reduction <add>, %11, %cst_10 [0] : vector<256x128xf32> to vector<128xf32>
    %14 = vector.shape_cast %13 : vector<128xf32> to vector<1x1x128xf32>
    %15 = vector.shape_cast %14 : vector<1x1x128xf32> to vector<1x1x128xf32>
    %16 = vector.broadcast %15 : vector<1x1x128xf32> to vector<1x8x128xf32>
    %c0_11 = arith.constant 0 : index
    %c0_12 = arith.constant 0 : index
    %c0_13 = arith.constant 0 : index
    %17 = vector.load %arg6[%c0_11, %c0_12, %c0_13] : memref<1x8x128xf32, #tpu.memory_space<vmem>>, vector<1x8x128xf32>
    tpu.vector_store %arg6[%c0_11, %c0_12, %c0_13], %16 {strides = array<i32>} : memref<1x8x128xf32, #tpu.memory_space<vmem>>, vector<1x8x128xf32>,
    %18 = arith.mulf %11, %11 : vector<256x128xf32>
    %cst_14 = arith.constant dense<0.000000e+00> : vector<128xf32>
    %19 = vector.multi_reduction <add>, %18, %cst_14 [0] : vector<256x128xf32> to vector<128xf32>
    %20 = vector.shape_cast %19 : vector<128xf32> to vector<1x1x128xf32>
    %21 = vector.shape_cast %20 : vector<1x1x128xf32> to vector<1x1x128xf32>
    %22 = vector.broadcast %21 : vector<1x1x128xf32> to vector<1x8x128xf32>
    %c0_15 = arith.constant 0 : index
    %c0_16 = arith.constant 0 : index
    %c0_17 = arith.constant 0 : index
    %23 = vector.load %arg7[%c0_15, %c0_16, %c0_17] : memref<1x8x128xf32, #tpu.memory_space<vmem>>, vector<1x8x128xf32>
    tpu.vector_store %arg7[%c0_15, %c0_16, %c0_17], %22 {strides = array<i32>} : memref<1x8x128xf32, #tpu.memory_space<vmem>>, vector<1x8x128xf32>,
    return
  }
  func.func @transform_0(%arg0: i32) -> (i32, i32) {
    %c0_i32 = arith.constant 0 : i32
    %c0_i32_0 = arith.constant 0 : i32
    return %arg0, %c0_i32 : i32, i32
  }
  func.func @transform_1(%arg0: i32) -> (i32, i32) {
    %c0_i32 = arith.constant 0 : i32
    %c0_i32_0 = arith.constant 0 : i32
    %c0_i32_1 = arith.constant 0 : i32
    return %c0_i32, %c0_i32_0 : i32, i32
  }
  func.func @transform_2(%arg0: i32) -> (i32, i32) {
    %c0_i32 = arith.constant 0 : i32
    %c0_i32_0 = arith.constant 0 : i32
    %c0_i32_1 = arith.constant 0 : i32
    return %c0_i32, %c0_i32_0 : i32, i32
  }
  func.func @transform_3(%arg0: i32) -> (i32, i32) {
    %c0_i32 = arith.constant 0 : i32
    %c0_i32_0 = arith.constant 0 : i32
    %c0_i32_1 = arith.constant 0 : i32
    return %c0_i32, %c0_i32_0 : i32, i32
  }
  func.func @transform_4(%arg0: i32) -> (i32, i32) {
    %c0_i32 = arith.constant 0 : i32
    %c0_i32_0 = arith.constant 0 : i32
    return %arg0, %c0_i32 : i32, i32
  }
  func.func @transform_5(%arg0: i32) -> (i32, i32, i32) {
    %c0_i32 = arith.constant 0 : i32
    %c0_i32_0 = arith.constant 0 : i32
    %c0_i32_1 = arith.constant 0 : i32
    return %arg0, %c0_i32, %c0_i32_0 : i32, i32, i32
  }
  func.func @transform_6(%arg0: i32) -> (i32, i32, i32) {
    %c0_i32 = arith.constant 0 : i32
    %c0_i32_0 = arith.constant 0 : i32
    %c0_i32_1 = arith.constant 0 : i32
    return %arg0, %c0_i32, %c0_i32_0 : i32, i32, i32
  }
}

module attributes {stable_mosaic.version = 11 : i64} {
  func.func @_bn_add_relu_kernel(%arg0: i32, %arg1: memref<512x128xf32, #tpu.memory_space<vmem>>, %arg2: memref<512x128xf32, #tpu.memory_space<vmem>>, %arg3: memref<1x128xf32, #tpu.memory_space<vmem>>, %arg4: memref<1x128xf32, #tpu.memory_space<vmem>>, %arg5: memref<1x128xf32, #tpu.memory_space<vmem>>, %arg6: memref<1x128xf32, #tpu.memory_space<vmem>>, %arg7: memref<512x128xf32, #tpu.memory_space<vmem>>) attributes {dimension_semantics = [#tpu.dimension_semantics<parallel>], iteration_bounds = array<i64: 1>, scalar_prefetch = 0 : i64, scratch_operands = 0 : i64, tpu.core_type = #tpu.core_type<tc>, window_params = [{transform_indices = @transform_0, window_bounds = array<i64: 512, 128>}, {transform_indices = @transform_1, window_bounds = array<i64: 512, 128>}, {pipeline_mode = #tpu.pipeline_mode<synchronous>, transform_indices = @transform_2, window_bounds = array<i64: 1, 128>}, {pipeline_mode = #tpu.pipeline_mode<synchronous>, transform_indices = @transform_3, window_bounds = array<i64: 1, 128>}, {pipeline_mode = #tpu.pipeline_mode<synchronous>, transform_indices = @transform_4, window_bounds = array<i64: 1, 128>}, {pipeline_mode = #tpu.pipeline_mode<synchronous>, transform_indices = @transform_5, window_bounds = array<i64: 1, 128>}, {transform_indices = @transform_6, window_bounds = array<i64: 512, 128>}]} {
    %c0 = arith.constant 0 : index
    %c0_0 = arith.constant 0 : index
    %0 = vector.load %arg1[%c0, %c0_0] : memref<512x128xf32, #tpu.memory_space<vmem>>, vector<512x128xf32>
    %c0_1 = arith.constant 0 : index
    %c0_2 = arith.constant 0 : index
    %1 = vector.load %arg3[%c0_1, %c0_2] : memref<1x128xf32, #tpu.memory_space<vmem>>, vector<1x128xf32>
    %2 = vector.broadcast %1 : vector<1x128xf32> to vector<512x128xf32>
    %3 = arith.mulf %0, %2 : vector<512x128xf32>
    %c0_3 = arith.constant 0 : index
    %c0_4 = arith.constant 0 : index
    %4 = vector.load %arg4[%c0_3, %c0_4] : memref<1x128xf32, #tpu.memory_space<vmem>>, vector<1x128xf32>
    %5 = vector.broadcast %4 : vector<1x128xf32> to vector<512x128xf32>
    %6 = arith.addf %3, %5 : vector<512x128xf32>
    %c0_5 = arith.constant 0 : index
    %c0_6 = arith.constant 0 : index
    %7 = vector.load %arg2[%c0_5, %c0_6] : memref<512x128xf32, #tpu.memory_space<vmem>>, vector<512x128xf32>
    %c0_7 = arith.constant 0 : index
    %c0_8 = arith.constant 0 : index
    %8 = vector.load %arg5[%c0_7, %c0_8] : memref<1x128xf32, #tpu.memory_space<vmem>>, vector<1x128xf32>
    %9 = vector.broadcast %8 : vector<1x128xf32> to vector<512x128xf32>
    %10 = arith.mulf %7, %9 : vector<512x128xf32>
    %11 = arith.addf %6, %10 : vector<512x128xf32>
    %c0_9 = arith.constant 0 : index
    %c0_10 = arith.constant 0 : index
    %12 = vector.load %arg6[%c0_9, %c0_10] : memref<1x128xf32, #tpu.memory_space<vmem>>, vector<1x128xf32>
    %13 = vector.broadcast %12 : vector<1x128xf32> to vector<512x128xf32>
    %14 = arith.addf %11, %13 : vector<512x128xf32>
    %cst = arith.constant 0.000000e+00 : f32
    %15 = vector.broadcast %cst : f32 to vector<512x128xf32>
    %16 = arith.maximumf %14, %15 : vector<512x128xf32>
    %c0_11 = arith.constant 0 : index
    %c0_12 = arith.constant 0 : index
    %17 = vector.load %arg7[%c0_11, %c0_12] : memref<512x128xf32, #tpu.memory_space<vmem>>, vector<512x128xf32>
    tpu.vector_store %arg7[%c0_11, %c0_12], %16 {strides = array<i32>} : memref<512x128xf32, #tpu.memory_space<vmem>>, vector<512x128xf32>,
    return
  }
  func.func @transform_0(%arg0: i32) -> (i32, i32) {
    %c0_i32 = arith.constant 0 : i32
    %c0_i32_0 = arith.constant 0 : i32
    return %arg0, %c0_i32 : i32, i32
  }
  func.func @transform_1(%arg0: i32) -> (i32, i32) {
    %c0_i32 = arith.constant 0 : i32
    %c0_i32_0 = arith.constant 0 : i32
    return %arg0, %c0_i32 : i32, i32
  }
  func.func @transform_2(%arg0: i32) -> (i32, i32) {
    %c0_i32 = arith.constant 0 : i32
    %c0_i32_0 = arith.constant 0 : i32
    %c0_i32_1 = arith.constant 0 : i32
    return %c0_i32, %c0_i32_0 : i32, i32
  }
  func.func @transform_3(%arg0: i32) -> (i32, i32) {
    %c0_i32 = arith.constant 0 : i32
    %c0_i32_0 = arith.constant 0 : i32
    %c0_i32_1 = arith.constant 0 : i32
    return %c0_i32, %c0_i32_0 : i32, i32
  }
  func.func @transform_4(%arg0: i32) -> (i32, i32) {
    %c0_i32 = arith.constant 0 : i32
    %c0_i32_0 = arith.constant 0 : i32
    %c0_i32_1 = arith.constant 0 : i32
    return %c0_i32, %c0_i32_0 : i32, i32
  }
  func.func @transform_5(%arg0: i32) -> (i32, i32) {
    %c0_i32 = arith.constant 0 : i32
    %c0_i32_0 = arith.constant 0 : i32
    %c0_i32_1 = arith.constant 0 : i32
    return %c0_i32, %c0_i32_0 : i32, i32
  }
  func.func @transform_6(%arg0: i32) -> (i32, i32) {
    %c0_i32 = arith.constant 0 : i32
    %c0_i32_0 = arith.constant 0 : i32
    return %arg0, %c0_i32 : i32, i32
  }
}

</mosaic_0001>

<bundles_post_ra>
// kernel: bottleneck_forward.5
= control target key start
LH: loop header
LB: loop body
LE: loop exit
PB: predicated region body
PF: predicated region fallthrough
CT: control target
= control target key end

     0   :  { %s1048_s21 = smov 0   ;;  %s1344_s0 = inlined_call_operand.vmem [shape: bf16[512,128], index: 0, kind: input, shape index: {}]   ;;  %s1345_s1 = inlined_call_operand.vmem [shape: bf16[128,128], index: 1, kind: input, shape index: {}]   ;;  %s1346_s2 = inlined_call_operand.vmem [shape: f32[1,128], index: 2, kind: input, shape index: {}]   ;;  %s1347_s3 = inlined_call_operand.vmem [shape: f32[1,128], index: 3, kind: input, shape index: {}]   ;;  %s1348_s4 = inlined_call_operand.vmem [shape: f32[512,128], index: 4, kind: output, shape index: {0}]   ;;  %s1349_s5 = inlined_call_operand.vmem [shape: f32[2,8,128], index: 5, kind: output, shape index: {1}]   ;;  %s1350_s6 = inlined_call_operand.vmem [shape: f32[2,8,128], index: 6, kind: output, shape index: {2}]  }
   0x1 LB: > { %s1054_s22 = sadd.s32 4294967295, %s1011_s21   ;;  %p843_p0 = scmp.ge.s32.totalorder %s1011_s21, 1  ;;  %s1011_s21 = sphi %s1048_s21, %s17_s21  }
   0x2   : > { %p218_p1 = scmp.lt.s32.totalorder %s1011_s21, 3 }
   0x4   : > { %p219_p2 = pnand %p843_p0, %p218_p1 }
   0x5   : > { %s844_s25 = sshll.u32 (!%p219_p2), %s1054_s22, 5  ;;  %p268_p4 = scmp.lt.s32.totalorder (!%p219_p2), %s1054_s22, 1 }
   0x6   : > { %222 = sbr.rel (%p219_p2) target bundleno = 290 (0x122), region = 36  ;;  %p257_p3 = scmp.lt.s32.totalorder (!%p219_p2), %s844_s25, 63 }
   0xb   : > { %v891_v0 = vld [vmem:[%s1345_s1 + $0x38] sm:$0xff]  ;;  %v890_v1 = vld [vmem:[%s1345_s1 + $0x30] sm:$0xff]  ;;  %s1352_s25 = smov (!%p257_p3, %s844_s25), 63  ;;  %v889_v2 = vld [vmem:[%s1345_s1 + $0x28] sm:$0xff]  ;;  %s1354_s22 = smov (!%p268_p4, %s1054_s22), 1 }
   0xc   : > { %492 = vmatpush.bf16.msra.mxu0 %v891_v0  ;;  %971 = vmatpush.bf16.msra.mxu1 %v891_v0  ;;  %s845_s30 = sshll.u32 %s1352_s25, 2  ;;  %v888_v3 = vld [vmem:[%s1345_s1 + $0x20] sm:$0xff]  ;;  %v887_v4 = vld [vmem:[%s1345_s1 + $0x18] sm:$0xff]  ;;  %v886_v13 = vld [vmem:[%s1345_s1 + $0x10] sm:$0xff]  ;;  %s847_s27 = sshll.u32 %s1352_s25, 3 }
   0xd   : > { %972 = vmatpush.bf16.msra.mxu2 %v891_v0  ;;  %973 = vmatpush.bf16.msra.mxu3 %v891_v0  ;;  %s1077_s11 = scalar_lea.vmem %s1344_s0, %s845_s30  ;;  %v1088_v10 = vld [vmem:[%s1346_s2] ss:$0 sm:$0xff]  ;;  %v885_v21 = vld [vmem:[%s1345_s1 + $0x8] sm:$0xff]  ;;  %s1185_s30 = scalar_lea.vmem %s1348_s4, %s847_s27 }
   0xe   : > { %v893_v5 = vld [vmem:[%s1077_s11] sm:$0xff]   ;;  %v956_v38 = vld [vmem:[%s1077_s11 + $0x8] sm:$0xff]   ;;  %s848_s25 = sshll.u32 %s1354_s22, 3 }
   0xf   : > { %v959_v6 = vld [vmem:[%s1077_s11 + $0x20] sm:$0xff]   ;;  %v894_v8 = vunpack.c.l.bf16 %v893_v5  ;;  %v895_v9 = vunpack.c.h.bf16 %v893_v5  ;;  %v960_v40 = vld [vmem:[%s1077_s11 + $0x28] sm:$0xff]   ;;  %v898_v44 = vunpack.c.l.bf16 %v956_v38  ;;  %v899_v45 = vunpack.c.h.bf16 %v956_v38  ;;  %s271_s9 = scalar_lea.vmem %s1349_s5, %s848_s25  ;;  %s275_s12 = scalar_lea.vmem %s1350_s6, %s848_s25 }
  0x10   : > { %493 = vmatpush.bf16.msra.mxu0 %v890_v1  ;;  %974 = vmatpush.bf16.msra.mxu1 %v890_v1  ;;  %v963_v7 = vld [vmem:[%s1077_s11 + $0x40] sm:$0xff]   ;;  %v910_v11 = vunpack.c.l.bf16 %v959_v6  ;;  %v911_v12 = vunpack.c.h.bf16 %v959_v6  ;;  %v964_v41 = vld [vmem:[%s1077_s11 + $0x48] sm:$0xff]   ;;  %v914_v46 = vunpack.c.l.bf16 %v960_v40  ;;  %v915_v47 = vunpack.c.h.bf16 %v960_v40 }
  0x11   : > { %975 = vmatpush.bf16.msra.mxu2 %v890_v1  ;;  %976 = vmatpush.bf16.msra.mxu3 %v890_v1  ;;  %v926_v14 = vunpack.c.l.bf16 %v963_v7  ;;  %v927_v15 = vunpack.c.h.bf16 %v963_v7  ;;  %v344_v16 = vmul.f32 %v1088_v10, %v894_v8  ;;  %v345_v17 = vmul.f32 %v1088_v10, %v895_v9  ;;  %v1098_v18 = vld [vmem:[%s1347_s3] ss:$0 sm:$0xff]  ;;  %v968_v63 = vld [vmem:[%s1077_s11 + $0x68] sm:$0xff]   ;;  %v961_v8 = vld [vmem:[%s1077_s11 + $0x30] sm:$0xff]  }
  0x12   : > { %v352_v19 = vmul.f32 %v1088_v10, %v910_v11  ;;  %v353_v20 = vmul.f32 %v1088_v10, %v911_v12  ;;  %v884_v28 = vld [vmem:[%s1345_s1] sm:$0xff]  ;;  %v930_v48 = vunpack.c.l.bf16 %v964_v41  ;;  %v931_v49 = vunpack.c.h.bf16 %v964_v41  ;;  %v965_v9 = vld [vmem:[%s1077_s11 + $0x50] sm:$0xff]  }
  0x13   : > { %v360_v22 = vmul.f32 %v1088_v10, %v926_v14  ;;  %v361_v23 = vmul.f32 %v1088_v10, %v927_v15  ;;  %v380_v24 = vadd.f32 %v1098_v18, %v344_v16  ;;  %v381_v25 = vadd.f32 %v1098_v18, %v345_v17  ;;  %v967_v31 = vld [vmem:[%s1077_s11 + $0x60] sm:$0xff]  }
  0x14   : > { %494 = vmatpush.bf16.msra.mxu0 %v889_v2  ;;  %977 = vmatpush.bf16.msra.mxu1 %v889_v2  ;;  %v388_v26 = vadd.f32 %v1098_v18, %v352_v19  ;;  %v389_v27 = vadd.f32 %v1098_v18, %v353_v20  ;;  %v942_v32 = vunpack.c.l.bf16 %v967_v31  ;;  %v943_v33 = vunpack.c.h.bf16 %v967_v31 }
  0x15   : > { %978 = vmatpush.bf16.msra.mxu2 %v889_v2  ;;  %979 = vmatpush.bf16.msra.mxu3 %v889_v2  ;;  %v396_v29 = vadd.f32 %v1098_v18, %v360_v22  ;;  %v397_v30 = vadd.f32 %v1098_v18, %v361_v23  ;;  %v412_v34 = vpack.c.bf16 %v381_v25, %v380_v24  ;;  %v946_v0 = vunpack.c.l.bf16 %v968_v63 }
  0x16   : > { %v416_v35 = vpack.c.bf16 %v389_v27, %v388_v26  ;;  %v368_v36 = vmul.f32 %v1088_v10, %v942_v32  ;;  %v369_v37 = vmul.f32 %v1088_v10, %v943_v33  ;;  %v346_v51 = vmul.f32 %v1088_v10, %v898_v44  ;;  %v962_v44 = vld [vmem:[%s1077_s11 + $0x38] sm:$0xff]  }
  0x17   : > { %v420_v39 = vpack.c.bf16 %v397_v30, %v396_v29  ;;  %v347_v52 = vmul.f32 %v1088_v10, %v899_v45  ;;  %v354_v53 = vmul.f32 %v1088_v10, %v914_v46  ;;  %v355_v54 = vmul.f32 %v1088_v10, %v915_v47  ;;  %v966_v45 = vld [vmem:[%s1077_s11 + $0x58] sm:$0xff]  }
  0x18   : > { %495 = vmatpush.bf16.msra.mxu0 %v888_v3  ;;  %980 = vmatpush.bf16.msra.mxu1 %v888_v3  ;;  %v404_v42 = vadd.f32 %v1098_v18, %v368_v36  ;;  %v405_v43 = vadd.f32 %v1098_v18, %v369_v37  ;;  %v362_v55 = vmul.f32 %v1088_v10, %v930_v48  ;;  %v947_v1 = vunpack.c.h.bf16 %v968_v63 }
  0x19   : > { %981 = vmatpush.bf16.msra.mxu2 %v888_v3  ;;  %982 = vmatpush.bf16.msra.mxu3 %v888_v3  ;;  %v363_v56 = vmul.f32 %v1088_v10, %v931_v49  ;;  %v382_v57 = vadd.f32 %v1098_v18, %v346_v51  ;;  %v383_v58 = vadd.f32 %v1098_v18, %v347_v52  ;;  %v918_v15 = vunpack.c.l.bf16 %v961_v8  ;;  %v970_v51 = vld [vmem:[%s1077_s11 + $0x78] sm:$0xff]  }
  0x1a   : > { %v424_v50 = vpack.c.bf16 %v405_v43, %v404_v42  ;;  %v390_v59 = vadd.f32 %v1098_v18, %v354_v53  ;;  %v391_v60 = vadd.f32 %v1098_v18, %v355_v54  ;;  %v398_v61 = vadd.f32 %v1098_v18, %v362_v55  ;;  %v958_v42 = vld [vmem:[%s1077_s11 + $0x18] sm:$0xff]  }
  0x1b   : > { %v399_v62 = vadd.f32 %v1098_v18, %v363_v56  ;;  %v413_v2 = vpack.c.bf16 %v383_v58, %v382_v57  ;;  %v370_v5 = vmul.f32 %v1088_v10, %v946_v0  ;;  %v371_v6 = vmul.f32 %v1088_v10, %v947_v1 }
  0x1c   : > { %496 = vmatpush.bf16.msra.mxu0 %v887_v4  ;;  %983 = vmatpush.bf16.msra.mxu1 %v887_v4  ;;  %v417_v3 = vpack.c.bf16 %v391_v60, %v390_v59  ;;  %v919_v16 = vunpack.c.h.bf16 %v961_v8  ;;  %v934_v19 = vunpack.c.l.bf16 %v965_v9  ;;  %v935_v20 = vunpack.c.h.bf16 %v965_v9 }
  0x1d   : > { %984 = vmatpush.bf16.msra.mxu2 %v887_v4  ;;  %985 = vmatpush.bf16.msra.mxu3 %v887_v4  ;;  %v957_v4 = vld [vmem:[%s1077_s11 + $0x10] sm:$0xff]   ;;  %v421_v7 = vpack.c.bf16 %v399_v62, %v398_v61  ;;  %v406_v11 = vadd.f32 %v1098_v18, %v370_v5  ;;  %v407_v12 = vadd.f32 %v1098_v18, %v371_v6  ;;  %v906_v47 = vunpack.c.l.bf16 %v958_v42 }
  0x1e   : > { %v903_v14 = vunpack.c.h.bf16 %v957_v4  ;;  %v356_v26 = vmul.f32 %v1088_v10, %v918_v15  ;;  %v357_v27 = vmul.f32 %v1088_v10, %v919_v16  ;;  %v365_v29 = vmul.f32 %v1088_v10, %v935_v20 }
  0x1f   : > { %v425_v17 = vpack.c.bf16 %v407_v12, %v406_v11  ;;  %v907_v48 = vunpack.c.h.bf16 %v958_v42  ;;  %v922_v49 = vunpack.c.l.bf16 %v962_v44  ;;  %v938_v52 = vunpack.c.l.bf16 %v966_v45 }
  0x20   : > { %497 = vmatpush.bf16.msra.mxu0 %v886_v13  ;;  %986 = vmatpush.bf16.msra.mxu1 %v886_v13  ;;  %v349_v25 = vmul.f32 %v1088_v10, %v903_v14  ;;  %v401_v37 = vadd.f32 %v1098_v18, %v365_v29  ;;  %v939_v53 = vunpack.c.h.bf16 %v966_v45  ;;  %v954_v54 = vunpack.c.l.bf16 %v970_v51 }
  0x21   : > { %987 = vmatpush.bf16.msra.mxu2 %v886_v13  ;;  %988 = vmatpush.bf16.msra.mxu3 %v886_v13  ;;  %v902_v13 = vunpack.c.l.bf16 %v957_v4  ;;  %v955_v55 = vunpack.c.h.bf16 %v970_v51  ;;  %v350_v56 = vmul.f32 %v1088_v10, %v906_v47  ;;  %v351_v57 = vmul.f32 %v1088_v10, %v907_v48 }
  0x22   : > { %v385_v33 = vadd.f32 %v1098_v18, %v349_v25  ;;  %v358_v58 = vmul.f32 %v1088_v10, %v922_v49  ;;  %v366_v60 = vmul.f32 %v1088_v10, %v938_v52  ;;  %v367_v61 = vmul.f32 %v1088_v10, %v939_v53 }
  0x23   : > { %v348_v24 = vmul.f32 %v1088_v10, %v902_v13  ;;  %v374_v62 = vmul.f32 %v1088_v10, %v954_v54  ;;  %v375_v63 = vmul.f32 %v1088_v10, %v955_v55  ;;  %v386_v0 = vadd.f32 %v1098_v18, %v350_v56 }
  0x24   : > { %498 = vmatpush.bf16.msra.mxu0 %v885_v21  ;;  %989 = vmatpush.bf16.msra.mxu1 %v885_v21  ;;  %v387_v1 = vadd.f32 %v1098_v18, %v351_v57  ;;  %v402_v4 = vadd.f32 %v1098_v18, %v366_v60  ;;  %v403_v5 = vadd.f32 %v1098_v18, %v367_v61 }
  0x25   : > { %990 = vmatpush.bf16.msra.mxu2 %v885_v21  ;;  %991 = vmatpush.bf16.msra.mxu3 %v885_v21  ;;  %v969_v21 = vld [vmem:[%s1077_s11 + $0x70] sm:$0xff]   ;;  %v384_v32 = vadd.f32 %v1098_v18, %v348_v24  ;;  %v410_v6 = vadd.f32 %v1098_v18, %v374_v62 }
  0x26   : > { %v950_v22 = vunpack.c.l.bf16 %v969_v21  ;;  %v951_v23 = vunpack.c.h.bf16 %v969_v21  ;;  %v415_v8 = vpack.c.bf16 %v387_v1, %v386_v0 }
  0x27   : > { %v414_v40 = vpack.c.bf16 %v385_v33, %v384_v32 }
  0x28   : > { %499 = vmatpush.bf16.msra.mxu0 %v884_v28  ;;  %992 = vmatpush.bf16.msra.mxu1 %v884_v28  ;;  %v372_v30 = vmul.f32 %v1088_v10, %v950_v22  ;;  %v373_v31 = vmul.f32 %v1088_v10, %v951_v23 }
  0x29   : > { %993 = vmatpush.bf16.msra.mxu2 %v884_v28  ;;  %994 = vmatpush.bf16.msra.mxu3 %v884_v28  ;;  %v364_v28 = vmul.f32 %v1088_v10, %v934_v19 }
  0x2a   : > { %v408_v38 = vadd.f32 %v1098_v18, %v372_v30 }
  0x2b   : > { %500 = vmatmul.bf16.vlgmr.msra.gmra.mxu0 %v412_v34  ;;  %520 = vmatmul.bf16.vlgmr.msra.gmra.mxu1 %v416_v35  ;;  %v392_v34 = vadd.f32 %v1098_v18, %v356_v26  ;;  %v393_v35 = vadd.f32 %v1098_v18, %v357_v27  ;;  %v400_v36 = vadd.f32 %v1098_v18, %v364_v28 }
  0x2c   : > { %540 = vmatmul.bf16.vlgmr.msra.gmra.mxu2 %v420_v39  ;;  %560 = vmatmul.bf16.vlgmr.msra.gmra.mxu3 %v424_v50  ;;  %v409_v39 = vadd.f32 %v1098_v18, %v373_v31  ;;  %v923_v50 = vunpack.c.h.bf16 %v962_v44 }
  0x2d   : > { %v418_v41 = vpack.c.bf16 %v393_v35, %v392_v34  ;;  %v422_v43 = vpack.c.bf16 %v401_v37, %v400_v36 }
  0x2e   : > { %v426_v46 = vpack.c.bf16 %v409_v39, %v408_v38  ;;  %v359_v59 = vmul.f32 %v1088_v10, %v923_v50  ;;  %v423_v10 = vpack.c.bf16 %v403_v5, %v402_v4 }
  0x3b   : > { %505 = vmatmul.bf16.gmra.mxu0 %v413_v2  ;;  %525 = vmatmul.bf16.gmra.mxu1 %v417_v3  ;;  %v394_v2 = vadd.f32 %v1098_v18, %v358_v58  ;;  %v395_v3 = vadd.f32 %v1098_v18, %v359_v59 }
  0x3c   : > { %545 = vmatmul.bf16.gmra.mxu2 %v421_v7  ;;  %565 = vmatmul.bf16.gmra.mxu3 %v425_v17  ;;  %v411_v7 = vadd.f32 %v1098_v18, %v375_v63 }
  0x3d   : > { %v419_v9 = vpack.c.bf16 %v395_v3, %v394_v2 }
  0x3e   : > { %v427_v11 = vpack.c.bf16 %v411_v7, %v410_v6 }
  0x4b   : > { %510 = vmatmul.bf16.gmra.mxu0 %v414_v40  ;;  %530 = vmatmul.bf16.gmra.mxu1 %v418_v41 }
  0x4c   : > { %550 = vmatmul.bf16.gmra.mxu2 %v422_v43  ;;  %570 = vmatmul.bf16.gmra.mxu3 %v426_v46 }
  0x5b   : > { %515 = vmatmul.bf16.gmra.mxu0 %v415_v8  ;;  %535 = vmatmul.bf16.gmra.mxu1 %v419_v9 }
  0x5c   : > { %555 = vmatmul.bf16.gmra.mxu2 %v423_v10  ;;  %575 = vmatmul.bf16.gmra.mxu3 %v427_v11 }
  0xa8   : > { %v501_v18 = vpop.f32.mrf.mxu0  ;;  %v1187_v12 = vpop.f32.mrf.mxu1 }
  0xa9   : > { %581 = vst [vmem:[%s1185_s30] sm:$0xff] %v501_v18  ;;  %v651_v35 = vmul.f32 %v501_v18, %v501_v18  ;;  %v659_v63 = vmul.f32 %v1187_v12, %v1187_v12 }
  0xaa   : > { %589 = vst [vmem:[%s1185_s30 + $0x40] sm:$0xff] %v1187_v12 }
  0xaf   : > { %v1192_v13 = vpop.f32.mrf.mxu2  ;;  %v1199_v16 = vpop.f32.mrf.mxu3 }
  0xb0   : > { %v503_v14 = vpop.f32.mrf.mxu0  ;;  %v1194_v15 = vpop.f32.mrf.mxu1  ;;  %597 = vst [vmem:[%s1185_s30 + $0x80] sm:$0xff] %v1192_v13 }
  0xb1   : > { %582 = vst [vmem:[%s1185_s30 + $0x8] sm:$0xff] %v503_v14  ;;  %v652_v34 = vmul.f32 %v503_v14, %v503_v14  ;;  %v613_v36 = vadd.f32 %v503_v14, %v501_v18  ;;  %v660_v2 = vmul.f32 %v1194_v15, %v1194_v15 }
  0xb2   : > { %590 = vst [vmem:[%s1185_s30 + $0x48] sm:$0xff] %v1194_v15 }
  0xb3   : > { %605 = vst [vmem:[%s1185_s30 + $0xc0] sm:$0xff] %v1199_v16  ;;  %v683_v38 = vadd.f32 %v652_v34, %v651_v35 }
  0xb7   : > { %v1205_v17 = vpop.f32.mrf.mxu2  ;;  %v1212_v21 = vpop.f32.mrf.mxu3 }
  0xb8   : > { %v506_v19 = vpop.f32.mrf.mxu0  ;;  %v1207_v20 = vpop.f32.mrf.mxu1  ;;  %598 = vst [vmem:[%s1185_s30 + $0x88] sm:$0xff] %v1205_v17 }
  0xb9   : > { %583 = vst [vmem:[%s1185_s30 + $0x10] sm:$0xff] %v506_v19  ;;  %v653_v37 = vmul.f32 %v506_v19, %v506_v19  ;;  %v614_v39 = vadd.f32 %v613_v36, %v506_v19  ;;  %v661_v5 = vmul.f32 %v1207_v20, %v1207_v20 }
  0xba   : > { %591 = vst [vmem:[%s1185_s30 + $0x50] sm:$0xff] %v1207_v20 }
  0xbb   : > { %606 = vst [vmem:[%s1185_s30 + $0xc8] sm:$0xff] %v1212_v21  ;;  %v684_v44 = vadd.f32 %v683_v38, %v653_v37  ;;  %v667_v37 = vmul.f32 %v1192_v13, %v1192_v13 }
  0xbf   : > { %v1218_v22 = vpop.f32.mrf.mxu2  ;;  %v1225_v25 = vpop.f32.mrf.mxu3 }
  0xc0   : > { %v508_v23 = vpop.f32.mrf.mxu0  ;;  %v1220_v24 = vpop.f32.mrf.mxu1  ;;  %599 = vst [vmem:[%s1185_s30 + $0x90] sm:$0xff] %v1218_v22 }
  0xc1   : > { %584 = vst [vmem:[%s1185_s30 + $0x18] sm:$0xff] %v508_v23  ;;  %v654_v40 = vmul.f32 %v508_v23, %v508_v23  ;;  %v615_v45 = vadd.f32 %v614_v39, %v508_v23  ;;  %v662_v9 = vmul.f32 %v1220_v24, %v1220_v24 }
  0xc2   : > { %592 = vst [vmem:[%s1185_s30 + $0x58] sm:$0xff] %v1220_v24 }
  0xc3   : > { %607 = vst [vmem:[%s1185_s30 + $0xd0] sm:$0xff] %v1225_v25  ;;  %v685_v48 = vadd.f32 %v684_v44, %v654_v40 }
  0xc7   : > { %v1231_v26 = vpop.f32.mrf.mxu2  ;;  %v1238_v29 = vpop.f32.mrf.mxu3 }
  0xc8   : > { %v511_v27 = vpop.f32.mrf.mxu0  ;;  %v1233_v28 = vpop.f32.mrf.mxu1  ;;  %600 = vst [vmem:[%s1185_s30 + $0x98] sm:$0xff] %v1231_v26 }
  0xc9   : > { %585 = vst [vmem:[%s1185_s30 + $0x20] sm:$0xff] %v511_v27  ;;  %v655_v46 = vmul.f32 %v511_v27, %v511_v27  ;;  %v616_v49 = vadd.f32 %v615_v45, %v511_v27  ;;  %v670_v45 = vmul.f32 %v1231_v26, %v1231_v26 }
  0xca   : > { %593 = vst [vmem:[%s1185_s30 + $0x60] sm:$0xff] %v1233_v28 }
  0xcb   : > { %608 = vst [vmem:[%s1185_s30 + $0xd8] sm:$0xff] %v1238_v29  ;;  %v686_v51 = vadd.f32 %v685_v48, %v655_v46 }
  0xcf   : > { %v1244_v30 = vpop.f32.mrf.mxu2  ;;  %v1251_v33 = vpop.f32.mrf.mxu3 }
  0xd0   : > { %v513_v31 = vpop.f32.mrf.mxu0  ;;  %v1246_v32 = vpop.f32.mrf.mxu1  ;;  %601 = vst [vmem:[%s1185_s30 + $0xa0] sm:$0xff] %v1244_v30 }
  0xd1   : > { %586 = vst [vmem:[%s1185_s30 + $0x28] sm:$0xff] %v513_v31  ;;  %v656_v50 = vmul.f32 %v513_v31, %v513_v31  ;;  %v617_v52 = vadd.f32 %v616_v49, %v513_v31  ;;  %v664_v19 = vmul.f32 %v1246_v32, %v1246_v32 }
  0xd2   : > { %594 = vst [vmem:[%s1185_s30 + $0x68] sm:$0xff] %v1246_v32 }
  0xd3   : > { %609 = vst [vmem:[%s1185_s30 + $0xe0] sm:$0xff] %v1251_v33  ;;  %v687_v54 = vadd.f32 %v686_v51, %v656_v50 }
  0xd7   : > { %v1257_v41 = vpop.f32.mrf.mxu2  ;;  %v1262_v47 = vpop.f32.mrf.mxu3 }
  0xd8   : > { %v516_v42 = vpop.f32.mrf.mxu0  ;;  %v536_v43 = vpop.f32.mrf.mxu1  ;;  %602 = vst [vmem:[%s1185_s30 + $0xa8] sm:$0xff] %v1257_v41  ;;  %v672_v51 = vmul.f32 %v1257_v41, %v1257_v41 }
  0xd9   : > { %587 = vst [vmem:[%s1185_s30 + $0x30] sm:$0xff] %v516_v42  ;;  %v657_v53 = vmul.f32 %v516_v42, %v516_v42  ;;  %v618_v55 = vadd.f32 %v617_v52, %v516_v42  ;;  %v665_v31 = vmul.f32 %v536_v43, %v536_v43 }
  0xda   : > { %595 = vst [vmem:[%s1185_s30 + $0x70] sm:$0xff] %v536_v43 }
  0xdb   : > { %610 = vst [vmem:[%s1185_s30 + $0xe8] sm:$0xff] %v1262_v47  ;;  %v688_v59 = vadd.f32 %v687_v54, %v657_v53 }
  0xdf   : > { %v556_v56 = vpop.f32.mrf.mxu2  ;;  %v1269_v62 = vpop.f32.mrf.mxu3 }
  0xe0   : > { %v518_v57 = vpop.f32.mrf.mxu0  ;;  %v538_v58 = vpop.f32.mrf.mxu1  ;;  %603 = vst [vmem:[%s1185_s30 + $0xb0] sm:$0xff] %v556_v56  ;;  %v673_v54 = vmul.f32 %v556_v56, %v556_v56 }
  0xe1   : > { %588 = vst [vmem:[%s1185_s30 + $0x38] sm:$0xff] %v518_v57  ;;  %v619_v60 = vadd.f32 %v618_v55, %v518_v57  ;;  %v658_v61 = vmul.f32 %v518_v57, %v518_v57 }
  0xe2   : > { %596 = vst [vmem:[%s1185_s30 + $0x78] sm:$0xff] %v538_v58 }
  0xe3   : > { %v620_v0 = vadd.f32 %v619_v60, %v1187_v12  ;;  %v689_v1 = vadd.f32 %v688_v59, %v658_v61  ;;  %611 = vst [vmem:[%s1185_s30 + $0xf0] sm:$0xff] %v1269_v62  ;;  %v663_v12 = vmul.f32 %v1233_v28, %v1233_v28 }
  0xe5   : > { %v621_v3 = vadd.f32 %v620_v0, %v1194_v15  ;;  %v690_v4 = vadd.f32 %v689_v1, %v659_v63  ;;  %v678_v1 = vmul.f32 %v1238_v29, %v1238_v29 }
  0xe7   : > { %v622_v6 = vadd.f32 %v621_v3, %v1207_v20  ;;  %v691_v7 = vadd.f32 %v690_v4, %v660_v2  ;;  %v558_v8 = vpop.f32.mrf.mxu2  ;;  %v578_v18 = vpop.f32.mrf.mxu3  ;;  %v679_v3 = vmul.f32 %v1251_v33, %v1251_v33 }
  0xe8   : > { %604 = vst [vmem:[%s1185_s30 + $0xb8] sm:$0xff] %v558_v8 }
  0xe9   : > { %v692_v10 = vadd.f32 %v691_v7, %v661_v5  ;;  %v623_v11 = vadd.f32 %v622_v6, %v1220_v24  ;;  %612 = vst [vmem:[%s1185_s30 + $0xf8] sm:$0xff] %v578_v18  ;;  %v666_v24 = vmul.f32 %v538_v58, %v538_v58  ;;  %v680_v6 = vmul.f32 %v1262_v47, %v1262_v47 }
  0xeb   : > { %v624_v14 = vadd.f32 %v623_v11, %v1233_v28  ;;  %v693_v15 = vadd.f32 %v692_v10, %v662_v9  ;;  %v668_v28 = vmul.f32 %v1205_v17, %v1205_v17  ;;  %v681_v9 = vmul.f32 %v1269_v62, %v1269_v62 }
  0xec   : > { %v682_v11 = vmul.f32 %v578_v18, %v578_v18 }
  0xed   : > { %v625_v20 = vadd.f32 %v624_v14, %v1246_v32  ;;  %v694_v23 = vadd.f32 %v693_v15, %v663_v12  ;;  %v669_v32 = vmul.f32 %v1218_v22, %v1218_v22 }
  0xef   : > { %v626_v27 = vadd.f32 %v625_v20, %v536_v43  ;;  %v695_v34 = vadd.f32 %v694_v23, %v664_v19 }
  0xf1   : > { %v696_v35 = vadd.f32 %v695_v34, %v665_v31  ;;  %v627_v36 = vadd.f32 %v626_v27, %v538_v58  ;;  %v674_v58 = vmul.f32 %v558_v8, %v558_v8 }
  0xf3   : > { %v628_v38 = vadd.f32 %v627_v36, %v1192_v13  ;;  %v697_v39 = vadd.f32 %v696_v35, %v666_v24  ;;  %v671_v13 = vmul.f32 %v1244_v30, %v1244_v30 }
  0xf5   : > { %v629_v40 = vadd.f32 %v628_v38, %v1205_v17  ;;  %v698_v42 = vadd.f32 %v697_v39, %v667_v37 }
  0xf7   : > { %v630_v43 = vadd.f32 %v629_v40, %v1218_v22  ;;  %v699_v44 = vadd.f32 %v698_v42, %v668_v28 }
  0xf9   : > { %v700_v46 = vadd.f32 %v699_v44, %v669_v32  ;;  %v631_v48 = vadd.f32 %v630_v43, %v1231_v26  ;;  %v675_v26 = vmul.f32 %v1199_v16, %v1199_v16 }
  0xfb   : > { %v632_v49 = vadd.f32 %v631_v48, %v1244_v30  ;;  %v701_v50 = vadd.f32 %v700_v46, %v670_v45  ;;  %v676_v30 = vmul.f32 %v1212_v21, %v1212_v21 }
  0xfd   : > { %v633_v17 = vadd.f32 %v632_v49, %v1257_v41  ;;  %v702_v52 = vadd.f32 %v701_v50, %v671_v13  ;;  %v677_v41 = vmul.f32 %v1225_v25, %v1225_v25 }
  0xff   : > { %v703_v22 = vadd.f32 %v702_v52, %v672_v51  ;;  %v634_v53 = vadd.f32 %v633_v17, %v556_v56 }
 0x101   : > { %v704_v55 = vadd.f32 %v703_v22, %v673_v54  ;;  %v635_v57 = vadd.f32 %v634_v53, %v558_v8 }
 0x103   : > { %v636_v59 = vadd.f32 %v635_v57, %v1199_v16  ;;  %v705_v60 = vadd.f32 %v704_v55, %v674_v58 }
 0x105   : > { %v637_v61 = vadd.f32 %v636_v59, %v1212_v21  ;;  %v706_v63 = vadd.f32 %v705_v60, %v675_v26 }
 0x107   : > { %v638_v56 = vadd.f32 %v637_v61, %v1225_v25  ;;  %v707_v0 = vadd.f32 %v706_v63, %v676_v30 }
 0x109   : > { %v708_v2 = vadd.f32 %v707_v0, %v677_v41  ;;  %v639_v16 = vadd.f32 %v638_v56, %v1238_v29 }
 0x10b   : > { %v640_v21 = vadd.f32 %v639_v16, %v1251_v33  ;;  %v709_v4 = vadd.f32 %v708_v2, %v678_v1 }
 0x10d   : > { %v641_v5 = vadd.f32 %v640_v21, %v1262_v47  ;;  %v710_v25 = vadd.f32 %v709_v4, %v679_v3 }
 0x10f   : > { %v711_v7 = vadd.f32 %v710_v25, %v680_v6  ;;  %v642_v8 = vadd.f32 %v641_v5, %v1269_v62 }
 0x111   : > { %v712_v29 = vadd.f32 %v711_v7, %v681_v9  ;;  %v643_v10 = vadd.f32 %v642_v8, %v578_v18 }
 0x113   : > { %v644_v12 = vrot.slane %v643_v10, 4  ;;  %v713_v14 = vadd.f32 %v712_v29, %v682_v11 }
 0x115   : > { %v645_v33 = vadd.f32 %v644_v12, %v643_v10  ;;  %v714_v15 = vrot.slane %v713_v14, 4 }
 0x117   : > { %v646_v19 = vrot.slane %v645_v33, 2  ;;  %v715_v20 = vadd.f32 %v714_v15, %v713_v14 }
 0x119   : > { %v647_v47 = vadd.f32 %v646_v19, %v645_v33  ;;  %v716_v23 = vrot.slane %v715_v20, 2 }
 0x11b   : > { %v648_v27 = vrot.slane %v647_v47, 1  ;;  %v717_v31 = vadd.f32 %v716_v23, %v715_v20 }
 0x11d   : > { %v649_v62 = vadd.f32 %v648_v27, %v647_v47  ;;  %v718_v34 = vrot.slane %v717_v31, 1 }
 0x11f   : > { %650 = vst [vmem:[%s271_s9] sm:$0xff] %v649_v62  ;;  %v719_v18 = vadd.f32 %v718_v34, %v717_v31 }
 0x121   : > { %720 = vst [vmem:[%s275_s12] sm:$0xff] %v719_v18 }
 0x122 PF: > { %s17_s21 = sadd.s32 1, %s1011_s21  }
 0x123   : > { %p14_p5 = scmp.ge.s32.totalorder %s17_s21, 4  }
 0x125   :  { %16 = sbr.rel (!%p14_p5) target bundleno = 1 (0x1), region = 90 }

// kernel: bottleneck_forward.7
= control target key start
LH: loop header
LB: loop body
LE: loop exit
PB: predicated region body
PF: predicated region fallthrough
CT: control target
= control target key end

     0   :  { %s969_s21 = smov 0   ;;  %s1284_s0 = inlined_call_operand.vmem [shape: f32[512,128], index: 0, kind: input, shape index: {}]   ;;  %s1285_s1 = inlined_call_operand.vmem [shape: bf16[128,128], index: 1, kind: input, shape index: {}]   ;;  %s1286_s2 = inlined_call_operand.vmem [shape: f32[1,128], index: 2, kind: input, shape index: {}]   ;;  %s1287_s3 = inlined_call_operand.vmem [shape: f32[1,128], index: 3, kind: input, shape index: {}]   ;;  %s1288_s4 = inlined_call_operand.vmem [shape: f32[512,128], index: 4, kind: output, shape index: {0}]   ;;  %s1289_s5 = inlined_call_operand.vmem [shape: f32[2,8,128], index: 5, kind: output, shape index: {1}]   ;;  %s1290_s6 = inlined_call_operand.vmem [shape: f32[2,8,128], index: 6, kind: output, shape index: {2}]  }
   0x1 LB: > { %s975_s22 = sadd.s32 4294967295, %s932_s21   ;;  %p843_p0 = scmp.ge.s32.totalorder %s932_s21, 1  ;;  %s932_s21 = sphi %s969_s21, %s17_s21  }
   0x2   : > { %p218_p1 = scmp.lt.s32.totalorder %s932_s21, 3 }
   0x4   : > { %p219_p2 = pnand %p843_p0, %p218_p1 }
   0x5   : > { %s844_s25 = sshll.u32 (!%p219_p2), %s975_s22, 5  ;;  %p268_p4 = scmp.lt.s32.totalorder (!%p219_p2), %s975_s22, 1 }
   0x6   : > { %222 = sbr.rel (%p219_p2) target bundleno = 290 (0x122), region = 36  ;;  %p257_p3 = scmp.lt.s32.totalorder (!%p219_p2), %s844_s25, 63 }
   0xb   : > { %v891_v0 = vld [vmem:[%s1285_s1 + $0x38] sm:$0xff]  ;;  %v890_v1 = vld [vmem:[%s1285_s1 + $0x30] sm:$0xff]  ;;  %s1292_s25 = smov (!%p257_p3, %s844_s25), 63  ;;  %v889_v2 = vld [vmem:[%s1285_s1 + $0x28] sm:$0xff]  ;;  %s1294_s22 = smov (!%p268_p4, %s975_s22), 1 }
   0xc   : > { %492 = vmatpush.bf16.msra.mxu0 %v891_v0  ;;  %892 = vmatpush.bf16.msra.mxu1 %v891_v0  ;;  %s845_s30 = sshll.u32 %s1292_s25, 3  ;;  %v888_v3 = vld [vmem:[%s1285_s1 + $0x20] sm:$0xff]  ;;  %v887_v4 = vld [vmem:[%s1285_s1 + $0x18] sm:$0xff]  ;;  %v886_v17 = vld [vmem:[%s1285_s1 + $0x10] sm:$0xff]  ;;  %s848_s25 = sshll.u32 %s1294_s22, 3 }
   0xd   : > { %893 = vmatpush.bf16.msra.mxu2 %v891_v0  ;;  %894 = vmatpush.bf16.msra.mxu3 %v891_v0  ;;  %s1000_s11 = scalar_lea.vmem %s1284_s0, %s845_s30  ;;  %v1009_v6 = vld [vmem:[%s1286_s2] ss:$0 sm:$0xff]  ;;  %v885_v24 = vld [vmem:[%s1285_s1 + $0x8] sm:$0xff]  ;;  %s1125_s29 = scalar_lea.vmem %s1288_s4, %s845_s30 }
   0xe   : > { %v276_v5 = vld [vmem:[%s1000_s11] sm:$0xff]  ;;  %v277_v7 = vld [vmem:[%s1000_s11 + $0x8] sm:$0xff]  ;;  %v278_v40 = vld [vmem:[%s1000_s11 + $0x10] sm:$0xff]  ;;  %s271_s8 = scalar_lea.vmem %s1289_s5, %s848_s25 }
   0xf   : > { %v284_v8 = vld [vmem:[%s1000_s11 + $0x40] sm:$0xff]  ;;  %v285_v9 = vld [vmem:[%s1000_s11 + $0x48] sm:$0xff]  ;;  %v312_v12 = vmul.f32 %v1009_v6, %v276_v5  ;;  %v313_v13 = vmul.f32 %v1009_v6, %v277_v7  ;;  %v279_v42 = vld [vmem:[%s1000_s11 + $0x18] sm:$0xff]  ;;  %v314_v50 = vmul.f32 %v1009_v6, %v278_v40 }
  0x10   : > { %493 = vmatpush.bf16.msra.mxu0 %v890_v1  ;;  %895 = vmatpush.bf16.msra.mxu1 %v890_v1  ;;  %v292_v10 = vld [vmem:[%s1000_s11 + $0x80] sm:$0xff]  ;;  %v293_v11 = vld [vmem:[%s1000_s11 + $0x88] sm:$0xff]  ;;  %v320_v15 = vmul.f32 %v1009_v6, %v284_v8  ;;  %v321_v16 = vmul.f32 %v1009_v6, %v285_v9  ;;  %v286_v44 = vld [vmem:[%s1000_s11 + $0x50] sm:$0xff]  ;;  %v315_v52 = vmul.f32 %v1009_v6, %v279_v42 }
  0x11   : > { %896 = vmatpush.bf16.msra.mxu2 %v890_v1  ;;  %897 = vmatpush.bf16.msra.mxu3 %v890_v1  ;;  %v1021_v14 = vld [vmem:[%s1287_s3] ss:$0 sm:$0xff]  ;;  %v328_v18 = vmul.f32 %v1009_v6, %v292_v10  ;;  %v329_v19 = vmul.f32 %v1009_v6, %v293_v11  ;;  %v301_v35 = vld [vmem:[%s1000_s11 + $0xc8] sm:$0xff]  ;;  %v287_v45 = vld [vmem:[%s1000_s11 + $0x58] sm:$0xff]  ;;  %v322_v53 = vmul.f32 %v1009_v6, %v286_v44 }
  0x12   : > { %v348_v20 = vadd.f32 %v1021_v14, %v312_v12  ;;  %v349_v21 = vadd.f32 %v1021_v14, %v313_v13  ;;  %v356_v22 = vadd.f32 %v1021_v14, %v320_v15  ;;  %v357_v23 = vadd.f32 %v1021_v14, %v321_v16  ;;  %v884_v31 = vld [vmem:[%s1285_s1] sm:$0xff]  ;;  %v294_v47 = vld [vmem:[%s1000_s11 + $0x90] sm:$0xff]  ;;  %v295_v48 = vld [vmem:[%s1000_s11 + $0x98] sm:$0xff] }
  0x13   : > { %v364_v25 = vadd.f32 %v1021_v14, %v328_v18  ;;  %v365_v26 = vadd.f32 %v1021_v14, %v329_v19  ;;  %v300_v34 = vld [vmem:[%s1000_s11 + $0xc0] sm:$0xff]  ;;  %v337_v37 = vmul.f32 %v1009_v6, %v301_v35  ;;  %v323_v54 = vmul.f32 %v1009_v6, %v287_v45  ;;  %v302_v7 = vld [vmem:[%s1000_s11 + $0xd0] sm:$0xff]  ;;  %v303_v8 = vld [vmem:[%s1000_s11 + $0xd8] sm:$0xff] }
  0x14   : > { %494 = vmatpush.bf16.msra.mxu0 %v889_v2  ;;  %898 = vmatpush.bf16.msra.mxu1 %v889_v2  ;;  %v380_v27 = vmax.f32 %v348_v20, 0.0  ;;  %v381_v28 = vmax.f32 %v349_v21, 0.0  ;;  %v388_v29 = vmax.f32 %v356_v22, 0.0  ;;  %v389_v30 = vmax.f32 %v357_v23, 0.0  ;;  %v280_v13 = vld [vmem:[%s1000_s11 + $0x20] sm:$0xff]  ;;  %v281_v16 = vld [vmem:[%s1000_s11 + $0x28] sm:$0xff] }
  0x15   : > { %899 = vmatpush.bf16.msra.mxu2 %v889_v2  ;;  %900 = vmatpush.bf16.msra.mxu3 %v889_v2  ;;  %v396_v32 = vmax.f32 %v364_v25, 0.0  ;;  %v397_v33 = vmax.f32 %v365_v26, 0.0  ;;  %v336_v36 = vmul.f32 %v1009_v6, %v300_v34  ;;  %v373_v46 = vadd.f32 %v1021_v14, %v337_v37  ;;  %v288_v18 = vld [vmem:[%s1000_s11 + $0x60] sm:$0xff]  ;;  %v289_v19 = vld [vmem:[%s1000_s11 + $0x68] sm:$0xff] }
  0x16   : > { %v412_v38 = vpack.c.bf16 %v381_v28, %v380_v27  ;;  %v416_v39 = vpack.c.bf16 %v389_v30, %v388_v29  ;;  %v330_v55 = vmul.f32 %v1009_v6, %v294_v47  ;;  %v331_v56 = vmul.f32 %v1009_v6, %v295_v48  ;;  %v296_v21 = vld [vmem:[%s1000_s11 + $0xa0] sm:$0xff]  ;;  %v297_v22 = vld [vmem:[%s1000_s11 + $0xa8] sm:$0xff] }
  0x17   : > { %v372_v41 = vadd.f32 %v1021_v14, %v336_v36  ;;  %v420_v43 = vpack.c.bf16 %v397_v33, %v396_v32  ;;  %v405_v51 = vmax.f32 %v373_v46, 0.0  ;;  %v350_v58 = vadd.f32 %v1021_v14, %v314_v50  ;;  %v304_v32 = vld [vmem:[%s1000_s11 + $0xe0] sm:$0xff]  ;;  %v305_v33 = vld [vmem:[%s1000_s11 + $0xe8] sm:$0xff] }
  0x18   : > { %495 = vmatpush.bf16.msra.mxu0 %v888_v3  ;;  %901 = vmatpush.bf16.msra.mxu1 %v888_v3  ;;  %v351_v59 = vadd.f32 %v1021_v14, %v315_v52  ;;  %v358_v60 = vadd.f32 %v1021_v14, %v322_v53  ;;  %v359_v61 = vadd.f32 %v1021_v14, %v323_v54  ;;  %v282_v54 = vld [vmem:[%s1000_s11 + $0x30] sm:$0xff] }
  0x19   : > { %902 = vmatpush.bf16.msra.mxu2 %v888_v3  ;;  %903 = vmatpush.bf16.msra.mxu3 %v888_v3  ;;  %v404_v49 = vmax.f32 %v372_v41, 0.0  ;;  %v366_v62 = vadd.f32 %v1021_v14, %v330_v55  ;;  %v367_v63 = vadd.f32 %v1021_v14, %v331_v56  ;;  %v382_v0 = vmax.f32 %v350_v58, 0.0  ;;  %v283_v55 = vld [vmem:[%s1000_s11 + $0x38] sm:$0xff] }
  0x1a   : > { %v383_v1 = vmax.f32 %v351_v59, 0.0  ;;  %v390_v2 = vmax.f32 %v358_v60, 0.0  ;;  %v391_v3 = vmax.f32 %v359_v61, 0.0  ;;  %v338_v9 = vmul.f32 %v1009_v6, %v302_v7  ;;  %v291_v58 = vld [vmem:[%s1000_s11 + $0x78] sm:$0xff]  ;;  %v298_v59 = vld [vmem:[%s1000_s11 + $0xb0] sm:$0xff] }
  0x1b   : > { %v424_v57 = vpack.c.bf16 %v405_v51, %v404_v49  ;;  %v399_v5 = vmax.f32 %v367_v63, 0.0  ;;  %v339_v10 = vmul.f32 %v1009_v6, %v303_v8  ;;  %v317_v26 = vmul.f32 %v1009_v6, %v281_v16  ;;  %v299_v60 = vld [vmem:[%s1000_s11 + $0xb8] sm:$0xff] }
  0x1c   : > { %496 = vmatpush.bf16.msra.mxu0 %v887_v4  ;;  %904 = vmatpush.bf16.msra.mxu1 %v887_v4  ;;  %v413_v11 = vpack.c.bf16 %v383_v1, %v382_v0  ;;  %v417_v12 = vpack.c.bf16 %v391_v3, %v390_v2  ;;  %v374_v15 = vadd.f32 %v1021_v14, %v338_v9  ;;  %v306_v2 = vld [vmem:[%s1000_s11 + $0xf0] sm:$0xff]  ;;  %v307_v3 = vld [vmem:[%s1000_s11 + $0xf8] sm:$0xff] }
  0x1d   : > { %905 = vmatpush.bf16.msra.mxu2 %v887_v4  ;;  %906 = vmatpush.bf16.msra.mxu3 %v887_v4  ;;  %v398_v4 = vmax.f32 %v366_v62, 0.0  ;;  %v375_v20 = vadd.f32 %v1021_v14, %v339_v10  ;;  %v324_v27 = vmul.f32 %v1009_v6, %v288_v18  ;;  %v325_v28 = vmul.f32 %v1009_v6, %v289_v19 }
  0x1e   : > { %v406_v23 = vmax.f32 %v374_v15, 0.0  ;;  %v332_v29 = vmul.f32 %v1009_v6, %v296_v21  ;;  %v333_v30 = vmul.f32 %v1009_v6, %v297_v22  ;;  %v340_v34 = vmul.f32 %v1009_v6, %v304_v32 }
  0x1f   : > { %v407_v25 = vmax.f32 %v375_v20, 0.0  ;;  %v341_v35 = vmul.f32 %v1009_v6, %v305_v33  ;;  %v353_v37 = vadd.f32 %v1021_v14, %v317_v26  ;;  %v318_v61 = vmul.f32 %v1009_v6, %v282_v54 }
  0x20   : > { %497 = vmatpush.bf16.msra.mxu0 %v886_v17  ;;  %907 = vmatpush.bf16.msra.mxu1 %v886_v17  ;;  %v368_v40 = vadd.f32 %v1021_v14, %v332_v29  ;;  %v369_v41 = vadd.f32 %v1021_v14, %v333_v30  ;;  %v376_v42 = vadd.f32 %v1021_v14, %v340_v34 }
  0x21   : > { %908 = vmatpush.bf16.msra.mxu2 %v886_v17  ;;  %909 = vmatpush.bf16.msra.mxu3 %v886_v17  ;;  %v421_v17 = vpack.c.bf16 %v399_v5, %v398_v4  ;;  %v385_v45 = vmax.f32 %v353_v37, 0.0  ;;  %v319_v63 = vmul.f32 %v1009_v6, %v283_v55  ;;  %v327_v1 = vmul.f32 %v1009_v6, %v291_v58 }
  0x22   : > { %v400_v48 = vmax.f32 %v368_v40, 0.0  ;;  %v401_v49 = vmax.f32 %v369_v41, 0.0  ;;  %v408_v50 = vmax.f32 %v376_v42, 0.0  ;;  %v334_v4 = vmul.f32 %v1009_v6, %v298_v59 }
  0x23   : > { %v335_v5 = vmul.f32 %v1009_v6, %v299_v60  ;;  %v342_v7 = vmul.f32 %v1009_v6, %v306_v2  ;;  %v343_v8 = vmul.f32 %v1009_v6, %v307_v3  ;;  %v354_v9 = vadd.f32 %v1021_v14, %v318_v61 }
  0x24   : > { %498 = vmatpush.bf16.msra.mxu0 %v885_v24  ;;  %910 = vmatpush.bf16.msra.mxu1 %v885_v24  ;;  %v422_v56 = vpack.c.bf16 %v401_v49, %v400_v48  ;;  %v355_v10 = vadd.f32 %v1021_v14, %v319_v63 }
  0x25   : > { %911 = vmatpush.bf16.msra.mxu2 %v885_v24  ;;  %912 = vmatpush.bf16.msra.mxu3 %v885_v24  ;;  %v316_v24 = vmul.f32 %v1009_v6, %v280_v13  ;;  %v370_v13 = vadd.f32 %v1021_v14, %v334_v4  ;;  %v371_v15 = vadd.f32 %v1021_v14, %v335_v5  ;;  %v386_v18 = vmax.f32 %v354_v9, 0.0 }
  0x26   : > { %v378_v16 = vadd.f32 %v1021_v14, %v342_v7  ;;  %v387_v19 = vmax.f32 %v355_v10, 0.0 }
  0x27   : > { %v352_v36 = vadd.f32 %v1021_v14, %v316_v24  ;;  %v402_v21 = vmax.f32 %v370_v13, 0.0  ;;  %v403_v22 = vmax.f32 %v371_v15, 0.0 }
  0x28   : > { %499 = vmatpush.bf16.msra.mxu0 %v884_v31  ;;  %913 = vmatpush.bf16.msra.mxu1 %v884_v31 }
  0x29   : > { %914 = vmatpush.bf16.msra.mxu2 %v884_v31  ;;  %915 = vmatpush.bf16.msra.mxu3 %v884_v31  ;;  %v425_v31 = vpack.c.bf16 %v407_v25, %v406_v23  ;;  %v384_v44 = vmax.f32 %v352_v36, 0.0  ;;  %v410_v23 = vmax.f32 %v378_v16, 0.0  ;;  %v415_v25 = vpack.c.bf16 %v387_v19, %v386_v18 }
  0x2b   : > { %500 = vmatmul.bf16.vlgmr.msra.gmra.mxu0 %v412_v38  ;;  %520 = vmatmul.bf16.vlgmr.msra.gmra.mxu1 %v416_v39  ;;  %v360_v38 = vadd.f32 %v1021_v14, %v324_v27  ;;  %v361_v39 = vadd.f32 %v1021_v14, %v325_v28  ;;  %v414_v52 = vpack.c.bf16 %v385_v45, %v384_v44 }
  0x2c   : > { %540 = vmatmul.bf16.vlgmr.msra.gmra.mxu2 %v420_v43  ;;  %560 = vmatmul.bf16.vlgmr.msra.gmra.mxu3 %v424_v57  ;;  %v377_v43 = vadd.f32 %v1021_v14, %v341_v35  ;;  %v290_v57 = vld [vmem:[%s1000_s11 + $0x70] sm:$0xff]  ;;  %v423_v27 = vpack.c.bf16 %v403_v22, %v402_v21  ;;  %s275_s11 = scalar_lea.vmem %s1290_s6, %s848_s25 }
  0x2d   : > { %v392_v46 = vmax.f32 %v360_v38, 0.0  ;;  %v393_v47 = vmax.f32 %v361_v39, 0.0  ;;  %v326_v0 = vmul.f32 %v1009_v6, %v290_v57 }
  0x2e   : > { %v409_v51 = vmax.f32 %v377_v43, 0.0 }
  0x2f   : > { %v418_v53 = vpack.c.bf16 %v393_v47, %v392_v46 }
  0x30   : > { %v426_v62 = vpack.c.bf16 %v409_v51, %v408_v50 }
  0x3b   : > { %505 = vmatmul.bf16.gmra.mxu0 %v413_v11  ;;  %525 = vmatmul.bf16.gmra.mxu1 %v417_v12  ;;  %v362_v11 = vadd.f32 %v1021_v14, %v326_v0  ;;  %v363_v12 = vadd.f32 %v1021_v14, %v327_v1 }
  0x3c   : > { %545 = vmatmul.bf16.gmra.mxu2 %v421_v17  ;;  %565 = vmatmul.bf16.gmra.mxu3 %v425_v31  ;;  %v379_v17 = vadd.f32 %v1021_v14, %v343_v8 }
  0x3d   : > { %v394_v6 = vmax.f32 %v362_v11, 0.0  ;;  %v395_v20 = vmax.f32 %v363_v12, 0.0 }
  0x3e   : > { %v411_v24 = vmax.f32 %v379_v17, 0.0 }
  0x3f   : > { %v419_v26 = vpack.c.bf16 %v395_v20, %v394_v6 }
  0x40   : > { %v427_v28 = vpack.c.bf16 %v411_v24, %v410_v23 }
  0x4b   : > { %510 = vmatmul.bf16.gmra.mxu0 %v414_v52  ;;  %530 = vmatmul.bf16.gmra.mxu1 %v418_v53 }
  0x4c   : > { %550 = vmatmul.bf16.gmra.mxu2 %v422_v56  ;;  %570 = vmatmul.bf16.gmra.mxu3 %v426_v62 }
  0x5b   : > { %515 = vmatmul.bf16.gmra.mxu0 %v415_v25  ;;  %535 = vmatmul.bf16.gmra.mxu1 %v419_v26 }
  0x5c   : > { %555 = vmatmul.bf16.gmra.mxu2 %v423_v27  ;;  %575 = vmatmul.bf16.gmra.mxu3 %v427_v28 }
  0xa8   : > { %v501_v14 = vpop.f32.mrf.mxu0  ;;  %v1127_v29 = vpop.f32.mrf.mxu1 }
  0xa9   : > { %581 = vst [vmem:[%s1125_s29] sm:$0xff] %v501_v14  ;;  %v651_v51 = vmul.f32 %v501_v14, %v501_v14  ;;  %v659_v17 = vmul.f32 %v1127_v29, %v1127_v29 }
  0xaa   : > { %589 = vst [vmem:[%s1125_s29 + $0x40] sm:$0xff] %v1127_v29 }
  0xaf   : > { %v1132_v30 = vpop.f32.mrf.mxu2  ;;  %v1139_v33 = vpop.f32.mrf.mxu3 }
  0xb0   : > { %v503_v31 = vpop.f32.mrf.mxu0  ;;  %v1134_v32 = vpop.f32.mrf.mxu1  ;;  %597 = vst [vmem:[%s1125_s29 + $0x80] sm:$0xff] %v1132_v30 }
  0xb1   : > { %582 = vst [vmem:[%s1125_s29 + $0x8] sm:$0xff] %v503_v31  ;;  %v652_v50 = vmul.f32 %v503_v31, %v503_v31  ;;  %v613_v52 = vadd.f32 %v503_v31, %v501_v14  ;;  %v660_v6 = vmul.f32 %v1134_v32, %v1134_v32 }
  0xb2   : > { %590 = vst [vmem:[%s1125_s29 + $0x48] sm:$0xff] %v1134_v32 }
  0xb3   : > { %605 = vst [vmem:[%s1125_s29 + $0xc0] sm:$0xff] %v1139_v33  ;;  %v683_v54 = vadd.f32 %v652_v50, %v651_v51 }
  0xb7   : > { %v1145_v34 = vpop.f32.mrf.mxu2  ;;  %v1152_v37 = vpop.f32.mrf.mxu3 }
  0xb8   : > { %v506_v35 = vpop.f32.mrf.mxu0  ;;  %v1147_v36 = vpop.f32.mrf.mxu1  ;;  %598 = vst [vmem:[%s1125_s29 + $0x88] sm:$0xff] %v1145_v34 }
  0xb9   : > { %583 = vst [vmem:[%s1125_s29 + $0x10] sm:$0xff] %v506_v35  ;;  %v653_v53 = vmul.f32 %v506_v35, %v506_v35  ;;  %v614_v55 = vadd.f32 %v613_v52, %v506_v35  ;;  %v661_v22 = vmul.f32 %v1147_v36, %v1147_v36 }
  0xba   : > { %591 = vst [vmem:[%s1125_s29 + $0x50] sm:$0xff] %v1147_v36 }
  0xbb   : > { %606 = vst [vmem:[%s1125_s29 + $0xc8] sm:$0xff] %v1152_v37  ;;  %v684_v60 = vadd.f32 %v683_v54, %v653_v53  ;;  %v667_v53 = vmul.f32 %v1132_v30, %v1132_v30 }
  0xbf   : > { %v1158_v38 = vpop.f32.mrf.mxu2  ;;  %v1165_v41 = vpop.f32.mrf.mxu3 }
  0xc0   : > { %v508_v39 = vpop.f32.mrf.mxu0  ;;  %v1160_v40 = vpop.f32.mrf.mxu1  ;;  %599 = vst [vmem:[%s1125_s29 + $0x90] sm:$0xff] %v1158_v38 }
  0xc1   : > { %584 = vst [vmem:[%s1125_s29 + $0x18] sm:$0xff] %v508_v39  ;;  %v654_v56 = vmul.f32 %v508_v39, %v508_v39  ;;  %v615_v61 = vadd.f32 %v614_v55, %v508_v39  ;;  %v662_v26 = vmul.f32 %v1160_v40, %v1160_v40 }
  0xc2   : > { %592 = vst [vmem:[%s1125_s29 + $0x58] sm:$0xff] %v1160_v40 }
  0xc3   : > { %607 = vst [vmem:[%s1125_s29 + $0xd0] sm:$0xff] %v1165_v41  ;;  %v685_v0 = vadd.f32 %v684_v60, %v654_v56 }
  0xc7   : > { %v1171_v42 = vpop.f32.mrf.mxu2  ;;  %v1178_v45 = vpop.f32.mrf.mxu3 }
  0xc8   : > { %v511_v43 = vpop.f32.mrf.mxu0  ;;  %v1173_v44 = vpop.f32.mrf.mxu1  ;;  %600 = vst [vmem:[%s1125_s29 + $0x98] sm:$0xff] %v1171_v42 }
  0xc9   : > { %585 = vst [vmem:[%s1125_s29 + $0x20] sm:$0xff] %v511_v43  ;;  %v655_v62 = vmul.f32 %v511_v43, %v511_v43  ;;  %v616_v1 = vadd.f32 %v615_v61, %v511_v43  ;;  %v670_v61 = vmul.f32 %v1171_v42, %v1171_v42 }
  0xca   : > { %593 = vst [vmem:[%s1125_s29 + $0x60] sm:$0xff] %v1173_v44 }
  0xcb   : > { %608 = vst [vmem:[%s1125_s29 + $0xd8] sm:$0xff] %v1178_v45  ;;  %v686_v3 = vadd.f32 %v685_v0, %v655_v62 }
  0xcf   : > { %v1184_v46 = vpop.f32.mrf.mxu2  ;;  %v1191_v49 = vpop.f32.mrf.mxu3 }
  0xd0   : > { %v513_v47 = vpop.f32.mrf.mxu0  ;;  %v1186_v48 = vpop.f32.mrf.mxu1  ;;  %601 = vst [vmem:[%s1125_s29 + $0xa0] sm:$0xff] %v1184_v46 }
  0xd1   : > { %586 = vst [vmem:[%s1125_s29 + $0x28] sm:$0xff] %v513_v47  ;;  %v656_v2 = vmul.f32 %v513_v47, %v513_v47  ;;  %v617_v4 = vadd.f32 %v616_v1, %v513_v47  ;;  %v664_v35 = vmul.f32 %v1186_v48, %v1186_v48 }
  0xd2   : > { %594 = vst [vmem:[%s1125_s29 + $0x68] sm:$0xff] %v1186_v48 }
  0xd3   : > { %609 = vst [vmem:[%s1125_s29 + $0xe0] sm:$0xff] %v1191_v49  ;;  %v687_v7 = vadd.f32 %v686_v3, %v656_v2 }
  0xd7   : > { %v1197_v57 = vpop.f32.mrf.mxu2  ;;  %v1202_v63 = vpop.f32.mrf.mxu3 }
  0xd8   : > { %v516_v58 = vpop.f32.mrf.mxu0  ;;  %v536_v59 = vpop.f32.mrf.mxu1  ;;  %602 = vst [vmem:[%s1125_s29 + $0xa8] sm:$0xff] %v1197_v57  ;;  %v672_v3 = vmul.f32 %v1197_v57, %v1197_v57 }
  0xd9   : > { %587 = vst [vmem:[%s1125_s29 + $0x30] sm:$0xff] %v516_v58  ;;  %v657_v5 = vmul.f32 %v516_v58, %v516_v58  ;;  %v618_v8 = vadd.f32 %v617_v4, %v516_v58  ;;  %v665_v47 = vmul.f32 %v536_v59, %v536_v59 }
  0xda   : > { %595 = vst [vmem:[%s1125_s29 + $0x70] sm:$0xff] %v536_v59 }
  0xdb   : > { %610 = vst [vmem:[%s1125_s29 + $0xe8] sm:$0xff] %v1202_v63  ;;  %v688_v12 = vadd.f32 %v687_v7, %v657_v5 }
  0xdf   : > { %v556_v9 = vpop.f32.mrf.mxu2  ;;  %v1209_v16 = vpop.f32.mrf.mxu3 }
  0xe0   : > { %v518_v10 = vpop.f32.mrf.mxu0  ;;  %v538_v11 = vpop.f32.mrf.mxu1  ;;  %603 = vst [vmem:[%s1125_s29 + $0xb0] sm:$0xff] %v556_v9  ;;  %v673_v7 = vmul.f32 %v556_v9, %v556_v9 }
  0xe1   : > { %588 = vst [vmem:[%s1125_s29 + $0x38] sm:$0xff] %v518_v10  ;;  %v619_v13 = vadd.f32 %v618_v8, %v518_v10  ;;  %v658_v15 = vmul.f32 %v518_v10, %v518_v10 }
  0xe2   : > { %596 = vst [vmem:[%s1125_s29 + $0x78] sm:$0xff] %v538_v11 }
  0xe3   : > { %v620_v18 = vadd.f32 %v619_v13, %v1127_v29  ;;  %v689_v19 = vadd.f32 %v688_v12, %v658_v15  ;;  %611 = vst [vmem:[%s1125_s29 + $0xf0] sm:$0xff] %v1209_v16  ;;  %v663_v29 = vmul.f32 %v1173_v44, %v1173_v44 }
  0xe5   : > { %v621_v20 = vadd.f32 %v620_v18, %v1134_v32  ;;  %v690_v21 = vadd.f32 %v689_v19, %v659_v17  ;;  %v678_v19 = vmul.f32 %v1178_v45, %v1178_v45 }
  0xe7   : > { %v622_v23 = vadd.f32 %v621_v20, %v1147_v36  ;;  %v691_v24 = vadd.f32 %v690_v21, %v660_v6  ;;  %v558_v25 = vpop.f32.mrf.mxu2  ;;  %v578_v14 = vpop.f32.mrf.mxu3  ;;  %v679_v20 = vmul.f32 %v1191_v49, %v1191_v49 }
  0xe8   : > { %604 = vst [vmem:[%s1125_s29 + $0xb8] sm:$0xff] %v558_v25 }
  0xe9   : > { %v692_v27 = vadd.f32 %v691_v24, %v661_v22  ;;  %v623_v28 = vadd.f32 %v622_v23, %v1160_v40  ;;  %612 = vst [vmem:[%s1125_s29 + $0xf8] sm:$0xff] %v578_v14  ;;  %v666_v40 = vmul.f32 %v538_v11, %v538_v11  ;;  %v680_v23 = vmul.f32 %v1202_v63, %v1202_v63 }
  0xeb   : > { %v624_v31 = vadd.f32 %v623_v28, %v1173_v44  ;;  %v693_v32 = vadd.f32 %v692_v27, %v662_v26  ;;  %v668_v44 = vmul.f32 %v1145_v34, %v1145_v34  ;;  %v681_v26 = vmul.f32 %v1209_v16, %v1209_v16 }
  0xec   : > { %v682_v28 = vmul.f32 %v578_v14, %v578_v14 }
  0xed   : > { %v625_v36 = vadd.f32 %v624_v31, %v1186_v48  ;;  %v694_v39 = vadd.f32 %v693_v32, %v663_v29  ;;  %v669_v48 = vmul.f32 %v1158_v38, %v1158_v38 }
  0xef   : > { %v626_v43 = vadd.f32 %v625_v36, %v536_v59  ;;  %v695_v50 = vadd.f32 %v694_v39, %v664_v35 }
  0xf1   : > { %v696_v51 = vadd.f32 %v695_v50, %v665_v47  ;;  %v627_v52 = vadd.f32 %v626_v43, %v538_v11  ;;  %v674_v11 = vmul.f32 %v558_v25, %v558_v25 }
  0xf3   : > { %v628_v54 = vadd.f32 %v627_v52, %v1132_v30  ;;  %v697_v55 = vadd.f32 %v696_v51, %v666_v40  ;;  %v671_v30 = vmul.f32 %v1184_v46, %v1184_v46 }
  0xf5   : > { %v629_v56 = vadd.f32 %v628_v54, %v1145_v34  ;;  %v698_v58 = vadd.f32 %v697_v55, %v667_v53 }
  0xf7   : > { %v630_v59 = vadd.f32 %v629_v56, %v1158_v38  ;;  %v699_v60 = vadd.f32 %v698_v58, %v668_v44 }
  0xf9   : > { %v700_v62 = vadd.f32 %v699_v60, %v669_v48  ;;  %v631_v0 = vadd.f32 %v630_v59, %v1171_v42  ;;  %v675_v42 = vmul.f32 %v1139_v33, %v1139_v33 }
  0xfb   : > { %v632_v1 = vadd.f32 %v631_v0, %v1184_v46  ;;  %v701_v2 = vadd.f32 %v700_v62, %v670_v61  ;;  %v676_v46 = vmul.f32 %v1152_v37, %v1152_v37 }
  0xfd   : > { %v633_v34 = vadd.f32 %v632_v1, %v1197_v57  ;;  %v702_v4 = vadd.f32 %v701_v2, %v671_v30  ;;  %v677_v57 = vmul.f32 %v1165_v41, %v1165_v41 }
  0xff   : > { %v703_v38 = vadd.f32 %v702_v4, %v672_v3  ;;  %v634_v5 = vadd.f32 %v633_v34, %v556_v9 }
 0x101   : > { %v704_v8 = vadd.f32 %v703_v38, %v673_v7  ;;  %v635_v10 = vadd.f32 %v634_v5, %v558_v25 }
 0x103   : > { %v636_v12 = vadd.f32 %v635_v10, %v1139_v33  ;;  %v705_v13 = vadd.f32 %v704_v8, %v674_v11 }
 0x105   : > { %v637_v15 = vadd.f32 %v636_v12, %v1152_v37  ;;  %v706_v17 = vadd.f32 %v705_v13, %v675_v42 }
 0x107   : > { %v638_v9 = vadd.f32 %v637_v15, %v1165_v41  ;;  %v707_v18 = vadd.f32 %v706_v17, %v676_v46 }
 0x109   : > { %v708_v6 = vadd.f32 %v707_v18, %v677_v57  ;;  %v639_v33 = vadd.f32 %v638_v9, %v1178_v45 }
 0x10b   : > { %v640_v37 = vadd.f32 %v639_v33, %v1191_v49  ;;  %v709_v21 = vadd.f32 %v708_v6, %v678_v19 }
 0x10d   : > { %v641_v22 = vadd.f32 %v640_v37, %v1202_v63  ;;  %v710_v41 = vadd.f32 %v709_v21, %v679_v20 }
 0x10f   : > { %v711_v24 = vadd.f32 %v710_v41, %v680_v23  ;;  %v642_v25 = vadd.f32 %v641_v22, %v1209_v16 }
 0x111   : > { %v712_v45 = vadd.f32 %v711_v24, %v681_v26  ;;  %v643_v27 = vadd.f32 %v642_v25, %v578_v14 }
 0x113   : > { %v644_v29 = vrot.slane %v643_v27, 4  ;;  %v713_v31 = vadd.f32 %v712_v45, %v682_v28 }
 0x115   : > { %v645_v49 = vadd.f32 %v644_v29, %v643_v27  ;;  %v714_v32 = vrot.slane %v713_v31, 4 }
 0x117   : > { %v646_v35 = vrot.slane %v645_v49, 2  ;;  %v715_v36 = vadd.f32 %v714_v32, %v713_v31 }
 0x119   : > { %v647_v63 = vadd.f32 %v646_v35, %v645_v49  ;;  %v716_v39 = vrot.slane %v715_v36, 2 }
 0x11b   : > { %v648_v43 = vrot.slane %v647_v63, 1  ;;  %v717_v47 = vadd.f32 %v716_v39, %v715_v36 }
 0x11d   : > { %v649_v16 = vadd.f32 %v648_v43, %v647_v63  ;;  %v718_v50 = vrot.slane %v717_v47, 1 }
 0x11f   : > { %650 = vst [vmem:[%s271_s8] sm:$0xff] %v649_v16  ;;  %v719_v14 = vadd.f32 %v718_v50, %v717_v47 }
 0x121   : > { %720 = vst [vmem:[%s275_s11] sm:$0xff] %v719_v14 }
 0x122 PF: > { %s17_s21 = sadd.s32 1, %s932_s21  }
 0x123   : > { %p14_p5 = scmp.ge.s32.totalorder %s17_s21, 4  }
 0x125   :  { %16 = sbr.rel (!%p14_p5) target bundleno = 1 (0x1), region = 90 }

// kernel: bottleneck_forward.9
= control target key start
LH: loop header
LB: loop body
LE: loop exit
PB: predicated region body
PF: predicated region fallthrough
CT: control target
= control target key end

     0   :  { %s1497_s0 = inlined_call_operand.vmem [shape: f32[512,128], index: 0, kind: input, shape index: {}]   ;;  %s1498_s1 = inlined_call_operand.vmem [shape: f32[512,128], index: 1, kind: input, shape index: {}]   ;;  %s1499_s2 = inlined_call_operand.vmem [shape: f32[1,128], index: 2, kind: input, shape index: {}]   ;;  %s1500_s3 = inlined_call_operand.vmem [shape: f32[1,128], index: 3, kind: input, shape index: {}]   ;;  %s1501_s4 = inlined_call_operand.vmem [shape: f32[1,128], index: 4, kind: input, shape index: {}]   ;;  %s1502_s5 = inlined_call_operand.vmem [shape: f32[1,128], index: 5, kind: input, shape index: {}]   ;;  %s1503_s6 = inlined_call_operand.vmem [shape: f32[512,128], index: 6, kind: output, shape index: {}]  }
   0x1   :  { %v23_v0 = vld [vmem:[%s1497_s0] sm:$0xff]  ;;  %v24_v7 = vld [vmem:[%s1497_s0 + $0x8] sm:$0xff]  ;;  %v25_v13 = vld [vmem:[%s1497_s0 + $0x10] sm:$0xff] }
   0x2   :  { %v668_v1 = vld [vmem:[%s1499_s2] ss:$0 sm:$0xff]  ;;  %v224_v8 = vld [vmem:[%s1498_s1 + $0x8] sm:$0xff]  ;;  %v225_v14 = vld [vmem:[%s1498_s1 + $0x10] sm:$0xff] }
   0x3   :  { %v673_v2 = vld [vmem:[%s1500_s3] ss:$0 sm:$0xff]  ;;  %v91_v4 = vmul.f32 %v668_v1, %v23_v0  ;;  %v92_v11 = vmul.f32 %v668_v1, %v24_v7  ;;  %v26_v15 = vld [vmem:[%s1497_s0 + $0x18] sm:$0xff]  ;;  %v93_v16 = vmul.f32 %v668_v1, %v25_v13  ;;  %v28_v26 = vld [vmem:[%s1497_s0 + $0x28] sm:$0xff] }
   0x4   :  { %v223_v3 = vld [vmem:[%s1498_s1] sm:$0xff]  ;;  %v94_v18 = vmul.f32 %v668_v1, %v26_v15  ;;  %v226_v19 = vld [vmem:[%s1498_s1 + $0x18] sm:$0xff]  ;;  %v228_v27 = vld [vmem:[%s1498_s1 + $0x28] sm:$0xff]  ;;  %v96_v32 = vmul.f32 %v668_v1, %v28_v26 }
   0x5   :  { %v682_v5 = vld [vmem:[%s1501_s4] ss:$0 sm:$0xff]  ;;  %v159_v9 = vadd.f32 %v673_v2, %v91_v4  ;;  %v160_v23 = vadd.f32 %v673_v2, %v92_v11  ;;  %v29_v28 = vld [vmem:[%s1497_s0 + $0x30] sm:$0xff]  ;;  %v161_v29 = vadd.f32 %v673_v2, %v93_v16  ;;  %v30_v42 = vld [vmem:[%s1497_s0 + $0x38] sm:$0xff] }
   0x6   :  { %v687_v6 = vld [vmem:[%s1502_s5] ss:$0 sm:$0xff]  ;;  %v291_v10 = vmul.f32 %v682_v5, %v223_v3  ;;  %v292_v12 = vmul.f32 %v682_v5, %v224_v8  ;;  %v293_v17 = vmul.f32 %v682_v5, %v225_v14  ;;  %v294_v24 = vmul.f32 %v682_v5, %v226_v19  ;;  %v229_v33 = vld [vmem:[%s1498_s1 + $0x30] sm:$0xff]  ;;  %v230_v43 = vld [vmem:[%s1498_s1 + $0x38] sm:$0xff] }
   0x7   :  { %v27_v20 = vld [vmem:[%s1497_s0 + $0x20] sm:$0xff]  ;;  %v162_v30 = vadd.f32 %v673_v2, %v94_v18  ;;  %v296_v37 = vmul.f32 %v682_v5, %v228_v27  ;;  %v164_v40 = vadd.f32 %v673_v2, %v96_v32  ;;  %v97_v41 = vmul.f32 %v668_v1, %v29_v28  ;;  %v32_v58 = vld [vmem:[%s1497_s0 + $0x48] sm:$0xff]  ;;  %v33_v0 = vld [vmem:[%s1497_s0 + $0x50] sm:$0xff] }
   0x8   :  { %v227_v21 = vld [vmem:[%s1498_s1 + $0x20] sm:$0xff]  ;;  %v355_v22 = vadd.f32 %v291_v10, %v159_v9  ;;  %v95_v25 = vmul.f32 %v668_v1, %v27_v20  ;;  %v356_v35 = vadd.f32 %v292_v12, %v160_v23  ;;  %v357_v38 = vadd.f32 %v293_v17, %v161_v29  ;;  %v232_v59 = vld [vmem:[%s1498_s1 + $0x48] sm:$0xff]  ;;  %v233_v3 = vld [vmem:[%s1498_s1 + $0x50] sm:$0xff] }
   0x9   :  { %v295_v31 = vmul.f32 %v682_v5, %v227_v21  ;;  %v358_v39 = vadd.f32 %v294_v24, %v162_v30  ;;  %v297_v47 = vmul.f32 %v682_v5, %v229_v33  ;;  %v360_v50 = vadd.f32 %v296_v37, %v164_v40  ;;  %v31_v52 = vld [vmem:[%s1497_s0 + $0x40] sm:$0xff]  ;;  %v34_v10 = vld [vmem:[%s1497_s0 + $0x58] sm:$0xff] }
   0xa   :  { %v423_v34 = vadd.f32 %v687_v6, %v355_v22  ;;  %v163_v36 = vadd.f32 %v673_v2, %v95_v25  ;;  %v424_v45 = vadd.f32 %v687_v6, %v356_v35  ;;  %v425_v48 = vadd.f32 %v687_v6, %v357_v38  ;;  %v231_v53 = vld [vmem:[%s1498_s1 + $0x40] sm:$0xff]  ;;  %v234_v11 = vld [vmem:[%s1498_s1 + $0x58] sm:$0xff]  ;;  %v36_v22 = vld [vmem:[%s1497_s0 + $0x68] sm:$0xff] }
   0xb   :  { %v426_v49 = vadd.f32 %v687_v6, %v358_v39  ;;  %v165_v51 = vadd.f32 %v673_v2, %v97_v41  ;;  %v98_v56 = vmul.f32 %v668_v1, %v30_v42  ;;  %v298_v57 = vmul.f32 %v682_v5, %v230_v43  ;;  %v35_v16 = vld [vmem:[%s1497_s0 + $0x60] sm:$0xff]  ;;  %v237_v41 = vld [vmem:[%s1498_s1 + $0x70] sm:$0xff] }
   0xc   :  { %v487_v44 = vmax.f32 %v423_v34, 0.0  ;;  %v359_v46 = vadd.f32 %v295_v31, %v163_v36  ;;  %v488_v54 = vmax.f32 %v424_v45, 0.0  ;;  %v489_v60 = vmax.f32 %v425_v48, 0.0  ;;  %v235_v21 = vld [vmem:[%s1498_s1 + $0x60] sm:$0xff]  ;;  %v236_v31 = vld [vmem:[%s1498_s1 + $0x68] sm:$0xff]  ;;  %v37_v36 = vld [vmem:[%s1497_s0 + $0x70] sm:$0xff] }
   0xd   :  { %v490_v61 = vmax.f32 %v426_v49, 0.0  ;;  %v428_v62 = vadd.f32 %v687_v6, %v360_v50  ;;  %v361_v63 = vadd.f32 %v297_v47, %v165_v51  ;;  %v166_v7 = vadd.f32 %v673_v2, %v98_v56  ;;  %v238_v51 = vld [vmem:[%s1498_s1 + $0x78] sm:$0xff] }
   0xe   :  { %551 = vst [vmem:[%s1503_s6] sm:$0xff] %v487_v44  ;;  %v427_v55 = vadd.f32 %v687_v6, %v359_v46  ;;  %v99_v8 = vmul.f32 %v668_v1, %v31_v52  ;;  %v299_v9 = vmul.f32 %v682_v5, %v231_v53  ;;  %v100_v14 = vmul.f32 %v668_v1, %v32_v58  ;;  %v38_v46 = vld [vmem:[%s1497_s0 + $0x78] sm:$0xff]  ;;  %v39_v52 = vld [vmem:[%s1497_s0 + $0x80] sm:$0xff] }
   0xf   :  { %552 = vst [vmem:[%s1503_s6 + $0x8] sm:$0xff] %v488_v54  ;;  %v492_v12 = vmax.f32 %v428_v62, 0.0  ;;  %v429_v13 = vadd.f32 %v687_v6, %v361_v63  ;;  %v300_v15 = vmul.f32 %v682_v5, %v232_v59  ;;  %v362_v17 = vadd.f32 %v298_v57, %v166_v7  ;;  %v239_v57 = vld [vmem:[%s1498_s1 + $0x80] sm:$0xff]  ;;  %v40_v62 = vld [vmem:[%s1497_s0 + $0x88] sm:$0xff] }
  0x10   :  { %v491_v4 = vmax.f32 %v427_v55, 0.0  ;;  %553 = vst [vmem:[%s1503_s6 + $0x10] sm:$0xff] %v489_v60  ;;  %v167_v18 = vadd.f32 %v673_v2, %v99_v8  ;;  %v101_v19 = vmul.f32 %v668_v1, %v33_v0  ;;  %v301_v20 = vmul.f32 %v682_v5, %v233_v3  ;;  %v240_v63 = vld [vmem:[%s1498_s1 + $0x88] sm:$0xff]  ;;  %v41_v8 = vld [vmem:[%s1497_s0 + $0x90] sm:$0xff] }
  0x11   :  { %554 = vst [vmem:[%s1503_s6 + $0x18] sm:$0xff] %v490_v61  ;;  %v493_v23 = vmax.f32 %v429_v13, 0.0  ;;  %v168_v24 = vadd.f32 %v673_v2, %v100_v14  ;;  %v102_v25 = vmul.f32 %v668_v1, %v34_v10  ;;  %v302_v26 = vmul.f32 %v682_v5, %v234_v11  ;;  %v42_v14 = vld [vmem:[%s1497_s0 + $0x98] sm:$0xff] }
  0x12   :  { %555 = vst [vmem:[%s1503_s6 + $0x20] sm:$0xff] %v491_v4  ;;  %v430_v27 = vadd.f32 %v687_v6, %v362_v17  ;;  %v363_v28 = vadd.f32 %v299_v9, %v167_v18  ;;  %v169_v29 = vadd.f32 %v673_v2, %v101_v19  ;;  %v103_v30 = vmul.f32 %v668_v1, %v35_v16  ;;  %v241_v9 = vld [vmem:[%s1498_s1 + $0x90] sm:$0xff] }
  0x13   :  { %556 = vst [vmem:[%s1503_s6 + $0x28] sm:$0xff] %v492_v12  ;;  %v364_v32 = vadd.f32 %v300_v15, %v168_v24  ;;  %v170_v33 = vadd.f32 %v673_v2, %v102_v25  ;;  %v303_v34 = vmul.f32 %v682_v5, %v235_v21  ;;  %v104_v35 = vmul.f32 %v668_v1, %v36_v22  ;;  %v242_v15 = vld [vmem:[%s1498_s1 + $0x98] sm:$0xff]  ;;  %v243_v25 = vld [vmem:[%s1498_s1 + $0xa0] sm:$0xff] }
  0x14   :  { %557 = vst [vmem:[%s1503_s6 + $0x30] sm:$0xff] %v493_v23  ;;  %v494_v37 = vmax.f32 %v430_v27, 0.0  ;;  %v431_v38 = vadd.f32 %v687_v6, %v363_v28  ;;  %v365_v39 = vadd.f32 %v301_v20, %v169_v29  ;;  %v171_v40 = vadd.f32 %v673_v2, %v103_v30  ;;  %v43_v20 = vld [vmem:[%s1497_s0 + $0xa0] sm:$0xff]  ;;  %v44_v30 = vld [vmem:[%s1497_s0 + $0xa8] sm:$0xff] }
  0x15   :  { %v432_v42 = vadd.f32 %v687_v6, %v364_v32  ;;  %v366_v43 = vadd.f32 %v302_v26, %v170_v33  ;;  %v172_v44 = vadd.f32 %v673_v2, %v104_v35  ;;  %v304_v45 = vmul.f32 %v682_v5, %v236_v31  ;;  %v244_v35 = vld [vmem:[%s1498_s1 + $0xa8] sm:$0xff] }
  0x16   :  { %558 = vst [vmem:[%s1503_s6 + $0x38] sm:$0xff] %v494_v37  ;;  %v495_v47 = vmax.f32 %v431_v38, 0.0  ;;  %v433_v48 = vadd.f32 %v687_v6, %v365_v39  ;;  %v367_v49 = vadd.f32 %v303_v34, %v171_v40  ;;  %v105_v50 = vmul.f32 %v668_v1, %v37_v36  ;;  %v45_v40 = vld [vmem:[%s1497_s0 + $0xb0] sm:$0xff] }
  0x17   :  { %v496_v53 = vmax.f32 %v432_v42, 0.0  ;;  %v434_v54 = vadd.f32 %v687_v6, %v366_v43  ;;  %v368_v55 = vadd.f32 %v304_v45, %v172_v44  ;;  %v305_v56 = vmul.f32 %v682_v5, %v237_v41  ;;  %v245_v45 = vld [vmem:[%s1498_s1 + $0xb0] sm:$0xff] }
  0x18   :  { %559 = vst [vmem:[%s1503_s6 + $0x40] sm:$0xff] %v495_v47  ;;  %v497_v58 = vmax.f32 %v433_v48, 0.0  ;;  %v435_v59 = vadd.f32 %v687_v6, %v367_v49  ;;  %v173_v60 = vadd.f32 %v673_v2, %v105_v50  ;;  %v106_v61 = vmul.f32 %v668_v1, %v38_v46  ;;  %v46_v46 = vld [vmem:[%s1497_s0 + $0xb8] sm:$0xff] }
  0x19   :  { %560 = vst [vmem:[%s1503_s6 + $0x48] sm:$0xff] %v496_v53  ;;  %v498_v0 = vmax.f32 %v434_v54, 0.0  ;;  %v436_v3 = vadd.f32 %v687_v6, %v368_v55  ;;  %v306_v4 = vmul.f32 %v682_v5, %v238_v51  ;;  %v107_v7 = vmul.f32 %v668_v1, %v39_v52  ;;  %v246_v55 = vld [vmem:[%s1498_s1 + $0xb8] sm:$0xff] }
  0x1a   :  { %561 = vst [vmem:[%s1503_s6 + $0x50] sm:$0xff] %v497_v58  ;;  %v499_v10 = vmax.f32 %v435_v59, 0.0  ;;  %v369_v11 = vadd.f32 %v305_v56, %v173_v60  ;;  %v174_v12 = vadd.f32 %v673_v2, %v106_v61  ;;  %v307_v13 = vmul.f32 %v682_v5, %v239_v57  ;;  %v47_v56 = vld [vmem:[%s1497_s0 + $0xc0] sm:$0xff] }
  0x1b   :  { %562 = vst [vmem:[%s1503_s6 + $0x58] sm:$0xff] %v498_v0  ;;  %v500_v16 = vmax.f32 %v436_v3, 0.0  ;;  %v175_v17 = vadd.f32 %v673_v2, %v107_v7  ;;  %v108_v18 = vmul.f32 %v668_v1, %v40_v62  ;;  %v308_v19 = vmul.f32 %v682_v5, %v240_v63  ;;  %v247_v61 = vld [vmem:[%s1498_s1 + $0xc0] sm:$0xff]  ;;  %v248_v7 = vld [vmem:[%s1498_s1 + $0xc8] sm:$0xff] }
  0x1c   :  { %563 = vst [vmem:[%s1503_s6 + $0x60] sm:$0xff] %v499_v10  ;;  %v437_v21 = vadd.f32 %v687_v6, %v369_v11  ;;  %v370_v22 = vadd.f32 %v306_v4, %v174_v12  ;;  %v109_v23 = vmul.f32 %v668_v1, %v41_v8  ;;  %v309_v24 = vmul.f32 %v682_v5, %v241_v9  ;;  %v48_v4 = vld [vmem:[%s1497_s0 + $0xc8] sm:$0xff]  ;;  %v49_v12 = vld [vmem:[%s1497_s0 + $0xd0] sm:$0xff] }
  0x1d   :  { %564 = vst [vmem:[%s1503_s6 + $0x68] sm:$0xff] %v500_v16  ;;  %v371_v26 = vadd.f32 %v307_v13, %v175_v17  ;;  %v176_v27 = vadd.f32 %v673_v2, %v108_v18  ;;  %v110_v28 = vmul.f32 %v668_v1, %v42_v14  ;;  %v310_v29 = vmul.f32 %v682_v5, %v242_v15  ;;  %v249_v13 = vld [vmem:[%s1498_s1 + $0xd0] sm:$0xff]  ;;  %v50_v18 = vld [vmem:[%s1497_s0 + $0xd8] sm:$0xff] }
  0x1e   :  { %v501_v31 = vmax.f32 %v437_v21, 0.0  ;;  %v438_v32 = vadd.f32 %v687_v6, %v370_v22  ;;  %v177_v33 = vadd.f32 %v673_v2, %v109_v23  ;;  %v111_v34 = vmul.f32 %v668_v1, %v43_v20  ;;  %v250_v23 = vld [vmem:[%s1498_s1 + $0xd8] sm:$0xff] }
  0x1f   :  { %v439_v36 = vadd.f32 %v687_v6, %v371_v26  ;;  %v372_v37 = vadd.f32 %v308_v19, %v176_v27  ;;  %v178_v38 = vadd.f32 %v673_v2, %v110_v28  ;;  %v311_v39 = vmul.f32 %v682_v5, %v243_v25 }
  0x20   :  { %565 = vst [vmem:[%s1503_s6 + $0x70] sm:$0xff] %v501_v31  ;;  %v502_v41 = vmax.f32 %v438_v32, 0.0  ;;  %v373_v42 = vadd.f32 %v309_v24, %v177_v33  ;;  %v179_v43 = vadd.f32 %v673_v2, %v111_v34  ;;  %v112_v44 = vmul.f32 %v668_v1, %v44_v30  ;;  %v51_v24 = vld [vmem:[%s1497_s0 + $0xe0] sm:$0xff]  ;;  %v52_v34 = vld [vmem:[%s1497_s0 + $0xe8] sm:$0xff] }
  0x21   :  { %v503_v47 = vmax.f32 %v439_v36, 0.0  ;;  %v440_v48 = vadd.f32 %v687_v6, %v372_v37  ;;  %v374_v49 = vadd.f32 %v310_v29, %v178_v38  ;;  %v312_v50 = vmul.f32 %v682_v5, %v244_v35  ;;  %v251_v33 = vld [vmem:[%s1498_s1 + $0xe0] sm:$0xff] }
  0x22   :  { %566 = vst [vmem:[%s1503_s6 + $0x78] sm:$0xff] %v502_v41  ;;  %v441_v51 = vadd.f32 %v687_v6, %v373_v42  ;;  %v375_v52 = vadd.f32 %v311_v39, %v179_v43  ;;  %v180_v53 = vadd.f32 %v673_v2, %v112_v44  ;;  %v113_v54 = vmul.f32 %v668_v1, %v45_v40  ;;  %v252_v39 = vld [vmem:[%s1498_s1 + $0xe8] sm:$0xff]  ;;  %v53_v44 = vld [vmem:[%s1497_s0 + $0xf0] sm:$0xff] }
  0x23   :  { %567 = vst [vmem:[%s1503_s6 + $0x80] sm:$0xff] %v503_v47  ;;  %v504_v57 = vmax.f32 %v440_v48, 0.0  ;;  %v442_v58 = vadd.f32 %v687_v6, %v374_v49  ;;  %v313_v59 = vmul.f32 %v682_v5, %v245_v45  ;;  %v114_v60 = vmul.f32 %v668_v1, %v46_v46  ;;  %v253_v49 = vld [vmem:[%s1498_s1 + $0xf0] sm:$0xff] }
  0x24   :  { %v505_v62 = vmax.f32 %v441_v51, 0.0  ;;  %v443_v63 = vadd.f32 %v687_v6, %v375_v52  ;;  %v376_v0 = vadd.f32 %v312_v50, %v180_v53  ;;  %v181_v3 = vadd.f32 %v673_v2, %v113_v54  ;;  %v54_v50 = vld [vmem:[%s1497_s0 + $0xf8] sm:$0xff] }
  0x25   :  { %568 = vst [vmem:[%s1503_s6 + $0x88] sm:$0xff] %v504_v57  ;;  %v506_v8 = vmax.f32 %v442_v58, 0.0  ;;  %v182_v9 = vadd.f32 %v673_v2, %v114_v60  ;;  %v314_v10 = vmul.f32 %v682_v5, %v246_v55  ;;  %v115_v11 = vmul.f32 %v668_v1, %v47_v56  ;;  %v55_v60 = vld [vmem:[%s1497_s0 + $0x100] sm:$0xff] }
  0x26   :  { %569 = vst [vmem:[%s1503_s6 + $0x90] sm:$0xff] %v505_v62  ;;  %v507_v14 = vmax.f32 %v443_v63, 0.0  ;;  %v444_v15 = vadd.f32 %v687_v6, %v376_v0  ;;  %v377_v16 = vadd.f32 %v313_v59, %v181_v3  ;;  %v315_v17 = vmul.f32 %v682_v5, %v247_v61  ;;  %v254_v59 = vld [vmem:[%s1498_s1 + $0xf8] sm:$0xff]  ;;  %v255_v3 = vld [vmem:[%s1498_s1 + $0x100] sm:$0xff] }
  0x27   :  { %570 = vst [vmem:[%s1503_s6 + $0x98] sm:$0xff] %v506_v8  ;;  %v378_v19 = vadd.f32 %v314_v10, %v182_v9  ;;  %v183_v20 = vadd.f32 %v673_v2, %v115_v11  ;;  %v116_v21 = vmul.f32 %v668_v1, %v48_v4  ;;  %v316_v22 = vmul.f32 %v682_v5, %v248_v7  ;;  %v56_v10 = vld [vmem:[%s1497_s0 + $0x108] sm:$0xff] }
  0x28   :  { %571 = vst [vmem:[%s1503_s6 + $0xa0] sm:$0xff] %v507_v14  ;;  %v508_v25 = vmax.f32 %v444_v15, 0.0  ;;  %v445_v26 = vadd.f32 %v687_v6, %v377_v16  ;;  %v117_v27 = vmul.f32 %v668_v1, %v49_v12  ;;  %v317_v28 = vmul.f32 %v682_v5, %v249_v13  ;;  %v256_v11 = vld [vmem:[%s1498_s1 + $0x108] sm:$0xff]  ;;  %v57_v16 = vld [vmem:[%s1497_s0 + $0x110] sm:$0xff] }
  0x29   :  { %v446_v29 = vadd.f32 %v687_v6, %v378_v19  ;;  %v379_v30 = vadd.f32 %v315_v17, %v183_v20  ;;  %v184_v31 = vadd.f32 %v673_v2, %v116_v21  ;;  %v118_v32 = vmul.f32 %v668_v1, %v50_v18  ;;  %v257_v17 = vld [vmem:[%s1498_s1 + $0x110] sm:$0xff] }
  0x2a   :  { %572 = vst [vmem:[%s1503_s6 + $0xa8] sm:$0xff] %v508_v25  ;;  %v509_v35 = vmax.f32 %v445_v26, 0.0  ;;  %v185_v36 = vadd.f32 %v673_v2, %v117_v27  ;;  %v318_v37 = vmul.f32 %v682_v5, %v250_v23  ;;  %v119_v38 = vmul.f32 %v668_v1, %v51_v24  ;;  %v258_v27 = vld [vmem:[%s1498_s1 + $0x118] sm:$0xff] }
  0x2b   :  { %v510_v40 = vmax.f32 %v446_v29, 0.0  ;;  %v447_v41 = vadd.f32 %v687_v6, %v379_v30  ;;  %v380_v42 = vadd.f32 %v316_v22, %v184_v31  ;;  %v186_v43 = vadd.f32 %v673_v2, %v118_v32  ;;  %v58_v22 = vld [vmem:[%s1497_s0 + $0x118] sm:$0xff] }
  0x2c   :  { %573 = vst [vmem:[%s1503_s6 + $0xb0] sm:$0xff] %v509_v35  ;;  %v381_v45 = vadd.f32 %v317_v28, %v185_v36  ;;  %v187_v46 = vadd.f32 %v673_v2, %v119_v38  ;;  %v319_v47 = vmul.f32 %v682_v5, %v251_v33  ;;  %v120_v48 = vmul.f32 %v668_v1, %v52_v34  ;;  %v59_v28 = vld [vmem:[%s1497_s0 + $0x120] sm:$0xff]  ;;  %v60_v38 = vld [vmem:[%s1497_s0 + $0x128] sm:$0xff] }
  0x2d   :  { %574 = vst [vmem:[%s1503_s6 + $0xb8] sm:$0xff] %v510_v40  ;;  %v511_v51 = vmax.f32 %v447_v41, 0.0  ;;  %v448_v52 = vadd.f32 %v687_v6, %v380_v42  ;;  %v382_v53 = vadd.f32 %v318_v37, %v186_v43  ;;  %v320_v54 = vmul.f32 %v682_v5, %v252_v39  ;;  %v259_v37 = vld [vmem:[%s1498_s1 + $0x120] sm:$0xff]  ;;  %v260_v43 = vld [vmem:[%s1498_s1 + $0x128] sm:$0xff] }
  0x2e   :  { %v449_v55 = vadd.f32 %v687_v6, %v381_v45  ;;  %v383_v56 = vadd.f32 %v319_v47, %v187_v46  ;;  %v188_v57 = vadd.f32 %v673_v2, %v120_v48  ;;  %v121_v58 = vmul.f32 %v668_v1, %v53_v44  ;;  %v61_v48 = vld [vmem:[%s1497_s0 + $0x130] sm:$0xff] }
  0x2f   :  { %575 = vst [vmem:[%s1503_s6 + $0xc0] sm:$0xff] %v511_v51  ;;  %v512_v61 = vmax.f32 %v448_v52, 0.0  ;;  %v450_v62 = vadd.f32 %v687_v6, %v382_v53  ;;  %v321_v63 = vmul.f32 %v682_v5, %v253_v49  ;;  %v122_v0 = vmul.f32 %v668_v1, %v54_v50  ;;  %v261_v53 = vld [vmem:[%s1498_s1 + $0x130] sm:$0xff] }
  0x30   :  { %v513_v4 = vmax.f32 %v449_v55, 0.0  ;;  %v451_v7 = vadd.f32 %v687_v6, %v383_v56  ;;  %v384_v8 = vadd.f32 %v320_v54, %v188_v57  ;;  %v189_v9 = vadd.f32 %v673_v2, %v121_v58  ;;  %v62_v54 = vld [vmem:[%s1497_s0 + $0x138] sm:$0xff] }
  0x31   :  { %576 = vst [vmem:[%s1503_s6 + $0xc8] sm:$0xff] %v512_v61  ;;  %v514_v12 = vmax.f32 %v450_v62, 0.0  ;;  %v190_v13 = vadd.f32 %v673_v2, %v122_v0  ;;  %v322_v14 = vmul.f32 %v682_v5, %v254_v59  ;;  %v123_v15 = vmul.f32 %v668_v1, %v55_v60  ;;  %v63_v0 = vld [vmem:[%s1497_s0 + $0x140] sm:$0xff] }
  0x32   :  { %577 = vst [vmem:[%s1503_s6 + $0xd0] sm:$0xff] %v513_v4  ;;  %v515_v18 = vmax.f32 %v451_v7, 0.0  ;;  %v452_v19 = vadd.f32 %v687_v6, %v384_v8  ;;  %v385_v20 = vadd.f32 %v321_v63, %v189_v9  ;;  %v323_v21 = vmul.f32 %v682_v5, %v255_v3  ;;  %v262_v63 = vld [vmem:[%s1498_s1 + $0x138] sm:$0xff]  ;;  %v263_v9 = vld [vmem:[%s1498_s1 + $0x140] sm:$0xff] }
  0x33   :  { %578 = vst [vmem:[%s1503_s6 + $0xd8] sm:$0xff] %v514_v12  ;;  %v386_v23 = vadd.f32 %v322_v14, %v190_v13  ;;  %v191_v24 = vadd.f32 %v673_v2, %v123_v15  ;;  %v124_v25 = vmul.f32 %v668_v1, %v56_v10  ;;  %v324_v26 = vmul.f32 %v682_v5, %v256_v11  ;;  %v64_v14 = vld [vmem:[%s1497_s0 + $0x148] sm:$0xff] }
  0x34   :  { %579 = vst [vmem:[%s1503_s6 + $0xe0] sm:$0xff] %v515_v18  ;;  %v516_v29 = vmax.f32 %v452_v19, 0.0  ;;  %v453_v30 = vadd.f32 %v687_v6, %v385_v20  ;;  %v125_v31 = vmul.f32 %v668_v1, %v57_v16  ;;  %v325_v32 = vmul.f32 %v682_v5, %v257_v17  ;;  %v264_v15 = vld [vmem:[%s1498_s1 + $0x148] sm:$0xff]  ;;  %v65_v20 = vld [vmem:[%s1497_s0 + $0x150] sm:$0xff] }
  0x35   :  { %v454_v33 = vadd.f32 %v687_v6, %v386_v23  ;;  %v387_v34 = vadd.f32 %v323_v21, %v191_v24  ;;  %v192_v35 = vadd.f32 %v673_v2, %v124_v25  ;;  %v126_v36 = vmul.f32 %v668_v1, %v58_v22  ;;  %v265_v21 = vld [vmem:[%s1498_s1 + $0x150] sm:$0xff] }
  0x36   :  { %580 = vst [vmem:[%s1503_s6 + $0xe8] sm:$0xff] %v516_v29  ;;  %v517_v39 = vmax.f32 %v453_v30, 0.0  ;;  %v193_v40 = vadd.f32 %v673_v2, %v125_v31  ;;  %v326_v41 = vmul.f32 %v682_v5, %v258_v27  ;;  %v127_v42 = vmul.f32 %v668_v1, %v59_v28  ;;  %v266_v31 = vld [vmem:[%s1498_s1 + $0x158] sm:$0xff] }
  0x37   :  { %v518_v44 = vmax.f32 %v454_v33, 0.0  ;;  %v455_v45 = vadd.f32 %v687_v6, %v387_v34  ;;  %v388_v46 = vadd.f32 %v324_v26, %v192_v35  ;;  %v194_v47 = vadd.f32 %v673_v2, %v126_v36  ;;  %v66_v26 = vld [vmem:[%s1497_s0 + $0x158] sm:$0xff] }
  0x38   :  { %581 = vst [vmem:[%s1503_s6 + $0xf0] sm:$0xff] %v517_v39  ;;  %v389_v49 = vadd.f32 %v325_v32, %v193_v40  ;;  %v195_v50 = vadd.f32 %v673_v2, %v127_v42  ;;  %v327_v51 = vmul.f32 %v682_v5, %v259_v37  ;;  %v128_v52 = vmul.f32 %v668_v1, %v60_v38  ;;  %v67_v32 = vld [vmem:[%s1497_s0 + $0x160] sm:$0xff]  ;;  %v68_v42 = vld [vmem:[%s1497_s0 + $0x168] sm:$0xff] }
  0x39   :  { %582 = vst [vmem:[%s1503_s6 + $0xf8] sm:$0xff] %v518_v44  ;;  %v519_v55 = vmax.f32 %v455_v45, 0.0  ;;  %v456_v56 = vadd.f32 %v687_v6, %v388_v46  ;;  %v390_v57 = vadd.f32 %v326_v41, %v194_v47  ;;  %v328_v58 = vmul.f32 %v682_v5, %v260_v43  ;;  %v267_v41 = vld [vmem:[%s1498_s1 + $0x160] sm:$0xff]  ;;  %v268_v47 = vld [vmem:[%s1498_s1 + $0x168] sm:$0xff] }
  0x3a   :  { %v457_v59 = vadd.f32 %v687_v6, %v389_v49  ;;  %v391_v60 = vadd.f32 %v327_v51, %v195_v50  ;;  %v196_v61 = vadd.f32 %v673_v2, %v128_v52  ;;  %v129_v62 = vmul.f32 %v668_v1, %v61_v48  ;;  %v69_v52 = vld [vmem:[%s1497_s0 + $0x170] sm:$0xff] }
  0x3b   :  { %583 = vst [vmem:[%s1503_s6 + $0x100] sm:$0xff] %v519_v55  ;;  %v520_v3 = vmax.f32 %v456_v56, 0.0  ;;  %v458_v4 = vadd.f32 %v687_v6, %v390_v57  ;;  %v329_v7 = vmul.f32 %v682_v5, %v261_v53  ;;  %v130_v8 = vmul.f32 %v668_v1, %v62_v54  ;;  %v269_v57 = vld [vmem:[%s1498_s1 + $0x170] sm:$0xff] }
  0x3c   :  { %v521_v10 = vmax.f32 %v457_v59, 0.0  ;;  %v459_v11 = vadd.f32 %v687_v6, %v391_v60  ;;  %v392_v12 = vadd.f32 %v328_v58, %v196_v61  ;;  %v197_v13 = vadd.f32 %v673_v2, %v129_v62  ;;  %v70_v58 = vld [vmem:[%s1497_s0 + $0x178] sm:$0xff] }
  0x3d   :  { %584 = vst [vmem:[%s1503_s6 + $0x108] sm:$0xff] %v520_v3  ;;  %v522_v16 = vmax.f32 %v458_v4, 0.0  ;;  %v198_v17 = vadd.f32 %v673_v2, %v130_v8  ;;  %v330_v18 = vmul.f32 %v682_v5, %v262_v63  ;;  %v131_v19 = vmul.f32 %v668_v1, %v63_v0  ;;  %v71_v8 = vld [vmem:[%s1497_s0 + $0x180] sm:$0xff] }
  0x3e   :  { %585 = vst [vmem:[%s1503_s6 + $0x110] sm:$0xff] %v521_v10  ;;  %v523_v22 = vmax.f32 %v459_v11, 0.0  ;;  %v460_v23 = vadd.f32 %v687_v6, %v392_v12  ;;  %v393_v24 = vadd.f32 %v329_v7, %v197_v13  ;;  %v331_v25 = vmul.f32 %v682_v5, %v263_v9  ;;  %v270_v7 = vld [vmem:[%s1498_s1 + $0x178] sm:$0xff]  ;;  %v271_v13 = vld [vmem:[%s1498_s1 + $0x180] sm:$0xff] }
  0x3f   :  { %586 = vst [vmem:[%s1503_s6 + $0x118] sm:$0xff] %v522_v16  ;;  %v394_v27 = vadd.f32 %v330_v18, %v198_v17  ;;  %v199_v28 = vadd.f32 %v673_v2, %v131_v19  ;;  %v132_v29 = vmul.f32 %v668_v1, %v64_v14  ;;  %v332_v30 = vmul.f32 %v682_v5, %v264_v15  ;;  %v72_v18 = vld [vmem:[%s1497_s0 + $0x188] sm:$0xff] }
  0x40   :  { %587 = vst [vmem:[%s1503_s6 + $0x120] sm:$0xff] %v523_v22  ;;  %v524_v33 = vmax.f32 %v460_v23, 0.0  ;;  %v461_v34 = vadd.f32 %v687_v6, %v393_v24  ;;  %v133_v35 = vmul.f32 %v668_v1, %v65_v20  ;;  %v333_v36 = vmul.f32 %v682_v5, %v265_v21  ;;  %v272_v19 = vld [vmem:[%s1498_s1 + $0x188] sm:$0xff]  ;;  %v73_v24 = vld [vmem:[%s1497_s0 + $0x190] sm:$0xff] }
  0x41   :  { %v462_v37 = vadd.f32 %v687_v6, %v394_v27  ;;  %v395_v38 = vadd.f32 %v331_v25, %v199_v28  ;;  %v200_v39 = vadd.f32 %v673_v2, %v132_v29  ;;  %v134_v40 = vmul.f32 %v668_v1, %v66_v26  ;;  %v273_v25 = vld [vmem:[%s1498_s1 + $0x190] sm:$0xff] }
  0x42   :  { %588 = vst [vmem:[%s1503_s6 + $0x128] sm:$0xff] %v524_v33  ;;  %v525_v43 = vmax.f32 %v461_v34, 0.0  ;;  %v201_v44 = vadd.f32 %v673_v2, %v133_v35  ;;  %v334_v45 = vmul.f32 %v682_v5, %v266_v31  ;;  %v135_v46 = vmul.f32 %v668_v1, %v67_v32  ;;  %v274_v35 = vld [vmem:[%s1498_s1 + $0x198] sm:$0xff] }
  0x43   :  { %v526_v48 = vmax.f32 %v462_v37, 0.0  ;;  %v463_v49 = vadd.f32 %v687_v6, %v395_v38  ;;  %v396_v50 = vadd.f32 %v332_v30, %v200_v39  ;;  %v202_v51 = vadd.f32 %v673_v2, %v134_v40  ;;  %v74_v30 = vld [vmem:[%s1497_s0 + $0x198] sm:$0xff] }
  0x44   :  { %589 = vst [vmem:[%s1503_s6 + $0x130] sm:$0xff] %v525_v43  ;;  %v397_v53 = vadd.f32 %v333_v36, %v201_v44  ;;  %v203_v54 = vadd.f32 %v673_v2, %v135_v46  ;;  %v335_v55 = vmul.f32 %v682_v5, %v267_v41  ;;  %v136_v56 = vmul.f32 %v668_v1, %v68_v42  ;;  %v75_v36 = vld [vmem:[%s1497_s0 + $0x1a0] sm:$0xff]  ;;  %v76_v46 = vld [vmem:[%s1497_s0 + $0x1a8] sm:$0xff] }
  0x45   :  { %590 = vst [vmem:[%s1503_s6 + $0x138] sm:$0xff] %v526_v48  ;;  %v527_v59 = vmax.f32 %v463_v49, 0.0  ;;  %v464_v60 = vadd.f32 %v687_v6, %v396_v50  ;;  %v398_v61 = vadd.f32 %v334_v45, %v202_v51  ;;  %v336_v62 = vmul.f32 %v682_v5, %v268_v47  ;;  %v275_v45 = vld [vmem:[%s1498_s1 + $0x1a0] sm:$0xff]  ;;  %v276_v51 = vld [vmem:[%s1498_s1 + $0x1a8] sm:$0xff] }
  0x46   :  { %v465_v63 = vadd.f32 %v687_v6, %v397_v53  ;;  %v399_v0 = vadd.f32 %v335_v55, %v203_v54  ;;  %v204_v3 = vadd.f32 %v673_v2, %v136_v56  ;;  %v137_v4 = vmul.f32 %v668_v1, %v69_v52  ;;  %v77_v56 = vld [vmem:[%s1497_s0 + $0x1b0] sm:$0xff] }
  0x47   :  { %591 = vst [vmem:[%s1503_s6 + $0x140] sm:$0xff] %v527_v59  ;;  %v528_v9 = vmax.f32 %v464_v60, 0.0  ;;  %v466_v10 = vadd.f32 %v687_v6, %v398_v61  ;;  %v337_v11 = vmul.f32 %v682_v5, %v269_v57  ;;  %v138_v12 = vmul.f32 %v668_v1, %v70_v58  ;;  %v277_v61 = vld [vmem:[%s1498_s1 + $0x1b0] sm:$0xff] }
  0x48   :  { %v529_v14 = vmax.f32 %v465_v63, 0.0  ;;  %v467_v15 = vadd.f32 %v687_v6, %v399_v0  ;;  %v400_v16 = vadd.f32 %v336_v62, %v204_v3  ;;  %v205_v17 = vadd.f32 %v673_v2, %v137_v4  ;;  %v78_v62 = vld [vmem:[%s1497_s0 + $0x1b8] sm:$0xff] }
  0x49   :  { %592 = vst [vmem:[%s1503_s6 + $0x148] sm:$0xff] %v528_v9  ;;  %v530_v20 = vmax.f32 %v466_v10, 0.0  ;;  %v206_v21 = vadd.f32 %v673_v2, %v138_v12  ;;  %v338_v22 = vmul.f32 %v682_v5, %v270_v7  ;;  %v139_v23 = vmul.f32 %v668_v1, %v71_v8  ;;  %v79_v12 = vld [vmem:[%s1497_s0 + $0x1c0] sm:$0xff] }
  0x4a   :  { %593 = vst [vmem:[%s1503_s6 + $0x150] sm:$0xff] %v529_v14  ;;  %v531_v26 = vmax.f32 %v467_v15, 0.0  ;;  %v468_v27 = vadd.f32 %v687_v6, %v400_v16  ;;  %v401_v28 = vadd.f32 %v337_v11, %v205_v17  ;;  %v339_v29 = vmul.f32 %v682_v5, %v271_v13  ;;  %v278_v11 = vld [vmem:[%s1498_s1 + $0x1b8] sm:$0xff]  ;;  %v279_v17 = vld [vmem:[%s1498_s1 + $0x1c0] sm:$0xff] }
  0x4b   :  { %594 = vst [vmem:[%s1503_s6 + $0x158] sm:$0xff] %v530_v20  ;;  %v402_v31 = vadd.f32 %v338_v22, %v206_v21  ;;  %v207_v32 = vadd.f32 %v673_v2, %v139_v23  ;;  %v140_v33 = vmul.f32 %v668_v1, %v72_v18  ;;  %v340_v34 = vmul.f32 %v682_v5, %v272_v19  ;;  %v80_v22 = vld [vmem:[%s1497_s0 + $0x1c8] sm:$0xff] }
  0x4c   :  { %595 = vst [vmem:[%s1503_s6 + $0x160] sm:$0xff] %v531_v26  ;;  %v532_v37 = vmax.f32 %v468_v27, 0.0  ;;  %v469_v38 = vadd.f32 %v687_v6, %v401_v28  ;;  %v141_v39 = vmul.f32 %v668_v1, %v73_v24  ;;  %v341_v40 = vmul.f32 %v682_v5, %v273_v25  ;;  %v280_v23 = vld [vmem:[%s1498_s1 + $0x1c8] sm:$0xff]  ;;  %v81_v28 = vld [vmem:[%s1497_s0 + $0x1d0] sm:$0xff] }
  0x4d   :  { %v470_v41 = vadd.f32 %v687_v6, %v402_v31  ;;  %v403_v42 = vadd.f32 %v339_v29, %v207_v32  ;;  %v208_v43 = vadd.f32 %v673_v2, %v140_v33  ;;  %v142_v44 = vmul.f32 %v668_v1, %v74_v30  ;;  %v281_v29 = vld [vmem:[%s1498_s1 + $0x1d0] sm:$0xff] }
  0x4e   :  { %596 = vst [vmem:[%s1503_s6 + $0x168] sm:$0xff] %v532_v37  ;;  %v533_v47 = vmax.f32 %v469_v38, 0.0  ;;  %v209_v48 = vadd.f32 %v673_v2, %v141_v39  ;;  %v342_v49 = vmul.f32 %v682_v5, %v274_v35  ;;  %v143_v50 = vmul.f32 %v668_v1, %v75_v36  ;;  %v623_v36 = vld [vmem:[%s1499_s2] ss:$0 sm:$0xff]  ;;  %v282_v39 = vld [vmem:[%s1498_s1 + $0x1d8] sm:$0xff] }
  0x4f   :  { %v534_v52 = vmax.f32 %v470_v41, 0.0  ;;  %v471_v53 = vadd.f32 %v687_v6, %v403_v42  ;;  %v404_v54 = vadd.f32 %v340_v34, %v208_v43  ;;  %v210_v55 = vadd.f32 %v673_v2, %v142_v44  ;;  %v625_v44 = vld [vmem:[%s1502_s5] ss:$0 sm:$0xff] }
  0x50   :  { %597 = vst [vmem:[%s1503_s6 + $0x170] sm:$0xff] %v533_v47  ;;  %v405_v57 = vadd.f32 %v341_v40, %v209_v48  ;;  %v211_v58 = vadd.f32 %v673_v2, %v143_v50  ;;  %v343_v59 = vmul.f32 %v682_v5, %v275_v45  ;;  %v144_v60 = vmul.f32 %v668_v1, %v76_v46  ;;  %v83_v40 = vld [vmem:[%s1497_s0 + $0x1e0] sm:$0xff]  ;;  %v84_v50 = vld [vmem:[%s1497_s0 + $0x1e8] sm:$0xff] }
  0x51   :  { %598 = vst [vmem:[%s1503_s6 + $0x178] sm:$0xff] %v534_v52  ;;  %v535_v63 = vmax.f32 %v471_v53, 0.0  ;;  %v472_v0 = vadd.f32 %v687_v6, %v404_v54  ;;  %v406_v3 = vadd.f32 %v342_v49, %v210_v55  ;;  %v344_v4 = vmul.f32 %v682_v5, %v276_v51  ;;  %v626_v47 = vld [vmem:[%s1500_s3] ss:$0 sm:$0xff]  ;;  %v284_v55 = vld [vmem:[%s1498_s1 + $0x1e8] sm:$0xff] }
  0x52   :  { %v473_v7 = vadd.f32 %v687_v6, %v405_v57  ;;  %v407_v8 = vadd.f32 %v343_v59, %v211_v58  ;;  %v212_v9 = vadd.f32 %v673_v2, %v144_v60  ;;  %v145_v10 = vmul.f32 %v668_v1, %v77_v56  ;;  %v85_v60 = vld [vmem:[%s1497_s0 + $0x1f0] sm:$0xff] }
  0x53   :  { %599 = vst [vmem:[%s1503_s6 + $0x180] sm:$0xff] %v535_v63  ;;  %v536_v13 = vmax.f32 %v472_v0, 0.0  ;;  %v474_v14 = vadd.f32 %v687_v6, %v406_v3  ;;  %v345_v15 = vmul.f32 %v682_v5, %v277_v61  ;;  %v146_v16 = vmul.f32 %v668_v1, %v78_v62  ;;  %v285_v3 = vld [vmem:[%s1498_s1 + $0x1f0] sm:$0xff] }
  0x54   :  { %v537_v18 = vmax.f32 %v473_v7, 0.0  ;;  %v475_v19 = vadd.f32 %v687_v6, %v407_v8  ;;  %v408_v20 = vadd.f32 %v344_v4, %v212_v9  ;;  %v213_v21 = vadd.f32 %v673_v2, %v145_v10  ;;  %v86_v4 = vld [vmem:[%s1497_s0 + $0x1f8] sm:$0xff] }
  0x55   :  { %600 = vst [vmem:[%s1503_s6 + $0x188] sm:$0xff] %v536_v13  ;;  %v538_v24 = vmax.f32 %v474_v14, 0.0  ;;  %v214_v25 = vadd.f32 %v673_v2, %v146_v16  ;;  %v346_v26 = vmul.f32 %v682_v5, %v278_v11  ;;  %v147_v27 = vmul.f32 %v668_v1, %v79_v12  ;;  %v82_v1 = vld [vmem:[%s1497_s0 + $0x1d8] sm:$0xff] }
  0x56   :  { %601 = vst [vmem:[%s1503_s6 + $0x190] sm:$0xff] %v537_v18  ;;  %v539_v30 = vmax.f32 %v475_v19, 0.0  ;;  %v476_v31 = vadd.f32 %v687_v6, %v408_v20  ;;  %v409_v32 = vadd.f32 %v345_v15, %v213_v21  ;;  %v347_v33 = vmul.f32 %v682_v5, %v279_v17  ;;  %v286_v15 = vld [vmem:[%s1498_s1 + $0x1f8] sm:$0xff] }
  0x57   :  { %602 = vst [vmem:[%s1503_s6 + $0x198] sm:$0xff] %v538_v24  ;;  %v410_v34 = vadd.f32 %v346_v26, %v214_v25  ;;  %v215_v35 = vadd.f32 %v673_v2, %v147_v27  ;;  %v148_v37 = vmul.f32 %v623_v36, %v80_v22  ;;  %v348_v38 = vmul.f32 %v682_v5, %v280_v23  ;;  %v624_v5 = vld [vmem:[%s1501_s4] ss:$0 sm:$0xff] }
  0x58   :  { %603 = vst [vmem:[%s1503_s6 + $0x1a0] sm:$0xff] %v539_v30  ;;  %v540_v2 = vmax.f32 %v476_v31, 0.0  ;;  %v477_v41 = vadd.f32 %v687_v6, %v409_v32  ;;  %v149_v42 = vmul.f32 %v623_v36, %v81_v28  ;;  %v349_v43 = vmul.f32 %v624_v5, %v281_v29  ;;  %v283_v6 = vld [vmem:[%s1498_s1 + $0x1e0] sm:$0xff] }
  0x59   :  { %v478_v45 = vadd.f32 %v625_v44, %v410_v34  ;;  %v411_v46 = vadd.f32 %v347_v33, %v215_v35  ;;  %v216_v48 = vadd.f32 %v626_v47, %v148_v37  ;;  %v150_v49 = vmul.f32 %v623_v36, %v82_v1 }
  0x5a   :  { %604 = vst [vmem:[%s1503_s6 + $0x1a8] sm:$0xff] %v540_v2  ;;  %v541_v51 = vmax.f32 %v477_v41, 0.0  ;;  %v217_v52 = vadd.f32 %v626_v47, %v149_v42  ;;  %v350_v53 = vmul.f32 %v624_v5, %v282_v39  ;;  %v151_v54 = vmul.f32 %v623_v36, %v83_v40 }
  0x5b   :  { %v542_v56 = vmax.f32 %v478_v45, 0.0  ;;  %v479_v57 = vadd.f32 %v625_v44, %v411_v46  ;;  %v412_v58 = vadd.f32 %v348_v38, %v216_v48  ;;  %v218_v59 = vadd.f32 %v626_v47, %v150_v49 }
  0x5c   :  { %605 = vst [vmem:[%s1503_s6 + $0x1b0] sm:$0xff] %v541_v51  ;;  %v413_v61 = vadd.f32 %v349_v43, %v217_v52  ;;  %v219_v62 = vadd.f32 %v626_v47, %v151_v54  ;;  %v351_v63 = vmul.f32 %v624_v5, %v283_v6  ;;  %v152_v0 = vmul.f32 %v623_v36, %v84_v50 }
  0x5d   :  { %606 = vst [vmem:[%s1503_s6 + $0x1b8] sm:$0xff] %v542_v56  ;;  %v543_v7 = vmax.f32 %v479_v57, 0.0  ;;  %v480_v8 = vadd.f32 %v625_v44, %v412_v58  ;;  %v414_v9 = vadd.f32 %v350_v53, %v218_v59  ;;  %v352_v10 = vmul.f32 %v624_v5, %v284_v55 }
  0x5e   :  { %v481_v11 = vadd.f32 %v625_v44, %v413_v61  ;;  %v415_v12 = vadd.f32 %v351_v63, %v219_v62  ;;  %v220_v13 = vadd.f32 %v626_v47, %v152_v0  ;;  %v153_v14 = vmul.f32 %v623_v36, %v85_v60 }
  0x5f   :  { %607 = vst [vmem:[%s1503_s6 + $0x1c0] sm:$0xff] %v543_v7  ;;  %v544_v16 = vmax.f32 %v480_v8, 0.0  ;;  %v482_v17 = vadd.f32 %v625_v44, %v414_v9  ;;  %v353_v18 = vmul.f32 %v624_v5, %v285_v3  ;;  %v154_v19 = vmul.f32 %v623_v36, %v86_v4 }
  0x60   :  { %v545_v20 = vmax.f32 %v481_v11, 0.0  ;;  %v483_v21 = vadd.f32 %v625_v44, %v415_v12  ;;  %v416_v22 = vadd.f32 %v352_v10, %v220_v13  ;;  %v221_v23 = vadd.f32 %v626_v47, %v153_v14 }
  0x61   :  { %608 = vst [vmem:[%s1503_s6 + $0x1c8] sm:$0xff] %v544_v16  ;;  %v546_v24 = vmax.f32 %v482_v17, 0.0  ;;  %v222_v25 = vadd.f32 %v626_v47, %v154_v19  ;;  %v354_v26 = vmul.f32 %v624_v5, %v286_v15 }
  0x62   :  { %609 = vst [vmem:[%s1503_s6 + $0x1d0] sm:$0xff] %v545_v20  ;;  %v547_v27 = vmax.f32 %v483_v21, 0.0  ;;  %v484_v28 = vadd.f32 %v625_v44, %v416_v22  ;;  %v417_v29 = vadd.f32 %v353_v18, %v221_v23 }
  0x63   :  { %610 = vst [vmem:[%s1503_s6 + $0x1d8] sm:$0xff] %v546_v24  ;;  %v418_v30 = vadd.f32 %v354_v26, %v222_v25 }
  0x64   :  { %611 = vst [vmem:[%s1503_s6 + $0x1e0] sm:$0xff] %v547_v27  ;;  %v548_v31 = vmax.f32 %v484_v28, 0.0  ;;  %v485_v32 = vadd.f32 %v625_v44, %v417_v29 }
  0x65   :  { %v486_v33 = vadd.f32 %v625_v44, %v418_v30 }
  0x66   :  { %612 = vst [vmem:[%s1503_s6 + $0x1e8] sm:$0xff] %v548_v31  ;;  %v549_v1 = vmax.f32 %v485_v32, 0.0 }
  0x67   :  { %v550_v34 = vmax.f32 %v486_v33, 0.0 }
  0x68   :  { %613 = vst [vmem:[%s1503_s6 + $0x1f0] sm:$0xff] %v549_v1 }
  0x69   :  { %614 = vst [vmem:[%s1503_s6 + $0x1f8] sm:$0xff] %v550_v34 }

// kernel: bottleneck_forward.6
= control target key start
LH: loop header
LB: loop body
LE: loop exit
PB: predicated region body
PF: predicated region fallthrough
CT: control target
= control target key end

     0   :  { %s6460_s21 = smov 0   ;;  %s8219_s0 = inlined_call_operand.vmem [shape: f32[2,16,16,128], index: 0, kind: input, shape index: {}]   ;;  %s8220_s1 = inlined_call_operand.vmem [shape: bf16[3,3,128,128], index: 1, kind: input, shape index: {}]   ;;  %s8221_s2 = inlined_call_operand.vmem [shape: f32[1,128], index: 2, kind: input, shape index: {}]   ;;  %s8222_s3 = inlined_call_operand.vmem [shape: f32[1,128], index: 3, kind: input, shape index: {}]   ;;  %s8223_s4 = inlined_call_operand.vmem [shape: f32[2,16,16,128], index: 4, kind: output, shape index: {0}]   ;;  %s8224_s5 = inlined_call_operand.vmem [shape: f32[2,8,128], index: 5, kind: output, shape index: {1}]   ;;  %s8225_s6 = inlined_call_operand.vmem [shape: f32[2,8,128], index: 6, kind: output, shape index: {2}]  }
   0x1 LB: > { %s5588_s22 = sadd.s32 4294967295, %s6422_s21   ;;  %p5592_p0 = scmp.ge.s32.totalorder %s6422_s21, 1  ;;  %s6422_s21 = sphi %s6460_s21, %s17_s21  }
   0x2   : > { %p217_p1 = scmp.lt.s32.totalorder %s6422_s21, 3 }
   0x4   : > { %p218_p2 = pnand %p5592_p0, %p217_p1 }
   0x6   : > { %221 = sbr.rel (%p218_p2) target bundleno = 818 (0x332), region = 36 }
   0xb   : > { %v6290_v0 = vld [vmem:[%s8220_s1 + $0x78] sm:$0xff]  ;;  %p255_p3 = scmp.lt.s32.totalorder %s5588_s22, 1  ;;  %v6424_v1 = vmov 0   ;;  %v6289_v2 = vld [vmem:[%s8220_s1 + $0x70] sm:$0xff]  ;;  %v6481_v3 = vld [vmem:[%s8221_s2] ss:$0 sm:$0xff] }
   0xc   : > { %291 = vst [vmem:[#allocation2 + $0x44] sm:$0xf] %v6424_v1  ;;  %6379 = vmatpush.bf16.msra.mxu1 %v6290_v0  ;;  %6380 = vmatpush.bf16.msra.mxu2 %v6290_v0  ;;  %v6495_v4 = vld [vmem:[%s8222_s3] ss:$0 sm:$0xff]  ;;  %v6288_v5 = vld [vmem:[%s8220_s1 + $0x68] sm:$0xff]  ;;  %v6286_v17 = vld [vmem:[%s8220_s1 + $0x58] sm:$0xff] }
   0xd   : > { %s8279_s22 = smov (!%p255_p3, %s5588_s22), 1  ;;  %292 = vst [vmem:[#allocation2 + $0x48] sm:$0xf] %v6424_v1  ;;  %6381 = vmatpush.bf16.msra.mxu3 %v6290_v0  ;;  %1127 = vmatpush.bf16.msra.mxu0 %v6290_v0  ;;  %v6287_v12 = vld [vmem:[%s8220_s1 + $0x60] sm:$0xff]  ;;  %v6285_v18 = vld [vmem:[%s8220_s1 + $0x50] sm:$0xff]  ;;  %v6284_v19 = vld [vmem:[%s8220_s1 + $0x48] sm:$0xff] }
   0xe   : > { %s6257_s29 = sshll.u32 %s8279_s22, 8  ;;  %274 = vst [vmem:[#allocation2] sm:$0xf] %v6424_v1  ;;  %v6283_v20 = vld [vmem:[%s8220_s1 + $0x40] sm:$0xff]  ;;  %v6298_v23 = vld [vmem:[%s8220_s1 + $0xb8] sm:$0xff]  ;;  %v6297_v30 = vld [vmem:[%s8220_s1 + $0xb0] sm:$0xff] }
   0xf   : > { %s6490_s8 = scalar_lea.vmem %s8219_s0, %s6257_s29  ;;  %275 = vst [vmem:[#allocation2 + $0x4] sm:$0xf] %v6424_v1  ;;  %v6322_v25 = vld [vmem:[%s8220_s1 + $0xf8] sm:$0xff]  ;;  %v6321_v32 = vld [vmem:[%s8220_s1 + $0xf0] sm:$0xff]  ;;  %vm595_vm0 = vsmask.f32 256  ;;  %s7992_s16 = scalar_lea.vmem %s8223_s4, %s6257_s29 }
  0x10   : > { %6382 = vmatpush.bf16.msra.mxu1 %v6289_v2  ;;  %6383 = vmatpush.bf16.msra.mxu2 %v6289_v2  ;;  %v352_v6 = vld [vmem:[%s6490_s8 + $0x30] sm:$0xff]  ;;  %v353_v7 = vld [vmem:[%s6490_s8 + $0x38] sm:$0xff]  ;;  %276 = vst [vmem:[#allocation2 + $0x8] sm:$0xf] %v6424_v1  ;;  %v354_v34 = vld [vmem:[%s6490_s8 + $0x40] sm:$0xff]  ;;  %s5597_s29 = sshll.u32 %s8279_s22, 3 }
  0x11   : > { %6384 = vmatpush.bf16.msra.mxu3 %v6289_v2  ;;  %1128 = vmatpush.bf16.msra.mxu0 %v6289_v2  ;;  %v388_v8 = vmul.f32 %v6481_v3, %v352_v6  ;;  %v389_v9 = vmul.f32 %v6481_v3, %v353_v7  ;;  %277 = vst [vmem:[#allocation2 + $0xc] sm:$0xf] %v6424_v1  ;;  %v360_v22 = vld [vmem:[%s6490_s8 + $0x70] sm:$0xff]  ;;  %v361_v26 = vld [vmem:[%s6490_s8 + $0x78] sm:$0xff]  ;;  %v355_v37 = vld [vmem:[%s6490_s8 + $0x48] sm:$0xff]  ;;  %s268_s19 = scalar_lea.vmem %s8224_s5, %s5597_s29  ;;  %s272_s24 = scalar_lea.vmem %s8225_s6, %s5597_s29 }
  0x12   : > { %278 = vst [vmem:[#allocation2 + $0x10] sm:$0xf] %v6424_v1  ;;  %v368_v27 = vld [vmem:[%s6490_s8 + $0xb0] sm:$0xff]  ;;  %v6282_v28 = vld [vmem:[%s8220_s1 + $0x38] sm:$0xff]  ;;  %v396_v35 = vmul.f32 %v6481_v3, %v360_v22  ;;  %v397_v36 = vmul.f32 %v6481_v3, %v361_v26  ;;  %v362_v40 = vld [vmem:[%s6490_s8 + $0x80] sm:$0xff]  ;;  %v390_v41 = vmul.f32 %v6481_v3, %v354_v34  ;;  %v391_v43 = vmul.f32 %v6481_v3, %v355_v37 }
  0x13   : > { %v424_v10 = vadd.f32 %v6495_v4, %v388_v8  ;;  %v425_v11 = vadd.f32 %v6495_v4, %v389_v9  ;;  %279 = vst [vmem:[#allocation2 + $0x14] sm:$0xf] %v6424_v1  ;;  %v369_v29 = vld [vmem:[%s6490_s8 + $0xb8] sm:$0xff]  ;;  %v6281_v33 = vld [vmem:[%s8220_s1 + $0x30] sm:$0xff]  ;;  %v404_v38 = vmul.f32 %v6481_v3, %v368_v27  ;;  %v363_v42 = vld [vmem:[%s6490_s8 + $0x88] sm:$0xff]  ;;  %v398_v46 = vmul.f32 %v6481_v3, %v362_v40 }
  0x14   : > { %6385 = vmatpush.bf16.msra.mxu1 %v6288_v5  ;;  %6386 = vmatpush.bf16.msra.mxu2 %v6288_v5  ;;  %280 = vst [vmem:[#allocation2 + $0x18] sm:$0xf] %v6424_v1  ;;  %v6330_v31 = vld [vmem:[%s8220_s1 + $0x138] sm:$0xff]  ;;  %v405_v39 = vmul.f32 %v6481_v3, %v369_v29  ;;  %v432_v44 = vadd.f32 %v6495_v4, %v396_v35  ;;  %v370_v47 = vld [vmem:[%s6490_s8 + $0xc0] sm:$0xff]  ;;  %v371_v48 = vld [vmem:[%s6490_s8 + $0xc8] sm:$0xff] }
  0x15   : > { %6387 = vmatpush.bf16.msra.mxu3 %v6288_v5  ;;  %1129 = vmatpush.bf16.msra.mxu0 %v6288_v5  ;;  %v456_v13 = vmax.f32 %v424_v10, 0.0  ;;  %v457_v14 = vmax.f32 %v425_v11, 0.0  ;;  %281 = vst [vmem:[#allocation2 + $0x1c] sm:$0xf] %v6424_v1  ;;  %v433_v45 = vadd.f32 %v6495_v4, %v397_v36  ;;  %v440_v49 = vadd.f32 %v6495_v4, %v404_v38  ;;  %v346_v56 = vld [vmem:[%s6490_s8] sm:$0xff]  ;;  %v347_v60 = vld [vmem:[%s6490_s8 + $0x8] sm:$0xff] }
  0x16   : > { %282 = vst [vmem:[#allocation2 + $0x20] sm:$0xf] %v6424_v1  ;;  %v441_v50 = vadd.f32 %v6495_v4, %v405_v39  ;;  %v399_v51 = vmul.f32 %v6481_v3, %v363_v42  ;;  %v6625_v52 = vadd.f32 %v6495_v4, %v390_v41  ;;  %v427_v53 = vadd.f32 %v6495_v4, %v391_v43  ;;  %v356_v5 = vld [vmem:[%s6490_s8 + $0x50] sm:$0xff]  ;;  %v357_v6 = vld [vmem:[%s6490_s8 + $0x58] sm:$0xff]  ;;  %v6319_v29 = vld [vmem:[%s8220_s1 + $0xe0] sm:$0xff] }
  0x17   : > { %v488_v15 = vpack.c.bf16 %v456_v13, %v456_v13  ;;  %v489_v16 = vpack.c.bf16 %v457_v14, %v457_v14  ;;  %283 = vst [vmem:[#allocation2 + $0x24] sm:$0xf] %v6424_v1  ;;  %v6259_v24 = vld [vmem:[#allocation2 + $0x4] sm:$0xff]  ;;  %v406_v54 = vmul.f32 %v6481_v3, %v370_v47  ;;  %v407_v55 = vmul.f32 %v6481_v3, %v371_v48  ;;  %v364_v11 = vld [vmem:[%s6490_s8 + $0x90] sm:$0xff]  ;;  %v373_v26 = vld [vmem:[%s6490_s8 + $0xd8] sm:$0xff] }
  0x18   : > { %6388 = vmatpush.bf16.msra.mxu1 %v6287_v12  ;;  %6389 = vmatpush.bf16.msra.mxu2 %v6287_v12  ;;  %284 = vst [vmem:[#allocation2 + $0x28] sm:$0xf] %v6424_v1  ;;  %v464_v57 = vmax.f32 %v432_v44, 0.0  ;;  %v465_v58 = vmax.f32 %v433_v45, 0.0  ;;  %v434_v59 = vadd.f32 %v6495_v4, %v398_v46  ;;  %v472_v61 = vmax.f32 %v440_v49, 0.0  ;;  %v372_v13 = vld [vmem:[%s6490_s8 + $0xd0] sm:$0xff] }
  0x19   : > { %6390 = vmatpush.bf16.msra.mxu3 %v6287_v12  ;;  %1130 = vmatpush.bf16.msra.mxu0 %v6287_v12  ;;  %521 = vst [vmem:[#allocation2 + $0x44] sm:$0xf] %v488_v15  ;;  %v473_v62 = vmax.f32 %v441_v50, 0.0  ;;  %v435_v63 = vadd.f32 %v6495_v4, %v399_v51  ;;  %v458_v0 = vmax.f32 %v6625_v52, 0.0  ;;  %v382_v2 = vmul.f32 %v6481_v3, %v346_v56  ;;  %v365_v12 = vld [vmem:[%s6490_s8 + $0x98] sm:$0xff]  ;;  %v6328_v36 = vld [vmem:[%s8220_s1 + $0x128] sm:$0xff] }
  0x1a   : > { %522 = vst [vmem:[#allocation2 + $0x48] sm:$0xf] %v489_v16  ;;  %v459_v7 = vmax.f32 %v427_v53, 0.0  ;;  %v6644_v8 = vadd.f32 %v6495_v4, %v406_v54  ;;  %v6647_v9 = vadd.f32 %v6495_v4, %v407_v55  ;;  %v383_v10 = vmul.f32 %v6481_v3, %v347_v60  ;;  %v6279_v37 = vld [vmem:[%s8220_s1 + $0x20] sm:$0xff]  ;;  %v349_v42 = vld [vmem:[%s6490_s8 + $0x18] sm:$0xff] }
  0x1b   : > { %285 = vst [vmem:[#allocation2 + $0x2c] sm:$0xf] %v6424_v1  ;;  %v496_v14 = vpack.c.bf16 %v464_v57, %v464_v57  ;;  %v497_v15 = vpack.c.bf16 %v465_v58, %v465_v58  ;;  %v466_v16 = vmax.f32 %v434_v59, 0.0  ;;  %v505_v22 = vpack.c.bf16 %v473_v62, %v473_v62 }
  0x1c   : > { %6391 = vmatpush.bf16.msra.mxu1 %v6286_v17  ;;  %6392 = vmatpush.bf16.msra.mxu2 %v6286_v17  ;;  %286 = vst [vmem:[#allocation2 + $0x30] sm:$0xf] %v6424_v1  ;;  %v418_v27 = vadd.f32 %v6495_v4, %v382_v2  ;;  %v475_v34 = vmax.f32 %v6647_v9, 0.0  ;;  %v419_v35 = vadd.f32 %v6495_v4, %v383_v10  ;;  %vm596_vm1 = vsmask.f32 4368 }
  0x1d   : > { %6393 = vmatpush.bf16.msra.mxu3 %v6286_v17  ;;  %1131 = vmatpush.bf16.msra.mxu0 %v6286_v17  ;;  %287 = vst [vmem:[#allocation2 + $0x34] sm:$0xf] %v6424_v1  ;;  %v6296_v17 = vld [vmem:[%s8220_s1 + $0xa8] sm:$0xff]  ;;  %v408_v38 = vmul.f32 %v6481_v3, %v372_v13  ;;  %v491_v39 = vpack.c.bf16 %v459_v7, %v459_v7  ;;  %vm6793_vm2 = vmor %vm595_vm0, %vm596_vm1  ;;  %vm1465_vm3 = vsmask.f32 3328 }
  0x1e   : > { %288 = vst [vmem:[#allocation2 + $0x38] sm:$0xf] %v6424_v1  ;;  %v498_v40 = vpack.c.bf16 %v466_v16, %v466_v16  ;;  %v409_v45 = vmul.f32 %v6481_v3, %v373_v26  ;;  %v450_v47 = vmax.f32 %v418_v27, 0.0  ;;  %v451_v50 = vmax.f32 %v419_v35, 0.0  ;;  %v359_v13 = vld [vmem:[%s6490_s8 + $0x68] sm:$0xff] }
  0x1f   : > { %289 = vst [vmem:[#allocation2 + $0x3c] sm:$0xf] %v6424_v1  ;;  %v444_v51 = vadd.f32 %v6495_v4, %v408_v38  ;;  %v385_v52 = vmul.f32 %v6481_v3, %v349_v42  ;;  %v507_v55 = vpack.c.bf16 %v475_v34, %v475_v34  ;;  %v6317_v34 = vld [vmem:[%s8220_s1 + $0xd0] sm:$0xff]  ;;  %vm1466_vm4 = vsmask.f32 7440 }
  0x20   : > { %6394 = vmatpush.bf16.msra.mxu1 %v6285_v18  ;;  %6395 = vmatpush.bf16.msra.mxu2 %v6285_v18  ;;  %290 = vst [vmem:[#allocation2 + $0x40] sm:$0xf] %v6424_v1  ;;  %v445_v57 = vadd.f32 %v6495_v4, %v409_v45  ;;  %v482_v59 = vpack.c.bf16 %v450_v47, %v450_v47  ;;  %v6277_v42 = vld [vmem:[%s8220_s1 + $0x10] sm:$0xff]  ;;  %vm6803_vm5 = vmor %vm1465_vm3, %vm1466_vm4 }
  0x21   : > { %6396 = vmatpush.bf16.msra.mxu3 %v6285_v18  ;;  %1132 = vmatpush.bf16.msra.mxu0 %v6285_v18  ;;  %293 = vst [vmem:[#allocation2 + $0x4c] sm:$0xf] %v6424_v1  ;;  %v6263_v21 = vld [vmem:[#allocation2 + $0x44] sm:$0xff]  ;;  %v483_v62 = vpack.c.bf16 %v451_v50, %v451_v50 }
  0x22   : > { %294 = vst [vmem:[#allocation2 + $0x50] sm:$0xf] %v6424_v1  ;;  %v6320_v18 = vld [vmem:[%s8220_s1 + $0xe8] sm:$0xff]  ;;  %v477_v7 = vmax.f32 %v445_v57, 0.0 }
  0x23   : > { %295 = vst [vmem:[#allocation2 + $0x54] sm:$0xf] %v6424_v1  ;;  %v351_v50 = vld [vmem:[%s6490_s8 + $0x28] sm:$0xff] }
  0x24   : > { %6397 = vmatpush.bf16.msra.mxu1 %v6284_v19  ;;  %6398 = vmatpush.bf16.msra.mxu2 %v6284_v19  ;;  %296 = vst [vmem:[#allocation2 + $0x58] sm:$0xf] %v6424_v1  ;;  %v509_v27 = vpack.c.bf16 %v477_v7, %v477_v7  ;;  %v6292_v7 = vld [vmem:[%s8220_s1 + $0x88] sm:$0xff] }
  0x25   : > { %6399 = vmatpush.bf16.msra.mxu3 %v6284_v19  ;;  %1133 = vmatpush.bf16.msra.mxu0 %v6284_v19  ;;  %297 = vst [vmem:[#allocation2 + $0x5c] sm:$0xf] %v6424_v1  ;;  %v6329_v19 = vld [vmem:[%s8220_s1 + $0x130] sm:$0xff] }
  0x26   : > { %298 = vst [vmem:[#allocation2 + $0x60] sm:$0xf] %v6424_v1 }
  0x27   : > { %299 = vst [vmem:[#allocation2 + $0x64] sm:$0xf] %v6424_v1 }
  0x28   : > { %6400 = vmatpush.bf16.msra.mxu1 %v6283_v20  ;;  %6401 = vmatpush.bf16.msra.mxu2 %v6283_v20  ;;  %300 = vst [vmem:[#allocation2 + $0x68] sm:$0xf] %v6424_v1 }
  0x29   : > { %6402 = vmatpush.bf16.msra.mxu3 %v6283_v20  ;;  %1134 = vmatpush.bf16.msra.mxu0 %v6283_v20  ;;  %301 = vst [vmem:[#allocation2 + $0x6c] sm:$0xf] %v6424_v1  ;;  %v392_v20 = vmul.f32 %v6481_v3, %v356_v5 }
  0x2a   : > { %302 = vst [vmem:[#allocation2 + $0x70] sm:$0xf] %v6424_v1 }
  0x2b   : > { %1155 = vmatmul.bf16.vlgmr.msra.gmra.mxu1 %v6263_v21  ;;  %303 = vst [vmem:[#allocation2 + $0x74] sm:$0xf] %v6424_v1  ;;  %v504_v21 = vpack.c.bf16 %v472_v61, %v472_v61  ;;  %v428_v41 = vadd.f32 %v6495_v4, %v392_v20  ;;  %v374_v20 = vld [vmem:[%s6490_s8 + $0xe0] sm:$0xff] }
  0x2c   : > { %304 = vst [vmem:[#allocation2 + $0x78] sm:$0xf] %v6424_v1  ;;  %1981 = vmatpush.bf16.msrb.mxu2 %v6298_v23  ;;  %1135 = vmatmul.bf16.vlgmr.msra.gmra.mxu0 %v6259_v24  ;;  %v467_v23 = vmax.f32 %v435_v63, 0.0  ;;  %v6280_v24 = vld [vmem:[%s8220_s1 + $0x28] sm:$0xff]  ;;  %v476_v63 = vmax.f32 %v444_v51, 0.0  ;;  %v410_v26 = vmul.f32 %v6481_v3, %v374_v20 }
  0x2d   : > { %305 = vst [vmem:[#allocation2 + $0x7c] sm:$0xf] %v6424_v1  ;;  %2631 = vmatpush.bf16.msrb.mxu3 %v6322_v25  ;;  %1328 = vmatpush.bf16.msrb.mxu1 %v6282_v28  ;;  %v393_v25 = vmul.f32 %v6481_v3, %v357_v6  ;;  %v6295_v28 = vld [vmem:[%s8220_s1 + $0xa0] sm:$0xff]  ;;  %v460_v54 = vmax.f32 %v428_v41, 0.0  ;;  %v375_v41 = vld [vmem:[%s6490_s8 + $0xe8] sm:$0xff] }
  0x2e   : > { %306 = vst [vmem:[#allocation2 + $0x80] sm:$0xf] %v6424_v1  ;;  %2913 = vmatpush.bf16.msrb.mxu0 %v6330_v31  ;;  %v401_v31 = vmul.f32 %v6481_v3, %v365_v12  ;;  %v499_v43 = vpack.c.bf16 %v467_v23, %v467_v23  ;;  %v358_v12 = vld [vmem:[%s6490_s8 + $0x60] sm:$0xff]  ;;  %v6318_v23 = vld [vmem:[%s8220_s1 + $0xd8] sm:$0xff]  ;;  %v411_v45 = vmul.f32 %v6481_v3, %v375_v41 }
  0x2f   : > { %307 = vst [vmem:[#allocation2 + $0x84] sm:$0xf] %v6424_v1  ;;  %v429_v44 = vadd.f32 %v6495_v4, %v393_v25  ;;  %v492_v5 = vpack.c.bf16 %v460_v54, %v460_v54  ;;  %v394_v16 = vmul.f32 %v6481_v3, %v358_v12  ;;  %v6324_v12 = vld [vmem:[%s8220_s1 + $0x108] sm:$0xff] }
  0x30   : > { %308 = vst [vmem:[#allocation2 + $0x88] sm:$0xf] %v6424_v1  ;;  %1982 = vmatpush.bf16.msrb.mxu2 %v6297_v30  ;;  %v400_v30 = vmul.f32 %v6481_v3, %v364_v11  ;;  %v437_v49 = vadd.f32 %v6495_v4, %v401_v31 }
  0x31   : > { %309 = vst [vmem:[#allocation2 + $0x8c] sm:$0xf] %v6424_v1  ;;  %2632 = vmatpush.bf16.msrb.mxu3 %v6321_v32  ;;  %1329 = vmatpush.bf16.msrb.mxu1 %v6281_v33  ;;  %v348_v32 = vld [vmem:[%s6490_s8 + $0x10] sm:$0xff]  ;;  %v474_v33 = vmax.f32 %v6644_v8, 0.0  ;;  %v461_v56 = vmax.f32 %v429_v44, 0.0  ;;  %v430_v31 = vadd.f32 %v6495_v4, %v394_v16 }
  0x32   : > { %310 = vst [vmem:[#allocation2 + $0x90] sm:$0xf] %v6424_v1  ;;  %2914 = vmatpush.bf16.msrb.mxu0 %v6329_v19  ;;  %v384_v46 = vmul.f32 %v6481_v3, %v348_v32  ;;  %v436_v48 = vadd.f32 %v6495_v4, %v400_v30  ;;  %v469_v61 = vmax.f32 %v437_v49, 0.0  ;;  %v367_v19 = vld [vmem:[%s6490_s8 + $0xa8] sm:$0xff]  ;;  %v6278_v30 = vld [vmem:[%s8220_s1 + $0x18] sm:$0xff]  ;;  %v350_v49 = vld [vmem:[%s6490_s8 + $0x20] sm:$0xff] }
  0x33   : > { %311 = vst [vmem:[#allocation2 + $0x94] sm:$0xf] %v6424_v1  ;;  %v506_v53 = vpack.c.bf16 %v474_v33, %v474_v33  ;;  %v493_v6 = vpack.c.bf16 %v461_v56, %v461_v56  ;;  %v403_v25 = vmul.f32 %v6481_v3, %v367_v19  ;;  %v6293_v33 = vld [vmem:[%s8220_s1 + $0x90] sm:$0xff]  ;;  %v387_v56 = vmul.f32 %v6481_v3, %v351_v50  ;;  %v548_v16 = vld [vmem:[#allocation2 + $0x4] sm:$0xf] }
  0x34   : > { %312 = vst [vmem:[#allocation2 + $0x98] sm:$0xf] %v6424_v1  ;;  %1983 = vmatpush.bf16.msrb.mxu2 %v6296_v17  ;;  %v420_v58 = vadd.f32 %v6495_v4, %v384_v46  ;;  %v468_v60 = vmax.f32 %v436_v48, 0.0  ;;  %v501_v11 = vpack.c.bf16 %v469_v61, %v469_v61  ;;  %v395_v17 = vmul.f32 %v6481_v3, %v359_v13  ;;  %v547_v19 = vld [vmem:[#allocation2] sm:$0x8] }
  0x35   : > { %313 = vst [vmem:[#allocation2 + $0x9c] sm:$0xf] %v6424_v1  ;;  %2633 = vmatpush.bf16.msrb.mxu3 %v6320_v18  ;;  %1330 = vmatpush.bf16.msrb.mxu1 %v6280_v24  ;;  %v366_v18 = vld [vmem:[%s6490_s8 + $0xa0] sm:$0xff]  ;;  %v604_v20 = vshrl.u32 %v548_v16, 16 }
  0x36   : > { %314 = vst [vmem:[#allocation2 + $0xa0] sm:$0xf] %v6424_v1  ;;  %2915 = vmatpush.bf16.msrb.mxu0 %v6328_v36  ;;  %v452_v8 = vmax.f32 %v420_v58, 0.0  ;;  %v500_v10 = vpack.c.bf16 %v468_v60, %v468_v60  ;;  %v402_v24 = vmul.f32 %v6481_v3, %v366_v18  ;;  %v431_v32 = vadd.f32 %v6495_v4, %v395_v17  ;;  %v549_v17 = vld [vmem:[#allocation2 + $0x8] sm:$0xf] }
  0x37   : > { %315 = vst [vmem:[#allocation2 + $0xa4] sm:$0xf] %v6424_v1  ;;  %v439_v36 = vadd.f32 %v6495_v4, %v403_v25  ;;  %v423_v60 = vadd.f32 %v6495_v4, %v387_v56  ;;  %v607_v25 = vshll.u32 %v548_v16, 16 }
  0x38   : > { %316 = vst [vmem:[#allocation2 + $0xa8] sm:$0xf] %v6424_v1  ;;  %1984 = vmatpush.bf16.msrb.mxu2 %v6295_v28  ;;  %v484_v28 = vpack.c.bf16 %v452_v8, %v452_v8  ;;  %v438_v35 = vadd.f32 %v6495_v4, %v402_v24  ;;  %v6325_v8 = vld [vmem:[%s8220_s1 + $0x110] sm:$0xff]  ;;  %v599_v24 = vshrl.u32 %v547_v19, 16 }
  0x39   : > { %317 = vst [vmem:[#allocation2 + $0xac] sm:$0xf] %v6424_v1  ;;  %2634 = vmatpush.bf16.msrb.mxu3 %v6319_v29  ;;  %1331 = vmatpush.bf16.msrb.mxu1 %v6279_v37  ;;  %v6327_v29 = vld [vmem:[%s8220_s1 + $0x120] sm:$0xff]  ;;  %v446_v37 = vadd.f32 %v6495_v4, %v410_v26  ;;  %v471_v44 = vmax.f32 %v439_v36, 0.0  ;;  %v616_v26 = vshll.u32 %v549_v17, 16 }
  0x3a   : > { %318 = vst [vmem:[#allocation2 + $0xb0] sm:$0xf] %v6424_v1  ;;  %2916 = vmatpush.bf16.msrb.mxu0 %v6327_v29  ;;  %v1417_v29 = vld [vmem:[#allocation2 + $0x4] sm:$0xf] }
  0x3b   : > { %319 = vst [vmem:[#allocation2 + $0xb4] sm:$0xf] %v6424_v1  ;;  %v478_v46 = vmax.f32 %v446_v37, 0.0  ;;  %v503_v54 = vpack.c.bf16 %v471_v44, %v471_v44  ;;  %v6338_v37 = vld [vmem:[%s8220_s1 + $0x178] sm:$0xff] }
  0x3c   : > { %320 = vst [vmem:[#allocation2 + $0xb8] sm:$0xf] %v6424_v1 }
  0x3d   : > { %321 = vst [vmem:[#allocation2 + $0xbc] sm:$0xf] %v6424_v1  ;;  %2635 = vmatpush.bf16.msrb.mxu3 %v6318_v23  ;;  %1332 = vmatpush.bf16.msrb.mxu1 %v6278_v30  ;;  %v510_v58 = vpack.c.bf16 %v478_v46, %v478_v46  ;;  %v1418_v30 = vld [vmem:[#allocation2 + $0x8] sm:$0xf]  ;;  %v1419_v46 = vld [vmem:[#allocation2 + $0xc] sm:$0x1] }
  0x3e   : > { %322 = vst [vmem:[#allocation2 + $0xc0] sm:$0xf] %v6424_v1  ;;  %v1478_v36 = vshll.u32 %v1418_v30, 16  ;;  %v1482_v41 = vshrl.u32 %v1418_v30, 16 }
  0x3f   : > { %323 = vst [vmem:[#allocation2 + $0xc4] sm:$0xf] %v6424_v1 }
  0x40   : > { %324 = vst [vmem:[#allocation2 + $0xc8] sm:$0xf] %v6424_v1 }
  0x41   : > { %325 = vst [vmem:[#allocation2 + $0xcc] sm:$0xf] %v6424_v1  ;;  %2636 = vmatpush.bf16.msrb.mxu3 %v6317_v34  ;;  %1333 = vmatpush.bf16.msrb.mxu1 %v6277_v42  ;;  %v1469_v34 = vshrl.u32 %v1417_v29, 16 }
  0x42   : > { %326 = vst [vmem:[#allocation2 + $0xd0] sm:$0xf] %v6424_v1 }
  0x43   : > { %327 = vst [vmem:[#allocation2 + $0xd4] sm:$0xf] %v6424_v1 }
  0x44   : > { %328 = vst [vmem:[#allocation2 + $0xd8] sm:$0xf] %v6424_v1 }
  0x45   : > { %329 = vst [vmem:[#allocation2 + $0xdc] sm:$0xf] %v6424_v1 }
  0x46   : > { %330 = vst [vmem:[#allocation2 + $0xe0] sm:$0xf] %v6424_v1 }
  0x47   : > { %331 = vst [vmem:[#allocation2 + $0xe4] sm:$0xf] %v6424_v1 }
  0x48   : > { %332 = vst [vmem:[#allocation2 + $0xe8] sm:$0xf] %v6424_v1 }
  0x49   : > { %333 = vst [vmem:[#allocation2 + $0xec] sm:$0xf] %v6424_v1 }
  0x4a   : > { %334 = vst [vmem:[#allocation2 + $0xf0] sm:$0xf] %v6424_v1 }
  0x4b   : > { %335 = vst [vmem:[#allocation2 + $0xf4] sm:$0xf] %v6424_v1 }
  0x4c   : > { %336 = vst [vmem:[#allocation2 + $0xf8] sm:$0xf] %v6424_v1 }
  0x4d   : > { %337 = vst [vmem:[#allocation2 + $0xfc] sm:$0xf] %v6424_v1 }
  0x4e   : > { %338 = vst [vmem:[#allocation2 + $0x100] sm:$0xf] %v6424_v1 }
  0x4f   : > { %339 = vst [vmem:[#allocation2 + $0x104] sm:$0xf] %v6424_v1 }
  0x50   : > { %340 = vst [vmem:[#allocation2 + $0x108] sm:$0xf] %v6424_v1 }
  0x51   : > { %341 = vst [vmem:[#allocation2 + $0x10c] sm:$0xf] %v6424_v1 }
  0x52   : > { %342 = vst [vmem:[#allocation2 + $0x110] sm:$0xf] %v6424_v1 }
  0x53   : > { %343 = vst [vmem:[#allocation2 + $0x114] sm:$0xf] %v6424_v1 }
  0x54   : > { %344 = vst [vmem:[#allocation2 + $0x118] sm:$0xf] %v6424_v1 }
  0x55   : > { %345 = vst [vmem:[#allocation2 + $0x11c] sm:$0xf] %v6424_v1  ;;  %v490_v1 = vpack.c.bf16 %v458_v0, %v458_v0  ;;  %v421_v0 = vadd.f32 %v6495_v4, %v385_v52 }
  0x56   : > { %529 = vst [vmem:[#allocation2 + $0x84] sm:$0xf] %v496_v14  ;;  %v508_v14 = vpack.c.bf16 %v476_v63, %v476_v63 }
  0x57   : > { %530 = vst [vmem:[#allocation2 + $0x88] sm:$0xf] %v497_v15  ;;  %v453_v15 = vmax.f32 %v421_v0, 0.0  ;;  %v455_v0 = vmax.f32 %v423_v60, 0.0 }
  0x58   : > { %537 = vst [vmem:[#allocation2 + $0xc4] sm:$0xf] %v504_v21 }
  0x59   : > { %538 = vst [vmem:[#allocation2 + $0xc8] sm:$0xf] %v505_v22  ;;  %v6294_v22 = vld [vmem:[%s8220_s1 + $0x98] sm:$0xff]  ;;  %v485_v38 = vpack.c.bf16 %v453_v15, %v453_v15  ;;  %v6323_v15 = vld [vmem:[%s8220_s1 + $0x100] sm:$0xff] }
  0x5a   : > { %523 = vst [vmem:[#allocation2 + $0x54] sm:$0xf] %v490_v1  ;;  %1985 = vmatpush.bf16.msrb.mxu2 %v6294_v22  ;;  %v6326_v1 = vld [vmem:[%s8220_s1 + $0x118] sm:$0xff] }
  0x5b   : > { %524 = vst [vmem:[#allocation2 + $0x58] sm:$0xf] %v491_v39  ;;  %v462_v39 = vmax.f32 %v430_v31, 0.0  ;;  %2917 = vmatpush.bf16.msrb.mxu0 %v6326_v1  ;;  %v6362_v31 = vld [vmem:[%s8220_s1 + $0x1b8] sm:$0xff] }
  0x5c   : > { %531 = vst [vmem:[#allocation2 + $0x94] sm:$0xf] %v498_v40  ;;  %v463_v40 = vmax.f32 %v431_v32, 0.0  ;;  %v6370_v32 = vld [vmem:[%s8220_s1 + $0x1f8] sm:$0xff] }
  0x5d   : > { %532 = vst [vmem:[#allocation2 + $0x98] sm:$0xf] %v499_v43  ;;  %v470_v43 = vmax.f32 %v438_v35, 0.0  ;;  %v494_v47 = vpack.c.bf16 %v462_v39, %v462_v39  ;;  %v1472_v35 = vshll.u32 %v1417_v29, 16 }
  0x5e   : > { %v6267_v2 = vld [vmem:[#allocation2 + $0x84] sm:$0xff]  ;;  %539 = vst [vmem:[#allocation2 + $0xd4] sm:$0xf] %v506_v53  ;;  %v495_v48 = vpack.c.bf16 %v463_v40, %v463_v40  ;;  %1986 = vmatpush.bf16.msrb.mxu2 %v6293_v33  ;;  %v447_v53 = vadd.f32 %v6495_v4, %v411_v45  ;;  %v5599_v33 = vrot.slane %v599_v24, 11 }
  0x5f   : > { %540 = vst [vmem:[#allocation2 + $0xd8] sm:$0xf] %v507_v55  ;;  %1175 = vmatmul.bf16.vlgmr.msra.gmra.mxu2 %v6267_v2  ;;  %v502_v52 = vpack.c.bf16 %v470_v43, %v470_v43  ;;  %v386_v55 = vmul.f32 %v6481_v3, %v350_v49  ;;  %2918 = vmatpush.bf16.msrb.mxu0 %v6325_v8  ;;  %v2102_v49 = vld [vmem:[#allocation2 + $0x10] sm:$0x8] }
  0x60   : > { %v6271_v9 = vld [vmem:[#allocation2 + $0xc4] sm:$0xff]  ;;  %515 = vst [vmem:[#allocation2 + $0x14] sm:$0xf] %v482_v59  ;;  %v479_v57 = vmax.f32 %v447_v53, 0.0  ;;  %v1484_v53 = vrot.slane %v1482_v41, 4 }
  0x61   : > { %516 = vst [vmem:[#allocation2 + $0x18] sm:$0xf] %v483_v62  ;;  %1195 = vmatmul.bf16.vlgmr.msra.gmra.mxu3 %v6271_v9  ;;  %v422_v59 = vadd.f32 %v6495_v4, %v386_v55  ;;  %v6316_v4 = vld [vmem:[%s8220_s1 + $0xc8] sm:$0xff] }
  0x62   : > { %v6264_v21 = vld [vmem:[#allocation2 + $0x54] sm:$0xff]  ;;  %525 = vst [vmem:[#allocation2 + $0x64] sm:$0xf] %v492_v5  ;;  %v511_v62 = vpack.c.bf16 %v479_v57, %v479_v57  ;;  %v487_v5 = vpack.c.bf16 %v455_v0, %v455_v0  ;;  %v6276_v9 = vld [vmem:[%s8220_s1 + $0x8] sm:$0xff]  ;;  %1987 = vmatpush.bf16.msrb.mxu2 %v6292_v7  ;;  %2637 = vmatpush.bf16.msrb.mxu3 %v6316_v4 }
  0x63   : > { %526 = vst [vmem:[#allocation2 + $0x68] sm:$0xf] %v493_v6  ;;  %1160 = vmatmul.bf16.gmra.mxu1 %v6264_v21  ;;  %v454_v63 = vmax.f32 %v422_v59, 0.0  ;;  %2919 = vmatpush.bf16.msrb.mxu0 %v6324_v12  ;;  %v613_v21 = vshrl.u32 %v549_v17, 16  ;;  %v2151_v59 = vshrl.u32 %v2102_v49, 16 }
  0x64   : > { %533 = vst [vmem:[#allocation2 + $0xa4] sm:$0xf] %v500_v10  ;;  %v6268_v61 = vld [vmem:[#allocation2 + $0x94] sm:$0xff]  ;;  %v6291_v10 = vld [vmem:[%s8220_s1 + $0x80] sm:$0xff]  ;;  %1334 = vmatpush.bf16.msrb.mxu1 %v6276_v9 }
  0x65   : > { %534 = vst [vmem:[#allocation2 + $0xa8] sm:$0xf] %v501_v11  ;;  %v486_v3 = vpack.c.bf16 %v454_v63, %v454_v63  ;;  %v6315_v11 = vld [vmem:[%s8220_s1 + $0xc0] sm:$0xff] }
  0x66   : > { %541 = vst [vmem:[#allocation2 + $0xe4] sm:$0xf] %v508_v14  ;;  %v6272_v2 = vld [vmem:[#allocation2 + $0xd4] sm:$0xff]  ;;  %v6275_v14 = vld [vmem:[%s8220_s1] sm:$0xff]  ;;  %1988 = vmatpush.bf16.msrb.mxu2 %v6291_v10  ;;  %2638 = vmatpush.bf16.msrb.mxu3 %v6315_v11  ;;  %v5807_v11 = vrot.slane %v2151_v59, 11 }
  0x67   : > { %542 = vst [vmem:[#allocation2 + $0xe8] sm:$0xf] %v509_v27  ;;  %2920 = vmatpush.bf16.msrb.mxu0 %v6323_v15  ;;  %v606_v27 = vrot.slane %v604_v20, 7  ;;  %v2103_v44 = vld [vmem:[#allocation2 + $0x14] sm:$0xf] }
  0x68   : > { %v6260_v51 = vld [vmem:[#allocation2 + $0x14] sm:$0xff]  ;;  %517 = vst [vmem:[#allocation2 + $0x24] sm:$0xf] %v484_v28  ;;  %1335 = vmatpush.bf16.msrb.mxu1 %v6275_v14  ;;  %v615_v28 = vrot.slane %v613_v21, 7  ;;  %v2159_v7 = vshll.u32 %v2103_v44, 16 }
  0x69   : > { %518 = vst [vmem:[#allocation2 + $0x28] sm:$0xf] %v485_v38  ;;  %1140 = vmatmul.bf16.gmra.mxu0 %v6260_v51  ;;  %v6378_v38 = vld [vmem:[%s8220_s1 + $0x238] sm:$0xff]  ;;  %v609_v1 = vor.u32 %v607_v25, %v606_v27  ;;  %v611_v39 = vrot.slane %v606_v27, 4  ;;  %v551_v56 = vld [vmem:[#allocation2 + $0x14] sm:$0xf] }
  0x6a   : > { %527 = vst [vmem:[#allocation2 + $0x74] sm:$0xf] %v494_v47  ;;  %v6265_v6 = vld [vmem:[#allocation2 + $0x64] sm:$0xff]  ;;  %v618_v40 = vor.u32 %v616_v26, %v615_v28  ;;  %4246 = vmatpush.bf16.msra.mxu2 %v6362_v31  ;;  %4528 = vmatpush.bf16.msra.mxu3 %v6370_v32  ;;  %v2104_v45 = vld [vmem:[#allocation2 + $0x18] sm:$0xf]  ;;  %v1471_v47 = vrot.slane %v1469_v34, 4 }
  0x6b   : > { %528 = vst [vmem:[#allocation2 + $0x78] sm:$0xf] %v495_v48  ;;  %5210 = vmatpush.bf16.msra.mxu0 %v6378_v38  ;;  %v1474_v48 = vrot.slane %v1472_v35, 5  ;;  %v610_v50 = vsel %vm6793_vm2, %v5599_v33, %v609_v1  ;;  %v2165_v55 = vshrl.u32 %v2104_v45, 16  ;;  %v552_v57 = vld [vmem:[#allocation2 + $0x18] sm:$0xf] }
  0x6c   : > { %535 = vst [vmem:[#allocation2 + $0xb4] sm:$0xf] %v502_v52  ;;  %v6269_v18 = vld [vmem:[#allocation2 + $0xa4] sm:$0xff]  ;;  %3595 = vmatpush.bf16.msra.mxu1 %v6338_v37  ;;  %v619_v51 = vsel %vm6793_vm2, %v611_v39, %v618_v40  ;;  %v1480_v52 = vrot.slane %v1478_v36, 5  ;;  %v2168_v8 = vshll.u32 %v2104_v45, 16  ;;  %v638_v20 = vshll.u32 %v552_v57, 16 }
  0x6d   : > { %536 = vst [vmem:[#allocation2 + $0xb8] sm:$0xf] %v503_v54  ;;  %v2156_v54 = vshrl.u32 %v2103_v44, 16  ;;  %v1475_v63 = vor.u32 %v1474_v48, %v1471_v47  ;;  %v2167_v4 = vrot.slane %v2165_v55, 7  ;;  %v1420_v15 = vld [vmem:[#allocation2 + $0x14] sm:$0xf] }
  0x6e   : > { %543 = vst [vmem:[#allocation2 + $0xf4] sm:$0xf] %v510_v58  ;;  %v6273_v22 = vld [vmem:[#allocation2 + $0xe4] sm:$0xff]  ;;  %v1488_v58 = vshll.u32 %v1419_v46, 16  ;;  %v1485_v0 = vor.u32 %v1484_v53, %v1480_v52  ;;  %v1421_v16 = vld [vmem:[#allocation2 + $0x18] sm:$0xf] }
  0x6f   : > { %544 = vst [vmem:[#allocation2 + $0xf8] sm:$0xf] %v511_v62  ;;  %1180 = vmatmul.bf16.gmra.mxu2 %v6268_v61  ;;  %v1216_v61 = vunpack.c.l.b16 %v610_v50  ;;  %v1217_v62 = vunpack.c.l.b16 %v619_v51  ;;  %v2170_v24 = vor.u32 %v2168_v8, %v2167_v4  ;;  %v1493_v26 = vshrl.u32 %v1420_v15, 16  ;;  %v6299_v38 = vld [vmem:[#allocation2 + $0x14] sm:$0xff]  ;;  %v1422_v1 = vld [vmem:[#allocation2 + $0x1c] sm:$0x1] }
  0x70   : > { %519 = vst [vmem:[#allocation2 + $0x34] sm:$0xf] %v486_v3  ;;  %v6261_v13 = vld [vmem:[#allocation2 + $0x24] sm:$0xff]  ;;  %v626_v3 = vshrl.u32 %v551_v56, 16  ;;  %v1490_v10 = vrot.slane %v1488_v58, 5  ;;  %v1486_v21 = vrot.slane %v1485_v0, 4 }
  0x71   : > { %1200 = vmatmul.bf16.gmra.mxu3 %v6272_v2  ;;  %520 = vst [vmem:[#allocation2 + $0x38] sm:$0xf] %v487_v5  ;;  %v550_v2 = vld [vmem:[#allocation2 + $0x10] sm:$0x8]  ;;  %v635_v5 = vshrl.u32 %v552_v57, 16  ;;  %v1248_v12 = vpack.c.b16 %v1217_v62, %v1216_v61  ;;  %v1496_v27 = vshll.u32 %v1420_v15, 16 }
  0x72   : > { %v6266_v23 = vld [vmem:[#allocation2 + $0x74] sm:$0xff]  ;;  %v621_v14 = vshrl.u32 %v550_v2, 16  ;;  %v628_v17 = vrot.slane %v626_v3, 7  ;;  %v1502_v28 = vshll.u32 %v1421_v16, 16  ;;  %v1506_v29 = vshrl.u32 %v1421_v16, 16 }
  0x73   : > { %1165 = vmatmul.bf16.gmra.mxu1 %v6265_v6  ;;  %v2158_v6 = vrot.slane %v2156_v54, 7  ;;  %v637_v19 = vrot.slane %v635_v5, 7  ;;  %v1491_v35 = vsel %vm6803_vm5, %v1486_v21, %v1490_v10  ;;  %v1495_v39 = vrot.slane %v1493_v26, 4  ;;  %v2106_v44 = vld [vmem:[#allocation2 + $0x24] sm:$0xf]  ;;  %v6361_v26 = vld [vmem:[%s8220_s1 + $0x1b0] sm:$0xff] }
  0x74   : > { %v6270_v60 = vld [vmem:[#allocation2 + $0xb4] sm:$0xff]  ;;  %v5600_v30 = vrot.slane %v621_v14, 11  ;;  %v633_v32 = vrot.slane %v628_v17, 4  ;;  %v1498_v40 = vrot.slane %v1496_v27, 5  ;;  %v6815_v41 = vrot.slane %v1502_v28, 5  ;;  %4247 = vmatpush.bf16.msra.mxu2 %v6361_v26 }
  0x75   : > { %v640_v33 = vor.u32 %v638_v20, %v637_v19  ;;  %v1870_v46 = vunpack.c.l.b16 %v1491_v35  ;;  %v2107_v49 = vld [vmem:[#allocation2 + $0x28] sm:$0xf]  ;;  %v554_v53 = vld [vmem:[#allocation2 + $0x24] sm:$0xf]  ;;  %v2105_v57 = vld [vmem:[#allocation2 + $0x20] sm:$0x8] }
  0x76   : > { %v6274_v9 = vld [vmem:[#allocation2 + $0xf4] sm:$0xff]  ;;  %v555_v54 = vld [vmem:[#allocation2 + $0x28] sm:$0xf]  ;;  %v1499_v55 = vor.u32 %v1498_v40, %v1495_v39  ;;  %v2178_v58 = vshrl.u32 %v2106_v44, 16  ;;  %v2187_v61 = vshrl.u32 %v2107_v49, 16  ;;  %v648_v0 = vshrl.u32 %v554_v53, 16 }
  0x77   : > { %v641_v48 = vsel %vm6793_vm2, %v633_v32, %v640_v33  ;;  %v657_v2 = vshrl.u32 %v555_v54, 16  ;;  %v651_v15 = vshll.u32 %v554_v53, 16  ;;  %v1424_v20 = vld [vmem:[#allocation2 + $0x28] sm:$0xf]  ;;  %v6369_v27 = vld [vmem:[%s8220_s1 + $0x1f0] sm:$0xff] }
  0x78   : > { %v6262_v43 = vld [vmem:[#allocation2 + $0x34] sm:$0xff]  ;;  %v2180_v8 = vrot.slane %v2178_v58, 7  ;;  %v650_v14 = vrot.slane %v648_v0, 7  ;;  %4529 = vmatpush.bf16.msra.mxu3 %v6369_v27  ;;  %v6300_v39 = vld [vmem:[#allocation2 + $0x24] sm:$0xff]  ;;  %v2108_v58 = vld [vmem:[#allocation2 + $0x30] sm:$0x8] }
  0x79   : > { %1145 = vmatmul.bf16.gmra.mxu0 %v6261_v13  ;;  %v1476_v13 = vrot.slane %v1475_v63, 4  ;;  %v553_v63 = vld [vmem:[#allocation2 + $0x20] sm:$0x8]  ;;  %v659_v16 = vrot.slane %v657_v2, 7  ;;  %v6337_v32 = vld [vmem:[%s8220_s1 + $0x170] sm:$0xff] }
  0x7a   : > { %v6377_v33 = vld [vmem:[%s8220_s1 + $0x230] sm:$0xff]  ;;  %v655_v35 = vrot.slane %v650_v14, 4  ;;  %3596 = vmatpush.bf16.msra.mxu1 %v6337_v32  ;;  %v1427_v27 = vld [vmem:[#allocation2 + $0x38] sm:$0xf] }
  0x7b   : > { %v1481_v34 = vsel %vm6803_vm5, %v1476_v13, %v1480_v52  ;;  %v1512_v52 = vshll.u32 %v1422_v1, 16  ;;  %v643_v13 = vshrl.u32 %v553_v63, 16  ;;  %v2109_v40 = vld [vmem:[#allocation2 + $0x34] sm:$0xf]  ;;  %5211 = vmatpush.bf16.msra.mxu0 %v6377_v33  ;;  %v556_v0 = vld [vmem:[#allocation2 + $0x30] sm:$0x8] }
  0x7c   : > { %v1869_v45 = vunpack.c.l.b16 %v1481_v34  ;;  %v653_v34 = vor.u32 %v651_v15, %v650_v14  ;;  %v2200_v53 = vshrl.u32 %v2109_v40, 16  ;;  %v665_v14 = vshrl.u32 %v556_v0, 16  ;;  %v1426_v15 = vld [vmem:[#allocation2 + $0x34] sm:$0xf] }
  0x7d   : > { %v1514_v5 = vrot.slane %v1512_v52, 5 }
  0x7e   : > { %v1901_v62 = vpack.c.b16 %v1870_v46, %v1869_v45  ;;  %v2110_v46 = vld [vmem:[#allocation2 + $0x38] sm:$0xf] }
  0x7f   : > { %1185 = vmatmul.bf16.gmra.mxu2 %v6269_v18  ;;  %v629_v18 = vshll.u32 %v551_v56, 16 }
  0x81   : > { %1205 = vmatmul.bf16.gmra.mxu3 %v6273_v22  ;;  %v2161_v22 = vor.u32 %v2159_v7, %v2158_v6  ;;  %v631_v31 = vor.u32 %v629_v18, %v628_v17  ;;  %v1500_v7 = vrot.slane %v1499_v55, 4  ;;  %v660_v17 = vshll.u32 %v555_v54, 16  ;;  %v1423_v18 = vld [vmem:[#allocation2 + $0x24] sm:$0xf]  ;;  %v557_v54 = vld [vmem:[#allocation2 + $0x34] sm:$0xf] }
  0x82   : > { %v558_v55 = vld [vmem:[#allocation2 + $0x38] sm:$0xf]  ;;  %v670_v2 = vshrl.u32 %v557_v54, 16 }
  0x83   : > { %1170 = vmatmul.bf16.gmra.mxu1 %v6266_v23  ;;  %v2163_v23 = vrot.slane %v2158_v6, 4  ;;  %v2162_v36 = vsel %vm6793_vm2, %v5807_v11, %v2161_v22  ;;  %v632_v47 = vsel %vm6793_vm2, %v5600_v30, %v631_v31  ;;  %v2173_v6 = vshrl.u32 %v2105_v57, 16 }
  0x84   : > { %v2519_v50 = vunpack.c.l.b16 %v2162_v36  ;;  %v1218_v59 = vunpack.c.l.b16 %v632_v47  ;;  %v2189_v11 = vrot.slane %v2187_v61, 7  ;;  %v1505_v21 = vsel %vm6803_vm5, %v1500_v7, %v6815_v41 }
  0x85   : > { %v2171_v37 = vsel %vm6793_vm2, %v2163_v23, %v2170_v24  ;;  %v5808_v19 = vrot.slane %v2173_v6, 11  ;;  %v2185_v24 = vrot.slane %v2180_v8, 4  ;;  %v1517_v30 = vshrl.u32 %v1423_v18, 16 }
  0x86   : > { %v2520_v51 = vunpack.c.l.b16 %v2171_v37  ;;  %v1520_v31 = vshll.u32 %v1423_v18, 16  ;;  %v662_v36 = vor.u32 %v660_v17, %v659_v16  ;;  %v1526_v37 = vshll.u32 %v1424_v20, 16 }
  0x87   : > { %v1871_v1 = vunpack.c.l.b16 %v1505_v21  ;;  %v1519_v45 = vrot.slane %v1517_v30, 4  ;;  %v2195_v7 = vshrl.u32 %v2108_v58, 16  ;;  %v672_v16 = vrot.slane %v670_v2, 7 }
  0x88   : > { %v2551_v3 = vpack.c.b16 %v2520_v51, %v2519_v50  ;;  %v1522_v50 = vrot.slane %v1520_v31, 5  ;;  %v1528_v51 = vrot.slane %v1526_v37, 5  ;;  %v673_v17 = vshll.u32 %v557_v54, 16  ;;  %v561_v54 = vld [vmem:[#allocation2 + $0x48] sm:$0xf] }
  0x89   : > { %1150 = vmatmul.bf16.gmra.mxu0 %v6262_v43  ;;  %v1508_v43 = vrot.slane %v1506_v29, 4  ;;  %v5601_v29 = vrot.slane %v643_v13, 11  ;;  %v5602_v30 = vrot.slane %v665_v14, 11  ;;  %v677_v32 = vrot.slane %v672_v16, 4 }
  0x8a   : > { %v675_v31 = vor.u32 %v673_v17, %v672_v16  ;;  %v1554_v37 = vshrl.u32 %v1427_v27, 16  ;;  %v701_v2 = vshrl.u32 %v561_v54, 16  ;;  %v704_v17 = vshll.u32 %v561_v54, 16  ;;  %v2114_v54 = vld [vmem:[#allocation2 + $0x50] sm:$0x8] }
  0x8b   : > { %v1509_v56 = vor.u32 %v1508_v43, %v6815_v41  ;;  %v654_v47 = vsel %vm6793_vm2, %v5601_v29, %v653_v34  ;;  %v1544_v29 = vshll.u32 %v1426_v15, 16 }
  0x8c   : > { %v703_v16 = vrot.slane %v701_v2, 7 }
  0x8d   : > { %v1510_v4 = vrot.slane %v1509_v56, 4 }
  0x8f   : > { %1190 = vmatmul.bf16.gmra.mxu2 %v6270_v60  ;;  %v1219_v60 = vunpack.c.l.b16 %v641_v48  ;;  %v1515_v22 = vsel %vm6803_vm5, %v1510_v4, %v1514_v5  ;;  %v663_v48 = vsel %vm6793_vm2, %v655_v35, %v662_v36  ;;  %v1523_v5 = vor.u32 %v1522_v50, %v1519_v45 }
  0x90   : > { %v1872_v41 = vunpack.c.l.b16 %v1515_v22  ;;  %v1221_v61 = vunpack.c.l.b16 %v663_v48  ;;  %v2202_v4 = vrot.slane %v2200_v53, 7  ;;  %v5809_v22 = vrot.slane %v2195_v7, 11  ;;  %v2113_v48 = vld [vmem:[#allocation2 + $0x48] sm:$0xf]  ;;  %v560_v53 = vld [vmem:[#allocation2 + $0x44] sm:$0xf] }
  0x91   : > { %1210 = vmatmul.bf16.gmra.mxu3 %v6274_v9  ;;  %v2181_v9 = vshll.u32 %v2106_v44, 16  ;;  %v1249_v10 = vpack.c.b16 %v1219_v60, %v1218_v59  ;;  %v2209_v59 = vshrl.u32 %v2110_v46, 16  ;;  %v1220_v60 = vunpack.c.l.b16 %v654_v47 }
  0x92   : > { %v1902_v63 = vpack.c.b16 %v1872_v41, %v1871_v1  ;;  %v1550_v36 = vshll.u32 %v1427_v27, 16  ;;  %v1546_v41 = vrot.slane %v1544_v29, 5  ;;  %v692_v0 = vshrl.u32 %v560_v53, 16  ;;  %v6360_v27 = vld [vmem:[%s8220_s1 + $0x1a8] sm:$0xff] }
  0x93   : > { %1336 = vmatmul.bf16.vlgmr.msrb.gmra.mxu1 %v1248_v12  ;;  %v2190_v12 = vshll.u32 %v2107_v49, 16  ;;  %v2183_v23 = vor.u32 %v2181_v9, %v2180_v8  ;;  %v1425_v49 = vld [vmem:[#allocation2 + $0x2c] sm:$0x1]  ;;  %v2203_v9 = vshll.u32 %v2109_v40, 16  ;;  %4248 = vmatpush.bf16.msra.mxu2 %v6360_v27 }
  0x94   : > { %v694_v14 = vrot.slane %v692_v0, 7 }
  0x95   : > { %v2192_v28 = vor.u32 %v2190_v12, %v2189_v11  ;;  %v2184_v43 = vsel %vm6793_vm2, %v5808_v19, %v2183_v23  ;;  %v2212_v11 = vshll.u32 %v2110_v46, 16  ;;  %v1250_v12 = vpack.c.b16 %v1221_v61, %v1220_v60  ;;  %v2111_v60 = vld [vmem:[#allocation2 + $0x40] sm:$0x8] }
  0x96   : > { %v2521_v56 = vunpack.c.l.b16 %v2184_v43  ;;  %v682_v19 = vshll.u32 %v558_v55, 16  ;;  %v2207_v23 = vrot.slane %v2202_v4, 4  ;;  %v2112_v43 = vld [vmem:[#allocation2 + $0x44] sm:$0xf]  ;;  %v676_v46 = vsel %vm6793_vm2, %v5602_v30, %v675_v31 }
  0x97   : > { %v2193_v44 = vsel %vm6793_vm2, %v2185_v24, %v2192_v28  ;;  %v2205_v24 = vor.u32 %v2203_v9, %v2202_v4  ;;  %v1541_v28 = vshrl.u32 %v1426_v15, 16  ;;  %v1222_v58 = vunpack.c.l.b16 %v676_v46  ;;  %v1431_v46 = vld [vmem:[#allocation2 + $0x4c] sm:$0x1] }
  0x98   : > { %v2522_v57 = vunpack.c.l.b16 %v2193_v44  ;;  %v2231_v61 = vshrl.u32 %v2113_v48, 16  ;;  %v2217_v4 = vshrl.u32 %v2111_v60, 16  ;;  %v2225_v9 = vshll.u32 %v2112_v43, 16 }
  0x99   : > { %2921 = vmatmul.bf16.vlgmr.msrb.gmra.mxu0 %v6299_v38  ;;  %v1530_v38 = vshrl.u32 %v1424_v20, 16  ;;  %v1524_v20 = vrot.slane %v1523_v5, 4  ;;  %v1543_v40 = vrot.slane %v1541_v28, 4  ;;  %v695_v15 = vshll.u32 %v560_v53, 16  ;;  %v6368_v28 = vld [vmem:[%s8220_s1 + $0x1e8] sm:$0xff] }
  0x9a   : > { %v2552_v8 = vpack.c.b16 %v2522_v57, %v2521_v56  ;;  %v2222_v57 = vshrl.u32 %v2112_v43, 16  ;;  %4530 = vmatpush.bf16.msra.mxu3 %v6368_v28  ;;  %v2115_v43 = vld [vmem:[#allocation2 + $0x54] sm:$0xf] }
  0x9b   : > { %v1532_v52 = vrot.slane %v1530_v38, 4  ;;  %v1529_v34 = vsel %vm6803_vm5, %v1524_v20, %v1528_v51  ;;  %v2206_v38 = vsel %vm6793_vm2, %v5809_v22, %v2205_v24  ;;  %v1547_v56 = vor.u32 %v1546_v41, %v1543_v40  ;;  %v6302_v41 = vld [vmem:[#allocation2 + $0x44] sm:$0xff] }
  0x9c   : > { %v1873_v44 = vunpack.c.l.b16 %v1529_v34  ;;  %v699_v34 = vrot.slane %v694_v14, 4 }
  0x9d   : > { %v1533_v6 = vor.u32 %v1532_v52, %v1528_v51  ;;  %v1552_v51 = vrot.slane %v1550_v36, 5  ;;  %v1556_v52 = vrot.slane %v1554_v37, 4  ;;  %v1548_v7 = vrot.slane %v1547_v56, 4 }
  0x9e   : > { %v2244_v56 = vshrl.u32 %v2115_v43, 16 }
  0x9f   : > { %1989 = vmatmul.bf16.vlgmr.msrb.gmra.mxu2 %v1901_v62  ;;  %v1536_v62 = vshll.u32 %v1425_v49, 16  ;;  %v1534_v21 = vrot.slane %v1533_v6, 4  ;;  %v2523_v49 = vunpack.c.l.b16 %v2206_v38  ;;  %v1557_v5 = vor.u32 %v1556_v52, %v1552_v51 }
  0xa0   : > { %v1553_v22 = vsel %vm6803_vm5, %v1548_v7, %v1552_v51 }
  0xa1   : > { %2639 = vmatmul.bf16.vlgmr.msrb.gmra.mxu3 %v2551_v3  ;;  %v679_v3 = vshrl.u32 %v558_v55, 16  ;;  %v1538_v13 = vrot.slane %v1536_v62, 5  ;;  %v1428_v55 = vld [vmem:[#allocation2 + $0x3c] sm:$0x1]  ;;  %v1875_v40 = vunpack.c.l.b16 %v1553_v22 }
  0xa2   : > { %v1560_v6 = vshll.u32 %v1428_v55, 16 }
  0xa3   : > { %1341 = vmatmul.bf16.gmra.mxu1 %v1249_v10  ;;  %v2211_v10 = vrot.slane %v2209_v59, 7  ;;  %v681_v18 = vrot.slane %v679_v3, 7  ;;  %v1539_v35 = vsel %vm6803_vm5, %v1534_v21, %v1538_v13  ;;  %v1430_v21 = vld [vmem:[#allocation2 + $0x48] sm:$0xf] }
  0xa4   : > { %v1874_v45 = vunpack.c.l.b16 %v1539_v35  ;;  %v1562_v20 = vrot.slane %v1560_v6, 5  ;;  %v706_v35 = vor.u32 %v704_v17, %v703_v16  ;;  %v1574_v36 = vshll.u32 %v1430_v21, 16  ;;  %v562_v6 = vld [vmem:[#allocation2 + $0x50] sm:$0x8]  ;;  %v1432_v16 = vld [vmem:[#allocation2 + $0x54] sm:$0xf] }
  0xa5   : > { %v2214_v26 = vor.u32 %v2212_v11, %v2211_v10  ;;  %v684_v33 = vor.u32 %v682_v19, %v681_v18  ;;  %v2233_v11 = vrot.slane %v2231_v61, 7  ;;  %v1429_v18 = vld [vmem:[#allocation2 + $0x44] sm:$0xf]  ;;  %v1558_v19 = vrot.slane %v1557_v5, 4 }
  0xa6   : > { %v1903_v62 = vpack.c.b16 %v1874_v45, %v1873_v44  ;;  %v1565_v31 = vshrl.u32 %v1429_v18, 16  ;;  %v1578_v38 = vshrl.u32 %v1430_v21, 16  ;;  %v707_v52 = vsel %vm6793_vm2, %v699_v34, %v706_v35  ;;  %v1433_v21 = vld [vmem:[#allocation2 + $0x58] sm:$0xf] }
  0xa7   : > { %v2215_v1 = vsel %vm6793_vm2, %v2207_v23, %v2214_v26  ;;  %v685_v47 = vsel %vm6793_vm2, %v677_v32, %v684_v33  ;;  %v5810_v23 = vrot.slane %v2217_v4, 11  ;;  %v1568_v32 = vshll.u32 %v1429_v18, 16 }
  0xa8   : > { %v2524_v50 = vunpack.c.l.b16 %v2215_v1  ;;  %v1223_v59 = vunpack.c.l.b16 %v685_v47  ;;  %v697_v33 = vor.u32 %v695_v15, %v694_v14  ;;  %v1563_v37 = vsel %vm6803_vm5, %v1558_v19, %v1562_v20  ;;  %v6336_v1 = vld [vmem:[%s8220_s1 + $0x168] sm:$0xff] }
  0xa9   : > { %2926 = vmatmul.bf16.gmra.mxu0 %v6300_v39  ;;  %v6301_v39 = vld [vmem:[#allocation2 + $0x34] sm:$0xff]  ;;  %v1567_v47 = vrot.slane %v1565_v31, 4  ;;  %3597 = vmatpush.bf16.msra.mxu1 %v6336_v1  ;;  %v6883_v53 = vrot.slane %v1574_v36, 5  ;;  %v1580_v55 = vrot.slane %v1578_v38, 4  ;;  %v1584_v61 = vshll.u32 %v1431_v46, 16  ;;  %v6888_v35 = vpop.f32.mrf.mxu0 }
  0xaa   : > { %v2553_v3 = vpack.c.b16 %v2524_v50, %v2523_v49  ;;  %v1251_v10 = vpack.c.b16 %v1223_v59, %v1222_v58  ;;  %v2116_v49 = vld [vmem:[#allocation2 + $0x58] sm:$0xf]  ;;  %v1876_v50 = vunpack.c.l.b16 %v1563_v37  ;;  %v1225_v0 = vunpack.c.l.b16 %v707_v52 }
  0xab   : > { %v564_v58 = vld [vmem:[#allocation2 + $0x58] sm:$0xf]  ;;  %v2256_v15 = vshll.u32 %v2116_v49, 16  ;;  %v709_v20 = vshrl.u32 %v562_v6, 16  ;;  %v1602_v34 = vshrl.u32 %v1433_v21, 16 }
  0xac   : > { %v1904_v5 = vpack.c.b16 %v1876_v50, %v1875_v40  ;;  %v723_v4 = vshrl.u32 %v564_v58, 16  ;;  %v6303_v46 = vld [vmem:[#allocation2 + $0x54] sm:$0xff]  ;;  %v1434_v50 = vld [vmem:[#allocation2 + $0x5c] sm:$0x1] }
  0xad   : > { %v5604_v36 = vrot.slane %v709_v20, 11  ;;  %v1436_v20 = vld [vmem:[#allocation2 + $0x68] sm:$0xf] }
  0xaf   : > { %1994 = vmatmul.bf16.gmra.mxu2 %v1902_v63  ;;  %v559_v63 = vld [vmem:[#allocation2 + $0x40] sm:$0x8] }
  0xb0   : > { %v687_v13 = vshrl.u32 %v559_v63, 16 }
  0xb1   : > { %2644 = vmatmul.bf16.gmra.mxu3 %v2552_v8  ;;  %v2224_v8 = vrot.slane %v2222_v57, 7  ;;  %v563_v57 = vld [vmem:[#allocation2 + $0x54] sm:$0xf] }
  0xb2   : > { %v5603_v30 = vrot.slane %v687_v13, 11  ;;  %v714_v7 = vshrl.u32 %v563_v57, 16  ;;  %v1586_v13 = vrot.slane %v1584_v61, 5 }
  0xb3   : > { %1346 = vmatmul.bf16.gmra.mxu1 %v1250_v12  ;;  %v2234_v12 = vshll.u32 %v2113_v48, 16  ;;  %v2227_v24 = vor.u32 %v2225_v9, %v2224_v8  ;;  %v2229_v26 = vrot.slane %v2224_v8, 4  ;;  %v1570_v48 = vrot.slane %v1568_v32, 5  ;;  %v6885_v8 = vpop.f32.mrf.mxu1 }
  0xb4   : > { %v698_v51 = vsel %vm6793_vm2, %v5603_v30, %v697_v33  ;;  %v1581_v9 = vor.u32 %v1580_v55, %v6883_v53  ;;  %v716_v22 = vrot.slane %v714_v7, 7  ;;  %v1592_v30 = vshll.u32 %v1432_v16, 16 }
  0xb5   : > { %v2236_v29 = vor.u32 %v2234_v12, %v2233_v11  ;;  %v2228_v44 = vsel %vm6793_vm2, %v5810_v23, %v2227_v24  ;;  %v1224_v63 = vunpack.c.l.b16 %v698_v51  ;;  %v1571_v2 = vor.u32 %v1570_v48, %v1567_v47  ;;  %v2118_v51 = vld [vmem:[#allocation2 + $0x64] sm:$0xf] }
  0xb6   : > { %v2525_v59 = vunpack.c.l.b16 %v2228_v44  ;;  %v2247_v11 = vshll.u32 %v2115_v43, 16  ;;  %v717_v23 = vshll.u32 %v563_v57, 16  ;;  %v725_v24 = vrot.slane %v723_v4, 7 }
  0xb7   : > { %v2237_v45 = vsel %vm6793_vm2, %v2229_v26, %v2236_v29  ;;  %v1252_v17 = vpack.c.b16 %v1225_v0, %v1224_v63  ;;  %v1572_v18 = vrot.slane %v1571_v2, 4  ;;  %v726_v26 = vshll.u32 %v564_v58, 16  ;;  %v2117_v63 = vld [vmem:[#allocation2 + $0x60] sm:$0x8]  ;;  %v567_v2 = vld [vmem:[#allocation2 + $0x68] sm:$0xf] }
  0xb8   : > { %v2526_v60 = vunpack.c.l.b16 %v2237_v45  ;;  %v1582_v27 = vrot.slane %v1581_v9, 4  ;;  %v1589_v29 = vshrl.u32 %v1432_v16, 16  ;;  %v1598_v33 = vshll.u32 %v1433_v21, 16  ;;  %v1435_v9 = vld [vmem:[#allocation2 + $0x64] sm:$0xf] }
  0xb9   : > { %2931 = vmatmul.bf16.gmra.mxu0 %v6301_v39  ;;  %v6376_v39 = vld [vmem:[%s8220_s1 + $0x228] sm:$0xff]  ;;  %v719_v37 = vor.u32 %v717_v23, %v716_v22  ;;  %v721_v38 = vrot.slane %v716_v22, 4  ;;  %v728_v1 = vor.u32 %v726_v26, %v725_v24  ;;  %v1594_v43 = vrot.slane %v1592_v30, 5 }
  0xba   : > { %5212 = vmatpush.bf16.msra.mxu0 %v6376_v39  ;;  %v2554_v12 = vpack.c.b16 %v2526_v60, %v2525_v59  ;;  %v1577_v39 = vsel %vm6803_vm5, %v1572_v18, %v6883_v53  ;;  %v1587_v40 = vsel %vm6803_vm5, %v1582_v27, %v1586_v13  ;;  %v6899_v47 = vrot.slane %v1598_v33, 5  ;;  %v566_v60 = vld [vmem:[#allocation2 + $0x64] sm:$0xf] }
  0xbb   : > { %v1604_v48 = vrot.slane %v1602_v34, 4  ;;  %v1877_v52 = vunpack.c.l.b16 %v1577_v39  ;;  %v1878_v53 = vunpack.c.l.b16 %v1587_v40  ;;  %v729_v55 = vsel %vm6793_vm2, %v721_v38, %v728_v1  ;;  %v6359_v38 = vld [vmem:[%s8220_s1 + $0x1a0] sm:$0xff] }
  0xbc   : > { %v2266_v0 = vshrl.u32 %v2118_v51, 16  ;;  %v736_v4 = vshrl.u32 %v566_v60, 16  ;;  %v2261_v13 = vshrl.u32 %v2117_v63, 16  ;;  %v1613_v24 = vshrl.u32 %v1435_v9, 16  ;;  %v6367_v1 = vld [vmem:[%s8220_s1 + $0x1e0] sm:$0xff]  ;;  %4249 = vmatpush.bf16.msra.mxu2 %v6359_v38 }
  0xbd   : > { %v1605_v61 = vor.u32 %v1604_v48, %v6899_v47  ;;  %v1905_v7 = vpack.c.b16 %v1878_v53, %v1877_v52  ;;  %v1622_v33 = vshll.u32 %v1436_v20, 16  ;;  %v1626_v34 = vshrl.u32 %v1436_v20, 16  ;;  %4531 = vmatpush.bf16.msra.mxu3 %v6367_v1 }
  0xbe   : > { %v2268_v18 = vrot.slane %v2266_v0, 7  ;;  %v738_v27 = vrot.slane %v736_v4, 7  ;;  %v1615_v48 = vrot.slane %v1613_v24, 4  ;;  %v569_v4 = vld [vmem:[#allocation2 + $0x74] sm:$0xf] }
  0xbf   : > { %1999 = vmatmul.bf16.gmra.mxu2 %v1903_v62  ;;  %v2253_v62 = vshrl.u32 %v2116_v49, 16  ;;  %v6901_v49 = vpop.f32.mrf.mxu1  ;;  %v1606_v16 = vrot.slane %v1605_v61, 4  ;;  %v6304_v61 = vld [vmem:[#allocation2 + $0x64] sm:$0xff]  ;;  %v758_v24 = vshrl.u32 %v569_v4, 16 }
  0xc0   : > { %v743_v53 = vrot.slane %v738_v27, 4 }
  0xc1   : > { %2649 = vmatmul.bf16.gmra.mxu3 %v2553_v3  ;;  %v2239_v3 = vshrl.u32 %v2114_v54, 16  ;;  %v2255_v14 = vrot.slane %v2253_v62, 7  ;;  %v720_v54 = vsel %vm6793_vm2, %v5604_v36, %v719_v37  ;;  %v1608_v62 = vshll.u32 %v1434_v50, 16 }
  0xc2   : > { %v5812_v37 = vrot.slane %v2261_v13, 11 }
  0xc3   : > { %1351 = vmatmul.bf16.gmra.mxu1 %v1251_v10  ;;  %v2246_v10 = vrot.slane %v2244_v56, 7  ;;  %v5811_v19 = vrot.slane %v2239_v3, 11  ;;  %v2258_v32 = vor.u32 %v2256_v15, %v2255_v14  ;;  %v2119_v56 = vld [vmem:[#allocation2 + $0x68] sm:$0xf]  ;;  %v1226_v3 = vunpack.c.l.b16 %v720_v54  ;;  %v565_v14 = vld [vmem:[#allocation2 + $0x60] sm:$0x8] }
  0xc4   : > { %v2275_v6 = vshrl.u32 %v2119_v56, 16  ;;  %v745_v15 = vshrl.u32 %v567_v2, 16  ;;  %v2278_v23 = vshll.u32 %v2119_v56, 16  ;;  %v731_v26 = vshrl.u32 %v565_v14, 16 }
  0xc5   : > { %v2249_v28 = vor.u32 %v2247_v11, %v2246_v10  ;;  %v2251_v31 = vrot.slane %v2246_v10, 4  ;;  %v6908_v11 = vpop.f32.mrf.mxu0  ;;  %v1628_v56 = vrot.slane %v1626_v34, 4 }
  0xc6   : > { %v2277_v22 = vrot.slane %v2275_v6, 7 }
  0xc7   : > { %v2250_v44 = vsel %vm6793_vm2, %v5811_v19, %v2249_v28  ;;  %v2259_v45 = vsel %vm6793_vm2, %v2251_v31, %v2258_v32  ;;  %v2269_v19 = vshll.u32 %v2118_v51, 16  ;;  %v739_v28 = vshll.u32 %v566_v60, 16  ;;  %v6927_v51 = vld [vmem:[#allocation2 + $0x78] sm:$0xf] }
  0xc8   : > { %v2527_v57 = vunpack.c.l.b16 %v2250_v44  ;;  %v2528_v58 = vunpack.c.l.b16 %v2259_v45  ;;  %v747_v31 = vrot.slane %v745_v15, 7  ;;  %v748_v32 = vshll.u32 %v567_v2, 16  ;;  %v6925_v45 = vld [vmem:[#allocation2 + $0x74] sm:$0xf] }
  0xc9   : > { %2936 = vmatmul.bf16.gmra.mxu0 %v6302_v41  ;;  %v1591_v41 = vrot.slane %v1589_v29, 4  ;;  %v1616_v29 = vshll.u32 %v1435_v9, 16  ;;  %v2280_v44 = vor.u32 %v2278_v23, %v2277_v22  ;;  %v2288_v6 = vshrl.u32 %v6925_v45, 16  ;;  %v570_v9 = vld [vmem:[#allocation2 + $0x78] sm:$0xf] }
  0xca   : > { %v2555_v10 = vpack.c.b16 %v2528_v58, %v2527_v57  ;;  %v750_v54 = vor.u32 %v748_v32, %v747_v31  ;;  %v6335_v57 = vld [vmem:[%s8220_s1 + $0x160] sm:$0xff]  ;;  %v2291_v22 = vshll.u32 %v6925_v45, 16  ;;  %v568_v23 = vld [vmem:[#allocation2 + $0x70] sm:$0x8]  ;;  %v2300_v31 = vshll.u32 %v6927_v51, 16 }
  0xcb   : > { %v1595_v59 = vor.u32 %v1594_v43, %v1591_v41  ;;  %v2271_v41 = vor.u32 %v2269_v19, %v2268_v18  ;;  %v2273_v43 = vrot.slane %v2268_v18, 4  ;;  %v1618_v50 = vrot.slane %v1616_v29, 5  ;;  %v6375_v58 = vld [vmem:[%s8220_s1 + $0x220] sm:$0xff]  ;;  %3598 = vmatpush.bf16.msra.mxu1 %v6335_v57 }
  0xcc   : > { %5213 = vmatpush.bf16.msra.mxu0 %v6375_v58  ;;  %v753_v1 = vshrl.u32 %v568_v23, 16  ;;  %v761_v45 = vshll.u32 %v569_v4, 16  ;;  %v2124_v4 = vld [vmem:[#allocation2 + $0x84] sm:$0xf] }
  0xcd   : > { %v2272_v0 = vsel %vm6793_vm2, %v5812_v37, %v2271_v41  ;;  %v2281_v2 = vsel %vm6793_vm2, %v2273_v43, %v2280_v44  ;;  %v1619_v13 = vor.u32 %v1618_v50, %v1615_v48  ;;  %v1439_v41 = vld [vmem:[#allocation2 + $0x78] sm:$0xf]  ;;  %v760_v44 = vrot.slane %v758_v24, 7 }
  0xce   : > { %v2530_v18 = vunpack.c.l.b16 %v2281_v2  ;;  %v1646_v58 = vshll.u32 %v1439_v41, 16  ;;  %v2310_v23 = vshrl.u32 %v2124_v4, 16 }
  0xcf   : > { %2004 = vmatmul.bf16.gmra.mxu2 %v1904_v5  ;;  %v1227_v5 = vunpack.c.l.b16 %v729_v55  ;;  %v6931_v55 = vrot.slane %v1622_v33, 5  ;;  %v1620_v33 = vrot.slane %v1619_v13, 4 }
  0xd1   : > { %2654 = vmatmul.bf16.gmra.mxu3 %v2554_v12  ;;  %v1596_v12 = vrot.slane %v1595_v59, 4  ;;  %v1253_v21 = vpack.c.b16 %v1227_v5, %v1226_v3  ;;  %v2120_v3 = vld [vmem:[#allocation2 + $0x70] sm:$0x8]  ;;  %v1629_v14 = vor.u32 %v1628_v56, %v6931_v55 }
  0xd2   : > { %v2283_v19 = vshrl.u32 %v2120_v3, 16  ;;  %v1625_v3 = vsel %vm6803_vm5, %v1620_v33, %v6931_v55  ;;  %v1440_v55 = vld [vmem:[#allocation2 + $0x7c] sm:$0x1] }
  0xd3   : > { %1356 = vmatmul.bf16.gmra.mxu1 %v1252_v17  ;;  %v1610_v17 = vrot.slane %v1608_v62, 5  ;;  %v1601_v36 = vsel %vm6803_vm5, %v1596_v12, %v6899_v47  ;;  %v741_v47 = vor.u32 %v739_v28, %v738_v27  ;;  %v1437_v62 = vld [vmem:[#allocation2 + $0x6c] sm:$0x1]  ;;  %v751_v12 = vsel %vm6793_vm2, %v743_v53, %v750_v54 }
  0xd4   : > { %v1879_v59 = vunpack.c.l.b16 %v1601_v36  ;;  %v1632_v15 = vshll.u32 %v1437_v62, 16  ;;  %v1229_v27 = vunpack.c.l.b16 %v751_v12  ;;  %v2290_v28 = vrot.slane %v2288_v6, 7 }
  0xd5   : > { %v1611_v40 = vsel %vm6803_vm5, %v1606_v16, %v1610_v17  ;;  %v2529_v17 = vunpack.c.l.b16 %v2272_v0  ;;  %v1630_v34 = vrot.slane %v1629_v14, 4  ;;  %v5813_v38 = vrot.slane %v2283_v19, 11 }
  0xd6   : > { %v1880_v60 = vunpack.c.l.b16 %v1611_v40  ;;  %v1634_v36 = vrot.slane %v1632_v15, 5  ;;  %v1438_v40 = vld [vmem:[#allocation2 + $0x74] sm:$0xf]  ;;  %v2293_v50 = vor.u32 %v2291_v22, %v2290_v28  ;;  %v763_v62 = vor.u32 %v761_v45, %v760_v44  ;;  %v2123_v22 = vld [vmem:[#allocation2 + $0x80] sm:$0x8] }
  0xd7   : > { %v2556_v37 = vpack.c.b16 %v2530_v18, %v2529_v17  ;;  %v1637_v56 = vshrl.u32 %v1438_v40, 16  ;;  %v1640_v57 = vshll.u32 %v1438_v40, 16  ;;  %v765_v0 = vrot.slane %v760_v44, 4  ;;  %v6305_v17 = vld [vmem:[#allocation2 + $0x74] sm:$0xff]  ;;  %v573_v45 = vld [vmem:[#allocation2 + $0x88] sm:$0xf] }
  0xd8   : > { %v1906_v16 = vpack.c.b16 %v1880_v60, %v1879_v59  ;;  %v1650_v59 = vshrl.u32 %v1439_v41, 16  ;;  %v2294_v6 = vsel %vm6793_vm2, %v5813_v38, %v2293_v50  ;;  %v6977_v15 = vrot.slane %v1646_v58, 5  ;;  %v572_v38 = vld [vmem:[#allocation2 + $0x84] sm:$0xf] }
  0xd9   : > { %2941 = vmatmul.bf16.gmra.mxu0 %v6303_v46  ;;  %v5605_v46 = vrot.slane %v731_v26, 11  ;;  %v767_v26 = vshrl.u32 %v570_v9, 16  ;;  %v1639_v13 = vrot.slane %v1637_v56, 4  ;;  %v1642_v14 = vrot.slane %v1640_v57, 5 }
  0xda   : > { %v2305_v41 = vshrl.u32 %v2123_v22, 16  ;;  %v2313_v44 = vshll.u32 %v2124_v4, 16  ;;  %v780_v58 = vshrl.u32 %v572_v38, 16  ;;  %v783_v22 = vshll.u32 %v572_v38, 16 }
  0xdb   : > { %v742_v5 = vsel %vm6793_vm2, %v5605_v46, %v741_v47  ;;  %v769_v46 = vrot.slane %v767_v26, 7  ;;  %v770_v47 = vshll.u32 %v570_v9, 16  ;;  %v2125_v9 = vld [vmem:[#allocation2 + $0x88] sm:$0xf]  ;;  %v1881_v26 = vunpack.c.l.b16 %v1625_v3 }
  0xdc   : > { %v2319_v24 = vshrl.u32 %v2125_v9, 16 }
  0xdd   : > { %v772_v2 = vor.u32 %v770_v47, %v769_v46  ;;  %v1442_v46 = vld [vmem:[#allocation2 + $0x88] sm:$0xf] }
  0xde   : > { %v2321_v50 = vrot.slane %v2319_v24, 7  ;;  %v1670_v3 = vshll.u32 %v1442_v46, 16 }
  0xdf   : > { %2009 = vmatmul.bf16.gmra.mxu2 %v1905_v7  ;;  %v2297_v7 = vshrl.u32 %v6927_v51, 16  ;;  %v2295_v51 = vrot.slane %v2290_v28, 4  ;;  %v2531_v28 = vunpack.c.l.b16 %v2294_v6 }
  0xe0   : > { %v6910_v30 = vpop.f32.mrf.mxu1 }
  0xe1   : > { %2659 = vmatmul.bf16.gmra.mxu3 %v2555_v10  ;;  %v2299_v29 = vrot.slane %v2297_v7, 7 }
  0xe2   : > { %v6921_v39 = vpop.f32.mrf.mxu2 }
  0xe3   : > { %1361 = vmatmul.bf16.gmra.mxu1 %v1253_v21  ;;  %v1228_v21 = vunpack.c.l.b16 %v742_v5  ;;  %v2302_v53 = vor.u32 %v2300_v31, %v2299_v29  ;;  %v1635_v5 = vsel %vm6803_vm5, %v1630_v34, %v1634_v36  ;;  %v1441_v31 = vld [vmem:[#allocation2 + $0x84] sm:$0xf]  ;;  %v1643_v34 = vor.u32 %v1642_v14, %v1639_v13 }
  0xe4   : > { %v6929_v52 = vpop.f32.mrf.mxu3  ;;  %v5814_v13 = vrot.slane %v2305_v41, 11 }
  0xe5   : > { %8230 = vst [vmem:[#allocation3_spill] sm:$0xff] %v6929_v52  ;;  %v1254_v48 = vpack.c.b16 %v1229_v27, %v1228_v21  ;;  %v2303_v7 = vsel %vm6793_vm2, %v2295_v51, %v2302_v53  ;;  %v773_v21 = vsel %vm6793_vm2, %v765_v0, %v772_v2  ;;  %v1882_v27 = vunpack.c.l.b16 %v1635_v5  ;;  %v571_v0 = vld [vmem:[#allocation2 + $0x80] sm:$0x8] }
  0xe6   : > { %v6939_v63 = vpop.f32.mrf.mxu0  ;;  %v2532_v29 = vunpack.c.l.b16 %v2303_v7  ;;  %v1231_v40 = vunpack.c.l.b16 %v773_v21  ;;  %v2322_v51 = vshll.u32 %v2125_v9, 16  ;;  %v1661_v53 = vshrl.u32 %v1441_v31, 16 }
  0xe7   : > { %v1907_v56 = vpack.c.b16 %v1882_v27, %v1881_v26  ;;  %v789_v2 = vshrl.u32 %v573_v45, 16  ;;  %v1674_v5 = vshrl.u32 %v1442_v46, 16  ;;  %v782_v21 = vrot.slane %v780_v58, 7 }
  0xe8   : > { %v6949_v10 = vpop.f32.mrf.mxu1  ;;  %v2557_v57 = vpack.c.b16 %v2532_v29, %v2531_v28  ;;  %v792_v27 = vshll.u32 %v573_v45, 16  ;;  %v6996_v28 = vrot.slane %v1670_v3, 5 }
  0xe9   : > { %2946 = vmatmul.bf16.gmra.mxu0 %v6304_v61  ;;  %v5606_v61 = vrot.slane %v753_v1, 11  ;;  %v791_v26 = vrot.slane %v789_v2, 7  ;;  %v1676_v29 = vrot.slane %v1674_v5, 4  ;;  %v785_v45 = vor.u32 %v783_v22, %v782_v21 }
  0xea   : > { %v6954_v20 = vpop.f32.mrf.mxu2 }
  0xeb   : > { %v764_v19 = vsel %vm6793_vm2, %v5606_v61, %v763_v62  ;;  %v1644_v62 = vrot.slane %v1643_v34, 4  ;;  %v6358_v34 = vld [vmem:[%s8220_s1 + $0x198] sm:$0xff] }
  0xec   : > { %v6958_v32 = vpop.f32.mrf.mxu3  ;;  %v1230_v1 = vunpack.c.l.b16 %v764_v19  ;;  %v775_v19 = vshrl.u32 %v571_v0, 16  ;;  %4250 = vmatpush.bf16.msra.mxu2 %v6358_v34  ;;  %v6374_v0 = vld [vmem:[%s8220_s1 + $0x218] sm:$0xff] }
  0xed   : > { %8231 = vst [vmem:[#allocation4_spill] sm:$0xff] %v6958_v32  ;;  %v1649_v38 = vsel %vm6803_vm5, %v1644_v62, %v6977_v15  ;;  %v6334_v62 = vld [vmem:[%s8220_s1 + $0x158] sm:$0xff]  ;;  %5214 = vmatpush.bf16.msra.mxu0 %v6374_v0 }
  0xee   : > { %v6960_v43 = vpop.f32.mrf.mxu0  ;;  %v1255_v6 = vpack.c.b16 %v1231_v40, %v1230_v1  ;;  %3599 = vmatpush.bf16.msra.mxu1 %v6334_v62 }
  0xef   : > { %2014 = vmatmul.bf16.gmra.mxu2 %v1906_v16  ;;  %v1652_v16 = vrot.slane %v1650_v59, 4  ;;  %v1664_v59 = vshll.u32 %v1441_v31, 16  ;;  %v1443_v31 = vld [vmem:[#allocation2 + $0x8c] sm:$0x1] }
  0xf0   : > { %v6962_v54 = vpop.f32.mrf.mxu1 }
  0xf1   : > { %2664 = vmatmul.bf16.gmra.mxu3 %v2556_v37  ;;  %v1653_v36 = vor.u32 %v1652_v16, %v6977_v15  ;;  %v1656_v37 = vshll.u32 %v1440_v55, 16  ;;  %v1663_v55 = vrot.slane %v1661_v53, 4  ;;  %v794_v53 = vor.u32 %v792_v27, %v791_v26 }
  0xf2   : > { %v6964_v60 = vpop.f32.mrf.mxu2  ;;  %v1677_v15 = vor.u32 %v1676_v29, %v6996_v28  ;;  %v576_v29 = vld [vmem:[#allocation2 + $0x98] sm:$0xf] }
  0xf3   : > { %1366 = vmatmul.bf16.gmra.mxu1 %v1254_v48  ;;  %v2312_v48 = vrot.slane %v2310_v23, 7  ;;  %v1654_v7 = vrot.slane %v1653_v36, 4  ;;  %v1658_v4 = vrot.slane %v1656_v37, 5  ;;  %v1666_v23 = vrot.slane %v1664_v59, 5  ;;  %v6366_v36 = vld [vmem:[%s8220_s1 + $0x1d8] sm:$0xff] }
  0xf4   : > { %v6975_v12 = vpop.f32.mrf.mxu3  ;;  %4532 = vmatpush.bf16.msra.mxu3 %v6366_v36  ;;  %v7018_v59 = vld [vmem:[#allocation2 + $0x94] sm:$0xf] }
  0xf5   : > { %8232 = vst [vmem:[#allocation5_spill] sm:$0xff] %v6975_v12  ;;  %v2315_v16 = vor.u32 %v2313_v44, %v2312_v48  ;;  %v2317_v9 = vrot.slane %v2312_v48, 4  ;;  %v1659_v1 = vsel %vm6803_vm5, %v1654_v7, %v1658_v4  ;;  %v5607_v44 = vrot.slane %v775_v19, 11  ;;  %v1444_v7 = vld [vmem:[#allocation2 + $0x94] sm:$0xf] }
  0xf6   : > { %v6979_v18 = vpop.f32.mrf.mxu0  ;;  %v1667_v46 = vor.u32 %v1666_v23, %v1663_v55  ;;  %v1884_v58 = vunpack.c.l.b16 %v1659_v1  ;;  %v1678_v19 = vrot.slane %v1677_v15, 4  ;;  %v2332_v22 = vshrl.u32 %v7018_v59, 16  ;;  %v1445_v23 = vld [vmem:[#allocation2 + $0x98] sm:$0xf] }
  0xf7   : > { %v2316_v40 = vsel %vm6793_vm2, %v5814_v13, %v2315_v16  ;;  %v786_v4 = vsel %vm6793_vm2, %v5607_v44, %v785_v45  ;;  %v2126_v16 = vld [vmem:[#allocation2 + $0x90] sm:$0x8]  ;;  %v1688_v34 = vshll.u32 %v1444_v7, 16 }
  0xf8   : > { %v6985_v33 = vpop.f32.mrf.mxu1  ;;  %v2533_v3 = vunpack.c.l.b16 %v2316_v40  ;;  %v1668_v13 = vrot.slane %v1667_v46, 4  ;;  %v2327_v1 = vshrl.u32 %v2126_v16, 16  ;;  %v2335_v40 = vshll.u32 %v7018_v59, 16  ;;  %v574_v46 = vld [vmem:[#allocation2 + $0x90] sm:$0x8] }
  0xf9   : > { %2951 = vmatmul.bf16.gmra.mxu0 %v6305_v17  ;;  %v2324_v17 = vor.u32 %v2322_v51, %v2321_v50  ;;  %v6306_v50 = vld [vmem:[#allocation2 + $0x84] sm:$0xff]  ;;  %v787_v51 = vrot.slane %v782_v21, 4  ;;  %v1232_v44 = vunpack.c.l.b16 %v786_v4 }
  0xfa   : > { %v6988_v47 = vpop.f32.mrf.mxu2 }
  0xfb   : > { %v2325_v41 = vsel %vm6793_vm2, %v2317_v9, %v2324_v17  ;;  %v575_v9 = vld [vmem:[#allocation2 + $0x94] sm:$0xf]  ;;  %v795_v55 = vsel %vm6793_vm2, %v787_v51, %v794_v53  ;;  %v1694_v51 = vshll.u32 %v1445_v23, 16  ;;  %v1698_v53 = vshrl.u32 %v1445_v23, 16 }
  0xfc   : > { %v6990_v61 = vpop.f32.mrf.mxu3  ;;  %v2534_v5 = vunpack.c.l.b16 %v2325_v41  ;;  %v802_v41 = vshrl.u32 %v575_v9, 16  ;;  %v1233_v45 = vunpack.c.l.b16 %v795_v55  ;;  %v805_v16 = vshll.u32 %v575_v9, 16 }
  0xfd   : > { %8233 = vst [vmem:[#allocation6_spill] sm:$0xff] %v6990_v61  ;;  %v5815_v23 = vrot.slane %v2327_v1, 11 }
  0xfe   : > { %v6992_v14 = vpop.f32.mrf.mxu0  ;;  %v804_v4 = vrot.slane %v802_v41, 7  ;;  %v1256_v55 = vpack.c.b16 %v1233_v45, %v1232_v44  ;;  %v2131_v44 = vld [vmem:[#allocation2 + $0xa8] sm:$0xf] }
  0xff   : > { %2019 = vmatmul.bf16.gmra.mxu2 %v1907_v56  ;;  %v1680_v56 = vshll.u32 %v1443_v31, 16  ;;  %v1685_v31 = vshrl.u32 %v1444_v7, 16  ;;  %v797_v7 = vshrl.u32 %v574_v46, 16 }
 0x100   : > { %v6994_v24 = vpop.f32.mrf.mxu1  ;;  %v807_v46 = vor.u32 %v805_v16, %v804_v4 }
 0x101   : > { %2669 = vmatmul.bf16.gmra.mxu3 %v2557_v57  ;;  %v1883_v57 = vunpack.c.l.b16 %v1649_v38  ;;  %v1682_v21 = vrot.slane %v1680_v56, 5  ;;  %v2558_v38 = vpack.c.b16 %v2534_v5, %v2533_v3  ;;  %v1687_v59 = vrot.slane %v1685_v31, 4  ;;  %v2130_v31 = vld [vmem:[#allocation2 + $0xa4] sm:$0xf] }
 0x102   : > { %v7004_v37 = vpop.f32.mrf.mxu2  ;;  %v1690_v3 = vrot.slane %v1688_v34, 5  ;;  %v5608_v45 = vrot.slane %v797_v7, 11 }
 0x103   : > { %1371 = vmatmul.bf16.gmra.mxu1 %v1255_v6  ;;  %v2128_v6 = vld [vmem:[#allocation2 + $0x98] sm:$0xf]  ;;  %v1908_v26 = vpack.c.b16 %v1884_v58, %v1883_v57  ;;  %v1683_v56 = vsel %vm6803_vm5, %v1678_v19, %v1682_v21  ;;  %v2334_v57 = vrot.slane %v2332_v22, 7  ;;  %v811_v58 = vshrl.u32 %v576_v29, 16 }
 0x104   : > { %v7015_v48 = vpop.f32.mrf.mxu3  ;;  %v2341_v27 = vshrl.u32 %v2128_v6, 16  ;;  %v2344_v0 = vshll.u32 %v2128_v6, 16  ;;  %v7053_v21 = vunpack.c.l.b16 %v1683_v56  ;;  %v814_v22 = vshll.u32 %v576_v29, 16 }
 0x105   : > { %8234 = vst [vmem:[#allocation7_spill] sm:$0xff] %v7015_v48  ;;  %v813_v6 = vrot.slane %v811_v58, 7  ;;  %v2337_v34 = vor.u32 %v2335_v40, %v2334_v57  ;;  %v2339_v41 = vrot.slane %v2334_v57, 4  ;;  %v2354_v56 = vshrl.u32 %v2130_v31, 16  ;;  %v1447_v58 = vld [vmem:[#allocation2 + $0xa4] sm:$0xf] }
 0x106   : > { %v7026_v2 = vpop.f32.mrf.mxu0  ;;  %v2343_v62 = vrot.slane %v2341_v27, 7  ;;  %v1446_v27 = vld [vmem:[#allocation2 + $0x9c] sm:$0x1]  ;;  %v809_v48 = vrot.slane %v804_v4, 4  ;;  %v2363_v40 = vshrl.u32 %v2131_v44, 16  ;;  %v808_v16 = vsel %vm6793_vm2, %v5608_v45, %v807_v46 }
 0x107   : > { %v578_v4 = vld [vmem:[#allocation2 + $0xa4] sm:$0xf]  ;;  %v1234_v46 = vunpack.c.l.b16 %v808_v16 }
 0x108   : > { %v7030_v17 = vpop.f32.mrf.mxu1  ;;  %v2346_v9 = vor.u32 %v2344_v0, %v2343_v62  ;;  %v2338_v62 = vsel %vm6793_vm2, %v5815_v23, %v2337_v34 }
 0x109   : > { %2956 = vmatmul.bf16.gmra.mxu0 %v6306_v50  ;;  %v1673_v50 = vsel %vm6803_vm5, %v1668_v13, %v6996_v28  ;;  %v1700_v28 = vrot.slane %v1698_v53, 4  ;;  %v1704_v53 = vshll.u32 %v1446_v27, 16  ;;  %v2535_v23 = vunpack.c.l.b16 %v2338_v62 }
 0x10a   : > { %v7035_v36 = vpop.f32.mrf.mxu2  ;;  %v7051_v19 = vunpack.c.l.b16 %v1673_v50  ;;  %v2129_v50 = vld [vmem:[#allocation2 + $0xa0] sm:$0x8]  ;;  %v2347_v0 = vsel %vm6793_vm2, %v2339_v41, %v2346_v9  ;;  %v2365_v9 = vrot.slane %v2363_v40, 7 }
 0x10b   : > { %v1706_v27 = vrot.slane %v1704_v53, 5  ;;  %v2536_v61 = vunpack.c.l.b16 %v2347_v0  ;;  %v577_v53 = vld [vmem:[#allocation2 + $0xa0] sm:$0x8] }
 0x10c   : > { %v7038_v15 = vpop.f32.mrf.mxu3  ;;  %v1909_v57 = vpack.c.b16 %v7053_v21, %v7051_v19  ;;  %v2356_v19 = vrot.slane %v2354_v56, 7  ;;  %v2357_v21 = vshll.u32 %v2130_v31, 16  ;;  %v819_v52 = vshrl.u32 %v577_v53, 16 }
 0x10d   : > { %8235 = vst [vmem:[#allocation8_spill] sm:$0xff] %v7038_v15  ;;  %v7047_v15 = vrot.slane %v1694_v51, 5  ;;  %v2559_v32 = vpack.c.b16 %v2536_v61, %v2535_v23 }
 0x10e   : > { %v7045_v5 = vpop.f32.mrf.mxu0 }
 0x10f   : > { %2024 = vmatmul.bf16.gmra.mxu2 %v1908_v26  ;;  %v1691_v26 = vor.u32 %v1690_v3, %v1687_v59  ;;  %v1701_v51 = vor.u32 %v1700_v28, %v7047_v15  ;;  %v6307_v59 = vld [vmem:[#allocation2 + $0x94] sm:$0xff]  ;;  %v1709_v28 = vshrl.u32 %v1447_v58, 16 }
 0x110   : > { %v7049_v13 = vpop.f32.mrf.mxu1 }
 0x111   : > { %2674 = vmatmul.bf16.gmra.mxu3 %v2558_v38  ;;  %v816_v38 = vor.u32 %v814_v22, %v813_v6  ;;  %v1692_v3 = vrot.slane %v1691_v26, 4  ;;  %v1712_v6 = vshll.u32 %v1447_v58, 16  ;;  %v1702_v22 = vrot.slane %v1701_v51, 4  ;;  %v1448_v58 = vld [vmem:[#allocation2 + $0xa8] sm:$0xf] }
 0x112   : > { %v7055_v1 = vpop.f32.mrf.mxu2  ;;  %v2366_v26 = vshll.u32 %v2131_v44, 16  ;;  %v1711_v62 = vrot.slane %v1709_v28, 4  ;;  %v1722_v12 = vshrl.u32 %v1448_v58, 16  ;;  %v1338_v23 = vadd.f32 %v7049_v13, %v6888_v35  ;;  %v2132_v35 = vld [vmem:[#allocation2 + $0xb0] sm:$0x8] }
 0x113   : > { %8236 = vst [vmem:[#allocation9_spill] sm:$0xff] %v7055_v1  ;;  %1376 = vmatmul.bf16.gmra.mxu1 %v1256_v55  ;;  %v2349_v55 = vshrl.u32 %v2129_v50, 16  ;;  %v817_v41 = vsel %vm6793_vm2, %v809_v48, %v816_v38  ;;  %v824_v50 = vshrl.u32 %v578_v4, 16  ;;  %v1697_v31 = vsel %vm6803_vm5, %v1692_v3, %v7047_v15 }
 0x114   : > { %v7058_v29 = vpop.f32.mrf.mxu3  ;;  %v1714_v48 = vrot.slane %v1712_v6, 5  ;;  %v1235_v38 = vunpack.c.l.b16 %v817_v41  ;;  %v1707_v44 = vsel %vm6803_vm5, %v1702_v22, %v1706_v27  ;;  %v2368_v16 = vor.u32 %v2366_v26, %v2365_v9  ;;  %v1449_v26 = vld [vmem:[#allocation2 + $0xac] sm:$0x1] }
 0x115   : > { %8237 = vst [vmem:[#allocation10_spill] sm:$0xff] %v7058_v29  ;;  %v579_v29 = vld [vmem:[#allocation2 + $0xa8] sm:$0xf]  ;;  %v5816_v40 = vrot.slane %v2349_v55, 11  ;;  %v827_v15 = vshll.u32 %v578_v4, 16  ;;  %v7086_v22 = vunpack.c.l.b16 %v1697_v31  ;;  %v7088_v55 = vunpack.c.l.b16 %v1707_v44 }
 0x116   : > { %v7066_v7 = vpop.f32.mrf.mxu0  ;;  %v833_v56 = vshrl.u32 %v579_v29, 16  ;;  %v836_v6 = vshll.u32 %v579_v29, 16  ;;  %v1715_v41 = vor.u32 %v1714_v48, %v1711_v62  ;;  %v1257_v1 = vpack.c.b16 %v1235_v38, %v1234_v46  ;;  %v6357_v46 = vld [vmem:[%s8220_s1 + $0x190] sm:$0xff]  ;;  %v6308_v38 = vld [vmem:[#allocation2 + $0xa4] sm:$0xff] }
 0x117   : > { %v1724_v4 = vrot.slane %v1722_v12, 4  ;;  %4251 = vmatpush.bf16.msra.mxu2 %v6357_v46  ;;  %v1910_v48 = vpack.c.b16 %v7088_v55, %v7086_v22 }
 0x118   : > { %v1339_v34 = vpop.f32.mrf.mxu1  ;;  %v835_v28 = vrot.slane %v833_v56, 7  ;;  %v1716_v53 = vrot.slane %v1715_v41, 4  ;;  %v7107_v56 = vld [vmem:[#allocation2 + $0xb8] sm:$0xf] }
 0x119   : > { %2961 = vmatmul.bf16.gmra.mxu0 %v6307_v59  ;;  %v7073_v45 = vadd.f32 %v1339_v34, %v6908_v11  ;;  %v2359_v11 = vor.u32 %v2357_v21, %v2356_v19  ;;  %v2361_v59 = vrot.slane %v2356_v19, 4  ;;  %v1718_v34 = vshll.u32 %v1448_v58, 16 }
 0x11a   : > { %v7075_v51 = vpop.f32.mrf.mxu2  ;;  %v838_v31 = vor.u32 %v836_v6, %v835_v28  ;;  %v581_v28 = vld [vmem:[#allocation2 + $0xb4] sm:$0xf] }
 0x11b   : > { %8238 = vst [vmem:[#allocation11_spill] sm:$0xff] %v7075_v51  ;;  %v826_v51 = vrot.slane %v824_v50, 7  ;;  %v2360_v19 = vsel %vm6793_vm2, %v5816_v40, %v2359_v11  ;;  %v2369_v61 = vsel %vm6793_vm2, %v2361_v59, %v2368_v16  ;;  %v1720_v21 = vrot.slane %v1718_v34, 5  ;;  %v6365_v50 = vld [vmem:[%s8220_s1 + $0x1d0] sm:$0xff] }
 0x11c   : > { %v7082_v0 = vpop.f32.mrf.mxu3  ;;  %v2538_v13 = vunpack.c.l.b16 %v2369_v61  ;;  %v1728_v40 = vshll.u32 %v1449_v26, 16  ;;  %4533 = vmatpush.bf16.msra.mxu3 %v6365_v50  ;;  %v2371_v16 = vshrl.u32 %v2132_v35, 16  ;;  %v6333_v34 = vld [vmem:[%s8220_s1 + $0x150] sm:$0xff]  ;;  %v582_v61 = vld [vmem:[#allocation2 + $0xb8] sm:$0xf] }
 0x11d   : > { %8239 = vst [vmem:[#allocation12_spill] sm:$0xff] %v7082_v0  ;;  %v829_v9 = vor.u32 %v827_v15, %v826_v51  ;;  %v831_v12 = vrot.slane %v826_v51, 4  ;;  %v1725_v44 = vor.u32 %v1724_v4, %v1720_v21  ;;  %v1450_v51 = vld [vmem:[#allocation2 + $0xb4] sm:$0xf]  ;;  %v1721_v22 = vsel %vm6803_vm5, %v1716_v53, %v1720_v21  ;;  %3600 = vmatpush.bf16.msra.mxu1 %v6333_v34  ;;  %v1451_v4 = vld [vmem:[#allocation2 + $0xb8] sm:$0xf] }
 0x11e   : > { %v7084_v3 = vpop.f32.mrf.mxu0  ;;  %v6373_v15 = vld [vmem:[%s8220_s1 + $0x210] sm:$0xff]  ;;  %v7134_v53 = vunpack.c.l.b16 %v1721_v22  ;;  %v5817_v22 = vrot.slane %v2371_v16, 11  ;;  %v858_v0 = vshll.u32 %v582_v61, 16 }
 0x11f   : > { %2029 = vmatmul.bf16.gmra.mxu2 %v1909_v57  ;;  %v5609_v57 = vrot.slane %v819_v52, 11  ;;  %v2537_v52 = vunpack.c.l.b16 %v2360_v19  ;;  %v839_v41 = vsel %vm6793_vm2, %v831_v12, %v838_v31  ;;  %5215 = vmatpush.bf16.msra.mxu0 %v6373_v15  ;;  %v1726_v50 = vrot.slane %v1725_v44, 4 }
 0x120   : > { %v1342_v27 = vpop.f32.mrf.mxu1  ;;  %v846_v12 = vshrl.u32 %v581_v28, 16  ;;  %v1237_v31 = vunpack.c.l.b16 %v839_v41  ;;  %v849_v15 = vshll.u32 %v581_v28, 16 }
 0x121   : > { %2679 = vmatmul.bf16.gmra.mxu3 %v2559_v32  ;;  %v7097_v29 = vadd.f32 %v1342_v27, %v6939_v63  ;;  %v7105_v32 = vld [vmem:[#allocation2 + $0xb4] sm:$0xf]  ;;  %v830_v59 = vsel %vm6793_vm2, %v5609_v57, %v829_v9  ;;  %v2385_v27 = vshrl.u32 %v7107_v56, 16  ;;  %v2560_v19 = vpack.c.b16 %v2538_v13, %v2537_v52 }
 0x122   : > { %v1990_v58 = vpop.f32.mrf.mxu2  ;;  %v2379_v55 = vshll.u32 %v7105_v32, 16  ;;  %v1736_v57 = vshll.u32 %v1450_v51, 16  ;;  %v1236_v46 = vunpack.c.l.b16 %v830_v59  ;;  %v2388_v52 = vshll.u32 %v7107_v56, 16  ;;  %v2136_v56 = vld [vmem:[#allocation2 + $0xc4] sm:$0xf] }
 0x123   : > { %v2070_v63 = vadd.f32 %v1990_v58, %v1338_v23  ;;  %1381 = vmatmul.bf16.gmra.mxu1 %v1257_v1  ;;  %v2376_v1 = vshrl.u32 %v7105_v32, 16  ;;  %v1733_v23 = vshrl.u32 %v1450_v51, 16  ;;  %v1730_v58 = vrot.slane %v1728_v40, 5  ;;  %v580_v32 = vld [vmem:[#allocation2 + $0xb0] sm:$0x8] }
 0x124   : > { %v2640_v62 = vpop.f32.mrf.mxu3  ;;  %v855_v13 = vshrl.u32 %v582_v61, 16  ;;  %v2387_v44 = vrot.slane %v2385_v27, 7  ;;  %v841_v59 = vshrl.u32 %v580_v32, 16  ;;  %v848_v34 = vrot.slane %v846_v12, 7  ;;  %v1452_v12 = vld [vmem:[#allocation2 + $0xbc] sm:$0x1] }
 0x125   : > { %v2720_v11 = vadd.f32 %v2640_v62, %v2070_v63  ;;  %v2378_v35 = vrot.slane %v2376_v1, 7  ;;  %v1746_v62 = vshrl.u32 %v1451_v4, 16  ;;  %v1735_v40 = vrot.slane %v1733_v23, 4  ;;  %v2137_v23 = vld [vmem:[#allocation2 + $0xc8] sm:$0xf] }
 0x126   : > { %v7120_v6 = vpop.f32.mrf.mxu0  ;;  %v1258_v41 = vpack.c.b16 %v1237_v31, %v1236_v46  ;;  %v5610_v46 = vrot.slane %v841_v59, 11  ;;  %v851_v16 = vor.u32 %v849_v15, %v848_v34  ;;  %v2401_v59 = vshll.u32 %v2136_v56, 16 }
 0x127   : > { %v7129_v9 = vadd.f32 %v7066_v7, %v2720_v11  ;;  %v1742_v7 = vshll.u32 %v1451_v4, 16  ;;  %v1738_v11 = vrot.slane %v1736_v57, 5  ;;  %v857_v4 = vrot.slane %v855_v13, 7 }
 0x128   : > { %v1344_v26 = vpop.f32.mrf.mxu1  ;;  %v1748_v27 = vrot.slane %v1746_v62, 4  ;;  %v2407_v13 = vshrl.u32 %v2137_v23, 16 }
 0x129   : > { %8240 = vst [vmem:[#allocation13_spill] sm:$0xff] %v7129_v9  ;;  %2966 = vmatmul.bf16.gmra.mxu0 %v6308_v38  ;;  %v7132_v21 = vadd.f32 %v1344_v26, %v6960_v43  ;;  %v1731_v43 = vsel %vm6803_vm5, %v1726_v50, %v1730_v58  ;;  %v2381_v26 = vor.u32 %v2379_v55, %v2378_v35  ;;  %v2383_v50 = vrot.slane %v2378_v35, 4 }
 0x12a   : > { %v1992_v63 = vpop.f32.mrf.mxu2  ;;  %v7144_v57 = vunpack.c.l.b16 %v1731_v43  ;;  %v2390_v58 = vor.u32 %v2388_v52, %v2387_v44  ;;  %v1739_v28 = vor.u32 %v1738_v11, %v1735_v40  ;;  %v2398_v55 = vshrl.u32 %v2136_v56, 16  ;;  %v6309_v11 = vld [vmem:[#allocation2 + $0xb4] sm:$0xff] }
 0x12b   : > { %v2071_v51 = vadd.f32 %v1992_v63, %v7073_v45  ;;  %v7142_v45 = vrot.slane %v1742_v7, 5  ;;  %v2135_v63 = vld [vmem:[#allocation2 + $0xc0] sm:$0x8]  ;;  %v853_v52 = vrot.slane %v848_v34, 4  ;;  %v860_v7 = vor.u32 %v858_v0, %v857_v4 }
 0x12c   : > { %v2642_v38 = vpop.f32.mrf.mxu3  ;;  %v2393_v43 = vshrl.u32 %v2135_v63, 16  ;;  %v2400_v0 = vrot.slane %v2398_v55, 7  ;;  %v583_v55 = vld [vmem:[#allocation2 + $0xc0] sm:$0x8] }
 0x12d   : > { %v2721_v1 = vadd.f32 %v2642_v38, %v2071_v51  ;;  %v1749_v62 = vor.u32 %v1748_v27, %v7142_v45  ;;  %v1752_v51 = vshll.u32 %v1452_v12, 16  ;;  %v852_v38 = vsel %vm6793_vm2, %v5610_v46, %v851_v16 }
 0x12e   : > { %v7140_v9 = vpop.f32.mrf.mxu0  ;;  %v861_v4 = vsel %vm6793_vm2, %v853_v52, %v860_v7  ;;  %v5818_v46 = vrot.slane %v2393_v43, 11  ;;  %v2403_v16 = vor.u32 %v2401_v59, %v2400_v0 }
 0x12f   : > { %2034 = vmatmul.bf16.gmra.mxu2 %v1910_v48  ;;  %v7147_v31 = vadd.f32 %v7084_v3, %v2721_v1  ;;  %v2382_v48 = vsel %vm6793_vm2, %v5817_v22, %v2381_v26  ;;  %v1911_v3 = vpack.c.b16 %v7144_v57, %v7134_v53  ;;  %v2409_v1 = vrot.slane %v2407_v13, 7  ;;  %v1453_v22 = vld [vmem:[#allocation2 + $0xc4] sm:$0xf] }
 0x130   : > { %v1347_v32 = vpop.f32.mrf.mxu1  ;;  %v2539_v15 = vunpack.c.l.b16 %v2382_v48  ;;  %v1750_v27 = vrot.slane %v1749_v62, 4  ;;  %v1754_v57 = vrot.slane %v1752_v51, 5  ;;  %v1757_v48 = vshrl.u32 %v1453_v22, 16 }
 0x131   : > { %2684 = vmatmul.bf16.gmra.mxu3 %v2560_v19  ;;  %v7150_v61 = vadd.f32 %v1347_v32, %v6979_v18  ;;  %v2391_v18 = vsel %vm6793_vm2, %v2383_v50, %v2390_v58  ;;  %v1740_v19 = vrot.slane %v1739_v28, 4  ;;  %v585_v50 = vld [vmem:[#allocation2 + $0xc8] sm:$0xf]  ;;  %v1238_v58 = vunpack.c.l.b16 %v852_v38 }
 0x132   : > { %v1995_v35 = vpop.f32.mrf.mxu2  ;;  %v2540_v53 = vunpack.c.l.b16 %v2391_v18  ;;  %v1454_v28 = vld [vmem:[#allocation2 + $0xc8] sm:$0xf]  ;;  %v1760_v63 = vshll.u32 %v1453_v22, 16  ;;  %v877_v7 = vshrl.u32 %v585_v50, 16  ;;  %v1755_v51 = vsel %vm6803_vm5, %v1750_v27, %v1754_v57 }
 0x133   : > { %v2072_v44 = vadd.f32 %v1995_v35, %v7097_v29  ;;  %1386 = vmatmul.bf16.gmra.mxu1 %v1258_v41  ;;  %v2410_v29 = vshll.u32 %v2137_v23, 16  ;;  %v584_v41 = vld [vmem:[#allocation2 + $0xc4] sm:$0xf]  ;;  %v1745_v56 = vsel %vm6803_vm5, %v1740_v19, %v7142_v45  ;;  %v2405_v35 = vrot.slane %v2400_v0, 4 }
 0x134   : > { %v2645_v40 = vpop.f32.mrf.mxu3  ;;  %v868_v12 = vshrl.u32 %v584_v41, 16  ;;  %v1239_v45 = vunpack.c.l.b16 %v861_v4  ;;  %v863_v19 = vshrl.u32 %v583_v55, 16  ;;  %v871_v38 = vshll.u32 %v584_v41, 16 }
 0x135   : > { %v2722_v34 = vadd.f32 %v2645_v40, %v2072_v44  ;;  %v2412_v52 = vor.u32 %v2410_v29, %v2409_v1  ;;  %v1770_v44 = vshrl.u32 %v1454_v28, 16  ;;  %v1759_v0 = vrot.slane %v1757_v48, 4  ;;  %v2138_v48 = vld [vmem:[#allocation2 + $0xd0] sm:$0x8] }
 0x136   : > { %v7162_v26 = vpop.f32.mrf.mxu0  ;;  %v870_v40 = vrot.slane %v868_v12, 7  ;;  %v1762_v59 = vrot.slane %v1760_v63, 5  ;;  %v879_v29 = vrot.slane %v877_v7, 7  ;;  %v880_v22 = vshll.u32 %v585_v50, 16  ;;  %v7190_v50 = vld [vmem:[#allocation2 + $0xd4] sm:$0xf] }
 0x137   : > { %v7170_v23 = vadd.f32 %v7120_v6, %v2722_v34  ;;  %v1766_v6 = vshll.u32 %v1454_v28, 16  ;;  %v2413_v1 = vsel %vm6793_vm2, %v2405_v35, %v2412_v52  ;;  %v7184_v27 = vunpack.c.l.b16 %v1745_v56  ;;  %v6356_v52 = vld [vmem:[%s8220_s1 + $0x188] sm:$0xff] }
 0x138   : > { %v1349_v32 = vpop.f32.mrf.mxu1  ;;  %v5611_v57 = vrot.slane %v863_v19, 11  ;;  %v873_v12 = vor.u32 %v871_v38, %v870_v40  ;;  %v1763_v55 = vor.u32 %v1762_v59, %v1759_v0  ;;  %v875_v35 = vrot.slane %v870_v40, 4  ;;  %v6364_v7 = vld [vmem:[%s8220_s1 + $0x1c8] sm:$0xff]  ;;  %4252 = vmatpush.bf16.msra.mxu2 %v6356_v52  ;;  %v1457_v19 = vld [vmem:[#allocation2 + $0xd8] sm:$0xf] }
 0x139   : > { %2971 = vmatmul.bf16.gmra.mxu0 %v6309_v11  ;;  %v7173_v13 = vadd.f32 %v1349_v32, %v6992_v14  ;;  %v2561_v11 = vpack.c.b16 %v2540_v53, %v2539_v15  ;;  %v2404_v14 = vsel %vm6793_vm2, %v5818_v46, %v2403_v16  ;;  %v7188_v41 = vrot.slane %v1766_v6, 5  ;;  %v1455_v16 = vld [vmem:[#allocation2 + $0xcc] sm:$0x1]  ;;  %4534 = vmatpush.bf16.msra.mxu3 %v6364_v7 }
 0x13a   : > { %v1997_v62 = vpop.f32.mrf.mxu2  ;;  %v1772_v15 = vrot.slane %v1770_v44, 4  ;;  %v1259_v53 = vpack.c.b16 %v1239_v45, %v1238_v58  ;;  %v2541_v32 = vunpack.c.l.b16 %v2404_v14  ;;  %v2542_v46 = vunpack.c.l.b16 %v2413_v1  ;;  %v7198_v58 = vld [vmem:[#allocation2 + $0xd8] sm:$0xf]  ;;  %v6372_v1 = vld [vmem:[%s8220_s1 + $0x208] sm:$0xff] }
 0x13b   : > { %v2073_v18 = vadd.f32 %v1997_v62, %v7132_v21  ;;  %v7186_v21 = vunpack.c.l.b16 %v1755_v51  ;;  %v874_v51 = vsel %vm6793_vm2, %v5611_v57, %v873_v12  ;;  %v1776_v6 = vshll.u32 %v1455_v16, 16  ;;  %5216 = vmatpush.bf16.msra.mxu0 %v6372_v1 }
 0x13c   : > { %v2647_v43 = vpop.f32.mrf.mxu3  ;;  %v1773_v45 = vor.u32 %v1772_v15, %v7188_v41  ;;  %v2420_v44 = vshrl.u32 %v7190_v50, 16  ;;  %v7213_v38 = vpack.c.b16 %v2542_v46, %v2541_v32  ;;  %v2415_v14 = vshrl.u32 %v2138_v48, 16 }
 0x13d   : > { %v2723_v34 = vadd.f32 %v2647_v43, %v2073_v18  ;;  %v1456_v18 = vld [vmem:[#allocation2 + $0xd4] sm:$0xf]  ;;  %v6310_v43 = vld [vmem:[#allocation2 + $0xc4] sm:$0xff]  ;;  %v2429_v0 = vshrl.u32 %v7198_v58, 16  ;;  %v1240_v57 = vunpack.c.l.b16 %v874_v51  ;;  %v1790_v32 = vshll.u32 %v1457_v19, 16 }
 0x13e   : > { %v7182_v4 = vpop.f32.mrf.mxu0  ;;  %v1784_v15 = vshll.u32 %v1456_v18, 16  ;;  %v1774_v12 = vrot.slane %v1773_v45, 4  ;;  %v1794_v46 = vshrl.u32 %v1457_v19, 16  ;;  %v1778_v16 = vrot.slane %v1776_v6, 5  ;;  %v586_v51 = vld [vmem:[#allocation2 + $0xd0] sm:$0x8] }
 0x13f   : > { %2039 = vmatmul.bf16.gmra.mxu2 %v1911_v3  ;;  %v7193_v56 = vadd.f32 %v7140_v9, %v2723_v34  ;;  %v882_v3 = vor.u32 %v880_v22, %v879_v29  ;;  %v6332_v34 = vld [vmem:[%s8220_s1 + $0x148] sm:$0xff]  ;;  %v587_v29 = vld [vmem:[#allocation2 + $0xd4] sm:$0xf]  ;;  %v1781_v22 = vshrl.u32 %v1456_v18, 16  ;;  %v2423_v48 = vshll.u32 %v7190_v50, 16 }
 0x140   : > { %v1352_v28 = vpop.f32.mrf.mxu1  ;;  %3601 = vmatpush.bf16.msra.mxu1 %v6332_v34  ;;  %v2431_v7 = vrot.slane %v2429_v0, 7  ;;  %v890_v45 = vshrl.u32 %v587_v29, 16  ;;  %v5819_v19 = vrot.slane %v2415_v14, 11  ;;  %v1458_v0 = vld [vmem:[#allocation2 + $0xdc] sm:$0x1] }
 0x141   : > { %2689 = vmatmul.bf16.gmra.mxu3 %v2561_v11  ;;  %v7196_v63 = vadd.f32 %v1352_v28, %v7026_v2  ;;  %v1764_v11 = vrot.slane %v1763_v55, 4  ;;  %v883_v59 = vsel %vm6793_vm2, %v875_v35, %v882_v3  ;;  %v588_v28 = vld [vmem:[#allocation2 + $0xd8] sm:$0xf]  ;;  %v2422_v55 = vrot.slane %v2420_v44, 7  ;;  %v2143_v9 = vld [vmem:[#allocation2 + $0xe8] sm:$0xf] }
 0x142   : > { %v2000_v62 = vpop.f32.mrf.mxu2  ;;  %v899_v50 = vshrl.u32 %v588_v28, 16  ;;  %v1783_v6 = vrot.slane %v1781_v22, 4  ;;  %v1786_v44 = vrot.slane %v1784_v15, 5  ;;  %v892_v22 = vrot.slane %v890_v45, 7 }
 0x143   : > { %v2074_v2 = vadd.f32 %v2000_v62, %v7150_v61  ;;  %1391 = vmatmul.bf16.gmra.mxu1 %v1259_v53  ;;  %v1769_v52 = vsel %vm6803_vm5, %v1764_v11, %v7188_v41  ;;  %v2432_v62 = vshll.u32 %v7198_v58, 16  ;;  %v1779_v58 = vsel %vm6803_vm5, %v1774_v12, %v1778_v16 }
 0x144   : > { %v2650_v40 = vpop.f32.mrf.mxu3  ;;  %v2425_v11 = vor.u32 %v2423_v48, %v2422_v55  ;;  %v893_v15 = vshll.u32 %v587_v29, 16  ;;  %v901_v14 = vrot.slane %v899_v50, 7  ;;  %v1800_v16 = vshll.u32 %v1458_v0, 16 }
 0x145   : > { %v2724_v61 = vadd.f32 %v2650_v40, %v2074_v2  ;;  %v7237_v40 = vrot.slane %v1790_v32, 5  ;;  %v2434_v1 = vor.u32 %v2432_v62, %v2431_v7  ;;  %v902_v32 = vshll.u32 %v588_v28, 16 }
 0x146   : > { %v7224_v53 = vpop.f32.mrf.mxu0  ;;  %v8242_v7 = vpack.c.b16 %v7186_v21, %v7184_v27  ;;  %v7250_v29 = vunpack.c.l.b16 %v1779_v58  ;;  %v2426_v28 = vsel %vm6793_vm2, %v5819_v19, %v2425_v11  ;;  %v2451_v45 = vshrl.u32 %v2143_v9, 16 }
 0x147   : > { %v7228_v35 = vadd.f32 %v7162_v26, %v2724_v61  ;;  %v1241_v26 = vunpack.c.l.b16 %v883_v59  ;;  %v1796_v61 = vrot.slane %v1794_v46, 4  ;;  %v897_v27 = vrot.slane %v892_v22, 4 }
 0x148   : > { %v1354_v3 = vpop.f32.mrf.mxu1  ;;  %v904_v21 = vor.u32 %v902_v32, %v901_v14  ;;  %v1802_v19 = vrot.slane %v1800_v16, 5  ;;  %v2453_v0 = vrot.slane %v2451_v45, 7  ;;  %v6311_v14 = vld [vmem:[#allocation2 + $0xd4] sm:$0xff]  ;;  %v590_v32 = vld [vmem:[#allocation2 + $0xe4] sm:$0xf] }
 0x149   : > { %8241 = vst [vmem:[#allocation14_spill] sm:$0xff] %v7228_v35  ;;  %2976 = vmatmul.bf16.gmra.mxu0 %v6310_v43  ;;  %v7235_v2 = vadd.f32 %v1354_v3, %v7045_v5  ;;  %v2427_v43 = vrot.slane %v2422_v55, 4  ;;  %v2142_v5 = vld [vmem:[#allocation2 + $0xe4] sm:$0xf]  ;;  %v885_v3 = vshrl.u32 %v586_v51, 16  ;;  %v1787_v35 = vor.u32 %v1786_v44, %v1783_v6 }
 0x14a   : > { %v2002_v18 = vpop.f32.mrf.mxu2  ;;  %v1797_v12 = vor.u32 %v1796_v61, %v7237_v40  ;;  %v2141_v55 = vld [vmem:[#allocation2 + $0xe0] sm:$0x8]  ;;  %v2442_v48 = vshrl.u32 %v2142_v5, 16  ;;  %v1260_v62 = vpack.c.b16 %v1241_v26, %v1240_v57  ;;  %v895_v6 = vor.u32 %v893_v15, %v892_v22  ;;  %v1460_v22 = vld [vmem:[#allocation2 + $0xe8] sm:$0xf] }
 0x14b   : > { %v2075_v41 = vadd.f32 %v2002_v18, %v7173_v13  ;;  %v7244_v13 = vunpack.c.l.b16 %v1769_v52  ;;  %v2435_v52 = vsel %vm6793_vm2, %v2427_v43, %v2434_v1  ;;  %v5612_v50 = vrot.slane %v885_v3, 11  ;;  %v1459_v1 = vld [vmem:[#allocation2 + $0xe4] sm:$0xf] }
 0x14c   : > { %v2652_v34 = vpop.f32.mrf.mxu3  ;;  %v1788_v57 = vrot.slane %v1787_v35, 4  ;;  %v2437_v18 = vshrl.u32 %v2141_v55, 16  ;;  %v1798_v61 = vrot.slane %v1797_v12, 4  ;;  %v2445_v58 = vshll.u32 %v2142_v5, 16  ;;  %v591_v12 = vld [vmem:[#allocation2 + $0xe8] sm:$0xf] }
 0x14d   : > { %v2725_v59 = vadd.f32 %v2652_v34, %v2075_v41  ;;  %v2444_v41 = vrot.slane %v2442_v48, 7  ;;  %v2543_v43 = vunpack.c.l.b16 %v2426_v28  ;;  %v2454_v34 = vshll.u32 %v2143_v9, 16 }
 0x14e   : > { %v7242_v46 = vpop.f32.mrf.mxu0  ;;  %v2544_v3 = vunpack.c.l.b16 %v2435_v52  ;;  %v1805_v35 = vshrl.u32 %v1459_v1, 16  ;;  %v1808_v15 = vshll.u32 %v1459_v1, 16  ;;  %v905_v5 = vsel %vm6793_vm2, %v897_v27, %v904_v21  ;;  %v589_v52 = vld [vmem:[#allocation2 + $0xe0] sm:$0x8] }
 0x14f   : > { %2044 = vmatmul.bf16.gmra.mxu2 %v8242_v7  ;;  %v7259_v44 = vadd.f32 %v7182_v4, %v2725_v59  ;;  %v5820_v9 = vrot.slane %v2437_v18, 11  ;;  %v1803_v55 = vsel %vm6803_vm5, %v1798_v61, %v1802_v19  ;;  %v2447_v48 = vor.u32 %v2445_v58, %v2444_v41 }
 0x150   : > { %v7254_v51 = vpop.f32.mrf.mxu1  ;;  %v912_v7 = vshrl.u32 %v590_v32, 16  ;;  %v2449_v28 = vrot.slane %v2444_v41, 4  ;;  %v2456_v45 = vor.u32 %v2454_v34, %v2453_v0  ;;  %v907_v21 = vshrl.u32 %v589_v52, 16 }
 0x151   : > { %2694 = vmatmul.bf16.gmra.mxu3 %v7213_v38  ;;  %v896_v38 = vsel %vm6793_vm2, %v5612_v50, %v895_v6  ;;  %v1807_v50 = vrot.slane %v1805_v35, 4  ;;  %v1814_v6 = vshll.u32 %v1460_v22, 16  ;;  %v1913_v18 = vpack.c.b16 %v7250_v29, %v7244_v13  ;;  %v7287_v29 = vld [vmem:[#allocation2 + $0xf4] sm:$0xf] }
 0x152   : > { %v2005_v26 = vpop.f32.mrf.mxu2  ;;  %v924_v1 = vshll.u32 %v591_v12, 16  ;;  %v1818_v61 = vshrl.u32 %v1460_v22, 16  ;;  %v2563_v58 = vpack.c.b16 %v2544_v3, %v2543_v43  ;;  %v1243_v41 = vunpack.c.l.b16 %v905_v5  ;;  %v7291_v5 = vld [vmem:[#allocation2 + $0xf8] sm:$0xf] }
 0x153   : > { %v2076_v11 = vadd.f32 %v2005_v26, %v7196_v63  ;;  %1396 = vmatmul.bf16.gmra.mxu1 %v1260_v62  ;;  %v1793_v63 = vsel %vm6803_vm5, %v1788_v57, %v7237_v40  ;;  %v921_v62 = vshrl.u32 %v591_v12, 16  ;;  %v914_v26 = vrot.slane %v912_v7, 7 }
 0x154   : > { %v2655_v4 = vpop.f32.mrf.mxu3  ;;  %v915_v40 = vshll.u32 %v590_v32, 16  ;;  %v1810_v57 = vrot.slane %v1808_v15, 5  ;;  %v7278_v0 = vunpack.c.l.b16 %v1793_v63  ;;  %v7281_v35 = vunpack.c.l.b16 %v1803_v55  ;;  %v376_v55 = vld [vmem:[%s6490_s8 + $0xf0] sm:$0xff] }
 0x155   : > { %v7265_v59 = vadd.f32 %v2655_v4, %v2076_v11  ;;  %v923_v11 = vrot.slane %v921_v62, 7  ;;  %v1242_v4 = vunpack.c.l.b16 %v896_v38  ;;  %v2448_v15 = vsel %vm6793_vm2, %v5820_v9, %v2447_v48  ;;  %v1461_v48 = vld [vmem:[#allocation2 + $0xec] sm:$0x1] }
 0x156   : > { %v7272_v16 = vpop.f32.mrf.mxu0  ;;  %v2457_v13 = vsel %vm6793_vm2, %v2449_v28, %v2456_v45  ;;  %v917_v43 = vor.u32 %v915_v40, %v914_v26  ;;  %v1811_v3 = vor.u32 %v1810_v57, %v1807_v50  ;;  %v7289_v38 = vrot.slane %v1814_v6, 5  ;;  %v2144_v50 = vld [vmem:[#allocation2 + $0xf0] sm:$0x8] }
 0x157   : > { %v926_v32 = vor.u32 %v924_v1, %v923_v11  ;;  %v1820_v12 = vrot.slane %v1818_v61, 4  ;;  %v1261_v9 = vpack.c.b16 %v1243_v41, %v1242_v4  ;;  %v2464_v62 = vshrl.u32 %v7287_v29, 16  ;;  %v6355_v1 = vld [vmem:[%s8220_s1 + $0x180] sm:$0xff] }
 0x158   : > { %v1359_v27 = vpop.f32.mrf.mxu1  ;;  %v1358_v28 = vadd.f32 %v7254_v51, %v6885_v8  ;;  %v2545_v45 = vunpack.c.l.b16 %v2448_v15  ;;  %v2546_v52 = vunpack.c.l.b16 %v2457_v13  ;;  %v2473_v6 = vshrl.u32 %v7291_v5, 16  ;;  %v6414_v8 = vld [vmem:[%s8221_s2] ss:$0 sm:$0xff]  ;;  %4253 = vmatpush.bf16.msra.mxu2 %v6355_v1 }
 0x159   : > { %2981 = vmatmul.bf16.gmra.mxu0 %v6311_v14  ;;  %v5613_v14 = vrot.slane %v907_v21, 11  ;;  %v7301_v21 = vadd.f32 %v1359_v27, %v6901_v49  ;;  %v1914_v40 = vpack.c.b16 %v7281_v35, %v7278_v0  ;;  %v1812_v57 = vrot.slane %v1811_v3, 4  ;;  %v6363_v61 = vld [vmem:[%s8220_s1 + $0x1c0] sm:$0xff]  ;;  %v1462_v3 = vld [vmem:[#allocation2 + $0xf4] sm:$0xf] }
 0x15a   : > { %v2007_v19 = vpop.f32.mrf.mxu2  ;;  %v412_v51 = vmul.f32 %v6414_v8, %v376_v55  ;;  %v1821_v49 = vor.u32 %v1820_v12, %v7289_v38  ;;  %v1824_v27 = vshll.u32 %v1461_v48, 16  ;;  %v2466_v41 = vrot.slane %v2464_v62, 7  ;;  %4535 = vmatpush.bf16.msra.mxu3 %v6363_v61 }
 0x15b   : > { %v2077_v34 = vadd.f32 %v2007_v19, %v7235_v2  ;;  %v919_v2 = vrot.slane %v914_v26, 4  ;;  %v377_v19 = vld [vmem:[%s6490_s8 + $0xf8] sm:$0xff]  ;;  %v7325_v15 = vadd.f32 %v7224_v53, %v7265_v59 }
 0x15c   : > { %v2657_v22 = vpop.f32.mrf.mxu3  ;;  %v1463_v53 = vld [vmem:[#allocation2 + $0xf8] sm:$0xf]  ;;  %v413_v59 = vmul.f32 %v6414_v8, %v377_v19  ;;  %v1826_v62 = vrot.slane %v1824_v27, 5  ;;  %v1829_v8 = vshrl.u32 %v1462_v3, 16  ;;  %v592_v27 = vld [vmem:[#allocation2 + $0xf0] sm:$0x8] }
 0x15d   : > { %v2727_v63 = vadd.f32 %v2657_v22, %v2077_v34  ;;  %v927_v11 = vsel %vm6793_vm2, %v919_v2, %v926_v32  ;;  %v2467_v34 = vshll.u32 %v7287_v29, 16  ;;  %v7327_v22 = vpack.c.b16 %v2546_v52, %v2545_v45  ;;  %v6312_v32 = vld [vmem:[#allocation2 + $0xe4] sm:$0xff]  ;;  %v593_v45 = vld [vmem:[#allocation2 + $0xf4] sm:$0xf] }
 0x15e   : > { %v7294_v7 = vpop.f32.mrf.mxu0  ;;  %v1245_v55 = vunpack.c.l.b16 %v927_v11  ;;  %v1817_v29 = vsel %vm6803_vm5, %v1812_v57, %v7289_v38  ;;  %v594_v57 = vld [vmem:[#allocation2 + $0xf8] sm:$0xf]  ;;  %v2471_v11 = vrot.slane %v2466_v41, 4  ;;  %v934_v1 = vshrl.u32 %v593_v45, 16 }
 0x15f   : > { %2049 = vmatmul.bf16.gmra.mxu2 %v1913_v18  ;;  %v918_v18 = vsel %vm6793_vm2, %v5613_v14, %v917_v43  ;;  %v2475_v14 = vrot.slane %v2473_v6, 7  ;;  %v2476_v43 = vshll.u32 %v7291_v5, 16  ;;  %v6331_v5 = vld [vmem:[%s8220_s1 + $0x140] sm:$0xff]  ;;  %v7340_v52 = vadd.f32 %v7242_v46, %v2727_v63 }
 0x160   : > { %v7303_v26 = vpop.f32.mrf.mxu1  ;;  %v1244_v12 = vunpack.c.l.b16 %v918_v18  ;;  %v2469_v6 = vor.u32 %v2467_v34, %v2466_v41  ;;  %v1832_v18 = vshll.u32 %v1462_v3, 16  ;;  %3602 = vmatpush.bf16.msra.mxu1 %v6331_v5  ;;  %v1838_v46 = vshll.u32 %v1463_v53, 16  ;;  %v6415_v63 = vld [vmem:[%s8222_s3] ss:$0 sm:$0xff] }
 0x161   : > { %2699 = vmatmul.bf16.gmra.mxu3 %v2563_v58  ;;  %v2459_v58 = vshrl.u32 %v2144_v50, 16  ;;  %v449_v34 = vadd.f32 %v6415_v63, %v413_v59  ;;  %v936_v59 = vrot.slane %v934_v1, 7 }
 0x162   : > { %v2010_v4 = vpop.f32.mrf.mxu2  ;;  %v1262_v41 = vpack.c.b16 %v1245_v55, %v1244_v12 }
 0x163   : > { %v2078_v13 = vadd.f32 %v2010_v4, %v1358_v28  ;;  %1401 = vmatmul.bf16.gmra.mxu1 %v1261_v9  ;;  %v1822_v9 = vrot.slane %v1821_v49, 4  ;;  %v6371_v28 = vld [vmem:[%s8220_s1 + $0x200] sm:$0xff]  ;;  %v5821_v38 = vrot.slane %v2459_v58, 11  ;;  %v2478_v49 = vor.u32 %v2476_v43, %v2475_v14 }
 0x164   : > { %v2660_v2 = vpop.f32.mrf.mxu3  ;;  %5217 = vmatpush.bf16.msra.mxu0 %v6371_v28  ;;  %v7347_v4 = vunpack.c.l.b16 %v1817_v29  ;;  %v448_v58 = vadd.f32 %v6415_v63, %v412_v51  ;;  %v943_v14 = vshrl.u32 %v594_v57, 16  ;;  %v1842_v43 = vshrl.u32 %v1463_v53, 16 }
 0x165   : > { %v2728_v48 = vadd.f32 %v2660_v2, %v2078_v13  ;;  %v1827_v13 = vsel %vm6803_vm5, %v1822_v9, %v1826_v62  ;;  %v929_v2 = vshrl.u32 %v592_v27, 16  ;;  %v1831_v29 = vrot.slane %v1829_v8, 4 }
 0x166   : > { %v7342_v50 = vpop.f32.mrf.mxu0  ;;  %v2479_v51 = vsel %vm6793_vm2, %v2471_v11, %v2478_v49  ;;  %v7359_v55 = vunpack.c.l.b16 %v1827_v13  ;;  %v7361_v9 = vrot.slane %v1838_v46, 5  ;;  %v480_v53 = vmax.f32 %v448_v58, 0.0 }
 0x167   : > { %v7345_v61 = vadd.f32 %v7272_v16, %v2728_v48  ;;  %v2470_v16 = vsel %vm6793_vm2, %v5821_v38, %v2469_v6  ;;  %v1834_v48 = vrot.slane %v1832_v18, 5  ;;  %v481_v62 = vmax.f32 %v449_v34, 0.0 }
 0x168   : > { %v1364_v19 = vpop.f32.mrf.mxu1  ;;  %v945_v63 = vrot.slane %v943_v14, 7  ;;  %v946_v38 = vshll.u32 %v594_v57, 16  ;;  %v1844_v6 = vrot.slane %v1842_v43, 4  ;;  %v2547_v18 = vunpack.c.l.b16 %v2470_v16  ;;  %v3034_v16 = vld [vmem:[#allocation2 + $0x14] sm:$0xf] }
 0x169   : > { %2986 = vmatmul.bf16.gmra.mxu0 %v6312_v32  ;;  %v937_v32 = vshll.u32 %v593_v45, 16  ;;  %v5614_v27 = vrot.slane %v929_v2, 11  ;;  %v1835_v11 = vor.u32 %v1834_v48, %v1831_v29  ;;  %v512_v49 = vpack.c.bf16 %v480_v53, %v480_v53  ;;  %v3035_v2 = vld [vmem:[#allocation2 + $0x18] sm:$0xf]  ;;  %v2147_v48 = vld [vmem:[#allocation2 + $0x100] sm:$0x8] }
 0x16a   : > { %v2012_v3 = vpop.f32.mrf.mxu2  ;;  %v513_v1 = vpack.c.bf16 %v481_v62, %v481_v62  ;;  %v1363_v57 = vadd.f32 %v7303_v26, %v6910_v30  ;;  %v941_v34 = vrot.slane %v936_v59, 4  ;;  %v948_v13 = vor.u32 %v946_v38, %v945_v63  ;;  %v7386_v62 = vld [vmem:[#allocation2 + $0x24] sm:$0xf] }
 0x16b   : > { %v2079_v5 = vadd.f32 %v2012_v3, %v7301_v21  ;;  %v2548_v21 = vunpack.c.l.b16 %v2479_v51  ;;  %v1464_v3 = vld [vmem:[#allocation2 + $0xfc] sm:$0x1]  ;;  %v939_v45 = vor.u32 %v937_v32, %v936_v59  ;;  %v1845_v14 = vor.u32 %v1844_v6, %v7361_v9  ;;  %545 = vst [vmem:[#allocation2 + $0x104] sm:$0xf] %v512_v49  ;;  %v6313_v32 = vld [vmem:[#allocation2 + $0xf4] sm:$0xff] }
 0x16c   : > { %v2662_v12 = vpop.f32.mrf.mxu3  ;;  %v1848_v43 = vshll.u32 %v1464_v3, 16  ;;  %v1365_v35 = vadd.f32 %v1364_v19, %v6949_v10  ;;  %546 = vst [vmem:[#allocation2 + $0x108] sm:$0xf] %v513_v1  ;;  %v3086_v51 = vshll.u32 %v3034_v16, 16  ;;  %v3092_v59 = vshll.u32 %v3035_v2, 16 }
 0x16d   : > { %v2729_v28 = vadd.f32 %v2662_v12, %v2079_v5  ;;  %v7380_v30 = vpack.c.b16 %v2548_v21, %v2547_v18  ;;  %v940_v26 = vsel %vm6793_vm2, %v5614_v27, %v939_v45  ;;  %v3083_v5 = vshrl.u32 %v3034_v16, 16 }
 0x16e   : > { %v7363_v8 = vpop.f32.mrf.mxu0  ;;  %v3096_v10 = vshrl.u32 %v3035_v2, 16  ;;  %v949_v12 = vsel %vm6793_vm2, %v941_v34, %v948_v13  ;;  %v1850_v53 = vrot.slane %v1848_v43, 5  ;;  %v3088_v38 = vrot.slane %v3086_v51, 5 }
 0x16f   : > { %2054 = vmatmul.bf16.gmra.mxu2 %v1914_v40  ;;  %v7369_v46 = vadd.f32 %v7294_v7, %v2729_v28  ;;  %v1915_v7 = vpack.c.b16 %v7359_v55, %v7347_v4  ;;  %v3085_v63 = vrot.slane %v3083_v5, 4  ;;  %v3094_v6 = vrot.slane %v3092_v59, 5 }
 0x170   : > { %v7373_v58 = vpop.f32.mrf.mxu1  ;;  %v3098_v18 = vrot.slane %v3096_v10, 4  ;;  %v1246_v21 = vunpack.c.l.b16 %v940_v26  ;;  %v2481_v3 = vshrl.u32 %v2147_v48, 16  ;;  %v3771_v43 = vshrl.u32 %v7386_v62, 16 }
 0x171   : > { %2704 = vmatmul.bf16.gmra.mxu3 %v7327_v22  ;;  %v1836_v22 = vrot.slane %v1835_v11, 4  ;;  %v3036_v11 = vld [vmem:[#allocation2 + $0x1c] sm:$0x1] }
 0x172   : > { %v2015_v0 = vpop.f32.mrf.mxu2  ;;  %v2148_v1 = vld [vmem:[#allocation2 + $0x104] sm:$0xf]  ;;  %v3099_v34 = vor.u32 %v3098_v18, %v3094_v6  ;;  %v3102_v13 = vshll.u32 %v3036_v11, 16  ;;  %v5822_v59 = vrot.slane %v2481_v3, 11 }
 0x173   : > { %v2080_v40 = vadd.f32 %v2015_v0, %v1363_v57  ;;  %1406 = vmatmul.bf16.gmra.mxu1 %v1262_v41  ;;  %v1846_v41 = vrot.slane %v1845_v14, 4  ;;  %v1841_v27 = vsel %vm6803_vm5, %v1836_v22, %v7361_v9  ;;  %v3089_v57 = vor.u32 %v3088_v38, %v3085_v63  ;;  %v7398_v14 = vld [vmem:[#allocation2 + $0x28] sm:$0xf] }
 0x174   : > { %v2665_v29 = vpop.f32.mrf.mxu3  ;;  %v1247_v0 = vunpack.c.l.b16 %v949_v12  ;;  %v2486_v26 = vshrl.u32 %v2148_v1, 16  ;;  %v2489_v22 = vshll.u32 %v2148_v1, 16  ;;  %v3100_v5 = vrot.slane %v3099_v34, 4 }
 0x175   : > { %v2730_v19 = vadd.f32 %v2665_v29, %v2080_v40  ;;  %v1851_v9 = vsel %vm6803_vm5, %v1846_v41, %v1850_v53  ;;  %v2149_v40 = vld [vmem:[#allocation2 + $0x108] sm:$0xf]  ;;  %v3090_v48 = vrot.slane %v3089_v57, 4  ;;  %v7403_v12 = vrot.slane %v3771_v43, 7  ;;  %v4649_v53 = vld [vmem:[#allocation2 + $0x24] sm:$0xf] }
 0x176   : > { %v7388_v28 = vpop.f32.mrf.mxu0  ;;  %v2495_v2 = vshrl.u32 %v2149_v40, 16  ;;  %v2498_v29 = vshll.u32 %v2149_v40, 16  ;;  %v2488_v10 = vrot.slane %v2486_v26, 7  ;;  %v3780_v41 = vshrl.u32 %v7398_v14, 16 }
 0x177   : > { %v7394_v45 = vadd.f32 %v7342_v50, %v2730_v19  ;;  %v3717_v50 = vld [vmem:[#allocation2 + $0x20] sm:$0x8]  ;;  %v3104_v19 = vrot.slane %v3102_v13, 5  ;;  %v3095_v57 = vsel %vm6803_vm5, %v3090_v48, %v3094_v6  ;;  %v1368_v43 = vadd.f32 %v7373_v58, %v6962_v54  ;;  %v4651_v48 = vld [vmem:[#allocation2 + $0x2c] sm:$0x1] }
 0x178   : > { %v7396_v49 = vpop.f32.mrf.mxu1  ;;  %v2497_v38 = vrot.slane %v2495_v2, 7  ;;  %v2491_v11 = vor.u32 %v2489_v22, %v2488_v10  ;;  %v2493_v1 = vrot.slane %v2488_v10, 4  ;;  %v1263_v40 = vpack.c.b16 %v1247_v0, %v1246_v21  ;;  %v4650_v22 = vld [vmem:[#allocation2 + $0x28] sm:$0xf] }
 0x179   : > { %2991 = vmatmul.bf16.gmra.mxu0 %v6313_v32  ;;  %v3766_v32 = vshrl.u32 %v3717_v50, 16  ;;  %v3105_v13 = vsel %vm6803_vm5, %v3100_v5, %v3104_v19  ;;  %v3774_v26 = vshll.u32 %v7386_v62, 16  ;;  %v4698_v6 = vshrl.u32 %v4649_v53, 16  ;;  %v3037_v19 = vld [vmem:[#allocation2 + $0x24] sm:$0xf] }
 0x17a   : > { %v2017_v16 = vpop.f32.mrf.mxu2  ;;  %v2500_v3 = vor.u32 %v2498_v29, %v2497_v38  ;;  %v2492_v54 = vsel %vm6793_vm2, %v5822_v59, %v2491_v11  ;;  %v7434_v55 = vunpack.c.l.b16 %v3105_v13  ;;  %v3782_v58 = vrot.slane %v3780_v41, 7  ;;  %v3038_v59 = vld [vmem:[#allocation2 + $0x28] sm:$0xf] }
 0x17b   : > { %v2081_v51 = vadd.f32 %v2017_v16, %v1365_v35  ;;  %v7412_v35 = vunpack.c.l.b16 %v1841_v27  ;;  %v7422_v16 = vunpack.c.l.b16 %v1851_v9  ;;  %v7424_v27 = vunpack.c.l.b16 %v3095_v57 }
 0x17c   : > { %v2667_v63 = vpop.f32.mrf.mxu3  ;;  %v7426_v2 = vrot.slane %v3766_v32, 11  ;;  %v2501_v4 = vsel %vm6793_vm2, %v2493_v1, %v2500_v3  ;;  %v4700_v62 = vrot.slane %v4698_v6, 4  ;;  %v4701_v21 = vshll.u32 %v4649_v53, 16  ;;  %v6314_v53 = vld [vmem:[#allocation2 + $0x104] sm:$0xff] }
 0x17d   : > { %v7406_v18 = vadd.f32 %v2667_v63, %v2081_v51  ;;  %v4707_v0 = vshll.u32 %v4650_v22, 16  ;;  %v4711_v9 = vshrl.u32 %v4650_v22, 16  ;;  %v3776_v51 = vor.u32 %v3774_v26, %v7403_v12 }
 0x17e   : > { %v7410_v34 = vpop.f32.mrf.mxu0  ;;  %v4717_v10 = vshll.u32 %v4651_v48, 16  ;;  %v2549_v38 = vunpack.c.l.b16 %v2492_v54  ;;  %v4703_v32 = vrot.slane %v4701_v21, 5  ;;  %v2550_v57 = vunpack.c.l.b16 %v2501_v4 }
 0x17f   : > { %2059 = vmatmul.bf16.gmra.mxu2 %v1915_v7  ;;  %v4709_v11 = vrot.slane %v4707_v0, 5  ;;  %v4713_v1 = vrot.slane %v4711_v9, 4  ;;  %v3107_v3 = vshrl.u32 %v3037_v19, 16  ;;  %v3110_v13 = vshll.u32 %v3037_v19, 16 }
 0x180   : > { %v1372_v50 = vpop.f32.mrf.mxu1  ;;  %v4704_v26 = vor.u32 %v4703_v32, %v4700_v62  ;;  %v4719_v22 = vrot.slane %v4717_v10, 5  ;;  %v3116_v6 = vshll.u32 %v3038_v59, 16  ;;  %v3120_v0 = vshrl.u32 %v3038_v59, 16  ;;  %v3720_v10 = vld [vmem:[#allocation2 + $0x30] sm:$0x8] }
 0x181   : > { %2709 = vmatmul.bf16.gmra.mxu3 %v7380_v30  ;;  %v3783_v30 = vshll.u32 %v7398_v14, 16  ;;  %v4714_v14 = vor.u32 %v4713_v1, %v4709_v11  ;;  %v3109_v54 = vrot.slane %v3107_v3, 4  ;;  %v3112_v21 = vrot.slane %v3110_v13, 5 }
 0x182   : > { %v2020_v7 = vpop.f32.mrf.mxu2  ;;  %v1370_v29 = vadd.f32 %v7396_v49, %v6985_v33  ;;  %v1916_v62 = vpack.c.b16 %v7422_v16, %v7412_v35  ;;  %v1373_v49 = vadd.f32 %v1372_v50, %v6994_v24  ;;  %v2566_v35 = vpack.c.b16 %v2550_v57, %v2549_v38 }
 0x183   : > { %v2082_v5 = vadd.f32 %v2020_v7, %v1368_v43  ;;  %1411 = vmatmul.bf16.gmra.mxu1 %v1263_v40  ;;  %v7440_v43 = vld [vmem:[#allocation2 + $0x34] sm:$0xf]  ;;  %v3785_v48 = vor.u32 %v3783_v30, %v3782_v58  ;;  %v3039_v7 = vld [vmem:[#allocation2 + $0x2c] sm:$0x1]  ;;  %v4715_v4 = vrot.slane %v4714_v14, 4  ;;  %v3515_v58 = vpack.c.b16 %v7434_v55, %v7424_v27 }
 0x184   : > { %v2670_v63 = vpop.f32.mrf.mxu3  ;;  %v3793_v19 = vshrl.u32 %v7440_v43, 16  ;;  %v3122_v30 = vrot.slane %v3120_v0, 4  ;;  %v3113_v3 = vor.u32 %v3112_v21, %v3109_v54  ;;  %v3126_v13 = vshll.u32 %v3039_v7, 16 }
 0x185   : > { %v7438_v41 = vadd.f32 %v2670_v63, %v2082_v5  ;;  %v4705_v5 = vrot.slane %v4704_v26, 4  ;;  %v7446_v63 = vrot.slane %v3116_v6, 5  ;;  %v4720_v1 = vsel %vm6803_vm5, %v4715_v4, %v4719_v22  ;;  %v3722_v26 = vld [vmem:[#allocation2 + $0x38] sm:$0xf] }
 0x186   : > { %v7442_v40 = vpop.f32.mrf.mxu0  ;;  %v3777_v16 = vsel %vm6793_vm2, %v7426_v2, %v3776_v51  ;;  %v8243_v55 = vrot.slane %v7403_v12, 4  ;;  %v3788_v14 = vshrl.u32 %v3720_v10, 16  ;;  %v7470_v22 = vrot.slane %v3793_v19, 7  ;;  %v4653_v6 = vld [vmem:[#allocation2 + $0x38] sm:$0xf] }
 0x187   : > { %v4710_v32 = vsel %vm6803_vm5, %v4705_v5, %v4709_v11  ;;  %v5099_v38 = vunpack.c.l.b16 %v4720_v1  ;;  %v3802_v2 = vshrl.u32 %v3722_v26, 16  ;;  %v4654_v51 = vld [vmem:[#allocation2 + $0x3c] sm:$0x1]  ;;  %v4134_v12 = vunpack.c.l.b16 %v3777_v16 }
 0x188   : > { %v7444_v9 = vpop.f32.mrf.mxu1  ;;  %v7467_v11 = vsel %vm6793_vm2, %v8243_v55, %v3785_v48  ;;  %v7474_v50 = vunpack.c.l.b16 %v4710_v32  ;;  %v3114_v7 = vrot.slane %v3113_v3, 4  ;;  %v3128_v48 = vrot.slane %v3126_v13, 5 }
 0x189   : > { %2996 = vmatmul.bf16.gmra.mxu0 %v6314_v53  ;;  %v3123_v53 = vor.u32 %v3122_v30, %v7446_v63  ;;  %v3796_v54 = vshll.u32 %v7440_v43, 16  ;;  %v4731_v4 = vshll.u32 %v4653_v6, 16  ;;  %v4135_v30 = vunpack.c.l.b16 %v7467_v11 }
 0x18a   : > { %v2022_v59 = vpop.f32.mrf.mxu2  ;;  %v7482_v10 = vrot.slane %v3788_v14, 11  ;;  %v4741_v32 = vshll.u32 %v4654_v51, 16  ;;  %v5130_v1 = vpack.c.b16 %v5099_v38, %v7474_v50  ;;  %v3800_v3 = vrot.slane %v7470_v22, 4 }
 0x18b   : > { %v2083_v33 = vadd.f32 %v2022_v59, %v1370_v29  ;;  %v4652_v29 = vld [vmem:[#allocation2 + $0x34] sm:$0xf]  ;;  %v3124_v21 = vrot.slane %v3123_v53, 4  ;;  %v4735_v59 = vshrl.u32 %v4653_v6, 16  ;;  %v3804_v13 = vrot.slane %v3802_v2, 7 }
 0x18c   : > { %v2672_v27 = vpop.f32.mrf.mxu3  ;;  %v4722_v0 = vshrl.u32 %v4652_v29, 16  ;;  %v4725_v5 = vshll.u32 %v4652_v29, 16  ;;  %v3805_v43 = vshll.u32 %v3722_v26, 16  ;;  %v3119_v11 = vsel %vm6803_vm5, %v3114_v7, %v7446_v63  ;;  %v3040_v29 = vld [vmem:[#allocation2 + $0x34] sm:$0xf] }
 0x18d   : > { %v7472_v24 = vadd.f32 %v2672_v27, %v2083_v33  ;;  %v4733_v27 = vrot.slane %v4731_v4, 5  ;;  %v4737_v55 = vrot.slane %v4735_v59, 4  ;;  %v3798_v14 = vor.u32 %v3796_v54, %v7470_v22  ;;  %v3041_v6 = vld [vmem:[#allocation2 + $0x38] sm:$0xf]  ;;  %v3042_v22 = vld [vmem:[#allocation2 + $0x3c] sm:$0x1] }
 0x18e   : > { %v7476_v57 = vpop.f32.mrf.mxu0  ;;  %v4724_v33 = vrot.slane %v4722_v0, 4  ;;  %v4727_v16 = vrot.slane %v4725_v5, 5  ;;  %v4743_v2 = vrot.slane %v4741_v32, 5  ;;  %v3131_v51 = vshrl.u32 %v3040_v29, 16 }
 0x18f   : > { %2064 = vmatmul.bf16.gmra.mxu2 %v1916_v62  ;;  %v4738_v38 = vor.u32 %v4737_v55, %v4733_v27  ;;  %v3144_v5 = vshrl.u32 %v3041_v6, 16  ;;  %v3807_v63 = vor.u32 %v3805_v43, %v3804_v13  ;;  %v3485_v32 = vunpack.c.l.b16 %v3119_v11  ;;  %v3725_v13 = vld [vmem:[#allocation2 + $0x48] sm:$0xf] }
 0x190   : > { %v7479_v19 = vpop.f32.mrf.mxu1  ;;  %v4728_v26 = vor.u32 %v4727_v16, %v4724_v33  ;;  %v1375_v43 = vadd.f32 %v7444_v9, %v7030_v17  ;;  %v3824_v9 = vshrl.u32 %v3725_v13, 16 }
 0x191   : > { %2714 = vmatmul.bf16.gmra.mxu3 %v2566_v35  ;;  %v3129_v35 = vsel %vm6803_vm5, %v3124_v21, %v3128_v48  ;;  %v4739_v59 = vrot.slane %v4738_v38, 4  ;;  %v3133_v48 = vrot.slane %v3131_v51, 4  ;;  %v3724_v21 = vld [vmem:[#allocation2 + $0x44] sm:$0xf]  ;;  %v3146_v33 = vrot.slane %v3144_v5, 4 }
 0x192   : > { %v2025_v62 = vpop.f32.mrf.mxu2  ;;  %v4729_v7 = vrot.slane %v4728_v26, 4  ;;  %v3486_v55 = vunpack.c.l.b16 %v3129_v35  ;;  %v3815_v26 = vshrl.u32 %v3724_v21, 16  ;;  %v7511_v11 = vsel %vm6793_vm2, %v3800_v3, %v3807_v63  ;;  %v3723_v51 = vld [vmem:[#allocation2 + $0x40] sm:$0x8] }
 0x193   : > { %v2084_v53 = vadd.f32 %v2025_v62, %v1373_v49  ;;  %3603 = vmatmul.bf16.vlgmr.msra.gmra.mxu1 %v3515_v58  ;;  %v3134_v49 = vshll.u32 %v3040_v29, 16  ;;  %v3140_v58 = vshll.u32 %v3041_v6, 16  ;;  %v4744_v29 = vsel %vm6803_vm5, %v4739_v59, %v4743_v2 }
 0x194   : > { %v2675_v50 = vpop.f32.mrf.mxu3  ;;  %v4166_v6 = vpack.c.b16 %v4135_v30, %v4134_v12  ;;  %v3150_v2 = vshll.u32 %v3042_v22, 16  ;;  %v4655_v12 = vld [vmem:[#allocation2 + $0x44] sm:$0xf]  ;;  %v3818_v5 = vshll.u32 %v3724_v21, 16  ;;  %v3810_v59 = vshrl.u32 %v3723_v51, 16 }
 0x195   : > { %v7492_v0 = vadd.f32 %v2675_v50, %v2084_v53  ;;  %v3136_v54 = vrot.slane %v3134_v49, 5  ;;  %v7496_v62 = vrot.slane %v3140_v58, 5  ;;  %v4734_v53 = vsel %vm6803_vm5, %v4729_v7, %v4733_v27  ;;  %v4656_v22 = vld [vmem:[#allocation2 + $0x48] sm:$0xf] }
 0x196   : > { %v7494_v4 = vpop.f32.mrf.mxu0  ;;  %v3799_v50 = vsel %vm6793_vm2, %v7482_v10, %v3798_v14  ;;  %v7513_v27 = vunpack.c.l.b16 %v4734_v53  ;;  %v7515_v58 = vunpack.c.l.b16 %v4744_v29  ;;  %v1378_v10 = vadd.f32 %v7479_v19, %v6921_v39 }
 0x197   : > { %v3137_v35 = vor.u32 %v3136_v54, %v3133_v48  ;;  %v3147_v17 = vor.u32 %v3146_v33, %v7496_v62  ;;  %v3516_v14 = vpack.c.b16 %v3486_v55, %v3485_v32  ;;  %v7520_v3 = vunpack.c.l.b16 %v3799_v50  ;;  %v4657_v54 = vld [vmem:[#allocation2 + $0x4c] sm:$0x1] }
 0x198   : > { %v7498_v16 = vpop.f32.mrf.mxu1  ;;  %v4137_v7 = vunpack.c.l.b16 %v7511_v11  ;;  %v7525_v48 = vrot.slane %v3815_v26, 7  ;;  %v3826_v29 = vrot.slane %v3824_v9, 7  ;;  %v4746_v39 = vshrl.u32 %v4655_v12, 16 }
 0x199   : > { %5218 = vmatmul.bf16.vlgmr.msra.gmra.mxu0 %v5130_v1  ;;  %v6339_v1 = vld [vmem:[#allocation2 + $0x24] sm:$0xff]  ;;  %v3138_v53 = vrot.slane %v3137_v35, 4  ;;  %v5131_v19 = vpack.c.b16 %v7515_v58, %v7513_v27  ;;  %v3148_v21 = vrot.slane %v3147_v17, 4  ;;  %v3152_v32 = vrot.slane %v3150_v2, 5 }
 0x19a   : > { %v2027_v38 = vpop.f32.mrf.mxu2  ;;  %v4749_v55 = vshll.u32 %v4655_v12, 16  ;;  %v4755_v26 = vshll.u32 %v4656_v22, 16  ;;  %v4759_v51 = vshrl.u32 %v4656_v22, 16  ;;  %v3820_v35 = vor.u32 %v3818_v5, %v7525_v48  ;;  %v3043_v22 = vld [vmem:[#allocation2 + $0x44] sm:$0xf] }
 0x19b   : > { %v2085_v49 = vadd.f32 %v2027_v38, %v1375_v43  ;;  %v3827_v43 = vshll.u32 %v3725_v13, 16  ;;  %v4748_v38 = vrot.slane %v4746_v39, 4  ;;  %v3822_v13 = vrot.slane %v7525_v48, 4 }
 0x19c   : > { %v2677_v30 = vpop.f32.mrf.mxu3  ;;  %v4751_v9 = vrot.slane %v4749_v55, 5  ;;  %v3143_v27 = vsel %vm6803_vm5, %v3138_v53, %v7496_v62  ;;  %v4757_v58 = vrot.slane %v4755_v26, 5  ;;  %v4761_v17 = vrot.slane %v4759_v51, 4 }
 0x19d   : > { %v7522_v63 = vadd.f32 %v2677_v30, %v2085_v49  ;;  %v4765_v49 = vshll.u32 %v4657_v54, 16  ;;  %v6033_v30 = vrot.slane %v3810_v59, 11  ;;  %v3829_v2 = vor.u32 %v3827_v43, %v3826_v29  ;;  %v3044_v54 = vld [vmem:[#allocation2 + $0x48] sm:$0xf] }
 0x19e   : > { %v7527_v33 = vpop.f32.mrf.mxu0  ;;  %v4752_v39 = vor.u32 %v4751_v9, %v4748_v38  ;;  %v7544_v5 = vadd.f32 %v7388_v28, %v7438_v41  ;;  %v4762_v48 = vor.u32 %v4761_v17, %v4757_v58  ;;  %v3155_v62 = vshrl.u32 %v3043_v22, 16  ;;  %v3727_v38 = vld [vmem:[#allocation2 + $0x54] sm:$0xf] }
 0x19f   : > { %4254 = vmatmul.bf16.vlgmr.msra.gmra.mxu2 %v4166_v6  ;;  %v4767_v55 = vrot.slane %v4765_v49, 5  ;;  %v3158_v53 = vshll.u32 %v3043_v22, 16  ;;  %v3168_v43 = vshrl.u32 %v3044_v54, 16  ;;  %v3045_v49 = vld [vmem:[#allocation2 + $0x4c] sm:$0x1]  ;;  %v7558_v17 = vadd.f32 %v7410_v34, %v7472_v24 }
 0x1a0   : > { %v7531_v50 = vpop.f32.mrf.mxu1  ;;  %v3157_v51 = vrot.slane %v3155_v62, 4  ;;  %v3726_v22 = vld [vmem:[#allocation2 + $0x50] sm:$0x8]  ;;  %v7570_v34 = vsel %vm6793_vm2, %v3822_v13, %v3829_v2 }
 0x1a1   : > { %4536 = vmatmul.bf16.vlgmr.msra.gmra.mxu3 %v6339_v1  ;;  %v7540_v1 = vadd.f32 %v7363_v8, %v7406_v18  ;;  %v3153_v8 = vsel %vm6803_vm5, %v3148_v21, %v3152_v32  ;;  %v4763_v18 = vrot.slane %v4762_v48, 4  ;;  %v3160_v28 = vrot.slane %v3158_v53, 5  ;;  %v3728_v53 = vld [vmem:[#allocation2 + $0x58] sm:$0xf] }
 0x1a2   : > { %v2030_v6 = vpop.f32.mrf.mxu2  ;;  %v3488_v48 = vunpack.c.l.b16 %v3153_v8  ;;  %v1383_v2 = vadd.f32 %v7531_v50, %v6964_v60  ;;  %v3840_v8 = vshll.u32 %v3727_v38, 16  ;;  %v4139_v11 = vunpack.c.l.b16 %v7570_v34 }
 0x1a3   : > { %v2086_v12 = vadd.f32 %v2030_v6, %v1378_v10  ;;  %3608 = vmatmul.bf16.gmra.mxu1 %v3516_v14  ;;  %v4753_v10 = vrot.slane %v4752_v39, 4  ;;  %v3164_v14 = vshll.u32 %v3044_v54, 16  ;;  %v3170_v6 = vrot.slane %v3168_v43, 4 }
 0x1a4   : > { %v2680_v59 = vpop.f32.mrf.mxu3  ;;  %v3821_v39 = vsel %vm6793_vm2, %v6033_v30, %v3820_v35  ;;  %v4768_v21 = vsel %vm6803_vm5, %v4763_v18, %v4767_v55  ;;  %v3161_v32 = vor.u32 %v3160_v28, %v3157_v51  ;;  %v3837_v54 = vshrl.u32 %v3727_v38, 16  ;;  %v4659_v18 = vld [vmem:[#allocation2 + $0x58] sm:$0xf] }
 0x1a5   : > { %v7546_v29 = vadd.f32 %v2680_v59, %v2086_v12  ;;  %v4758_v41 = vsel %vm6803_vm5, %v4753_v10, %v4757_v58  ;;  %v7554_v9 = vrot.slane %v3164_v14, 5  ;;  %v1380_v58 = vadd.f32 %v7498_v16, %v6954_v20  ;;  %v6340_v28 = vld [vmem:[#allocation2 + $0x34] sm:$0xff] }
 0x1a6   : > { %v7548_v26 = vpop.f32.mrf.mxu0  ;;  %v3487_v59 = vunpack.c.l.b16 %v3143_v27  ;;  %v7572_v62 = vunpack.c.l.b16 %v4758_v41  ;;  %v7574_v30 = vunpack.c.l.b16 %v4768_v21  ;;  %v3174_v55 = vshll.u32 %v3045_v49, 16  ;;  %v4658_v27 = vld [vmem:[#allocation2 + $0x54] sm:$0xf]  ;;  %v4660_v21 = vld [vmem:[#allocation2 + $0x5c] sm:$0x1] }
 0x1a7   : > { %v3171_v35 = vor.u32 %v3170_v6, %v7554_v9  ;;  %v4167_v20 = vpack.c.b16 %v4137_v7, %v7520_v3  ;;  %v7580_v16 = vunpack.c.l.b16 %v3821_v39  ;;  %v3162_v14 = vrot.slane %v3161_v32, 4 }
 0x1a8   : > { %v7560_v12 = vpop.f32.mrf.mxu1  ;;  %v7584_v43 = vrot.slane %v3837_v54, 7  ;;  %v3517_v41 = vpack.c.b16 %v3488_v48, %v3487_v59  ;;  %v3846_v3 = vshrl.u32 %v3728_v53, 16  ;;  %v5132_v49 = vpack.c.b16 %v7574_v30, %v7572_v62 }
 0x1a9   : > { %5223 = vmatmul.bf16.gmra.mxu0 %v5131_v19  ;;  %v3832_v19 = vshrl.u32 %v3726_v22, 16  ;;  %v3172_v6 = vrot.slane %v3171_v35, 4  ;;  %v3176_v39 = vrot.slane %v3174_v55, 5  ;;  %v4770_v60 = vshrl.u32 %v4658_v27, 16 }
 0x1aa   : > { %v2032_v24 = vpop.f32.mrf.mxu2  ;;  %v4773_v38 = vshll.u32 %v4658_v27, 16  ;;  %v4779_v32 = vshll.u32 %v4659_v18, 16  ;;  %v4783_v22 = vshrl.u32 %v4659_v18, 16  ;;  %v3842_v59 = vor.u32 %v3840_v8, %v7584_v43  ;;  %v3046_v8 = vld [vmem:[#allocation2 + $0x54] sm:$0xf] }
 0x1ab   : > { %v2087_v10 = vadd.f32 %v2032_v24, %v1380_v58  ;;  %v6034_v50 = vrot.slane %v3832_v19, 11  ;;  %v3167_v58 = vsel %vm6803_vm5, %v3162_v14, %v7554_v9  ;;  %v3849_v48 = vshll.u32 %v3728_v53, 16  ;;  %v3047_v18 = vld [vmem:[#allocation2 + $0x58] sm:$0xf] }
 0x1ac   : > { %v2682_v13 = vpop.f32.mrf.mxu3  ;;  %v4772_v34 = vrot.slane %v4770_v60, 4  ;;  %v3848_v24 = vrot.slane %v3846_v3, 7  ;;  %v4775_v62 = vrot.slane %v4773_v38, 5  ;;  %v7597_v30 = vrot.slane %v4779_v32, 5 }
 0x1ad   : > { %v7586_v51 = vadd.f32 %v2682_v13, %v2087_v10  ;;  %v4785_v35 = vrot.slane %v4783_v22, 4  ;;  %v3177_v10 = vsel %vm6803_vm5, %v3172_v6, %v3176_v39  ;;  %v7603_v19 = vadd.f32 %v7442_v40, %v7492_v0 }
 0x1ae   : > { %v7589_v7 = vpop.f32.mrf.mxu0  ;;  %v7607_v9 = vadd.f32 %v7476_v57, %v7522_v63  ;;  %v3844_v27 = vrot.slane %v7584_v43, 4  ;;  %v4776_v13 = vor.u32 %v4775_v62, %v4772_v34  ;;  %v3179_v3 = vshrl.u32 %v3046_v8, 16 }
 0x1af   : > { %4259 = vmatmul.bf16.gmra.mxu2 %v4167_v20  ;;  %v4789_v20 = vshll.u32 %v4660_v21, 16  ;;  %v4786_v14 = vor.u32 %v4785_v35, %v7597_v30  ;;  %v3182_v6 = vshll.u32 %v3046_v8, 16  ;;  %v3188_v39 = vshll.u32 %v3047_v18, 16  ;;  %v7623_v35 = vld [vmem:[#allocation2 + $0x64] sm:$0xf] }
 0x1b0   : > { %v1387_v54 = vpop.f32.mrf.mxu1  ;;  %v3192_v60 = vshrl.u32 %v3047_v18, 16  ;;  %v7613_v0 = vunpack.c.l.b16 %v3167_v58  ;;  %v7615_v57 = vunpack.c.l.b16 %v3177_v10  ;;  %v3851_v63 = vor.u32 %v3849_v48, %v3848_v24 }
 0x1b1   : > { %4541 = vmatmul.bf16.gmra.mxu3 %v6340_v28  ;;  %v3843_v43 = vsel %vm6793_vm2, %v6034_v50, %v3842_v59  ;;  %v3181_v21 = vrot.slane %v3179_v3, 4  ;;  %v3184_v38 = vrot.slane %v3182_v6, 5  ;;  %v4777_v32 = vrot.slane %v4776_v13, 4  ;;  %v3048_v50 = vld [vmem:[#allocation2 + $0x5c] sm:$0x1] }
 0x1b2   : > { %v2035_v55 = vpop.f32.mrf.mxu2  ;;  %v4787_v22 = vrot.slane %v4786_v14, 4  ;;  %v7621_v34 = vrot.slane %v3188_v39, 5  ;;  %v3194_v62 = vrot.slane %v3192_v60, 4  ;;  %v1385_v48 = vadd.f32 %v7560_v12, %v6988_v47  ;;  %v3731_v14 = vld [vmem:[#allocation2 + $0x68] sm:$0xf] }
 0x1b3   : > { %v2088_v53 = vadd.f32 %v2035_v55, %v1383_v2  ;;  %3613 = vmatmul.bf16.gmra.mxu1 %v3517_v41  ;;  %v4791_v41 = vrot.slane %v4789_v20, 5  ;;  %v7631_v24 = vsel %vm6793_vm2, %v3844_v27, %v3851_v63  ;;  %v3185_v59 = vor.u32 %v3184_v38, %v3181_v21  ;;  %v3729_v55 = vld [vmem:[#allocation2 + $0x60] sm:$0x8]  ;;  %v4661_v47 = vld [vmem:[#allocation2 + $0x64] sm:$0xf] }
 0x1b4   : > { %v2685_v28 = vpop.f32.mrf.mxu3  ;;  %v4168_v20 = vpack.c.b16 %v4139_v11, %v7580_v16  ;;  %v7636_v13 = vunpack.c.l.b16 %v3843_v43  ;;  %v3859_v8 = vshrl.u32 %v7623_v35, 16  ;;  %v3195_v18 = vor.u32 %v3194_v62, %v7621_v34  ;;  %v4662_v39 = vld [vmem:[#allocation2 + $0x68] sm:$0xf] }
 0x1b5   : > { %v7611_v40 = vadd.f32 %v2685_v28, %v2088_v53  ;;  %v3518_v53 = vpack.c.b16 %v7615_v57, %v7613_v0  ;;  %v4792_v27 = vsel %vm6803_vm5, %v4787_v22, %v4791_v41  ;;  %v1388_v11 = vadd.f32 %v1387_v54, %v7004_v37  ;;  %v6341_v0 = vld [vmem:[#allocation2 + $0x44] sm:$0xff] }
 0x1b6   : > { %v7617_v2 = vpop.f32.mrf.mxu0  ;;  %v4141_v28 = vunpack.c.l.b16 %v7631_v24  ;;  %v3198_v3 = vshll.u32 %v3048_v50, 16  ;;  %v3854_v6 = vshrl.u32 %v3729_v55, 16  ;;  %v3186_v57 = vrot.slane %v3185_v59, 4  ;;  %v4663_v59 = vld [vmem:[#allocation2 + $0x6c] sm:$0x1] }
 0x1b7   : > { %v3868_v63 = vshrl.u32 %v3731_v14, 16  ;;  %v4794_v43 = vshrl.u32 %v4661_v47, 16  ;;  %v5105_v38 = vunpack.c.l.b16 %v4792_v27  ;;  %v3861_v41 = vrot.slane %v3859_v8, 7 }
 0x1b8   : > { %v7625_v58 = vpop.f32.mrf.mxu1  ;;  %v3196_v22 = vrot.slane %v3195_v18, 4  ;;  %v4803_v37 = vshll.u32 %v4662_v39, 16  ;;  %v4807_v54 = vshrl.u32 %v4662_v39, 16  ;;  %v3200_v50 = vrot.slane %v3198_v3, 5 }
 0x1b9   : > { %5228 = vmatmul.bf16.gmra.mxu0 %v5132_v49  ;;  %v4782_v49 = vsel %vm6803_vm5, %v4777_v32, %v7597_v30  ;;  %v4797_v32 = vshll.u32 %v4661_v47, 16  ;;  %v4796_v62 = vrot.slane %v4794_v43, 4  ;;  %v6035_v55 = vrot.slane %v3854_v6, 11  ;;  %v3049_v43 = vld [vmem:[#allocation2 + $0x64] sm:$0xf] }
 0x1ba   : > { %v2037_v10 = vpop.f32.mrf.mxu2  ;;  %v5104_v30 = vunpack.c.l.b16 %v4782_v49  ;;  %v3191_v49 = vsel %vm6803_vm5, %v3186_v57, %v7621_v34  ;;  %v3870_v8 = vrot.slane %v3868_v63, 7  ;;  %v4805_v47 = vrot.slane %v4803_v37, 5  ;;  %v3050_v34 = vld [vmem:[#allocation2 + $0x68] sm:$0xf] }
 0x1bb   : > { %v2089_v12 = vadd.f32 %v2037_v10, %v1385_v48  ;;  %v3862_v10 = vshll.u32 %v7623_v35, 16  ;;  %v3871_v18 = vshll.u32 %v3731_v14, 16  ;;  %v7657_v39 = vadd.f32 %v7494_v4, %v7546_v29 }
 0x1bc   : > { %v2687_v16 = vpop.f32.mrf.mxu3  ;;  %v7661_v35 = vadd.f32 %v7527_v33, %v7586_v51  ;;  %v7665_v57 = vadd.f32 %v7548_v26, %v7611_v40  ;;  %v3201_v63 = vsel %vm6803_vm5, %v3196_v22, %v3200_v50  ;;  %v3203_v29 = vshrl.u32 %v3049_v43, 16 }
 0x1bd   : > { %v2739_v60 = vadd.f32 %v2687_v16, %v2089_v12  ;;  %v4799_v12 = vrot.slane %v4797_v32, 5  ;;  %v3864_v4 = vor.u32 %v3862_v10, %v3861_v41  ;;  %v3206_v32 = vshll.u32 %v3049_v43, 16  ;;  %v7685_v10 = vld [vmem:[#allocation2 + $0x74] sm:$0xf] }
 0x1be   : > { %v7647_v21 = vpop.f32.mrf.mxu0  ;;  %8244 = vst [vmem:[#allocation15_spill] sm:$0xff] %v7665_v57  ;;  %v5133_v33 = vpack.c.b16 %v5105_v38, %v5104_v30  ;;  %v3866_v51 = vrot.slane %v3861_v41, 4  ;;  %v3873_v37 = vor.u32 %v3871_v18, %v3870_v8  ;;  %v3216_v26 = vshrl.u32 %v3050_v34, 16  ;;  %v3051_v18 = vld [vmem:[#allocation2 + $0x6c] sm:$0x1]  ;;  %v8246_v43 = vld [vmem:[#allocation9_spill] sm:$0xff] }
 0x1bf   : > { %4264 = vmatmul.bf16.gmra.mxu2 %v4168_v20  ;;  %v4809_v20 = vrot.slane %v4807_v54, 4  ;;  %v4800_v16 = vor.u32 %v4799_v12, %v4796_v62  ;;  %v7674_v40 = vunpack.c.l.b16 %v3191_v49  ;;  %v3492_v12 = vunpack.c.l.b16 %v3201_v63  ;;  %v4664_v49 = vld [vmem:[#allocation2 + $0x74] sm:$0xf]  ;;  %v4665_v63 = vld [vmem:[#allocation2 + $0x78] sm:$0xf] }
 0x1c0   : > { %v7649_v48 = vpop.f32.mrf.mxu1  ;;  %v3865_v30 = vsel %vm6793_vm2, %v6035_v55, %v3864_v4  ;;  %v3205_v38 = vrot.slane %v3203_v29, 4  ;;  %v3208_v41 = vrot.slane %v3206_v32, 5  ;;  %v4818_v4 = vshrl.u32 %v4664_v49, 16  ;;  %v6342_v32 = vld [vmem:[#allocation2 + $0x54] sm:$0xff] }
 0x1c1   : > { %4546 = vmatmul.bf16.gmra.mxu3 %v6341_v0  ;;  %v4810_v6 = vor.u32 %v4809_v20, %v4805_v47  ;;  %v4813_v0 = vshll.u32 %v4663_v59, 16  ;;  %v4801_v54 = vrot.slane %v4800_v16, 4  ;;  %v3212_v59 = vshll.u32 %v3050_v34, 16 }
 0x1c2   : > { %v2040_v27 = vpop.f32.mrf.mxu2  ;;  %v3519_v24 = vpack.c.b16 %v3492_v12, %v7674_v40  ;;  %v1393_v34 = vadd.f32 %v7649_v48, %v8246_v43  ;;  %v4666_v48 = vld [vmem:[#allocation2 + $0x7c] sm:$0x1] }
 0x1c3   : > { %v2090_v3 = vadd.f32 %v2040_v27, %v1388_v11  ;;  %3618 = vmatmul.bf16.gmra.mxu1 %v3518_v53  ;;  %v7670_v53 = vadd.f32 %v7589_v7, %v2739_v60  ;;  %v4811_v20 = vrot.slane %v4810_v6, 4  ;;  %v4815_v22 = vrot.slane %v4813_v0, 5  ;;  %v3734_v6 = vld [vmem:[#allocation2 + $0x78] sm:$0xf] }
 0x1c4   : > { %v2690_v14 = vpop.f32.mrf.mxu3  ;;  %v1390_v7 = vadd.f32 %v7625_v58, %v7035_v36  ;;  %v4169_v60 = vpack.c.b16 %v4141_v28, %v7636_v13  ;;  %v7689_v27 = vsel %vm6793_vm2, %v3866_v51, %v3873_v37  ;;  %v4806_v55 = vsel %vm6803_vm5, %v4801_v54, %v4805_v47 }
 0x1c5   : > { %v2740_v62 = vadd.f32 %v2690_v14, %v2090_v3  ;;  %8245 = vst [vmem:[#allocation16_spill] sm:$0xff] %v7670_v53  ;;  %v7693_v16 = vrot.slane %v3212_v59, 5  ;;  %v3218_v36 = vrot.slane %v3216_v26, 4  ;;  %v7696_v13 = vunpack.c.l.b16 %v3865_v30  ;;  %v3732_v3 = vld [vmem:[#allocation2 + $0x70] sm:$0x8] }
 0x1c6   : > { %v7672_v11 = vpop.f32.mrf.mxu0  ;;  %v4816_v28 = vsel %vm6803_vm5, %v4811_v20, %v4815_v22  ;;  %v3209_v14 = vor.u32 %v3208_v41, %v3205_v38  ;;  %v3881_v47 = vshrl.u32 %v7685_v10, 16  ;;  %v5106_v51 = vunpack.c.l.b16 %v4806_v55  ;;  %v3052_v53 = vld [vmem:[#allocation2 + $0x74] sm:$0xf] }
 0x1c7   : > { %v3222_v37 = vshll.u32 %v3051_v18, 16  ;;  %v5107_v59 = vunpack.c.l.b16 %v4816_v28  ;;  %v3219_v26 = vor.u32 %v3218_v36, %v7693_v16  ;;  %v3876_v40 = vshrl.u32 %v3732_v3, 16 }
 0x1c8   : > { %v7676_v50 = vpop.f32.mrf.mxu1  ;;  %v3890_v12 = vshrl.u32 %v3734_v6, 16  ;;  %v4820_v20 = vrot.slane %v4818_v4, 4  ;;  %v4821_v22 = vshll.u32 %v4664_v49, 16  ;;  %v4827_v30 = vshll.u32 %v4665_v63, 16 }
 0x1c9   : > { %5233 = vmatmul.bf16.gmra.mxu0 %v5133_v33  ;;  %v4831_v38 = vshrl.u32 %v4665_v63, 16  ;;  %v3884_v55 = vshll.u32 %v7685_v10, 16  ;;  %v7713_v18 = vadd.f32 %v7617_v2, %v2740_v62  ;;  %v3893_v49 = vshll.u32 %v3734_v6, 16  ;;  %v3053_v10 = vld [vmem:[#allocation2 + $0x78] sm:$0xf] }
 0x1ca   : > { %v2042_v8 = vpop.f32.mrf.mxu2  ;;  %v4823_v36 = vrot.slane %v4821_v22, 5  ;;  %v4829_v28 = vrot.slane %v4827_v30, 5  ;;  %v3892_v43 = vrot.slane %v3890_v12, 7  ;;  %v4837_v4 = vshll.u32 %v4666_v48, 16 }
 0x1cb   : > { %v2091_v58 = vadd.f32 %v2042_v8, %v1390_v7  ;;  %v3210_v7 = vrot.slane %v3209_v14, 4  ;;  %v3883_v8 = vrot.slane %v3881_v47, 7  ;;  %v4833_v3 = vrot.slane %v4831_v38, 4 }
 0x1cc   : > { %v2692_v0 = vpop.f32.mrf.mxu3  ;;  %v5134_v33 = vpack.c.b16 %v5107_v59, %v5106_v51  ;;  %v4824_v14 = vor.u32 %v4823_v36, %v4820_v20  ;;  %v3227_v2 = vshrl.u32 %v3052_v53, 16  ;;  %v3230_v62 = vshll.u32 %v3052_v53, 16 }
 0x1cd   : > { %v7703_v29 = vadd.f32 %v2692_v0, %v2091_v58  ;;  %v3224_v58 = vrot.slane %v3222_v37, 5  ;;  %v3220_v0 = vrot.slane %v3219_v26, 4  ;;  %v4834_v47 = vor.u32 %v4833_v3, %v4829_v28 }
 0x1ce   : > { %v7706_v54 = vpop.f32.mrf.mxu0  ;;  %v3240_v37 = vshrl.u32 %v3053_v10, 16  ;;  %v6036_v30 = vrot.slane %v3876_v40, 11  ;;  %v3886_v38 = vor.u32 %v3884_v55, %v3883_v8  ;;  %v3888_v26 = vrot.slane %v3883_v8, 4  ;;  %v8247_v55 = vld [vmem:[#allocation11_spill] sm:$0xff] }
 0x1cf   : > { %4269 = vmatmul.bf16.gmra.mxu2 %v4169_v60  ;;  %v3225_v6 = vsel %vm6803_vm5, %v3220_v0, %v3224_v58  ;;  %v4839_v51 = vrot.slane %v4837_v4, 5  ;;  %v4825_v59 = vrot.slane %v4824_v14, 4  ;;  %v4835_v53 = vrot.slane %v4834_v47, 4  ;;  %v3054_v58 = vld [vmem:[#allocation2 + $0x7c] sm:$0x1] }
 0x1d0   : > { %v7709_v41 = vpop.f32.mrf.mxu1  ;;  %v3229_v48 = vrot.slane %v3227_v2, 4  ;;  %v3232_v20 = vrot.slane %v3230_v62, 5  ;;  %v3242_v8 = vrot.slane %v3240_v37, 4  ;;  %v1395_v36 = vadd.f32 %v7676_v50, %v8247_v55  ;;  %v4667_v4 = vld [vmem:[#allocation2 + $0x84] sm:$0xf] }
 0x1d1   : > { %4551 = vmatmul.bf16.gmra.mxu3 %v6342_v32  ;;  %v3236_v32 = vshll.u32 %v3053_v10, 16  ;;  %v8248_v0 = vunpack.c.l.b16 %v7689_v27  ;;  %v4830_v50 = vsel %vm6803_vm5, %v4825_v59, %v4829_v28  ;;  %v3246_v27 = vshll.u32 %v3054_v58, 16  ;;  %v7753_v59 = vld [vmem:[#allocation2 + $0x88] sm:$0xf] }
 0x1d2   : > { %v2045_v60 = vpop.f32.mrf.mxu2  ;;  %v3233_v14 = vor.u32 %v3232_v20, %v3229_v48  ;;  %v4842_v28 = vshrl.u32 %v4667_v4, 16  ;;  %v4845_v48 = vshll.u32 %v4667_v4, 16 }
 0x1d3   : > { %v2092_v63 = vadd.f32 %v2045_v60, %v1393_v34  ;;  %3623 = vmatmul.bf16.gmra.mxu1 %v3519_v24  ;;  %v3215_v24 = vsel %vm6803_vm5, %v3210_v7, %v7693_v16  ;;  %v3895_v34 = vor.u32 %v3893_v49, %v3892_v43  ;;  %v7726_v40 = vrot.slane %v3236_v32, 5  ;;  %v8249_v32 = vld [vmem:[#allocation3_spill] sm:$0xff] }
 0x1d4   : > { %v2695_v57 = vpop.f32.mrf.mxu3  ;;  %v3493_v3 = vunpack.c.l.b16 %v3215_v24  ;;  %v3494_v16 = vunpack.c.l.b16 %v3225_v6  ;;  %v3887_v7 = vsel %vm6793_vm2, %v6036_v30, %v3886_v38  ;;  %v4170_v43 = vpack.c.b16 %v8248_v0, %v7696_v13  ;;  %v4668_v13 = vld [vmem:[#allocation2 + $0x88] sm:$0xf] }
 0x1d5   : > { %v7715_v22 = vadd.f32 %v2695_v57, %v2092_v63  ;;  %v7737_v49 = vsel %vm6793_vm2, %v3888_v26, %v3895_v34  ;;  %v7743_v10 = vunpack.c.l.b16 %v3887_v7  ;;  %v3243_v2 = vor.u32 %v3242_v8, %v7726_v40  ;;  %v6343_v30 = vld [vmem:[#allocation2 + $0x64] sm:$0xff] }
 0x1d6   : > { %v7717_v12 = vpop.f32.mrf.mxu0  ;;  %v1398_v37 = vadd.f32 %v7709_v41, %v8249_v32  ;;  %v3520_v38 = vpack.c.b16 %v3494_v16, %v3493_v3  ;;  %v7748_v26 = vld [vmem:[#allocation2 + $0x84] sm:$0xf]  ;;  %v4145_v6 = vunpack.c.l.b16 %v7737_v49  ;;  %v5108_v34 = vunpack.c.l.b16 %v4830_v50  ;;  %v3056_v32 = vld [vmem:[#allocation2 + $0x88] sm:$0xf] }
 0x1d7   : > { %v3234_v20 = vrot.slane %v3233_v14, 4  ;;  %v4844_v8 = vrot.slane %v4842_v28, 4  ;;  %v4851_v55 = vshll.u32 %v4668_v13, 16  ;;  %v4855_v41 = vshrl.u32 %v4668_v13, 16  ;;  %v3055_v13 = vld [vmem:[#allocation2 + $0x84] sm:$0xf] }
 0x1d8   : > { %v7724_v57 = vpop.f32.mrf.mxu1  ;;  %v3244_v3 = vrot.slane %v3243_v2, 4  ;;  %v3248_v16 = vrot.slane %v3246_v27, 5  ;;  %v3903_v7 = vshrl.u32 %v7748_v26, 16  ;;  %v4847_v58 = vrot.slane %v4845_v48, 5 }
 0x1d9   : > { %5238 = vmatmul.bf16.gmra.mxu0 %v5134_v33  ;;  %v4840_v33 = vsel %vm6803_vm5, %v4835_v53, %v4839_v51  ;;  %v4669_v53 = vld [vmem:[#allocation2 + $0x8c] sm:$0x1]  ;;  %v4853_v0 = vrot.slane %v4851_v55, 5  ;;  %v4857_v49 = vrot.slane %v4855_v41, 4  ;;  %v7765_v14 = vadd.f32 %v7672_v11, %v7715_v22 }
 0x1da   : > { %v2047_v60 = vpop.f32.mrf.mxu2  ;;  %v5109_v51 = vunpack.c.l.b16 %v4840_v33  ;;  %v7761_v33 = vadd.f32 %v7647_v21, %v7703_v29  ;;  %v3239_v2 = vsel %vm6803_vm5, %v3234_v20, %v7726_v40  ;;  %v3249_v21 = vsel %vm6803_vm5, %v3244_v3, %v3248_v16  ;;  %v3735_v29 = vld [vmem:[#allocation2 + $0x80] sm:$0x8]  ;;  %v3057_v16 = vld [vmem:[#allocation2 + $0x8c] sm:$0x1] }
 0x1db   : > { %v2093_v63 = vadd.f32 %v2047_v60, %v1395_v36  ;;  %v3912_v60 = vshrl.u32 %v7753_v59, 16  ;;  %8251 = vst [vmem:[#allocation11_spill] sm:$0xff] %v7765_v14  ;;  %v4858_v27 = vor.u32 %v4857_v49, %v4853_v0  ;;  %v3254_v11 = vshll.u32 %v3055_v13, 16 }
 0x1dc   : > { %v2697_v47 = vpop.f32.mrf.mxu3  ;;  %v5135_v4 = vpack.c.b16 %v5109_v51, %v5108_v34  ;;  %8250 = vst [vmem:[#allocation9_spill] sm:$0xff] %v7761_v33  ;;  %v3251_v34 = vshrl.u32 %v3055_v13, 16  ;;  %v3260_v22 = vshll.u32 %v3056_v32, 16  ;;  %v3905_v41 = vrot.slane %v3903_v7, 7 }
 0x1dd   : > { %v2743_v62 = vadd.f32 %v2697_v47, %v2093_v63  ;;  %v4861_v63 = vshll.u32 %v4669_v53, 16  ;;  %v3264_v53 = vshrl.u32 %v3056_v32, 16  ;;  %v4859_v40 = vrot.slane %v4858_v27, 4  ;;  %v8253_v27 = vld [vmem:[#allocation4_spill] sm:$0xff] }
 0x1de   : > { %v7750_v24 = vpop.f32.mrf.mxu0  ;;  %v3253_v20 = vrot.slane %v3251_v34, 4  ;;  %v7777_v55 = vrot.slane %v3260_v22, 5  ;;  %v3906_v3 = vshll.u32 %v7748_v26, 16  ;;  %v1400_v13 = vadd.f32 %v7724_v57, %v8253_v27  ;;  %v3738_v34 = vld [vmem:[#allocation2 + $0x90] sm:$0x8] }
 0x1df   : > { %4274 = vmatmul.bf16.gmra.mxu2 %v4170_v43  ;;  %v4848_v43 = vor.u32 %v4847_v58, %v4844_v8  ;;  %v4863_v51 = vrot.slane %v4861_v63, 5  ;;  %v3256_v8 = vrot.slane %v3254_v11, 5  ;;  %v3266_v58 = vrot.slane %v3264_v53, 4  ;;  %v4671_v27 = vld [vmem:[#allocation2 + $0x98] sm:$0xf] }
 0x1e0   : > { %v7755_v36 = vpop.f32.mrf.mxu1  ;;  %v3496_v63 = vunpack.c.l.b16 %v3249_v21  ;;  %v4171_v32 = vpack.c.b16 %v4145_v6, %v7743_v10  ;;  %v3908_v22 = vor.u32 %v3906_v3, %v3905_v41  ;;  %v3910_v10 = vrot.slane %v3905_v41, 4 }
 0x1e1   : > { %4556 = vmatmul.bf16.gmra.mxu3 %v6343_v30  ;;  %v7771_v30 = vadd.f32 %v7706_v54, %v2743_v62  ;;  %v7779_v54 = vld [vmem:[#allocation2 + $0x94] sm:$0xf]  ;;  %v3898_v62 = vshrl.u32 %v3735_v29, 16  ;;  %v3257_v21 = vor.u32 %v3256_v8, %v3253_v20  ;;  %v3920_v20 = vshrl.u32 %v3738_v34, 16 }
 0x1e2   : > { %v2050_v50 = vpop.f32.mrf.mxu2  ;;  %v3925_v26 = vshrl.u32 %v7779_v54, 16 }
 0x1e3   : > { %v2094_v47 = vadd.f32 %v2050_v50, %v1398_v37  ;;  %3628 = vmatmul.bf16.gmra.mxu1 %v3520_v38  ;;  %8252 = vst [vmem:[#allocation3_spill] sm:$0xff] %v7771_v30  ;;  %v4849_v38 = vrot.slane %v4848_v43, 4  ;;  %v3495_v50 = vunpack.c.l.b16 %v3239_v2  ;;  %v3914_v43 = vrot.slane %v3912_v60, 7 }
 0x1e4   : > { %v2700_v28 = vpop.f32.mrf.mxu3  ;;  %v4864_v2 = vsel %vm6803_vm5, %v4859_v40, %v4863_v51  ;;  %v3267_v60 = vor.u32 %v3266_v58, %v7777_v55  ;;  %v6037_v57 = vrot.slane %v3898_v62, 11  ;;  %v6344_v51 = vld [vmem:[#allocation2 + $0x74] sm:$0xff]  ;;  %v7798_v8 = vrot.slane %v3925_v26, 7 }
 0x1e5   : > { %v2744_v37 = vadd.f32 %v2700_v28, %v2094_v47  ;;  %v3915_v47 = vshll.u32 %v7753_v59, 16  ;;  %v4854_v7 = vsel %vm6803_vm5, %v4849_v38, %v4853_v0  ;;  %v4670_v28 = vld [vmem:[#allocation2 + $0x94] sm:$0xf]  ;;  %v3270_v59 = vshll.u32 %v3057_v16, 16  ;;  %v3740_v38 = vld [vmem:[#allocation2 + $0x98] sm:$0xf] }
 0x1e6   : > { %v7775_v48 = vpop.f32.mrf.mxu0  ;;  %v7794_v0 = vunpack.c.l.b16 %v4854_v7  ;;  %v4866_v30 = vshrl.u32 %v4670_v28, 16  ;;  %v5111_v40 = vunpack.c.l.b16 %v4864_v2  ;;  %v3258_v62 = vrot.slane %v3257_v21, 4  ;;  %v8255_v21 = vld [vmem:[#allocation5_spill] sm:$0xff] }
 0x1e7   : > { %v3917_v53 = vor.u32 %v3915_v47, %v3914_v43  ;;  %v3268_v3 = vrot.slane %v3267_v60, 4  ;;  %v3272_v41 = vrot.slane %v3270_v59, 5  ;;  %v3928_v58 = vshll.u32 %v7779_v54, 16 }
 0x1e8   : > { %v7782_v49 = vpop.f32.mrf.mxu1  ;;  %v4875_v43 = vshll.u32 %v4671_v27, 16  ;;  %v4879_v47 = vshrl.u32 %v4671_v27, 16  ;;  %v3909_v7 = vsel %vm6793_vm2, %v6037_v57, %v3908_v22  ;;  %v7810_v2 = vadd.f32 %v7717_v12, %v2744_v37 }
 0x1e9   : > { %5243 = vmatmul.bf16.gmra.mxu0 %v5135_v4  ;;  %v3521_v4 = vpack.c.b16 %v3496_v63, %v3495_v50  ;;  %v3934_v50 = vshrl.u32 %v3740_v38, 16  ;;  %v4869_v63 = vshll.u32 %v4670_v28, 16  ;;  %v3918_v26 = vsel %vm6793_vm2, %v3910_v10, %v3917_v53  ;;  %v3059_v53 = vld [vmem:[#allocation2 + $0x98] sm:$0xf] }
 0x1ea   : > { %v2052_v29 = vpop.f32.mrf.mxu2  ;;  %8254 = vst [vmem:[#allocation4_spill] sm:$0xff] %v7810_v2  ;;  %v1403_v54 = vadd.f32 %v7755_v36, %v8255_v21  ;;  %v7814_v60 = vrot.slane %v4875_v43, 5  ;;  %v4881_v59 = vrot.slane %v4879_v47, 4  ;;  %v3263_v57 = vsel %vm6803_vm5, %v3258_v62, %v7777_v55  ;;  %v4681_v2 = vld [vmem:[#allocation2 + $0xcc] sm:$0x1] }
 0x1eb   : > { %v2095_v11 = vadd.f32 %v2052_v29, %v1400_v13  ;;  %v4868_v29 = vrot.slane %v4866_v30, 4  ;;  %v4871_v28 = vrot.slane %v4869_v63, 5  ;;  %v6038_v30 = vrot.slane %v3920_v20, 11 }
 0x1ec   : > { %v2702_v6 = vpop.f32.mrf.mxu3  ;;  %v3930_v12 = vor.u32 %v3928_v58, %v7798_v8  ;;  %v3273_v36 = vsel %vm6803_vm5, %v3268_v3, %v3272_v41  ;;  %v3936_v22 = vrot.slane %v3934_v50, 7  ;;  %v3937_v10 = vshll.u32 %v3740_v38, 16  ;;  %v8256_v58 = vld [vmem:[#allocation6_spill] sm:$0xff] }
 0x1ed   : > { %v7796_v14 = vadd.f32 %v2702_v6, %v2095_v11  ;;  %v5136_v11 = vpack.c.b16 %v5111_v40, %v7794_v0  ;;  %v3058_v6 = vld [vmem:[#allocation2 + $0x94] sm:$0xf]  ;;  %v4882_v0 = vor.u32 %v4881_v59, %v7814_v60  ;;  %v3284_v20 = vshll.u32 %v3059_v53, 16 }
 0x1ee   : > { %v7800_v16 = vpop.f32.mrf.mxu0  ;;  %v3275_v63 = vshrl.u32 %v3058_v6, 16  ;;  %v3278_v55 = vshll.u32 %v3058_v6, 16  ;;  %v3288_v62 = vshrl.u32 %v3059_v53, 16  ;;  %v4146_v3 = vunpack.c.l.b16 %v3909_v7  ;;  %v4673_v53 = vld [vmem:[#allocation2 + $0xa4] sm:$0xf] }
 0x1ef   : > { %4279 = vmatmul.bf16.gmra.mxu2 %v4171_v32  ;;  %v4672_v32 = vld [vmem:[#allocation2 + $0x9c] sm:$0x1]  ;;  %v4147_v38 = vunpack.c.l.b16 %v3918_v26  ;;  %v3497_v41 = vunpack.c.l.b16 %v3263_v57  ;;  %v3931_v50 = vsel %vm6793_vm2, %v6038_v30, %v3930_v12  ;;  %v3939_v21 = vor.u32 %v3937_v10, %v3936_v22  ;;  %v7837_v26 = vld [vmem:[#allocation2 + $0xa4] sm:$0xf] }
 0x1f0   : > { %v7803_v13 = vpop.f32.mrf.mxu1  ;;  %v4885_v40 = vshll.u32 %v4672_v32, 16  ;;  %v3498_v32 = vunpack.c.l.b16 %v3273_v36  ;;  %v4883_v59 = vrot.slane %v4882_v0, 4  ;;  %v7835_v6 = vrot.slane %v3284_v20, 5  ;;  %v3060_v22 = vld [vmem:[#allocation2 + $0x9c] sm:$0x1] }
 0x1f1   : > { %4561 = vmatmul.bf16.gmra.mxu3 %v6344_v51  ;;  %v4872_v51 = vor.u32 %v4871_v28, %v4868_v29  ;;  %v3932_v29 = vrot.slane %v7798_v8, 4  ;;  %v3290_v7 = vrot.slane %v3288_v62, 4  ;;  %v4172_v12 = vpack.c.b16 %v4147_v38, %v4146_v3  ;;  %v8257_v3 = vld [vmem:[#allocation7_spill] sm:$0xff] }
 0x1f2   : > { %v2055_v34 = vpop.f32.mrf.mxu2  ;;  %v7843_v36 = vunpack.c.l.b16 %v3931_v50  ;;  %v3947_v0 = vshrl.u32 %v7837_v26, 16  ;;  %v1408_v38 = vadd.f32 %v7803_v13, %v8257_v3  ;;  %v3294_v50 = vshll.u32 %v3060_v22, 16 }
 0x1f3   : > { %v2096_v37 = vadd.f32 %v2055_v34, %v1403_v54  ;;  %3633 = vmatmul.bf16.gmra.mxu1 %v3521_v4  ;;  %v1405_v4 = vadd.f32 %v7782_v49, %v8256_v58  ;;  %v4873_v28 = vrot.slane %v4872_v51, 4  ;;  %v4887_v34 = vrot.slane %v4885_v40, 5  ;;  %v4674_v40 = vld [vmem:[#allocation2 + $0xa8] sm:$0xf]  ;;  %v3741_v58 = vld [vmem:[#allocation2 + $0xa0] sm:$0x8] }
 0x1f4   : > { %v2705_v27 = vpop.f32.mrf.mxu3  ;;  %v3280_v49 = vrot.slane %v3278_v55, 5  ;;  %v7841_v8 = vsel %vm6793_vm2, %v3932_v29, %v3939_v21  ;;  %v6345_v55 = vld [vmem:[#allocation2 + $0x84] sm:$0xff]  ;;  %v3291_v62 = vor.u32 %v3290_v7, %v7835_v6  ;;  %v4893_v29 = vshll.u32 %v4673_v53, 16 }
 0x1f5   : > { %v7824_v43 = vadd.f32 %v2705_v27, %v2096_v37  ;;  %v3277_v37 = vrot.slane %v3275_v63, 4  ;;  %v4878_v27 = vsel %vm6803_vm5, %v4873_v28, %v7814_v60  ;;  %v4888_v51 = vsel %vm6803_vm5, %v4883_v59, %v4887_v34 }
 0x1f6   : > { %v7828_v47 = vpop.f32.mrf.mxu0  ;;  %v5112_v21 = vunpack.c.l.b16 %v4878_v27  ;;  %v4899_v59 = vshll.u32 %v4674_v40, 16  ;;  %v4903_v34 = vshrl.u32 %v4674_v40, 16  ;;  %v3942_v7 = vshrl.u32 %v3741_v58, 16  ;;  %v3743_v27 = vld [vmem:[#allocation2 + $0xa8] sm:$0xf] }
 0x1f7   : > { %v3281_v20 = vor.u32 %v3280_v49, %v3277_v37  ;;  %v5113_v49 = vunpack.c.l.b16 %v4888_v51  ;;  %v7865_v40 = vadd.f32 %v7750_v24, %v7796_v14  ;;  %v7869_v51 = vadd.f32 %v7775_v48, %v7824_v43  ;;  %v3062_v58 = vld [vmem:[#allocation2 + $0xa8] sm:$0xf] }
 0x1f8   : > { %v7833_v54 = vpop.f32.mrf.mxu1  ;;  %v7861_v3 = vrot.slane %v4899_v59, 5  ;;  %v4905_v22 = vrot.slane %v4903_v34, 4  ;;  %v3308_v14 = vshll.u32 %v3062_v58, 16  ;;  %v3956_v48 = vshrl.u32 %v3743_v27, 16 }
 0x1f9   : > { %5248 = vmatmul.bf16.gmra.mxu0 %v5136_v11  ;;  %v3522_v11 = vpack.c.b16 %v3498_v32, %v3497_v41  ;;  %v4675_v32 = vld [vmem:[#allocation2 + $0xac] sm:$0x1]  ;;  %v3282_v13 = vrot.slane %v3281_v20, 4  ;;  %8258 = vst [vmem:[#allocation5_spill] sm:$0xff] %v7865_v40  ;;  %v5137_v34 = vpack.c.b16 %v5113_v49, %v5112_v21  ;;  %v3312_v43 = vshrl.u32 %v3062_v58, 16 }
 0x1fa   : > { %v2057_v57 = vpop.f32.mrf.mxu2  ;;  %v4909_v60 = vshll.u32 %v4675_v32, 16  ;;  %8259 = vst [vmem:[#allocation6_spill] sm:$0xff] %v7869_v51  ;;  %v4906_v20 = vor.u32 %v4905_v22, %v7861_v3  ;;  %v7887_v49 = vrot.slane %v3942_v7, 11 }
 0x1fb   : > { %v2097_v30 = vadd.f32 %v2057_v57, %v1405_v4  ;;  %v4890_v4 = vshrl.u32 %v4673_v53, 16  ;;  %v7859_v57 = vrot.slane %v3947_v0, 7  ;;  %v3314_v58 = vrot.slane %v3312_v43, 4 }
 0x1fc   : > { %v2707_v10 = vpop.f32.mrf.mxu3  ;;  %v4907_v22 = vrot.slane %v4906_v20, 4  ;;  %v8262_v20 = vunpack.c.l.b16 %v7841_v8 }
 0x1fd   : > { %v2747_v63 = vadd.f32 %v2707_v10, %v2097_v30  ;;  %v4892_v28 = vrot.slane %v4890_v4, 4  ;;  %v4895_v30 = vrot.slane %v4893_v29, 5  ;;  %v3292_v10 = vrot.slane %v3291_v62, 4  ;;  %v3061_v62 = vld [vmem:[#allocation2 + $0xa4] sm:$0xf] }
 0x1fe   : > { %v7854_v41 = vpop.f32.mrf.mxu0  ;;  %v3950_v29 = vshll.u32 %v7837_v26, 16  ;;  %v3299_v32 = vshrl.u32 %v3061_v62, 16  ;;  %v3302_v24 = vshll.u32 %v3061_v62, 16  ;;  %v4911_v26 = vrot.slane %v4909_v60, 5  ;;  %v3063_v60 = vld [vmem:[#allocation2 + $0xac] sm:$0x1] }
 0x1ff   : > { %4284 = vmatmul.bf16.gmra.mxu2 %v4172_v12  ;;  %v3296_v12 = vrot.slane %v3294_v50, 5  ;;  %v7873_v4 = vadd.f32 %v7800_v16, %v2747_v63  ;;  %v3287_v16 = vsel %vm6803_vm5, %v3282_v13, %v7835_v6  ;;  %v7892_v62 = vrot.slane %v3308_v14, 5 }
 0x200   : > { %v7857_v37 = vpop.f32.mrf.mxu1  ;;  %v3499_v6 = vunpack.c.l.b16 %v3287_v16  ;;  %v4677_v16 = vld [vmem:[#allocation2 + $0xb8] sm:$0xf] }
 0x201   : > { %4566 = vmatmul.bf16.gmra.mxu3 %v6345_v55  ;;  %v4896_v55 = vor.u32 %v4895_v30, %v4892_v28  ;;  %8260 = vst [vmem:[#allocation7_spill] sm:$0xff] %v7873_v4  ;;  %v3297_v63 = vsel %vm6803_vm5, %v3292_v10, %v3296_v12  ;;  %v3959_v10 = vshll.u32 %v3743_v27, 16  ;;  %v4676_v12 = vld [vmem:[#allocation2 + $0xb4] sm:$0xf]  ;;  %v3954_v27 = vrot.slane %v7859_v57, 4 }
 0x202   : > { %v2060_v53 = vpop.f32.mrf.mxu2  ;;  %v3500_v13 = vunpack.c.l.b16 %v3297_v63  ;;  %v3315_v43 = vor.u32 %v3314_v58, %v7892_v62  ;;  %v4914_v8 = vshrl.u32 %v4676_v12, 16  ;;  %v3746_v58 = vld [vmem:[#allocation2 + $0xb8] sm:$0xf] }
 0x203   : > { %v2098_v0 = vadd.f32 %v2060_v53, %v1408_v38  ;;  %3638 = vmatmul.bf16.gmra.mxu1 %v3522_v11  ;;  %v8261_v38 = vld [vmem:[#allocation8_spill] sm:$0xff]  ;;  %v4897_v30 = vrot.slane %v4896_v55, 4  ;;  %v3301_v53 = vrot.slane %v3299_v32, 4  ;;  %v4173_v32 = vpack.c.b16 %v8262_v20, %v7843_v36  ;;  %v3744_v20 = vld [vmem:[#allocation2 + $0xb0] sm:$0x8] }
 0x204   : > { %v2710_v50 = vpop.f32.mrf.mxu3  ;;  %v1410_v11 = vadd.f32 %v7833_v54, %v8261_v38  ;;  %v7890_v54 = vor.u32 %v3950_v29, %v7859_v57  ;;  %v3318_v38 = vshll.u32 %v3063_v60, 16  ;;  %v3523_v63 = vpack.c.b16 %v3500_v13, %v3499_v6 }
 0x205   : > { %v2748_v59 = vadd.f32 %v2710_v50, %v2098_v0  ;;  %v3304_v0 = vrot.slane %v3302_v24, 5  ;;  %v3958_v50 = vrot.slane %v3956_v48, 7  ;;  %v4902_v29 = vsel %vm6803_vm5, %v4897_v30, %v7861_v3  ;;  %v8263_v30 = vld [vmem:[#allocation10_spill] sm:$0xff] }
 0x206   : > { %v7878_v28 = vpop.f32.mrf.mxu0  ;;  %v4912_v24 = vsel %vm6803_vm5, %v4907_v22, %v4911_v26  ;;  %v3953_v3 = vsel %vm6793_vm2, %v7887_v49, %v7890_v54  ;;  %v1413_v22 = vadd.f32 %v7857_v37, %v8263_v30  ;;  %v5114_v57 = vunpack.c.l.b16 %v4902_v29  ;;  %v4678_v29 = vld [vmem:[#allocation2 + $0xbc] sm:$0x1] }
 0x207   : > { %v3305_v14 = vor.u32 %v3304_v0, %v3301_v53  ;;  %v3961_v26 = vor.u32 %v3959_v10, %v3958_v50  ;;  %v5115_v0 = vunpack.c.l.b16 %v4912_v24  ;;  %v4917_v6 = vshll.u32 %v4676_v12, 16 }
 0x208   : > { %v7885_v21 = vpop.f32.mrf.mxu1  ;;  %v4923_v13 = vshll.u32 %v4677_v16, 16  ;;  %v3316_v49 = vrot.slane %v3315_v43, 4  ;;  %v3320_v54 = vrot.slane %v3318_v38, 5  ;;  %v4916_v50 = vrot.slane %v4914_v8, 4 }
 0x209   : > { %5253 = vmatmul.bf16.gmra.mxu0 %v5137_v34  ;;  %v7902_v34 = vld [vmem:[#allocation2 + $0xb4] sm:$0xf]  ;;  %v7920_v37 = vadd.f32 %v7828_v47, %v2748_v59  ;;  %v3978_v10 = vshrl.u32 %v3746_v58, 16  ;;  %v4919_v24 = vrot.slane %v4917_v6, 5  ;;  %v3962_v12 = vsel %vm6793_vm2, %v3954_v27, %v3961_v26  ;;  %v3065_v6 = vld [vmem:[#allocation2 + $0xb8] sm:$0xf] }
 0x20a   : > { %v2062_v55 = vpop.f32.mrf.mxu2  ;;  %v3969_v60 = vshrl.u32 %v7902_v34, 16  ;;  %v7922_v30 = vrot.slane %v4923_v13, 5  ;;  %v3972_v43 = vshll.u32 %v7902_v34, 16  ;;  %v5138_v8 = vpack.c.b16 %v5115_v0, %v5114_v57 }
 0x20b   : > { %v2099_v7 = vadd.f32 %v2062_v55, %v1410_v11  ;;  %v6346_v11 = vld [vmem:[#allocation2 + $0x94] sm:$0xff]  ;;  %v3306_v55 = vrot.slane %v3305_v14, 4  ;;  %8264 = vst [vmem:[#allocation8_spill] sm:$0xff] %v7920_v37  ;;  %v3981_v59 = vshll.u32 %v3746_v58, 16  ;;  %v4920_v37 = vor.u32 %v4919_v24, %v4916_v50  ;;  %v8265_v50 = vld [vmem:[#allocation12_spill] sm:$0xff] }
 0x20c   : > { %v2712_v48 = vpop.f32.mrf.mxu3  ;;  %v3971_v4 = vrot.slane %v3969_v60, 7  ;;  %v4933_v26 = vshll.u32 %v4678_v29, 16  ;;  %v3980_v34 = vrot.slane %v3978_v10, 7  ;;  %v4150_v0 = vunpack.c.l.b16 %v3953_v3 }
 0x20d   : > { %v7906_v36 = vadd.f32 %v2712_v48, %v2099_v7  ;;  %v4927_v7 = vshrl.u32 %v4677_v16, 16  ;;  %v3964_v16 = vshrl.u32 %v3744_v20, 16  ;;  %v3311_v47 = vsel %vm6803_vm5, %v3306_v55, %v7892_v62 }
 0x20e   : > { %v7914_v53 = vpop.f32.mrf.mxu0  ;;  %v4151_v62 = vunpack.c.l.b16 %v3962_v12  ;;  %v3332_v58 = vshll.u32 %v3065_v6, 16  ;;  %v3336_v55 = vshrl.u32 %v3065_v6, 16  ;;  %v7937_v20 = vunpack.c.l.b16 %v3311_v47  ;;  %v3748_v6 = vld [vmem:[#allocation2 + $0xc4] sm:$0xf] }
 0x20f   : > { %4289 = vmatmul.bf16.gmra.mxu2 %v4173_v32  ;;  %v4929_v32 = vrot.slane %v4927_v7, 4  ;;  %v3321_v7 = vsel %vm6803_vm5, %v3316_v49, %v3320_v54  ;;  %v7941_v49 = vrot.slane %v3964_v16, 11  ;;  %v7943_v54 = vor.u32 %v3972_v43, %v3971_v4  ;;  %v4679_v43 = vld [vmem:[#allocation2 + $0xc4] sm:$0xf] }
 0x210   : > { %v7917_v48 = vpop.f32.mrf.mxu1  ;;  %v1415_v29 = vadd.f32 %v7885_v21, %v8265_v50  ;;  %v4921_v24 = vrot.slane %v4920_v37, 4  ;;  %v3976_v3 = vrot.slane %v3971_v4, 4  ;;  %v3983_v12 = vor.u32 %v3981_v59, %v3980_v34  ;;  %v3066_v4 = vld [vmem:[#allocation2 + $0xbc] sm:$0x1] }
 0x211   : > { %4571 = vmatmul.bf16.gmra.mxu3 %v6346_v11  ;;  %v3064_v11 = vld [vmem:[#allocation2 + $0xb4] sm:$0xf]  ;;  %v4930_v27 = vor.u32 %v4929_v32, %v7922_v30  ;;  %v3338_v16 = vrot.slane %v3336_v55, 4  ;;  %v4174_v40 = vpack.c.b16 %v4151_v62, %v4150_v0  ;;  %v3975_v37 = vsel %vm6793_vm2, %v7941_v49, %v7943_v54  ;;  %v4680_v0 = vld [vmem:[#allocation2 + $0xc8] sm:$0xf] }
 0x212   : > { %v2065_v14 = vpop.f32.mrf.mxu2  ;;  %v4926_v34 = vsel %vm6803_vm5, %v4921_v24, %v7922_v30  ;;  %v7966_v55 = vsel %vm6793_vm2, %v3976_v3, %v3983_v12  ;;  %v4938_v49 = vshrl.u32 %v4679_v43, 16  ;;  %v3342_v50 = vshll.u32 %v3066_v4, 16 }
 0x213   : > { %v2100_v38 = vadd.f32 %v2065_v14, %v1413_v22  ;;  %3643 = vmatmul.bf16.gmra.mxu1 %v3523_v63  ;;  %v3323_v63 = vshrl.u32 %v3064_v11, 16  ;;  %v3326_v22 = vshll.u32 %v3064_v11, 16  ;;  %v7939_v14 = vunpack.c.l.b16 %v3321_v7 }
 0x214   : > { %v2715_v13 = vpop.f32.mrf.mxu3  ;;  %v4931_v32 = vrot.slane %v4930_v27, 4  ;;  %v7949_v7 = vrot.slane %v3332_v58, 5  ;;  %v8266_v27 = vld [vmem:[#allocation13_spill] sm:$0xff]  ;;  %v6347_v58 = vld [vmem:[#allocation2 + $0xa4] sm:$0xff]  ;;  %v5116_v24 = vunpack.c.l.b16 %v4926_v34  ;;  %v4940_v12 = vrot.slane %v4938_v49, 4 }
 0x215   : > { %v7933_v60 = vadd.f32 %v2715_v13, %v2100_v38  ;;  %v4935_v38 = vrot.slane %v4933_v26, 5  ;;  %v3325_v11 = vrot.slane %v3323_v63, 4  ;;  %v3328_v47 = vrot.slane %v3326_v22, 5 }
 0x216   : > { %v7935_v57 = vpop.f32.mrf.mxu0  ;;  %v3524_v21 = vpack.c.b16 %v7939_v14, %v7937_v20  ;;  %v3684_v26 = vadd.f32 %v7917_v48, %v8266_v27  ;;  %v3991_v22 = vshrl.u32 %v3748_v6, 16  ;;  %v3747_v14 = vld [vmem:[#allocation2 + $0xc0] sm:$0x8]  ;;  %v3339_v48 = vor.u32 %v3338_v16, %v7949_v7 }
 0x217   : > { %v4936_v63 = vsel %vm6803_vm5, %v4931_v32, %v4935_v38  ;;  %v3329_v20 = vor.u32 %v3328_v47, %v3325_v11  ;;  %v4947_v38 = vshll.u32 %v4680_v0, 16  ;;  %v3994_v27 = vshll.u32 %v3748_v6, 16 }
 0x218   : > { %v7947_v10 = vpop.f32.mrf.mxu1  ;;  %v5117_v32 = vunpack.c.l.b16 %v4936_v63  ;;  %v3993_v3 = vrot.slane %v3991_v22, 7  ;;  %v7977_v34 = vadd.f32 %v7854_v41, %v7906_v36  ;;  %v7981_v63 = vadd.f32 %v7878_v28, %v7933_v60 }
 0x219   : > { %5258 = vmatmul.bf16.gmra.mxu0 %v5138_v8  ;;  %v3749_v8 = vld [vmem:[#allocation2 + $0xc8] sm:$0xf]  ;;  %v3330_v47 = vrot.slane %v3329_v20, 4  ;;  %v7973_v33 = vrot.slane %v4947_v38, 5  ;;  %v4153_v60 = vunpack.c.l.b16 %v7966_v55 }
 0x21a   : > { %v2067_v13 = vpop.f32.mrf.mxu2  ;;  %v4000_v30 = vshrl.u32 %v3749_v8, 16  ;;  %v4003_v6 = vshll.u32 %v3749_v8, 16  ;;  %v3996_v36 = vor.u32 %v3994_v27, %v3993_v3 }
 0x21b   : > { %v2101_v51 = vadd.f32 %v2067_v13, %v1415_v29  ;;  %v4941_v29 = vshll.u32 %v4679_v43, 16  ;;  %v3340_v43 = vrot.slane %v3339_v48, 4  ;;  %v4957_v48 = vshll.u32 %v4681_v2, 16 }
 0x21c   : > { %v2717_v59 = vpop.f32.mrf.mxu3  ;;  %v3335_v2 = vsel %vm6803_vm5, %v3330_v47, %v7949_v7 }
 0x21d   : > { %v2751_v62 = vadd.f32 %v2717_v59, %v2101_v51  ;;  %v4951_v51 = vshrl.u32 %v4680_v0, 16  ;;  %v3986_v59 = vshrl.u32 %v3747_v14, 16  ;;  %v4943_v11 = vrot.slane %v4941_v29, 5 }
 0x21e   : > { %v7968_v54 = vpop.f32.mrf.mxu0  ;;  %v4002_v0 = vrot.slane %v4000_v30, 7  ;;  %v5139_v29 = vpack.c.b16 %v5117_v32, %v5116_v24  ;;  %v4959_v38 = vrot.slane %v4957_v48, 5 }
 0x21f   : > { %4294 = vmatmul.bf16.gmra.mxu2 %v4174_v40  ;;  %v4953_v16 = vrot.slane %v4951_v51, 4  ;;  %v3344_v40 = vrot.slane %v3342_v50, 5  ;;  %v4944_v14 = vor.u32 %v4943_v11, %v4940_v12  ;;  %v6041_v41 = vrot.slane %v3986_v59, 11 }
 0x220   : > { %v7971_v13 = vpop.f32.mrf.mxu1  ;;  %v3503_v51 = vunpack.c.l.b16 %v3335_v2  ;;  %v3069_v2 = vld [vmem:[#allocation2 + $0xcc] sm:$0x1] }
 0x221   : > { %4576 = vmatmul.bf16.gmra.mxu3 %v6347_v58  ;;  %v7984_v58 = vadd.f32 %v7914_v53, %v2751_v62  ;;  %v4954_v49 = vor.u32 %v4953_v16, %v7973_v33  ;;  %v4152_v53 = vunpack.c.l.b16 %v3975_v37  ;;  %v4005_v62 = vor.u32 %v4003_v6, %v4002_v0  ;;  %v3068_v16 = vld [vmem:[#allocation2 + $0xc8] sm:$0xf] }
 0x222   : > { %v4255_v4 = vpop.f32.mrf.mxu2  ;;  %v4945_v24 = vrot.slane %v4944_v14, 4  ;;  %v3685_v37 = vadd.f32 %v7947_v10, %v7147_v31  ;;  %v3067_v10 = vld [vmem:[#allocation2 + $0xc4] sm:$0xf]  ;;  %v3356_v0 = vshll.u32 %v3068_v16, 16  ;;  %v3686_v6 = vadd.f32 %v7971_v13, %v7170_v23  ;;  %v3750_v23 = vld [vmem:[#allocation2 + $0xd0] sm:$0x8] }
 0x223   : > { %v4335_v22 = vadd.f32 %v4255_v4, %v3684_v26  ;;  %3648 = vmatmul.bf16.gmra.mxu1 %v3524_v21  ;;  %v3998_v21 = vrot.slane %v3993_v3, 4  ;;  %v3345_v26 = vsel %vm6803_vm5, %v3340_v43, %v3344_v40  ;;  %v4955_v32 = vrot.slane %v4954_v49, 4  ;;  %v6348_v43 = vld [vmem:[#allocation2 + $0xb4] sm:$0xff] }
 0x224   : > { %v4537_v20 = vpop.f32.mrf.mxu3  ;;  %v3504_v7 = vunpack.c.l.b16 %v3345_v26  ;;  %v4175_v3 = vpack.c.b16 %v4153_v60, %v4152_v53  ;;  %v4950_v27 = vsel %vm6803_vm5, %v4945_v24, %v7973_v33  ;;  %v3347_v40 = vshrl.u32 %v3067_v10, 16  ;;  %v3751_v33 = vld [vmem:[#allocation2 + $0xd4] sm:$0xf] }
 0x225   : > { %v4617_v50 = vadd.f32 %v4537_v20, %v4335_v22  ;;  %v4006_v12 = vsel %vm6793_vm2, %v3998_v21, %v4005_v62  ;;  %v4960_v31 = vsel %vm6803_vm5, %v4955_v32, %v4959_v38  ;;  %v3350_v22 = vshll.u32 %v3067_v10, 16 }
 0x226   : > { %v7994_v28 = vpop.f32.mrf.mxu0  ;;  %v3525_v14 = vpack.c.b16 %v3504_v7, %v3503_v51  ;;  %v4155_v49 = vunpack.c.l.b16 %v4006_v12  ;;  %v3360_v48 = vshrl.u32 %v3068_v16, 16  ;;  %v5118_v60 = vunpack.c.l.b16 %v4950_v27  ;;  %v4682_v27 = vld [vmem:[#allocation2 + $0xd4] sm:$0xf] }
 0x227   : > { %v5299_v8 = vadd.f32 %v7935_v57, %v4617_v50  ;;  %v3997_v57 = vsel %vm6793_vm2, %v6041_v41, %v3996_v36  ;;  %v3352_v41 = vrot.slane %v3350_v22, 5  ;;  %v3358_v36 = vrot.slane %v3356_v0, 5 }
 0x228   : > { %v8003_v30 = vpop.f32.mrf.mxu1  ;;  %v4154_v47 = vunpack.c.l.b16 %v3997_v57  ;;  %v5119_v21 = vunpack.c.l.b16 %v4960_v31  ;;  %v3362_v26 = vrot.slane %v3360_v48, 4  ;;  %v4013_v13 = vshrl.u32 %v3751_v33, 16 }
 0x229   : > { %5331 = vst [vmem:[%s7992_s16] sm:$0xff] %v5299_v8  ;;  %5263 = vmatmul.bf16.gmra.mxu0 %v5139_v29  ;;  %v3349_v29 = vrot.slane %v3347_v40, 4  ;;  %v5401_v62 = vmul.f32 %v5299_v8, %v5299_v8  ;;  %v3366_v38 = vshll.u32 %v3069_v2, 16  ;;  %v4008_v51 = vshrl.u32 %v3750_v23, 16  ;;  %v4684_v23 = vld [vmem:[#allocation2 + $0xdc] sm:$0x1] }
 0x22a   : > { %v4257_v55 = vpop.f32.mrf.mxu2  ;;  %v3363_v57 = vor.u32 %v3362_v26, %v3358_v36  ;;  %v8025_v7 = vrot.slane %v4013_v13, 7  ;;  %v4176_v10 = vpack.c.b16 %v4155_v49, %v4154_v47  ;;  %v5140_v16 = vpack.c.b16 %v5119_v21, %v5118_v60 }
 0x22b   : > { %v4336_v59 = vadd.f32 %v4257_v55, %v3685_v37  ;;  %v3752_v55 = vld [vmem:[#allocation2 + $0xd8] sm:$0xf]  ;;  %v3368_v12 = vrot.slane %v3366_v38, 5  ;;  %v6042_v40 = vrot.slane %v4008_v51, 11  ;;  %v3687_v49 = vadd.f32 %v8003_v30, %v7193_v56 }
 0x22c   : > { %v4539_v11 = vpop.f32.mrf.mxu3  ;;  %v4022_v0 = vshrl.u32 %v3752_v55, 16  ;;  %v4020_v60 = vrot.slane %v8025_v7, 4 }
 0x22d   : > { %v4618_v4 = vadd.f32 %v4539_v11, %v4336_v59  ;;  %v4016_v11 = vshll.u32 %v3751_v33, 16  ;;  %v4962_v33 = vshrl.u32 %v4682_v27, 16 }
 0x22e   : > { %v8019_v20 = vpop.f32.mrf.mxu0  ;;  %v4024_v26 = vrot.slane %v4022_v0, 7 }
 0x22f   : > { %v5300_v50 = vadd.f32 %v7968_v54, %v4618_v4  ;;  %4299 = vmatmul.bf16.gmra.mxu2 %v4175_v3  ;;  %v3353_v54 = vor.u32 %v3352_v41, %v3349_v29  ;;  %v3364_v4 = vrot.slane %v3363_v57, 4  ;;  %v4018_v22 = vor.u32 %v4016_v11, %v8025_v7  ;;  %v8267_v11 = vld [vmem:[#allocation14_spill] sm:$0xff] }
 0x230   : > { %v8022_v53 = vpop.f32.mrf.mxu1  ;;  %v4965_v29 = vshll.u32 %v4682_v27, 16 }
 0x231   : > { %5332 = vst [vmem:[%s7992_s16 + $0x8] sm:$0xff] %v5300_v50  ;;  %v5363_v24 = vadd.f32 %v5300_v50, %v5299_v8  ;;  %v5402_v32 = vmul.f32 %v5300_v50, %v5300_v50  ;;  %4581 = vmatmul.bf16.gmra.mxu3 %v6348_v43  ;;  %v3354_v8 = vrot.slane %v3353_v54, 4  ;;  %v4683_v50 = vld [vmem:[#allocation2 + $0xd8] sm:$0xf]  ;;  %v3369_v41 = vsel %vm6803_vm5, %v3364_v4, %v3368_v12 }
 0x232   : > { %v4260_v37 = vpop.f32.mrf.mxu2  ;;  %v4967_v13 = vrot.slane %v4965_v29, 5  ;;  %v4971_v56 = vshll.u32 %v4683_v50, 16  ;;  %v3506_v38 = vunpack.c.l.b16 %v3369_v41  ;;  %v4975_v57 = vshrl.u32 %v4683_v50, 16  ;;  %v3071_v4 = vld [vmem:[#allocation2 + $0xd8] sm:$0xf] }
 0x233   : > { %v5433_v59 = vadd.f32 %v5402_v32, %v5401_v62  ;;  %v4337_v3 = vadd.f32 %v4260_v37, %v3686_v6  ;;  %3653 = vmatmul.bf16.gmra.mxu1 %v3525_v14  ;;  %v3359_v6 = vsel %vm6803_vm5, %v3354_v8, %v3358_v36  ;;  %v4025_v14 = vshll.u32 %v3752_v55, 16  ;;  %v3070_v8 = vld [vmem:[#allocation2 + $0xd4] sm:$0xf] }
 0x234   : > { %v4542_v31 = vpop.f32.mrf.mxu3  ;;  %v8038_v2 = vunpack.c.l.b16 %v3359_v6  ;;  %v4964_v36 = vrot.slane %v4962_v33, 4  ;;  %v4973_v7 = vrot.slane %v4971_v56, 5  ;;  %v3688_v27 = vadd.f32 %v8022_v53, %v8267_v11 }
 0x235   : > { %v4619_v43 = vadd.f32 %v4542_v31, %v4337_v3  ;;  %v4027_v37 = vor.u32 %v4025_v14, %v4024_v26  ;;  %v4981_v3 = vshll.u32 %v4684_v23, 16  ;;  %v3374_v50 = vshll.u32 %v3070_v8, 16  ;;  %v3072_v26 = vld [vmem:[#allocation2 + $0xdc] sm:$0x1] }
 0x236   : > { %v8028_v48 = vpop.f32.mrf.mxu0  ;;  %v4968_v54 = vor.u32 %v4967_v13, %v4964_v36  ;;  %v3380_v33 = vshll.u32 %v3071_v4, 16  ;;  %v3384_v13 = vshrl.u32 %v3071_v4, 16  ;;  %v4685_v4 = vld [vmem:[#allocation2 + $0xe4] sm:$0xf] }
 0x237   : > { %v5301_v47 = vadd.f32 %v7994_v28, %v4619_v43  ;;  %v4019_v28 = vsel %vm6793_vm2, %v6042_v40, %v4018_v22  ;;  %v6349_v40 = vld [vmem:[#allocation2 + $0xc4] sm:$0xff]  ;;  %v4983_v0 = vrot.slane %v4981_v3, 5  ;;  %v3376_v23 = vrot.slane %v3374_v50, 5 }
 0x238   : > { %v3616_v21 = vpop.f32.mrf.mxu1  ;;  %v4969_v31 = vrot.slane %v4968_v54, 4  ;;  %v3382_v36 = vrot.slane %v3380_v33, 5  ;;  %v3386_v54 = vrot.slane %v3384_v13, 4  ;;  %v4989_v13 = vshll.u32 %v4685_v4, 16 }
 0x239   : > { %5333 = vst [vmem:[%s7992_s16 + $0x10] sm:$0xff] %v5301_v47  ;;  %v5364_v62 = vadd.f32 %v5363_v24, %v5301_v47  ;;  %v5403_v32 = vmul.f32 %v5301_v47, %v5301_v47  ;;  %5268 = vmatmul.bf16.gmra.mxu0 %v5140_v16  ;;  %v8045_v24 = vunpack.c.l.b16 %v4019_v28  ;;  %v4977_v16 = vrot.slane %v4975_v57, 4  ;;  %v3755_v57 = vld [vmem:[#allocation2 + $0xe8] sm:$0xf] }
 0x23a   : > { %v4262_v30 = vpop.f32.mrf.mxu2  ;;  %v8048_v22 = vadd.f32 %v3616_v21, %v7259_v44  ;;  %v4974_v14 = vsel %vm6803_vm5, %v4969_v31, %v4973_v7  ;;  %v3526_v47 = vpack.c.b16 %v3506_v38, %v8038_v2  ;;  %v4028_v44 = vsel %vm6793_vm2, %v4020_v60, %v4027_v37 }
 0x23b   : > { %v5434_v55 = vadd.f32 %v5433_v59, %v5403_v32  ;;  %v4338_v51 = vadd.f32 %v4262_v30, %v3687_v49  ;;  %v3371_v59 = vshrl.u32 %v3070_v8, 16  ;;  %v4978_v53 = vor.u32 %v4977_v16, %v4973_v7  ;;  %v3754_v30 = vld [vmem:[#allocation2 + $0xe4] sm:$0xf] }
 0x23c   : > { %v4544_v12 = vpop.f32.mrf.mxu3  ;;  %v5120_v56 = vunpack.c.l.b16 %v4974_v14  ;;  %v4157_v38 = vunpack.c.l.b16 %v4028_v44  ;;  %v3387_v31 = vor.u32 %v3386_v54, %v3382_v36  ;;  %v4035_v8 = vshrl.u32 %v3754_v30, 16 }
 0x23d   : > { %v4620_v43 = vadd.f32 %v4544_v12, %v4338_v51  ;;  %v3373_v49 = vrot.slane %v3371_v59, 4  ;;  %v4979_v21 = vrot.slane %v4978_v53, 4  ;;  %v4038_v59 = vshll.u32 %v3754_v30, 16 }
 0x23e   : > { %v8050_v6 = vpop.f32.mrf.mxu0  ;;  %v4044_v14 = vshrl.u32 %v3755_v57, 16  ;;  %v4037_v53 = vrot.slane %v4035_v8, 7  ;;  %v4047_v50 = vshll.u32 %v3755_v57, 16  ;;  %v4986_v44 = vshrl.u32 %v4685_v4, 16  ;;  %v6350_v8 = vld [vmem:[#allocation2 + $0xd4] sm:$0xff] }
 0x23f   : > { %v5302_v29 = vadd.f32 %v8019_v20, %v4620_v43  ;;  %4304 = vmatmul.bf16.gmra.mxu2 %v4176_v10  ;;  %v3390_v20 = vshll.u32 %v3072_v26, 16  ;;  %v3753_v10 = vld [vmem:[#allocation2 + $0xe0] sm:$0x8]  ;;  %v4984_v60 = vsel %vm6803_vm5, %v4979_v21, %v4983_v0  ;;  %v3377_v37 = vor.u32 %v3376_v23, %v3373_v49 }
 0x240   : > { %v8058_v41 = vpop.f32.mrf.mxu1  ;;  %v5121_v3 = vunpack.c.l.b16 %v4984_v60  ;;  %v4030_v12 = vshrl.u32 %v3753_v10, 16  ;;  %v4040_v23 = vor.u32 %v4038_v59, %v4037_v53  ;;  %v4686_v10 = vld [vmem:[#allocation2 + $0xe8] sm:$0xf]  ;;  %v4177_v30 = vpack.c.b16 %v4157_v38, %v8045_v24  ;;  %v4687_v60 = vld [vmem:[#allocation2 + $0xec] sm:$0x1] }
 0x241   : > { %5334 = vst [vmem:[%s7992_s16 + $0x18] sm:$0xff] %v5302_v29  ;;  %v5365_v32 = vadd.f32 %v5364_v62, %v5302_v29  ;;  %v5404_v28 = vmul.f32 %v5302_v29, %v5302_v29  ;;  %4586 = vmatmul.bf16.gmra.mxu3 %v6349_v40  ;;  %v3378_v11 = vrot.slane %v3377_v37, 4  ;;  %v3392_v16 = vrot.slane %v3390_v20, 5  ;;  %v3073_v24 = vld [vmem:[#allocation2 + $0xe4] sm:$0xf] }
 0x242   : > { %v4265_v2 = vpop.f32.mrf.mxu2  ;;  %v5141_v40 = vpack.c.b16 %v5121_v3, %v5120_v56  ;;  %v6043_v29 = vrot.slane %v4030_v12, 11  ;;  %v4042_v20 = vrot.slane %v4037_v53, 4  ;;  %v4988_v37 = vrot.slane %v4986_v44, 4  ;;  %v3075_v44 = vld [vmem:[#allocation2 + $0xec] sm:$0x1] }
 0x243   : > { %v5435_v51 = vadd.f32 %v5434_v55, %v5404_v28  ;;  %v4339_v7 = vadd.f32 %v4265_v2, %v3688_v27  ;;  %3658 = vmatmul.bf16.gmra.mxu1 %v3526_v47  ;;  %v3383_v55 = vsel %vm6803_vm5, %v3378_v11, %v3382_v36  ;;  %v3388_v27 = vrot.slane %v3387_v31, 4 }
 0x244   : > { %v4547_v62 = vpop.f32.mrf.mxu3  ;;  %v4046_v47 = vrot.slane %v4044_v14, 7  ;;  %v8072_v26 = vunpack.c.l.b16 %v3383_v55  ;;  %v4991_v54 = vrot.slane %v4989_v13, 5  ;;  %v3690_v3 = vadd.f32 %v8058_v41, %v7325_v15 }
 0x245   : > { %v4621_v43 = vadd.f32 %v4547_v62, %v4339_v7  ;;  %v3393_v21 = vsel %vm6803_vm5, %v3388_v27, %v3392_v16  ;;  %v4995_v31 = vshll.u32 %v4686_v10, 16  ;;  %v4999_v16 = vshrl.u32 %v4686_v10, 16 }
 0x246   : > { %v8063_v0 = vpop.f32.mrf.mxu0  ;;  %v3508_v56 = vunpack.c.l.b16 %v3393_v21  ;;  %v4049_v2 = vor.u32 %v4047_v50, %v4046_v47  ;;  %v4992_v11 = vor.u32 %v4991_v54, %v4988_v37  ;;  %v5005_v4 = vshll.u32 %v4687_v60, 16 }
 0x247   : > { %v5303_v33 = vadd.f32 %v8028_v48, %v4621_v43  ;;  %v3395_v43 = vshrl.u32 %v3073_v24, 16  ;;  %v4997_v41 = vrot.slane %v4995_v31, 5  ;;  %v5001_v59 = vrot.slane %v4999_v16, 4  ;;  %v3758_v16 = vld [vmem:[#allocation2 + $0xf8] sm:$0xf] }
 0x248   : > { %v8068_v49 = vpop.f32.mrf.mxu1  ;;  %v3527_v62 = vpack.c.b16 %v3508_v56, %v8072_v26  ;;  %v4993_v15 = vrot.slane %v4992_v11, 4  ;;  %v3398_v14 = vshll.u32 %v3073_v24, 16  ;;  %v5007_v53 = vrot.slane %v5005_v4, 5 }
 0x249   : > { %5335 = vst [vmem:[%s7992_s16 + $0x20] sm:$0xff] %v5303_v33  ;;  %v5366_v28 = vadd.f32 %v5365_v32, %v5303_v33  ;;  %v5405_v36 = vmul.f32 %v5303_v33, %v5303_v33  ;;  %5273 = vmatmul.bf16.gmra.mxu0 %v5141_v40  ;;  %v4041_v32 = vsel %vm6793_vm2, %v6043_v29, %v4040_v23  ;;  %v3397_v50 = vrot.slane %v3395_v43, 4  ;;  %v3756_v23 = vld [vmem:[#allocation2 + $0xf0] sm:$0x8] }
 0x24a   : > { %v4267_v48 = vpop.f32.mrf.mxu2  ;;  %v4158_v27 = vunpack.c.l.b16 %v4041_v32  ;;  %v4998_v29 = vsel %vm6803_vm5, %v4993_v15, %v4997_v41  ;;  %v5002_v47 = vor.u32 %v5001_v59, %v4997_v41  ;;  %v3400_v21 = vrot.slane %v3398_v14, 5  ;;  %v4688_v14 = vld [vmem:[#allocation2 + $0xf4] sm:$0xf] }
 0x24b   : > { %v5436_v57 = vadd.f32 %v5435_v51, %v5405_v36  ;;  %v4340_v7 = vadd.f32 %v4267_v48, %v8048_v22  ;;  %v4050_v51 = vsel %vm6793_vm2, %v4042_v20, %v4049_v2  ;;  %v3074_v22 = vld [vmem:[#allocation2 + $0xe8] sm:$0xf]  ;;  %v3757_v20 = vld [vmem:[#allocation2 + $0xf4] sm:$0xf]  ;;  %v4052_v32 = vshrl.u32 %v3756_v23, 16 }
 0x24c   : > { %v4549_v12 = vpop.f32.mrf.mxu3  ;;  %v3404_v26 = vshll.u32 %v3074_v22, 16  ;;  %v4159_v56 = vunpack.c.l.b16 %v4050_v51  ;;  %v5003_v48 = vrot.slane %v5002_v47, 4  ;;  %v3408_v60 = vshrl.u32 %v3074_v22, 16 }
 0x24d   : > { %v4622_v38 = vadd.f32 %v4549_v12, %v4340_v7  ;;  %v3414_v7 = vshll.u32 %v3075_v44, 16  ;;  %v4057_v24 = vshrl.u32 %v3757_v20, 16  ;;  %v4060_v22 = vshll.u32 %v3757_v20, 16 }
 0x24e   : > { %v8084_v40 = vpop.f32.mrf.mxu0  ;;  %v3406_v2 = vrot.slane %v3404_v26, 5  ;;  %v5008_v11 = vsel %vm6803_vm5, %v5003_v48, %v5007_v53  ;;  %v3410_v31 = vrot.slane %v3408_v60, 4  ;;  %v3691_v15 = vadd.f32 %v8068_v49, %v7340_v52 }
 0x24f   : > { %v5304_v55 = vadd.f32 %v8050_v6, %v4622_v38  ;;  %4309 = vmatmul.bf16.gmra.mxu2 %v4177_v30  ;;  %v5122_v6 = vunpack.c.l.b16 %v4998_v29  ;;  %v3401_v30 = vor.u32 %v3400_v21, %v3397_v50  ;;  %v3416_v51 = vrot.slane %v3414_v7, 5 }
 0x250   : > { %v8087_v33 = vpop.f32.mrf.mxu1  ;;  %v4066_v59 = vshrl.u32 %v3758_v16, 16  ;;  %v6044_v29 = vrot.slane %v4052_v32, 11  ;;  %v4069_v47 = vshll.u32 %v3758_v16, 16  ;;  %v5010_v49 = vshrl.u32 %v4688_v14, 16 }
 0x251   : > { %5336 = vst [vmem:[%s7992_s16 + $0x28] sm:$0xff] %v5304_v55  ;;  %v5367_v13 = vadd.f32 %v5366_v28, %v5304_v55  ;;  %v5406_v36 = vmul.f32 %v5304_v55, %v5304_v55  ;;  %4591 = vmatmul.bf16.gmra.mxu3 %v6350_v8  ;;  %v3402_v28 = vrot.slane %v3401_v30, 4  ;;  %v5123_v8 = vunpack.c.l.b16 %v5008_v11  ;;  %v4690_v30 = vld [vmem:[#allocation2 + $0xfc] sm:$0x1] }
 0x252   : > { %v4270_v10 = vpop.f32.mrf.mxu2  ;;  %v4178_v55 = vpack.c.b16 %v4159_v56, %v4158_v27  ;;  %v4068_v23 = vrot.slane %v4066_v59, 7 }
 0x253   : > { %v5437_v37 = vadd.f32 %v5436_v57, %v5406_v36  ;;  %v4341_v54 = vadd.f32 %v4270_v10, %v3690_v3  ;;  %3663 = vmatmul.bf16.gmra.mxu1 %v3527_v62  ;;  %v3407_v57 = vsel %vm6803_vm5, %v3402_v28, %v3406_v2  ;;  %v3411_v3 = vor.u32 %v3410_v31, %v3406_v2  ;;  %v4689_v36 = vld [vmem:[#allocation2 + $0xf8] sm:$0xf] }
 0x254   : > { %v4552_v12 = vpop.f32.mrf.mxu3  ;;  %v4059_v62 = vrot.slane %v4057_v24, 7  ;;  %v5142_v41 = vpack.c.b16 %v5123_v8, %v5122_v6  ;;  %v3509_v26 = vunpack.c.l.b16 %v3407_v57  ;;  %v5013_v6 = vshll.u32 %v4688_v14, 16 }
 0x255   : > { %v4623_v38 = vadd.f32 %v4552_v12, %v4341_v54  ;;  %v3412_v50 = vrot.slane %v3411_v3, 4  ;;  %v4071_v60 = vor.u32 %v4069_v47, %v4068_v23  ;;  %v5019_v7 = vshll.u32 %v4689_v36, 16  ;;  %v6351_v12 = vld [vmem:[#allocation2 + $0xe4] sm:$0xff]  ;;  %v3078_v23 = vld [vmem:[#allocation2 + $0xfc] sm:$0x1] }
 0x256   : > { %v8094_v4 = vpop.f32.mrf.mxu0  ;;  %v4062_v52 = vor.u32 %v4060_v22, %v4059_v62  ;;  %v4064_v48 = vrot.slane %v4059_v62, 4  ;;  %v5015_v54 = vrot.slane %v5013_v6, 5  ;;  %v5023_v11 = vshrl.u32 %v4689_v36, 16  ;;  %v3759_v6 = vld [vmem:[#allocation2 + $0x100] sm:$0x8] }
 0x257   : > { %v5305_v43 = vadd.f32 %v8063_v0, %v4623_v38  ;;  %v3417_v0 = vsel %vm6803_vm5, %v3412_v50, %v3416_v51  ;;  %v5021_v16 = vrot.slane %v5019_v7, 5  ;;  %v5029_v24 = vshll.u32 %v4690_v30, 16 }
 0x258   : > { %v3626_v53 = vpop.f32.mrf.mxu1  ;;  %v3510_v56 = vunpack.c.l.b16 %v3417_v0  ;;  %v5025_v8 = vrot.slane %v5023_v11, 4  ;;  %v4063_v57 = vsel %vm6793_vm2, %v6044_v29, %v4062_v52  ;;  %v4072_v3 = vsel %vm6793_vm2, %v4064_v48, %v4071_v60  ;;  %v3761_v11 = vld [vmem:[#allocation2 + $0x108] sm:$0xf] }
 0x259   : > { %5337 = vst [vmem:[%s7992_s16 + $0x30] sm:$0xff] %v5305_v43  ;;  %v5368_v44 = vadd.f32 %v5367_v13, %v5305_v43  ;;  %v5407_v21 = vmul.f32 %v5305_v43, %v5305_v43  ;;  %5278 = vmatmul.bf16.gmra.mxu0 %v5142_v41  ;;  %v5012_v13 = vrot.slane %v5010_v49, 4  ;;  %v3693_v41 = vadd.f32 %v3626_v53, %v7369_v46 }
 0x25a   : > { %v4272_v20 = vpop.f32.mrf.mxu2  ;;  %v3528_v38 = vpack.c.b16 %v3510_v56, %v3509_v26  ;;  %v5026_v14 = vor.u32 %v5025_v8, %v5021_v16  ;;  %v4160_v47 = vunpack.c.l.b16 %v4063_v57  ;;  %v3076_v26 = vld [vmem:[#allocation2 + $0xf4] sm:$0xf]  ;;  %v3438_v49 = vshll.u32 %v3078_v23, 16 }
 0x25b   : > { %v5438_v10 = vadd.f32 %v5437_v37, %v5407_v21  ;;  %v4342_v27 = vadd.f32 %v4272_v20, %v3691_v15  ;;  %v5016_v31 = vor.u32 %v5015_v54, %v5012_v13  ;;  %v3692_v15 = vadd.f32 %v8087_v33, %v7345_v61 }
 0x25c   : > { %v4554_v2 = vpop.f32.mrf.mxu3  ;;  %v4161_v21 = vunpack.c.l.b16 %v4072_v3  ;;  %v5027_v20 = vrot.slane %v5026_v14, 4  ;;  %v3419_v61 = vshrl.u32 %v3076_v26, 16  ;;  %v3422_v33 = vshll.u32 %v3076_v26, 16 }
 0x25d   : > { %v4624_v32 = vadd.f32 %v4554_v2, %v4342_v27  ;;  %v5017_v62 = vrot.slane %v5016_v31, 4  ;;  %v3760_v27 = vld [vmem:[#allocation2 + $0x104] sm:$0xf]  ;;  %v4074_v31 = vshrl.u32 %v3759_v6, 16  ;;  %v3440_v57 = vrot.slane %v3438_v49, 5 }
 0x25e   : > { %v8104_v28 = vpop.f32.mrf.mxu0  ;;  %v3421_v48 = vrot.slane %v3419_v61, 4  ;;  %v3424_v30 = vrot.slane %v3422_v33, 5  ;;  %v4179_v13 = vpack.c.b16 %v4161_v21, %v4160_v47  ;;  %v4692_v47 = vld [vmem:[#allocation2 + $0x108] sm:$0xf] }
 0x25f   : > { %v5306_v37 = vadd.f32 %v8084_v40, %v4624_v32  ;;  %4314 = vmatmul.bf16.gmra.mxu2 %v4178_v55  ;;  %v5022_v59 = vsel %vm6803_vm5, %v5017_v62, %v5021_v16  ;;  %v5031_v55 = vrot.slane %v5029_v24, 5  ;;  %v4079_v16 = vshrl.u32 %v3760_v27, 16 }
 0x260   : > { %v8107_v51 = vpop.f32.mrf.mxu1  ;;  %v5124_v46 = vunpack.c.l.b16 %v5022_v59  ;;  %v4082_v24 = vshll.u32 %v3760_v27, 16 }
 0x261   : > { %5338 = vst [vmem:[%s7992_s16 + $0x38] sm:$0xff] %v5306_v37  ;;  %v5369_v22 = vadd.f32 %v5368_v44, %v5306_v37  ;;  %v5408_v43 = vmul.f32 %v5306_v37, %v5306_v37  ;;  %4596 = vmatmul.bf16.gmra.mxu3 %v6351_v12  ;;  %v3077_v44 = vld [vmem:[#allocation2 + $0xf8] sm:$0xf]  ;;  %v5032_v56 = vsel %vm6803_vm5, %v5027_v20, %v5031_v55  ;;  %v4088_v55 = vshrl.u32 %v3761_v11, 16 }
 0x262   : > { %v4275_v40 = vpop.f32.mrf.mxu2  ;;  %v3428_v0 = vshll.u32 %v3077_v44, 16  ;;  %v3432_v53 = vshrl.u32 %v3077_v44, 16  ;;  %v5125_v54 = vunpack.c.l.b16 %v5032_v56  ;;  %v3425_v12 = vor.u32 %v3424_v30, %v3421_v48  ;;  %v6352_v20 = vld [vmem:[#allocation2 + $0xf4] sm:$0xff] }
 0x263   : > { %v5439_v50 = vadd.f32 %v5438_v10, %v5408_v43  ;;  %v4343_v29 = vadd.f32 %v4275_v40, %v3692_v15  ;;  %3668 = vmatmul.bf16.gmra.mxu1 %v3528_v38  ;;  %v6045_v15 = vrot.slane %v4074_v31, 11  ;;  %v4081_v40 = vrot.slane %v4079_v16, 7 }
 0x264   : > { %v4557_v36 = vpop.f32.mrf.mxu3  ;;  %v3430_v2 = vrot.slane %v3428_v0, 5  ;;  %v3434_v7 = vrot.slane %v3432_v53, 4  ;;  %v5143_v8 = vpack.c.b16 %v5125_v54, %v5124_v46  ;;  %v3426_v62 = vrot.slane %v3425_v12, 4  ;;  %v4693_v46 = vld [vmem:[#allocation2 + $0x10c] sm:$0x1] }
 0x265   : > { %v4625_v52 = vadd.f32 %v4557_v36, %v4343_v29  ;;  %v4091_v29 = vshll.u32 %v3761_v11, 16  ;;  %v3694_v26 = vadd.f32 %v8107_v51, %v7394_v45  ;;  %v4084_v23 = vor.u32 %v4082_v24, %v4081_v40 }
 0x266   : > { %v8119_v10 = vpop.f32.mrf.mxu0  ;;  %v3435_v43 = vor.u32 %v3434_v7, %v3430_v2  ;;  %v4086_v61 = vrot.slane %v4081_v40, 4  ;;  %v4090_v33 = vrot.slane %v4088_v55, 7  ;;  %v5043_v45 = vshll.u32 %v4692_v47, 16  ;;  %v3081_v55 = vld [vmem:[#allocation2 + $0x10c] sm:$0x1] }
 0x267   : > { %v5307_v60 = vadd.f32 %v8094_v4, %v4625_v52  ;;  %v4691_v4 = vld [vmem:[#allocation2 + $0x104] sm:$0xf]  ;;  %v4085_v6 = vsel %vm6793_vm2, %v6045_v15, %v4084_v23  ;;  %v5053_v11 = vshll.u32 %v4693_v46, 16  ;;  %v3462_v46 = vshll.u32 %v3081_v55, 16 }
 0x268   : > { %v3631_v32 = vpop.f32.mrf.mxu1  ;;  %v3436_v44 = vrot.slane %v3435_v43, 4  ;;  %v5034_v0 = vshrl.u32 %v4691_v4, 16  ;;  %v5037_v53 = vshll.u32 %v4691_v4, 16  ;;  %v4093_v27 = vor.u32 %v4091_v29, %v4090_v33  ;;  %v3080_v43 = vld [vmem:[#allocation2 + $0x108] sm:$0xf] }
 0x269   : > { %5339 = vst [vmem:[%s7992_s16 + $0x40] sm:$0xff] %v5307_v60  ;;  %v5370_v37 = vadd.f32 %v5369_v22, %v5307_v60  ;;  %v5409_v38 = vmul.f32 %v5307_v60, %v5307_v60  ;;  %5283 = vmatmul.bf16.gmra.mxu0 %v5143_v8  ;;  %v3431_v22 = vsel %vm6803_vm5, %v3426_v62, %v3430_v2  ;;  %v5045_v2 = vrot.slane %v5043_v45, 5  ;;  %v3079_v62 = vld [vmem:[#allocation2 + $0x104] sm:$0xf] }
 0x26a   : > { %v4277_v3 = vpop.f32.mrf.mxu2  ;;  %v3511_v52 = vunpack.c.l.b16 %v3431_v22  ;;  %v5036_v48 = vrot.slane %v5034_v0, 4  ;;  %v5039_v30 = vrot.slane %v5037_v53, 5  ;;  %v5047_v60 = vshrl.u32 %v4692_v47, 16  ;;  %v3763_v53 = vld [vmem:[#allocation2 + $0x114] sm:$0xf] }
 0x26b   : > { %v5440_v59 = vadd.f32 %v5439_v50, %v5409_v38  ;;  %v4344_v14 = vadd.f32 %v4277_v3, %v3693_v41  ;;  %v3441_v41 = vsel %vm6803_vm5, %v3436_v44, %v3440_v57  ;;  %v3695_v12 = vadd.f32 %v3631_v32, %v7540_v1 }
 0x26c   : > { %v4559_v21 = vpop.f32.mrf.mxu3  ;;  %v3512_v49 = vunpack.c.l.b16 %v3441_v41  ;;  %v4094_v31 = vsel %vm6793_vm2, %v4086_v61, %v4093_v27  ;;  %v5040_v16 = vor.u32 %v5039_v30, %v5036_v48  ;;  %v5049_v24 = vrot.slane %v5047_v60, 4  ;;  %v3764_v48 = vld [vmem:[#allocation2 + $0x118] sm:$0xf] }
 0x26d   : > { %v4626_v36 = vadd.f32 %v4559_v21, %v4344_v14  ;;  %v4162_v57 = vunpack.c.l.b16 %v4085_v6  ;;  %v5055_v3 = vrot.slane %v5053_v11, 5  ;;  %v3443_v4 = vshrl.u32 %v3079_v62, 16  ;;  %v3762_v21 = vld [vmem:[#allocation2 + $0x110] sm:$0x8] }
 0x26e   : > { %v8129_v50 = vpop.f32.mrf.mxu0  ;;  %v5050_v40 = vor.u32 %v5049_v24, %v5045_v2  ;;  %v3446_v1 = vshll.u32 %v3079_v62, 16  ;;  %v4163_v14 = vunpack.c.l.b16 %v4094_v31  ;;  %v3452_v29 = vshll.u32 %v3080_v43, 16 }
 0x26f   : > { %v5308_v51 = vadd.f32 %v8104_v28, %v4626_v36  ;;  %4319 = vmatmul.bf16.gmra.mxu2 %v4179_v13  ;;  %v3529_v13 = vpack.c.b16 %v3512_v49, %v3511_v52  ;;  %v3456_v47 = vshrl.u32 %v3080_v43, 16  ;;  %v3445_v44 = vrot.slane %v3443_v4, 4  ;;  %v6353_v43 = vld [vmem:[#allocation2 + $0x104] sm:$0xff]  ;;  %v4695_v4 = vld [vmem:[#allocation2 + $0x118] sm:$0xf] }
 0x270   : > { %v8136_v56 = vpop.f32.mrf.mxu1  ;;  %v3448_v23 = vrot.slane %v3446_v1, 5  ;;  %v3454_v61 = vrot.slane %v3452_v29, 5  ;;  %v4096_v45 = vshrl.u32 %v3762_v21, 16  ;;  %v4180_v6 = vpack.c.b16 %v4163_v14, %v4162_v57 }
 0x271   : > { %5340 = vst [vmem:[%s7992_s16 + $0x48] sm:$0xff] %v5308_v51  ;;  %v5371_v54 = vadd.f32 %v5370_v37, %v5308_v51  ;;  %v5410_v7 = vmul.f32 %v5308_v51, %v5308_v51  ;;  %4601 = vmatmul.bf16.gmra.mxu3 %v6352_v20  ;;  %v5041_v37 = vrot.slane %v5040_v16, 4  ;;  %v3458_v33 = vrot.slane %v3456_v47, 4  ;;  %v4694_v16 = vld [vmem:[#allocation2 + $0x114] sm:$0xf] }
 0x272   : > { %v4280_v28 = vpop.f32.mrf.mxu2  ;;  %v3449_v52 = vor.u32 %v3448_v23, %v3445_v44  ;;  %v3464_v60 = vrot.slane %v3462_v46, 5  ;;  %v4101_v31 = vshrl.u32 %v3763_v53, 16  ;;  %v4110_v62 = vshrl.u32 %v3764_v48, 16 }
 0x273   : > { %v5441_v38 = vadd.f32 %v5440_v59, %v5410_v7  ;;  %v4345_v8 = vadd.f32 %v4280_v28, %v3694_v26  ;;  %3673 = vmatmul.bf16.gmra.mxu1 %v3529_v13  ;;  %v5046_v59 = vsel %vm6803_vm5, %v5041_v37, %v5045_v2  ;;  %v5051_v26 = vrot.slane %v5050_v40, 4 }
 0x274   : > { %v4562_v15 = vpop.f32.mrf.mxu3  ;;  %v5126_v20 = vunpack.c.l.b16 %v5046_v59  ;;  %v3459_v2 = vor.u32 %v3458_v33, %v3454_v61  ;;  %v6046_v7 = vrot.slane %v4096_v45, 11  ;;  %v4103_v37 = vrot.slane %v4101_v31, 7 }
 0x275   : > { %v4627_v32 = vadd.f32 %v4562_v15, %v4345_v8  ;;  %v5056_v0 = vsel %vm6803_vm5, %v5051_v26, %v5055_v3  ;;  %v4113_v40 = vshll.u32 %v3764_v48, 16  ;;  %v4112_v1 = vrot.slane %v4110_v62, 7 }
 0x276   : > { %v8142_v22 = vpop.f32.mrf.mxu0  ;;  %v5127_v27 = vunpack.c.l.b16 %v5056_v0  ;;  %v3460_v3 = vrot.slane %v3459_v2, 4  ;;  %v5061_v14 = vshll.u32 %v4694_v16, 16  ;;  %v4108_v21 = vrot.slane %v4103_v37, 4  ;;  %v4696_v0 = vld [vmem:[#allocation2 + $0x11c] sm:$0x1] }
 0x277   : > { %v5309_v36 = vadd.f32 %v8119_v10, %v4627_v32  ;;  %v3450_v10 = vrot.slane %v3449_v52, 4  ;;  %v5058_v32 = vshrl.u32 %v4694_v16, 16  ;;  %v4115_v26 = vor.u32 %v4113_v40, %v4112_v1 }
 0x278   : > { %v8149_v41 = vpop.f32.mrf.mxu1  ;;  %v5144_v13 = vpack.c.b16 %v5127_v27, %v5126_v20  ;;  %v5063_v23 = vrot.slane %v5061_v14, 5  ;;  %v3696_v33 = vadd.f32 %v8136_v56, %v7544_v5  ;;  %v5071_v52 = vshrl.u32 %v4695_v4, 16 }
 0x279   : > { %5341 = vst [vmem:[%s7992_s16 + $0x50] sm:$0xff] %v5309_v36  ;;  %v5372_v51 = vadd.f32 %v5371_v54, %v5309_v36  ;;  %v5411_v49 = vmul.f32 %v5309_v36, %v5309_v36  ;;  %v3455_v8 = vsel %vm6803_vm5, %v3450_v10, %v3454_v61  ;;  %v4104_v54 = vshll.u32 %v3763_v53, 16 }
 0x27a   : > { %v4282_v30 = vpop.f32.mrf.mxu2  ;;  %5288 = vmatmul.bf16.gmra.mxu0 %v5144_v13  ;;  %v3513_v15 = vunpack.c.l.b16 %v3455_v8  ;;  %v5060_v44 = vrot.slane %v5058_v32, 4  ;;  %v5067_v36 = vshll.u32 %v4695_v4, 16  ;;  %v4116_v27 = vsel %vm6793_vm2, %v4108_v21, %v4115_v26 }
 0x27b   : > { %v5442_v11 = vadd.f32 %v5441_v38, %v5411_v49  ;;  %v4346_v28 = vadd.f32 %v4282_v30, %v3695_v12  ;;  %v3465_v12 = vsel %vm6803_vm5, %v3460_v3, %v3464_v60  ;;  %v4106_v47 = vor.u32 %v4104_v54, %v4103_v37 }
 0x27c   : > { %v4564_v24 = vpop.f32.mrf.mxu3  ;;  %v3514_v29 = vunpack.c.l.b16 %v3465_v12  ;;  %v5064_v53 = vor.u32 %v5063_v23, %v5060_v44  ;;  %v5069_v30 = vrot.slane %v5067_v36, 5  ;;  %v5073_v5 = vrot.slane %v5071_v52, 4  ;;  %v6354_v12 = vld [vmem:[#allocation2 + $0x114] sm:$0xff] }
 0x27d   : > { %v4628_v57 = vadd.f32 %v4564_v24, %v4346_v28  ;;  %v5077_v56 = vshll.u32 %v4696_v0, 16  ;;  %v4165_v31 = vunpack.c.l.b16 %v4116_v27  ;;  %v3697_v3 = vadd.f32 %v8149_v41, %v7558_v17 }
 0x27e   : > { %v5251_v38 = vpop.f32.mrf.mxu0 }
 0x27f   : > { %v5310_v55 = vadd.f32 %v8129_v50, %v4628_v57  ;;  %4324 = vmatmul.bf16.gmra.mxu2 %v4180_v6  ;;  %v3530_v50 = vpack.c.b16 %v3514_v29, %v3513_v15  ;;  %v4107_v6 = vsel %vm6793_vm2, %v6046_v7, %v4106_v47  ;;  %v5079_v28 = vrot.slane %v5077_v56, 5 }
 0x280   : > { %v3639_v59 = vpop.f32.mrf.mxu1  ;;  %v4164_v7 = vunpack.c.l.b16 %v4107_v6 }
 0x281   : > { %5342 = vst [vmem:[%s7992_s16 + $0x58] sm:$0xff] %v5310_v55  ;;  %v5373_v20 = vadd.f32 %v5372_v51, %v5310_v55  ;;  %v5412_v61 = vmul.f32 %v5310_v55, %v5310_v55  ;;  %4606 = vmatmul.bf16.gmra.mxu3 %v6353_v43  ;;  %v5065_v51 = vrot.slane %v5064_v53, 4  ;;  %v3698_v25 = vadd.f32 %v3639_v59, %v7603_v19 }
 0x282   : > { %v4285_v46 = vpop.f32.mrf.mxu2  ;;  %v4181_v37 = vpack.c.b16 %v4165_v31, %v4164_v7 }
 0x283   : > { %v5443_v45 = vadd.f32 %v5442_v11, %v5412_v61  ;;  %v4347_v49 = vadd.f32 %v4285_v46, %v3696_v33  ;;  %3678 = vmatmul.bf16.gmra.mxu1 %v3530_v50  ;;  %v5070_v60 = vsel %vm6803_vm5, %v5065_v51, %v5069_v30  ;;  %v5074_v11 = vor.u32 %v5073_v5, %v5069_v30 }
 0x284   : > { %v4567_v48 = vpop.f32.mrf.mxu3  ;;  %v5128_v54 = vunpack.c.l.b16 %v5070_v60 }
 0x285   : > { %v4629_v10 = vadd.f32 %v4567_v48, %v4347_v49  ;;  %v5075_v42 = vrot.slane %v5074_v11, 4 }
 0x286   : > { %v5254_v2 = vpop.f32.mrf.mxu0 }
 0x287   : > { %v5311_v13 = vadd.f32 %v8142_v22, %v4629_v10  ;;  %v5080_v57 = vsel %vm6803_vm5, %v5075_v42, %v5079_v28 }
 0x288   : > { %v3641_v16 = vpop.f32.mrf.mxu1  ;;  %v5129_v22 = vunpack.c.l.b16 %v5080_v57 }
 0x289   : > { %5343 = vst [vmem:[%s7992_s16 + $0x60] sm:$0xff] %v5311_v13  ;;  %v5374_v24 = vadd.f32 %v5373_v20, %v5311_v13  ;;  %v5413_v8 = vmul.f32 %v5311_v13, %v5311_v13  ;;  %v3699_v33 = vadd.f32 %v3641_v16, %v7607_v9 }
 0x28a   : > { %v4287_v62 = vpop.f32.mrf.mxu2  ;;  %v5145_v1 = vpack.c.b16 %v5129_v22, %v5128_v54 }
 0x28b   : > { %v5444_v43 = vadd.f32 %v5443_v45, %v5413_v8  ;;  %v4348_v15 = vadd.f32 %v4287_v62, %v3697_v3  ;;  %v8268_v62 = vld [vmem:[#allocation15_spill] sm:$0xff] }
 0x28c   : > { %v4569_v40 = vpop.f32.mrf.mxu3  ;;  %5293 = vmatmul.bf16.gmra.mxu0 %v5145_v1 }
 0x28d   : > { %v4630_v4 = vadd.f32 %v4569_v40, %v4348_v15 }
 0x28e   : > { %v5256_v32 = vpop.f32.mrf.mxu0 }
 0x28f   : > { %v5312_v14 = vadd.f32 %v5251_v38, %v4630_v4  ;;  %4329 = vmatmul.bf16.gmra.mxu2 %v4181_v37 }
 0x290   : > { %v3644_v17 = vpop.f32.mrf.mxu1 }
 0x291   : > { %5344 = vst [vmem:[%s7992_s16 + $0x68] sm:$0xff] %v5312_v14  ;;  %v5375_v41 = vadd.f32 %v5374_v24, %v5312_v14  ;;  %v5414_v55 = vmul.f32 %v5312_v14, %v5312_v14  ;;  %4611 = vmatmul.bf16.gmra.mxu3 %v6354_v12  ;;  %v3700_v27 = vadd.f32 %v3644_v17, %v7657_v39  ;;  %v8269_v14 = vld [vmem:[#allocation16_spill] sm:$0xff] }
 0x292   : > { %v4290_v29 = vpop.f32.mrf.mxu2 }
 0x293   : > { %v5445_v47 = vadd.f32 %v5444_v43, %v5414_v55  ;;  %v4349_v21 = vadd.f32 %v4290_v29, %v3698_v25 }
 0x294   : > { %v4572_v26 = vpop.f32.mrf.mxu3 }
 0x295   : > { %v4631_v44 = vadd.f32 %v4572_v26, %v4349_v21 }
 0x296   : > { %v5259_v23 = vpop.f32.mrf.mxu0 }
 0x297   : > { %v5313_v36 = vadd.f32 %v5254_v2, %v4631_v44 }
 0x298   : > { %v3646_v20 = vpop.f32.mrf.mxu1 }
 0x299   : > { %5345 = vst [vmem:[%s7992_s16 + $0x70] sm:$0xff] %v5313_v36  ;;  %v5376_v38 = vadd.f32 %v5375_v41, %v5313_v36  ;;  %v5415_v61 = vmul.f32 %v5313_v36, %v5313_v36  ;;  %v3701_v28 = vadd.f32 %v3646_v20, %v7661_v35 }
 0x29a   : > { %v4292_v0 = vpop.f32.mrf.mxu2 }
 0x29b   : > { %v5446_v52 = vadd.f32 %v5445_v47, %v5415_v61  ;;  %v4350_v46 = vadd.f32 %v4292_v0, %v3699_v33 }
 0x29c   : > { %v4574_v50 = vpop.f32.mrf.mxu3 }
 0x29d   : > { %v4632_v19 = vadd.f32 %v4574_v50, %v4350_v46 }
 0x29e   : > { %v5261_v59 = vpop.f32.mrf.mxu0 }
 0x29f   : > { %v5314_v53 = vadd.f32 %v5256_v32, %v4632_v19 }
 0x2a0   : > { %v3649_v45 = vpop.f32.mrf.mxu1 }
 0x2a1   : > { %5346 = vst [vmem:[%s7992_s16 + $0x78] sm:$0xff] %v5314_v53  ;;  %v5377_v49 = vadd.f32 %v5376_v38, %v5314_v53  ;;  %v5416_v6 = vmul.f32 %v5314_v53, %v5314_v53  ;;  %v3702_v57 = vadd.f32 %v3649_v45, %v8268_v62  ;;  %v8270_v45 = vld [vmem:[#allocation9_spill] sm:$0xff] }
 0x2a2   : > { %v4295_v48 = vpop.f32.mrf.mxu2 }
 0x2a3   : > { %v5447_v51 = vadd.f32 %v5446_v52, %v5416_v6  ;;  %v4351_v30 = vadd.f32 %v4295_v48, %v3700_v27 }
 0x2a4   : > { %v4577_v5 = vpop.f32.mrf.mxu3 }
 0x2a5   : > { %v4633_v56 = vadd.f32 %v4577_v5, %v4351_v30 }
 0x2a6   : > { %v5264_v9 = vpop.f32.mrf.mxu0 }
 0x2a7   : > { %v5315_v10 = vadd.f32 %v5259_v23, %v4633_v56 }
 0x2a8   : > { %v3651_v2 = vpop.f32.mrf.mxu1 }
 0x2a9   : > { %5347 = vst [vmem:[%s7992_s16 + $0x80] sm:$0xff] %v5315_v10  ;;  %v5378_v60 = vadd.f32 %v5377_v49, %v5315_v10  ;;  %v5417_v11 = vmul.f32 %v5315_v10, %v5315_v10  ;;  %v3703_v17 = vadd.f32 %v3651_v2, %v8269_v14  ;;  %v8271_v2 = vld [vmem:[#allocation11_spill] sm:$0xff] }
 0x2aa   : > { %v4297_v13 = vpop.f32.mrf.mxu2 }
 0x2ab   : > { %v5448_v7 = vadd.f32 %v5447_v51, %v5417_v11  ;;  %v4352_v31 = vadd.f32 %v4297_v13, %v3701_v28 }
 0x2ac   : > { %v4579_v42 = vpop.f32.mrf.mxu3 }
 0x2ad   : > { %v4634_v16 = vadd.f32 %v4579_v42, %v4352_v31 }
 0x2ae   : > { %v5266_v39 = vpop.f32.mrf.mxu0 }
 0x2af   : > { %v5316_v24 = vadd.f32 %v5261_v59, %v4634_v16 }
 0x2b0   : > { %v3654_v8 = vpop.f32.mrf.mxu1 }
 0x2b1   : > { %5348 = vst [vmem:[%s7992_s16 + $0x88] sm:$0xff] %v5316_v24  ;;  %v5379_v3 = vadd.f32 %v5378_v60, %v5316_v24  ;;  %v5418_v54 = vmul.f32 %v5316_v24, %v5316_v24  ;;  %v3704_v20 = vadd.f32 %v3654_v8, %v7713_v18  ;;  %v8272_v8 = vld [vmem:[#allocation3_spill] sm:$0xff] }
 0x2b2   : > { %v4300_v43 = vpop.f32.mrf.mxu2 }
 0x2b3   : > { %v5449_v15 = vadd.f32 %v5448_v7, %v5418_v54  ;;  %v4353_v37 = vadd.f32 %v4300_v43, %v3702_v57 }
 0x2b4   : > { %v4582_v22 = vpop.f32.mrf.mxu3 }
 0x2b5   : > { %v4635_v40 = vadd.f32 %v4582_v22, %v4353_v37 }
 0x2b6   : > { %v5269_v35 = vpop.f32.mrf.mxu0 }
 0x2b7   : > { %v5317_v4 = vadd.f32 %v5264_v9, %v4635_v40 }
 0x2b8   : > { %v3656_v12 = vpop.f32.mrf.mxu1 }
 0x2b9   : > { %5349 = vst [vmem:[%s7992_s16 + $0x90] sm:$0xff] %v5317_v4  ;;  %v5380_v1 = vadd.f32 %v5379_v3, %v5317_v4  ;;  %v5419_v32 = vmul.f32 %v5317_v4, %v5317_v4  ;;  %v3705_v49 = vadd.f32 %v3656_v12, %v8270_v45  ;;  %v8273_v4 = vld [vmem:[#allocation4_spill] sm:$0xff] }
 0x2ba   : > { %v4302_v41 = vpop.f32.mrf.mxu2 }
 0x2bb   : > { %v5450_v55 = vadd.f32 %v5449_v15, %v5419_v32  ;;  %v4354_v25 = vadd.f32 %v4302_v41, %v3703_v17 }
 0x2bc   : > { %v4584_v29 = vpop.f32.mrf.mxu3 }
 0x2bd   : > { %v4636_v47 = vadd.f32 %v4584_v29, %v4354_v25 }
 0x2be   : > { %v5271_v21 = vpop.f32.mrf.mxu0 }
 0x2bf   : > { %v5318_v26 = vadd.f32 %v5266_v39, %v4636_v47 }
 0x2c0   : > { %v3659_v44 = vpop.f32.mrf.mxu1 }
 0x2c1   : > { %5350 = vst [vmem:[%s7992_s16 + $0x98] sm:$0xff] %v5318_v26  ;;  %v5381_v23 = vadd.f32 %v5380_v1, %v5318_v26  ;;  %v5420_v36 = vmul.f32 %v5318_v26, %v5318_v26  ;;  %v3706_v60 = vadd.f32 %v3659_v44, %v8271_v2  ;;  %v8274_v26 = vld [vmem:[#allocation5_spill] sm:$0xff] }
 0x2c2   : > { %v4305_v38 = vpop.f32.mrf.mxu2 }
 0x2c3   : > { %v5451_v61 = vadd.f32 %v5450_v55, %v5420_v36  ;;  %v4355_v33 = vadd.f32 %v4305_v38, %v3704_v20 }
 0x2c4   : > { %v4587_v0 = vpop.f32.mrf.mxu3 }
 0x2c5   : > { %v4637_v52 = vadd.f32 %v4587_v0, %v4355_v33 }
 0x2c6   : > { %v5274_v46 = vpop.f32.mrf.mxu0 }
 0x2c7   : > { %v5319_v50 = vadd.f32 %v5269_v35, %v4637_v52 }
 0x2c8   : > { %v3661_v19 = vpop.f32.mrf.mxu1 }
 0x2c9   : > { %5351 = vst [vmem:[%s7992_s16 + $0xa0] sm:$0xff] %v5319_v50  ;;  %v5382_v59 = vadd.f32 %v5381_v23, %v5319_v50  ;;  %v5421_v53 = vmul.f32 %v5319_v50, %v5319_v50  ;;  %v3707_v3 = vadd.f32 %v3661_v19, %v8272_v8  ;;  %v8275_v19 = vld [vmem:[#allocation6_spill] sm:$0xff] }
 0x2ca   : > { %v4307_v6 = vpop.f32.mrf.mxu2 }
 0x2cb   : > { %v5452_v27 = vadd.f32 %v5451_v61, %v5421_v53  ;;  %v4356_v48 = vadd.f32 %v4307_v6, %v3705_v49 }
 0x2cc   : > { %v4589_v51 = vpop.f32.mrf.mxu3 }
 0x2cd   : > { %v4638_v18 = vadd.f32 %v4589_v51, %v4356_v48 }
 0x2ce   : > { %v5276_v30 = vpop.f32.mrf.mxu0 }
 0x2cf   : > { %v5320_v5 = vadd.f32 %v5271_v21, %v4638_v18 }
 0x2d0   : > { %v3664_v56 = vpop.f32.mrf.mxu1 }
 0x2d1   : > { %5352 = vst [vmem:[%s7992_s16 + $0xa8] sm:$0xff] %v5320_v5  ;;  %v5383_v9 = vadd.f32 %v5382_v59, %v5320_v5  ;;  %v5422_v10 = vmul.f32 %v5320_v5, %v5320_v5  ;;  %v3708_v12 = vadd.f32 %v3664_v56, %v8273_v4  ;;  %v8276_v56 = vld [vmem:[#allocation7_spill] sm:$0xff] }
 0x2d2   : > { %v4310_v11 = vpop.f32.mrf.mxu2 }
 0x2d3   : > { %v5453_v28 = vadd.f32 %v5452_v27, %v5422_v10  ;;  %v4357_v13 = vadd.f32 %v4310_v11, %v3706_v60 }
 0x2d4   : > { %v4592_v7 = vpop.f32.mrf.mxu3 }
 0x2d5   : > { %v4639_v31 = vadd.f32 %v4592_v7, %v4357_v13 }
 0x2d6   : > { %v5279_v16 = vpop.f32.mrf.mxu0 }
 0x2d7   : > { %v5321_v42 = vadd.f32 %v5274_v46, %v4639_v31 }
 0x2d8   : > { %v3666_v62 = vpop.f32.mrf.mxu1 }
 0x2d9   : > { %5353 = vst [vmem:[%s7992_s16 + $0xb0] sm:$0xff] %v5321_v42  ;;  %v5384_v39 = vadd.f32 %v5383_v9, %v5321_v42  ;;  %v5423_v24 = vmul.f32 %v5321_v42, %v5321_v42  ;;  %v3709_v44 = vadd.f32 %v3666_v62, %v8274_v26 }
 0x2da   : > { %v4312_v54 = vpop.f32.mrf.mxu2 }
 0x2db   : > { %v5454_v57 = vadd.f32 %v5453_v28, %v5423_v24  ;;  %v4358_v43 = vadd.f32 %v4312_v54, %v3707_v3 }
 0x2dc   : > { %v4594_v15 = vpop.f32.mrf.mxu3 }
 0x2dd   : > { %v4640_v37 = vadd.f32 %v4594_v15, %v4358_v43 }
 0x2de   : > { %v5281_v32 = vpop.f32.mrf.mxu0 }
 0x2df   : > { %v5322_v22 = vadd.f32 %v5276_v30, %v4640_v37 }
 0x2e0   : > { %v3669_v55 = vpop.f32.mrf.mxu1 }
 0x2e1   : > { %5354 = vst [vmem:[%s7992_s16 + $0xb8] sm:$0xff] %v5322_v22  ;;  %v5385_v40 = vadd.f32 %v5384_v39, %v5322_v22  ;;  %v5424_v35 = vmul.f32 %v5322_v22, %v5322_v22  ;;  %v3710_v59 = vadd.f32 %v3669_v55, %v8275_v19 }
 0x2e2   : > { %v4315_v1 = vpop.f32.mrf.mxu2 }
 0x2e3   : > { %v5455_v14 = vadd.f32 %v5454_v57, %v5424_v35  ;;  %v4359_v17 = vadd.f32 %v4315_v1, %v3708_v12 }
 0x2e4   : > { %v4597_v41 = vpop.f32.mrf.mxu3 }
 0x2e5   : > { %v4641_v25 = vadd.f32 %v4597_v41, %v4359_v17 }
 0x2e6   : > { %v5284_v61 = vpop.f32.mrf.mxu0 }
 0x2e7   : > { %v5323_v29 = vadd.f32 %v5279_v16, %v4641_v25  ;;  %v8277_v16 = vld [vmem:[#allocation8_spill] sm:$0xff] }
 0x2e8   : > { %v3671_v0 = vpop.f32.mrf.mxu1 }
 0x2e9   : > { %5355 = vst [vmem:[%s7992_s16 + $0xc0] sm:$0xff] %v5323_v29  ;;  %v5386_v47 = vadd.f32 %v5385_v40, %v5323_v29  ;;  %v5425_v21 = vmul.f32 %v5323_v29, %v5323_v29  ;;  %v3711_v9 = vadd.f32 %v3671_v0, %v8276_v56 }
 0x2ea   : > { %v4317_v23 = vpop.f32.mrf.mxu2 }
 0x2eb   : > { %v5456_v36 = vadd.f32 %v5455_v14, %v5425_v21  ;;  %v4360_v20 = vadd.f32 %v4317_v23, %v3709_v44 }
 0x2ec   : > { %v4599_v38 = vpop.f32.mrf.mxu3 }
 0x2ed   : > { %v4642_v33 = vadd.f32 %v4599_v38, %v4360_v20 }
 0x2ee   : > { %v5286_v48 = vpop.f32.mrf.mxu0 }
 0x2ef   : > { %v5324_v52 = vadd.f32 %v5281_v32, %v4642_v33 }
 0x2f0   : > { %v3674_v18 = vpop.f32.mrf.mxu1 }
 0x2f1   : > { %5356 = vst [vmem:[%s7992_s16 + $0xc8] sm:$0xff] %v5324_v52  ;;  %v5387_v46 = vadd.f32 %v5386_v47, %v5324_v52  ;;  %v5426_v50 = vmul.f32 %v5324_v52, %v5324_v52  ;;  %v3712_v39 = vadd.f32 %v3674_v18, %v8277_v16 }
 0x2f2   : > { %v4320_v53 = vpop.f32.mrf.mxu2 }
 0x2f3   : > { %v5457_v45 = vadd.f32 %v5456_v36, %v5426_v50  ;;  %v4361_v49 = vadd.f32 %v4320_v53, %v3710_v59 }
 0x2f4   : > { %v4602_v6 = vpop.f32.mrf.mxu3 }
 0x2f5   : > { %v4643_v27 = vadd.f32 %v4602_v6, %v4361_v49 }
 0x2f7   : > { %v5325_v51 = vadd.f32 %v5284_v61, %v4643_v27  ;;  %v5289_v7 = vpop.f32.mrf.mxu0 }
 0x2f8   : > { %v3676_v8 = vpop.f32.mrf.mxu1 }
 0x2f9   : > { %5357 = vst [vmem:[%s7992_s16 + $0xd0] sm:$0xff] %v5325_v51  ;;  %v5388_v30 = vadd.f32 %v5387_v46, %v5325_v51  ;;  %v5427_v5 = vmul.f32 %v5325_v51, %v5325_v51  ;;  %v3713_v22 = vadd.f32 %v3676_v8, %v7977_v34 }
 0x2fa   : > { %v4322_v10 = vpop.f32.mrf.mxu2 }
 0x2fb   : > { %v5458_v2 = vadd.f32 %v5457_v45, %v5427_v5  ;;  %v4362_v60 = vadd.f32 %v4322_v10, %v3711_v9 }
 0x2fc   : > { %v4604_v11 = vpop.f32.mrf.mxu3 }
 0x2fd   : > { %v4644_v28 = vadd.f32 %v4604_v11, %v4362_v60 }
 0x2ff   : > { %v5326_v13 = vadd.f32 %v5286_v48, %v4644_v28  ;;  %v5291_v40 = vpop.f32.mrf.mxu0 }
 0x300   : > { %v3679_v32 = vpop.f32.mrf.mxu1 }
 0x301   : > { %5358 = vst [vmem:[%s7992_s16 + $0xd8] sm:$0xff] %v5326_v13  ;;  %v5389_v31 = vadd.f32 %v5388_v30, %v5326_v13  ;;  %v5428_v42 = vmul.f32 %v5326_v13, %v5326_v13  ;;  %v3714_v25 = vadd.f32 %v3679_v32, %v7981_v63 }
 0x302   : > { %v4325_v24 = vpop.f32.mrf.mxu2 }
 0x303   : > { %v5459_v3 = vadd.f32 %v5458_v2, %v5428_v42  ;;  %v4363_v54 = vadd.f32 %v4325_v24, %v3712_v39 }
 0x304   : > { %v4607_v62 = vpop.f32.mrf.mxu3 }
 0x305   : > { %v4645_v57 = vadd.f32 %v4607_v62, %v4363_v54 }
 0x307   : > { %v5327_v43 = vadd.f32 %v5289_v7, %v4645_v57 }
 0x308   : > { %v3681_v23 = vpop.f32.mrf.mxu1 }
 0x309   : > { %5359 = vst [vmem:[%s7992_s16 + $0xe0] sm:$0xff] %v5327_v43  ;;  %v5390_v15 = vadd.f32 %v5389_v31, %v5327_v43  ;;  %v5429_v37 = vmul.f32 %v5327_v43, %v5327_v43  ;;  %v5294_v26 = vpop.f32.mrf.mxu0  ;;  %v3715_v61 = vadd.f32 %v3681_v23, %v7984_v58 }
 0x30a   : > { %v4327_v35 = vpop.f32.mrf.mxu2 }
 0x30b   : > { %v5460_v4 = vadd.f32 %v5459_v3, %v5429_v37  ;;  %v4364_v12 = vadd.f32 %v4327_v35, %v3713_v22 }
 0x30c   : > { %v4609_v1 = vpop.f32.mrf.mxu3 }
 0x30d   : > { %v4646_v14 = vadd.f32 %v4609_v1, %v4364_v12 }
 0x30f   : > { %v5328_v17 = vadd.f32 %v5291_v40, %v4646_v14 }
 0x311   : > { %5360 = vst [vmem:[%s7992_s16 + $0xe8] sm:$0xff] %v5328_v17  ;;  %v5391_v41 = vadd.f32 %v5390_v15, %v5328_v17  ;;  %v5430_v55 = vmul.f32 %v5328_v17, %v5328_v17  ;;  %v5296_v50 = vpop.f32.mrf.mxu0 }
 0x312   : > { %v4330_v29 = vpop.f32.mrf.mxu2 }
 0x313   : > { %v5461_v47 = vadd.f32 %v5460_v4, %v5430_v55  ;;  %v4365_v21 = vadd.f32 %v4330_v29, %v3714_v25 }
 0x314   : > { %v4612_v34 = vpop.f32.mrf.mxu3 }
 0x315   : > { %v4647_v44 = vadd.f32 %v4612_v34, %v4365_v21 }
 0x317   : > { %v5329_v36 = vadd.f32 %v5294_v26, %v4647_v44 }
 0x319   : > { %5361 = vst [vmem:[%s7992_s16 + $0xf0] sm:$0xff] %v5329_v36  ;;  %v5392_v20 = vadd.f32 %v5391_v41, %v5329_v36  ;;  %v5431_v38 = vmul.f32 %v5329_v36, %v5329_v36 }
 0x31a   : > { %v4332_v33 = vpop.f32.mrf.mxu2 }
 0x31b   : > { %v5462_v0 = vadd.f32 %v5461_v47, %v5431_v38  ;;  %v4366_v52 = vadd.f32 %v4332_v33, %v3715_v61 }
 0x31c   : > { %v4614_v46 = vpop.f32.mrf.mxu3 }
 0x31d   : > { %v4648_v63 = vadd.f32 %v4614_v46, %v4366_v52 }
 0x31f   : > { %v5330_v19 = vadd.f32 %v5296_v50, %v4648_v63 }
 0x321   : > { %5362 = vst [vmem:[%s7992_s16 + $0xf8] sm:$0xff] %v5330_v19  ;;  %v5393_v59 = vadd.f32 %v5392_v20, %v5330_v19  ;;  %v5432_v53 = vmul.f32 %v5330_v19, %v5330_v19 }
 0x323   : > { %v5394_v45 = vrot.slane %v5393_v59, 4  ;;  %v5463_v49 = vadd.f32 %v5462_v0, %v5432_v53 }
 0x325   : > { %v5395_v6 = vadd.f32 %v5394_v45, %v5393_v59  ;;  %v5464_v27 = vrot.slane %v5463_v49, 4 }
 0x327   : > { %v5396_v48 = vrot.slane %v5395_v6, 2  ;;  %v5465_v51 = vadd.f32 %v5464_v27, %v5463_v49 }
 0x329   : > { %v5397_v18 = vadd.f32 %v5396_v48, %v5395_v6  ;;  %v5466_v58 = vrot.slane %v5465_v51, 2 }
 0x32b   : > { %v5398_v30 = vrot.slane %v5397_v18, 1  ;;  %v5467_v5 = vadd.f32 %v5466_v58, %v5465_v51 }
 0x32d   : > { %v5399_v56 = vadd.f32 %v5398_v30, %v5397_v18  ;;  %v5468_v9 = vrot.slane %v5467_v5, 1 }
 0x32f   : > { %5400 = vst [vmem:[%s268_s19] sm:$0xff] %v5399_v56  ;;  %v5469_v10 = vadd.f32 %v5468_v9, %v5467_v5 }
 0x331   : > { %5470 = vst [vmem:[%s272_s24] sm:$0xff] %v5469_v10 }
 0x332 PF: > { %s17_s21 = sadd.s32 1, %s6422_s21  }
 0x333   : > { %p14_p4 = scmp.ge.s32.totalorder %s17_s21, 4  }
 0x335   :  { %16 = sbr.rel (!%p14_p4) target bundleno = 1 (0x1), region = 100 }

</bundles_post_ra>
